<compile_context>
chip_gen: v7x
topology: tpu7x:2x2x1
jax: 0.10.0
libtpu: 0.0.40
codegen_flags: <defaults>
</compile_context>

<pallas_src>
import functools

import jax
import jax.numpy as jnp
from jax.experimental import pallas as pl
from jax.experimental.pallas import tpu as pltpu


def _round_up(x, m):
    return ((x + m - 1) // m) * m


@functools.lru_cache(maxsize=1)
def _tensorcores_per_chip():
    # The 2-way "parallel" grid split only pays on chips with 2 TensorCores per device (v7x);
    # on v5e/v6e it is just a sequential loop plus extra padding, so use 1 there.
    try:
        kind = jax.devices()[0].device_kind.lower()
    except Exception:
        return 1
    return 2 if ("v7" in kind or "7x" in kind) else 1


def _mpad_split(m):
    """Per-layer M padding & grid split: pad to 128; split only when there are 2 TensorCores
    and the layer is big enough that each core still gets a >=256-wide lane-dense tile."""
    cores = _tensorcores_per_chip()
    if cores > 1 and m >= 512:
        return _round_up(m, 128 * cores), cores
    return _round_up(m, 128), 1


# ----------------------------------------------------------------------------
# Pallas kernels (lane-dense: output last dim = M tile, a multiple of 128)
# ----------------------------------------------------------------------------
def _matmul_bias_act_kernel(w_ref, p_ref, b_ref, o_ref, *, act):
    # w_ref: (Cout, K) bf16   p_ref: (K, MT) bf16   b_ref: (Cout, 1) f32   o_ref: (Cout, MT) f32
    acc = jnp.dot(w_ref[...], p_ref[...], preferred_element_type=jnp.float32)
    acc = acc + b_ref[...]
    if act == "relu":
        acc = jnp.maximum(acc, 0.0)
    elif act == "sigmoid":
        # numerically-stable sigmoid on EUP (exp + reciprocal); never overflows.
        e = jnp.exp(-jnp.abs(acc))
        r = pl.reciprocal(1.0 + e)
        acc = jnp.where(acc >= 0.0, r, e * r)
    o_ref[...] = acc.astype(o_ref.dtype)


def _conv_relu_pool_kernel(w_ref, b_ref, q_ref, o_ref, *, cout):
    # Fused 3x3 conv + bias + ReLU + 2x2 maxpool, ONE MXU dot:
    #   w_ref: (4*Cout, K4) = kron(I4, W) block-diagonal (bf16)
    #   q_ref: (K4, MT)     = the 4 pooling-quadrant patch matrices stacked along K (bf16)
    # maxpool(relu(conv+b)) == relu(max over quadrants of W@q + b)  (bias/ReLU commute w/ max).
    acc = jnp.dot(w_ref[...], q_ref[...], preferred_element_type=jnp.float32)  # (4*Cout, MT)
    m = jnp.maximum(jnp.maximum(acc[0:cout], acc[cout:2 * cout]),
                    jnp.maximum(acc[2 * cout:3 * cout], acc[3 * cout:4 * cout]))
    o_ref[...] = jnp.maximum(m + b_ref[...], 0.0).astype(o_ref.dtype)


def _dec12_kernel(w1_ref, b1_ref, w2_ref, b2_ref, x_ref, o_ref):
    # Fused dec1 + dec2 (both ConvTranspose2d k=2, stride=2) in sub-pixel layout:
    #   y1 rows = (r1, s1, c1)           y2 rows = (r1, s1, r2, s2, c2)
    # w2_ref is block-diagonal over the 4 dec1 phases; the dec1 activation stays in VMEM.
    y1 = jnp.dot(w1_ref[...], x_ref[...], preferred_element_type=jnp.float32)
    y1 = jnp.maximum(y1 + b1_ref[...], 0.0)
    y2 = jnp.dot(w2_ref[...], y1, preferred_element_type=jnp.float32)
    y2 = jnp.maximum(y2 + b2_ref[...], 0.0)
    o_ref[...] = y2.astype(o_ref.dtype)


# ----------------------------------------------------------------------------
# Pallas wrappers
# ----------------------------------------------------------------------------
def _w_to_mat(w):
    """PyTorch Conv2d weight (Cout, Cin, kh, kw) -> (Cout, kh*kw*Cin), tap-major columns."""
    Cout, Cin, kh, kw = w.shape
    return jnp.transpose(w, (0, 2, 3, 1)).reshape(Cout, kh * kw * Cin)


def matmul_bias_act(w_mat, rhs, bias, act):
    """Lane-dense act(w_mat @ rhs + bias); w_mat (Cout, K), rhs (K, M) -> (Cout, M) f32."""
    Cout, K = w_mat.shape
    M = rhs.shape[1]
    Mpad, split = _mpad_split(M)
    Kp = _round_up(K, 8)
    if Kp != K or Mpad != M:
        rhs = jnp.pad(rhs, ((0, Kp - K), (0, Mpad - M)))
    if Kp != K:
        w_mat = jnp.pad(w_mat, ((0, 0), (0, Kp - K)))
    mt = Mpad // split

    out = pl.pallas_call(
        functools.partial(_matmul_bias_act_kernel, act=act),
        out_shape=jax.ShapeDtypeStruct((Cout, Mpad), jnp.float32),
        grid=(split,),
        in_specs=[
            pl.BlockSpec((Cout, Kp), lambda i: (0, 0)),   # weights resident
            pl.BlockSpec((Kp, mt), lambda i: (0, i)),
            pl.BlockSpec((Cout, 1), lambda i: (0, 0)),    # bias resident
        ],
        out_specs=pl.BlockSpec((Cout, mt), lambda i: (0, i)),
        compiler_params=pltpu.CompilerParams(dimension_semantics=("parallel",)),
    )(w_mat.astype(jnp.bfloat16), rhs.astype(jnp.bfloat16),
      bias.reshape(Cout, 1).astype(jnp.float32))
    return out[:, :M]


def conv3x3_relu_pool(x, w, b):
    """Fused Conv2d(k=3, pad=1) + ReLU + MaxPool2d(2, 2), one pallas_call, one MXU dot.

    x: (Cin, N, H, W) -> (Cout, N, H//2, W//2)
    """
    Cout, Cin, kh, kw = w.shape
    _, N, H, W = x.shape
    Hh, Wh = H // 2, W // 2                       # floor, like nn.MaxPool2d(2, 2)
    xb = x.astype(jnp.bfloat16)
    xp = jnp.pad(xb, ((0, 0), (0, 0), (1, 1), (1, 1)))

    taps = []
    for dy2 in range(2):                          # pooling quadrant
        for dx2 in range(2):
            for dy in range(kh):                  # conv tap
                for dx in range(kw):
                    taps.append(xp[:, :, dy2 + dy:dy2 + dy + 2 * Hh:2,
                                        dx2 + dx:dx2 + dx + 2 * Wh:2])
    K4 = 4 * kh * kw * Cin
    M = N * Hh * Wh
    rhs = jnp.stack(taps, 0).reshape(K4, M)                       # [q0; q1; q2; q3] along K

    w4 = jnp.kron(jnp.eye(4, dtype=w.dtype), _w_to_mat(w))        # (4*Cout, K4) block-diagonal
    Mpad, split = _mpad_split(M)
    Kp = _round_up(K4, 8)
    if Kp != K4 or Mpad != M:
        rhs = jnp.pad(rhs, ((0, Kp - K4), (0, Mpad - M)))
    if Kp != K4:
        w4 = jnp.pad(w4, ((0, 0), (0, Kp - K4)))
    mt = Mpad // split

    out = pl.pallas_call(
        functools.partial(_conv_relu_pool_kernel, cout=Cout),
        out_shape=jax.ShapeDtypeStruct((Cout, Mpad), jnp.float32),
        grid=(split,),
        in_specs=[
            pl.BlockSpec((4 * Cout, Kp), lambda i: (0, 0)),
            pl.BlockSpec((Cout, 1), lambda i: (0, 0)),
            pl.BlockSpec((Kp, mt), lambda i: (0, i)),
        ],
        out_specs=pl.BlockSpec((Cout, mt), lambda i: (0, i)),
        compiler_params=pltpu.CompilerParams(dimension_semantics=("parallel",)),
    )(w4.astype(jnp.bfloat16), b.reshape(Cout, 1).astype(jnp.float32),
      rhs.astype(jnp.bfloat16))
    return out[:, :M].reshape(Cout, N, Hh, Wh)


def conv_transpose3x3_s2_relu(x, w_t, b):
    """ConvTranspose2d(Cin, Cout, 3, stride=2) + ReLU via sub-pixel decomposition.

    One (4*Cout, 4*Cin) x (4*Cin, N*(H+1)*(W+1)) matmul on the 2x2 im2col of the zero-padded
    input, then pixel shuffle + crop.  No zero-dilated input, no scatter.
    x: (Cin, N, H, W) -> (Cout, N, 2H+1, 2W+1);  w_t torch layout (Cin, Cout, 3, 3).
    """
    Cin, Cout, kh, kw = w_t.shape
    _, N, H, W = x.shape
    Hg, Wg = H + 1, W + 1
    xb = x.astype(jnp.bfloat16)
    xp = jnp.pad(xb, ((0, 0), (0, 0), (1, 1), (1, 1)))
    taps = [xp[:, :, di:di + Hg, dj:dj + Wg] for di in range(2) for dj in range(2)]
    patches = jnp.stack(taps, 0).reshape(4 * Cin, N * Hg * Wg)

    # Stacked phase weights: output phase (2i+r, 2j+s) tap (di, dj) uses kernel element
    # (r + 2 - 2*di, s + 2 - 2*dj) when in range, else 0 (boundary handled by zero-padding).
    blocks = []
    for r in range(2):
        for s in range(2):
            row = []
            for di in range(2):
                for dj in range(2):
                    kr, kc = r + 2 - 2 * di, s + 2 - 2 * dj
                    if 0 <= kr < kh and 0 <= kc < kw:
                        row.append(jnp.transpose(w_t[:, :, kr, kc], (1, 0)))  # (Cout, Cin)
                    else:
                        row.append(jnp.zeros((Cout, Cin), w_t.dtype))
            blocks.append(jnp.concatenate(row, axis=1))
    w_stk = jnp.concatenate(blocks, axis=0)                       # (4*Cout, 4*Cin)
    b_stk = jnp.tile(b, 4)                                        # rows (r, s, o)

    out = matmul_bias_act(w_stk, patches, b_stk, "relu")          # (4*Cout, N*Hg*Wg)
    out = out.reshape(2, 2, Cout, N, Hg, Wg)                      # (r, s, o, n, i, j)
    out = jnp.transpose(out, (2, 3, 4, 0, 5, 1))                  # (o, n, i, r, j, s)
    out = out.reshape(Cout, N, 2 * Hg, 2 * Wg)
    return out[:, :, :2 * H + 1, :2 * W + 1]


def conv_transpose2x2_s2_x2_relu(x, w1_t, b1, w2_t, b2):
    """Two chained ConvTranspose2d(k=2, stride=2) + ReLU layers fused into one pallas_call.

    Both layers are pure per-pixel matmuls in sub-pixel form; the intermediate (dec1)
    activation stays in VMEM.  x: (C0, N, H, W) -> (C2, N, 4H, 4W).
    Torch weight layouts: (Cin, Cout, 2, 2).
    """
    C0, C1 = w1_t.shape[0], w1_t.shape[1]
    C2 = w2_t.shape[1]
    _, N, H, W = x.shape
    M = N * H * W
    Mpad, split = _mpad_split(M)
    rhs = x.reshape(C0, M)
    if Mpad != M:
        rhs = jnp.pad(rhs, ((0, 0), (0, Mpad - M)))

    # dec1 rows: (r1, s1, c1).  dec2 applied per dec1 phase -> block-diagonal weight with
    # output rows (r1, s1, r2, s2, c2).
    w1s = jnp.transpose(w1_t, (2, 3, 1, 0)).reshape(4 * C1, C0)
    b1s = jnp.tile(b1, 4).reshape(4 * C1, 1)
    w2s = jnp.transpose(w2_t, (2, 3, 1, 0)).reshape(4 * C2, C1)
    w2big = jnp.kron(jnp.eye(4, dtype=w2s.dtype), w2s)            # (16*C2, 4*C1)
    b2big = jnp.tile(b2, 16).reshape(16 * C2, 1)

    mt = Mpad // split
    out = pl.pallas_call(
        _dec12_kernel,
        out_shape=jax.ShapeDtypeStruct((16 * C2, Mpad), jnp.float32),
        grid=(split,),
        in_specs=[
            pl.BlockSpec((4 * C1, C0), lambda i: (0, 0)),
            pl.BlockSpec((4 * C1, 1), lambda i: (0, 0)),
            pl.BlockSpec((16 * C2, 4 * C1), lambda i: (0, 0)),
            pl.BlockSpec((16 * C2, 1), lambda i: (0, 0)),
            pl.BlockSpec((C0, mt), lambda i: (0, i)),
        ],
        out_specs=pl.BlockSpec((16 * C2, mt), lambda i: (0, i)),
        compiler_params=pltpu.CompilerParams(dimension_semantics=("parallel",)),
    )(w1s.astype(jnp.float32), b1s.astype(jnp.float32),
      w2big.astype(jnp.float32), b2big.astype(jnp.float32),
      rhs.astype(jnp.float32))

    out = out[:, :M].reshape(2, 2, 2, 2, C2, N, H, W)             # (r1, s1, r2, s2, c2, n, h, w)
    out = jnp.transpose(out, (4, 5, 6, 0, 2, 7, 1, 3))            # (c2, n, h, r1, r2, w, s1, s2)
    return out.reshape(C2, N, 4 * H, 4 * W)


def final_conv_crop_sigmoid(x, w, b):
    """Conv2d(Cin, 1, 3, pad=0) + row crop [1:-1] + sigmoid.

    The crop is folded into the im2col (only the kept output rows are built) and Cout is
    zero-padded to 8 so the kernel's output tile is full-sublane.
    x: (Cin, N, H, W) -> (1, N, H-4, W-2)
    """
    Cout, Cin, kh, kw = w.shape
    _, N, H, W = x.shape
    Ho, Wo = H - kh + 1 - 2, W - kw + 1
    xb = x.astype(jnp.bfloat16)
    taps = [xb[:, :, 1 + dy:1 + dy + Ho, dx:dx + Wo]
            for dy in range(kh) for dx in range(kw)]
    patches = jnp.stack(taps, 0).reshape(kh * kw * Cin, N * Ho * Wo)
    cpad = _round_up(Cout, 8) - Cout
    wm = jnp.pad(_w_to_mat(w), ((0, cpad), (0, 0)))
    bp = jnp.pad(b, (0, cpad))
    out = matmul_bias_act(wm, patches, bp, "sigmoid")             # (8, N*Ho*Wo)
    return out[:Cout].reshape(Cout, N, Ho, Wo)


# ----------------------------------------------------------------------------
# Model
# ----------------------------------------------------------------------------
def init_params(key):
    shapes = {
        "enc0_w": (32, 1, 3, 3), "enc0_b": (32,),
        "enc1_w": (16, 32, 3, 3), "enc1_b": (16,),
        "enc2_w": (8, 16, 3, 3), "enc2_b": (8,),
        "dec0_w": (8, 8, 3, 3), "dec0_b": (8,),      # ConvTranspose2d(8, 8, 3, stride=2)
        "dec1_w": (8, 16, 2, 2), "dec1_b": (16,),    # ConvTranspose2d(8, 16, 2, stride=2)
        "dec2_w": (16, 32, 2, 2), "dec2_b": (32,),   # ConvTranspose2d(16, 32, 2, stride=2)
        "dec3_w": (1, 32, 3, 3), "dec3_b": (1,),
    }
    params = {}
    for name, shape in shapes.items():
        key, sub = jax.random.split(key)
        params[name] = (0.1 * jax.random.normal(sub, shape)).astype(jnp.float32)
    return params


def post_print_denoiser_forward(x_nchw, params):
    # x_nchw: (N, 1, 40, 50) float32 (40x50 is forced by the module's final crop).
    # Internal layout is channel-leading (C, N, H, W) so every matmul output is lane-dense.
    x = jnp.transpose(x_nchw, (1, 0, 2, 3)).astype(jnp.float32)            # (1, N, 40, 50)

    # encoder: 3 fused conv + ReLU + maxpool calls
    x = conv3x3_relu_pool(x, params["enc0_w"], params["enc0_b"])           # (32, N, 20, 25)
    x = conv3x3_relu_pool(x, params["enc1_w"], params["enc1_b"])           # (16, N, 10, 12)
    x = conv3x3_relu_pool(x, params["enc2_w"], params["enc2_b"])           # ( 8, N,  5,  6)

    # decoder: dec0 sub-pixel, dec1+dec2 fused, dec3 with crop + sigmoid folded in
    x = conv_transpose3x3_s2_relu(x, params["dec0_w"], params["dec0_b"])   # ( 8, N, 11, 13)
    x = conv_transpose2x2_s2_x2_relu(x, params["dec1_w"], params["dec1_b"],
                                     params["dec2_w"], params["dec2_b"])   # (32, N, 44, 52)
    x = final_conv_crop_sigmoid(x, params["dec3_w"], params["dec3_b"])     # ( 1, N, 40, 50)

    return jnp.transpose(x, (1, 0, 2, 3))                                  # (N, 1, 40, 50)


if __name__ == "__main__":
    key = jax.random.PRNGKey(0)
    kx, kp = jax.random.split(key)
    params = init_params(kp)
    x = jax.random.normal(kx, (2, 1, 40, 50), dtype=jnp.float32)

    fwd = jax.jit(post_print_denoiser_forward)
    out = jax.block_until_ready(fwd(x, params))

    assert out.shape == (2, 1, 40, 50), out.shape
    assert out.dtype == jnp.float32
    assert bool(jnp.all(jnp.isfinite(out)))
    assert bool(jnp.all((out >= 0.0) & (out <= 1.0)))   # sigmoid range
    print("KERNEL_OK")
</pallas_src>

<mosaic_0001>
module attributes {stable_mosaic.version = 11 : i64} {
  func.func @_conv_relu_pool_kernel(%arg0: i32, %arg1: memref<128x40xbf16, #tpu.memory_space<vmem>>, %arg2: memref<32x1xf32, #tpu.memory_space<vmem>>, %arg3: memref<40x1024xbf16, #tpu.memory_space<vmem>>, %arg4: memref<32x1024xf32, #tpu.memory_space<vmem>>) attributes {dimension_semantics = [#tpu.dimension_semantics<parallel>], iteration_bounds = array<i64: 1>, scalar_prefetch = 0 : i64, scratch_operands = 0 : i64, tpu.core_type = #tpu.core_type<tc>, window_params = [{pipeline_mode = #tpu.pipeline_mode<synchronous>, transform_indices = @transform_0, window_bounds = array<i64: 128, 40>}, {pipeline_mode = #tpu.pipeline_mode<synchronous>, transform_indices = @transform_1, window_bounds = array<i64: 32, 1>}, {transform_indices = @transform_2, window_bounds = array<i64: 40, 1024>}, {transform_indices = @transform_3, window_bounds = array<i64: 32, 1024>}]} {
    %c0 = arith.constant 0 : index
    %c0_0 = arith.constant 0 : index
    %0 = vector.load %arg1[%c0, %c0_0] : memref<128x40xbf16, #tpu.memory_space<vmem>>, vector<128x40xbf16>
    %c0_1 = arith.constant 0 : index
    %c0_2 = arith.constant 0 : index
    %1 = vector.load %arg3[%c0_1, %c0_2] : memref<40x1024xbf16, #tpu.memory_space<vmem>>, vector<40x1024xbf16>
    %cst = arith.constant dense<0.000000e+00> : vector<128x1024xf32>
    %2 = tpu.matmul %0, %1, %cst {dimension_numbers = #tpu.dot_dimension_numbers<[1], [0], [0], [1], [0, 0, 1, 1], [], []>} : vector<128x40xbf16>, vector<40x1024xbf16>, vector<128x1024xf32> -> vector<128x1024xf32>
    %3 = vector.extract_strided_slice %2 {offsets = [0, 0], sizes = [32, 1024], strides = [1, 1]} : vector<128x1024xf32> to vector<32x1024xf32>
    %4 = vector.extract_strided_slice %2 {offsets = [32, 0], sizes = [32, 1024], strides = [1, 1]} : vector<128x1024xf32> to vector<32x1024xf32>
    %5 = arith.maximumf %3, %4 : vector<32x1024xf32>
    %6 = vector.extract_strided_slice %2 {offsets = [64, 0], sizes = [32, 1024], strides = [1, 1]} : vector<128x1024xf32> to vector<32x1024xf32>
    %7 = vector.extract_strided_slice %2 {offsets = [96, 0], sizes = [32, 1024], strides = [1, 1]} : vector<128x1024xf32> to vector<32x1024xf32>
    %8 = arith.maximumf %6, %7 : vector<32x1024xf32>
    %9 = arith.maximumf %5, %8 : vector<32x1024xf32>
    %c0_3 = arith.constant 0 : index
    %c0_4 = arith.constant 0 : index
    %10 = vector.load %arg2[%c0_3, %c0_4] : memref<32x1xf32, #tpu.memory_space<vmem>>, vector<32x1xf32>
    %11 = vector.broadcast %10 : vector<32x1xf32> to vector<32x1024xf32>
    %12 = arith.addf %9, %11 : vector<32x1024xf32>
    %cst_5 = arith.constant 0.000000e+00 : f32
    %13 = vector.broadcast %cst_5 : f32 to vector<32x1024xf32>
    %14 = arith.maximumf %12, %13 : vector<32x1024xf32>
    %c0_6 = arith.constant 0 : index
    %c0_7 = arith.constant 0 : index
    %15 = vector.load %arg4[%c0_6, %c0_7] : memref<32x1024xf32, #tpu.memory_space<vmem>>, vector<32x1024xf32>
    tpu.vector_store %arg4[%c0_6, %c0_7], %14 {strides = array<i32>} : memref<32x1024xf32, #tpu.memory_space<vmem>>, vector<32x1024xf32>,
    return
  }
  func.func @transform_0(%arg0: i32) -> (i32, i32) {
    %c0_i32 = arith.constant 0 : i32
    %c0_i32_0 = arith.constant 0 : i32
    %c0_i32_1 = arith.constant 0 : i32
    return %c0_i32, %c0_i32_0 : i32, i32
  }
  func.func @transform_1(%arg0: i32) -> (i32, i32) {
    %c0_i32 = arith.constant 0 : i32
    %c0_i32_0 = arith.constant 0 : i32
    %c0_i32_1 = arith.constant 0 : i32
    return %c0_i32, %c0_i32_0 : i32, i32
  }
  func.func @transform_2(%arg0: i32) -> (i32, i32) {
    %c0_i32 = arith.constant 0 : i32
    %c0_i32_0 = arith.constant 0 : i32
    return %c0_i32, %arg0 : i32, i32
  }
  func.func @transform_3(%arg0: i32) -> (i32, i32) {
    %c0_i32 = arith.constant 0 : i32
    %c0_i32_0 = arith.constant 0 : i32
    return %c0_i32, %arg0 : i32, i32
  }
}

module attributes {stable_mosaic.version = 11 : i64} {
  func.func @_conv_relu_pool_kernel(%arg0: i32, %arg1: memref<64x1152xbf16, #tpu.memory_space<vmem>>, %arg2: memref<16x1xf32, #tpu.memory_space<vmem>>, %arg3: memref<1152x256xbf16, #tpu.memory_space<vmem>>, %arg4: memref<16x256xf32, #tpu.memory_space<vmem>>) attributes {dimension_semantics = [#tpu.dimension_semantics<parallel>], iteration_bounds = array<i64: 1>, scalar_prefetch = 0 : i64, scratch_operands = 0 : i64, tpu.core_type = #tpu.core_type<tc>, window_params = [{pipeline_mode = #tpu.pipeline_mode<synchronous>, transform_indices = @transform_0, window_bounds = array<i64: 64, 1152>}, {pipeline_mode = #tpu.pipeline_mode<synchronous>, transform_indices = @transform_1, window_bounds = array<i64: 16, 1>}, {transform_indices = @transform_2, window_bounds = array<i64: 1152, 256>}, {transform_indices = @transform_3, window_bounds = array<i64: 16, 256>}]} {
    %c0 = arith.constant 0 : index
    %c0_0 = arith.constant 0 : index
    %0 = vector.load %arg1[%c0, %c0_0] : memref<64x1152xbf16, #tpu.memory_space<vmem>>, vector<64x1152xbf16>
    %c0_1 = arith.constant 0 : index
    %c0_2 = arith.constant 0 : index
    %1 = vector.load %arg3[%c0_1, %c0_2] : memref<1152x256xbf16, #tpu.memory_space<vmem>>, vector<1152x256xbf16>
    %cst = arith.constant dense<0.000000e+00> : vector<64x256xf32>
    %2 = tpu.matmul %0, %1, %cst {dimension_numbers = #tpu.dot_dimension_numbers<[1], [0], [0], [1], [0, 0, 1, 1], [], []>} : vector<64x1152xbf16>, vector<1152x256xbf16>, vector<64x256xf32> -> vector<64x256xf32>
    %3 = vector.extract_strided_slice %2 {offsets = [0, 0], sizes = [16, 256], strides = [1, 1]} : vector<64x256xf32> to vector<16x256xf32>
    %4 = vector.extract_strided_slice %2 {offsets = [16, 0], sizes = [16, 256], strides = [1, 1]} : vector<64x256xf32> to vector<16x256xf32>
    %5 = arith.maximumf %3, %4 : vector<16x256xf32>
    %6 = vector.extract_strided_slice %2 {offsets = [32, 0], sizes = [16, 256], strides = [1, 1]} : vector<64x256xf32> to vector<16x256xf32>
    %7 = vector.extract_strided_slice %2 {offsets = [48, 0], sizes = [16, 256], strides = [1, 1]} : vector<64x256xf32> to vector<16x256xf32>
    %8 = arith.maximumf %6, %7 : vector<16x256xf32>
    %9 = arith.maximumf %5, %8 : vector<16x256xf32>
    %c0_3 = arith.constant 0 : index
    %c0_4 = arith.constant 0 : index
    %10 = vector.load %arg2[%c0_3, %c0_4] : memref<16x1xf32, #tpu.memory_space<vmem>>, vector<16x1xf32>
    %11 = vector.broadcast %10 : vector<16x1xf32> to vector<16x256xf32>
    %12 = arith.addf %9, %11 : vector<16x256xf32>
    %cst_5 = arith.constant 0.000000e+00 : f32
    %13 = vector.broadcast %cst_5 : f32 to vector<16x256xf32>
    %14 = arith.maximumf %12, %13 : vector<16x256xf32>
    %c0_6 = arith.constant 0 : index
    %c0_7 = arith.constant 0 : index
    %15 = vector.load %arg4[%c0_6, %c0_7] : memref<16x256xf32, #tpu.memory_space<vmem>>, vector<16x256xf32>
    tpu.vector_store %arg4[%c0_6, %c0_7], %14 {strides = array<i32>} : memref<16x256xf32, #tpu.memory_space<vmem>>, vector<16x256xf32>,
    return
  }
  func.func @transform_0(%arg0: i32) -> (i32, i32) {
    %c0_i32 = arith.constant 0 : i32
    %c0_i32_0 = arith.constant 0 : i32
    %c0_i32_1 = arith.constant 0 : i32
    return %c0_i32, %c0_i32_0 : i32, i32
  }
  func.func @transform_1(%arg0: i32) -> (i32, i32) {
    %c0_i32 = arith.constant 0 : i32
    %c0_i32_0 = arith.constant 0 : i32
    %c0_i32_1 = arith.constant 0 : i32
    return %c0_i32, %c0_i32_0 : i32, i32
  }
  func.func @transform_2(%arg0: i32) -> (i32, i32) {
    %c0_i32 = arith.constant 0 : i32
    %c0_i32_0 = arith.constant 0 : i32
    return %c0_i32, %arg0 : i32, i32
  }
  func.func @transform_3(%arg0: i32) -> (i32, i32) {
    %c0_i32 = arith.constant 0 : i32
    %c0_i32_0 = arith.constant 0 : i32
    return %c0_i32, %arg0 : i32, i32
  }
}

module attributes {stable_mosaic.version = 11 : i64} {
  func.func @_conv_relu_pool_kernel(%arg0: i32, %arg1: memref<32x576xbf16, #tpu.memory_space<vmem>>, %arg2: memref<8x1xf32, #tpu.memory_space<vmem>>, %arg3: memref<576x128xbf16, #tpu.memory_space<vmem>>, %arg4: memref<8x128xf32, #tpu.memory_space<vmem>>) attributes {dimension_semantics = [#tpu.dimension_semantics<parallel>], iteration_bounds = array<i64: 1>, scalar_prefetch = 0 : i64, scratch_operands = 0 : i64, tpu.core_type = #tpu.core_type<tc>, window_params = [{pipeline_mode = #tpu.pipeline_mode<synchronous>, transform_indices = @transform_0, window_bounds = array<i64: 32, 576>}, {pipeline_mode = #tpu.pipeline_mode<synchronous>, transform_indices = @transform_1, window_bounds = array<i64: 8, 1>}, {transform_indices = @transform_2, window_bounds = array<i64: 576, 128>}, {transform_indices = @transform_3, window_bounds = array<i64: 8, 128>}]} {
    %c0 = arith.constant 0 : index
    %c0_0 = arith.constant 0 : index
    %0 = vector.load %arg1[%c0, %c0_0] : memref<32x576xbf16, #tpu.memory_space<vmem>>, vector<32x576xbf16>
    %c0_1 = arith.constant 0 : index
    %c0_2 = arith.constant 0 : index
    %1 = vector.load %arg3[%c0_1, %c0_2] : memref<576x128xbf16, #tpu.memory_space<vmem>>, vector<576x128xbf16>
    %cst = arith.constant dense<0.000000e+00> : vector<32x128xf32>
    %2 = tpu.matmul %0, %1, %cst {dimension_numbers = #tpu.dot_dimension_numbers<[1], [0], [0], [1], [0, 0, 1, 1], [], []>} : vector<32x576xbf16>, vector<576x128xbf16>, vector<32x128xf32> -> vector<32x128xf32>
    %3 = vector.extract_strided_slice %2 {offsets = [0, 0], sizes = [8, 128], strides = [1, 1]} : vector<32x128xf32> to vector<8x128xf32>
    %4 = vector.extract_strided_slice %2 {offsets = [8, 0], sizes = [8, 128], strides = [1, 1]} : vector<32x128xf32> to vector<8x128xf32>
    %5 = arith.maximumf %3, %4 : vector<8x128xf32>
    %6 = vector.extract_strided_slice %2 {offsets = [16, 0], sizes = [8, 128], strides = [1, 1]} : vector<32x128xf32> to vector<8x128xf32>
    %7 = vector.extract_strided_slice %2 {offsets = [24, 0], sizes = [8, 128], strides = [1, 1]} : vector<32x128xf32> to vector<8x128xf32>
    %8 = arith.maximumf %6, %7 : vector<8x128xf32>
    %9 = arith.maximumf %5, %8 : vector<8x128xf32>
    %c0_3 = arith.constant 0 : index
    %c0_4 = arith.constant 0 : index
    %10 = vector.load %arg2[%c0_3, %c0_4] : memref<8x1xf32, #tpu.memory_space<vmem>>, vector<8x1xf32>
    %11 = vector.broadcast %10 : vector<8x1xf32> to vector<8x128xf32>
    %12 = arith.addf %9, %11 : vector<8x128xf32>
    %cst_5 = arith.constant 0.000000e+00 : f32
    %13 = vector.broadcast %cst_5 : f32 to vector<8x128xf32>
    %14 = arith.maximumf %12, %13 : vector<8x128xf32>
    %c0_6 = arith.constant 0 : index
    %c0_7 = arith.constant 0 : index
    %15 = vector.load %arg4[%c0_6, %c0_7] : memref<8x128xf32, #tpu.memory_space<vmem>>, vector<8x128xf32>
    tpu.vector_store %arg4[%c0_6, %c0_7], %14 {strides = array<i32>} : memref<8x128xf32, #tpu.memory_space<vmem>>, vector<8x128xf32>,
    return
  }
  func.func @transform_0(%arg0: i32) -> (i32, i32) {
    %c0_i32 = arith.constant 0 : i32
    %c0_i32_0 = arith.constant 0 : i32
    %c0_i32_1 = arith.constant 0 : i32
    return %c0_i32, %c0_i32_0 : i32, i32
  }
  func.func @transform_1(%arg0: i32) -> (i32, i32) {
    %c0_i32 = arith.constant 0 : i32
    %c0_i32_0 = arith.constant 0 : i32
    %c0_i32_1 = arith.constant 0 : i32
    return %c0_i32, %c0_i32_0 : i32, i32
  }
  func.func @transform_2(%arg0: i32) -> (i32, i32) {
    %c0_i32 = arith.constant 0 : i32
    %c0_i32_0 = arith.constant 0 : i32
    return %c0_i32, %arg0 : i32, i32
  }
  func.func @transform_3(%arg0: i32) -> (i32, i32) {
    %c0_i32 = arith.constant 0 : i32
    %c0_i32_0 = arith.constant 0 : i32
    return %c0_i32, %arg0 : i32, i32
  }
}

module attributes {stable_mosaic.version = 11 : i64} {
  func.func @_matmul_bias_act_kernel(%arg0: i32, %arg1: memref<32x32xbf16, #tpu.memory_space<vmem>>, %arg2: memref<32x128xbf16, #tpu.memory_space<vmem>>, %arg3: memref<32x1xf32, #tpu.memory_space<vmem>>, %arg4: memref<32x128xf32, #tpu.memory_space<vmem>>) attributes {dimension_semantics = [#tpu.dimension_semantics<parallel>], iteration_bounds = array<i64: 1>, scalar_prefetch = 0 : i64, scratch_operands = 0 : i64, tpu.core_type = #tpu.core_type<tc>, window_params = [{pipeline_mode = #tpu.pipeline_mode<synchronous>, transform_indices = @transform_0, window_bounds = array<i64: 32, 32>}, {transform_indices = @transform_1, window_bounds = array<i64: 32, 128>}, {pipeline_mode = #tpu.pipeline_mode<synchronous>, transform_indices = @transform_2, window_bounds = array<i64: 32, 1>}, {transform_indices = @transform_3, window_bounds = array<i64: 32, 128>}]} {
    %c0 = arith.constant 0 : index
    %c0_0 = arith.constant 0 : index
    %0 = vector.load %arg1[%c0, %c0_0] : memref<32x32xbf16, #tpu.memory_space<vmem>>, vector<32x32xbf16>
    %c0_1 = arith.constant 0 : index
    %c0_2 = arith.constant 0 : index
    %1 = vector.load %arg2[%c0_1, %c0_2] : memref<32x128xbf16, #tpu.memory_space<vmem>>, vector<32x128xbf16>
    %cst = arith.constant dense<0.000000e+00> : vector<32x128xf32>
    %2 = tpu.matmul %0, %1, %cst {dimension_numbers = #tpu.dot_dimension_numbers<[1], [0], [0], [1], [0, 0, 1, 1], [], []>} : vector<32x32xbf16>, vector<32x128xbf16>, vector<32x128xf32> -> vector<32x128xf32>
    %c0_3 = arith.constant 0 : index
    %c0_4 = arith.constant 0 : index
    %3 = vector.load %arg3[%c0_3, %c0_4] : memref<32x1xf32, #tpu.memory_space<vmem>>, vector<32x1xf32>
    %4 = vector.broadcast %3 : vector<32x1xf32> to vector<32x128xf32>
    %5 = arith.addf %2, %4 : vector<32x128xf32>
    %cst_5 = arith.constant 0.000000e+00 : f32
    %6 = vector.broadcast %cst_5 : f32 to vector<32x128xf32>
    %7 = arith.maximumf %5, %6 : vector<32x128xf32>
    %c0_6 = arith.constant 0 : index
    %c0_7 = arith.constant 0 : index
    %8 = vector.load %arg4[%c0_6, %c0_7] : memref<32x128xf32, #tpu.memory_space<vmem>>, vector<32x128xf32>
    tpu.vector_store %arg4[%c0_6, %c0_7], %7 {strides = array<i32>} : memref<32x128xf32, #tpu.memory_space<vmem>>, vector<32x128xf32>,
    return
  }
  func.func @transform_0(%arg0: i32) -> (i32, i32) {
    %c0_i32 = arith.constant 0 : i32
    %c0_i32_0 = arith.constant 0 : i32
    %c0_i32_1 = arith.constant 0 : i32
    return %c0_i32, %c0_i32_0 : i32, i32
  }
  func.func @transform_1(%arg0: i32) -> (i32, i32) {
    %c0_i32 = arith.constant 0 : i32
    %c0_i32_0 = arith.constant 0 : i32
    return %c0_i32, %arg0 : i32, i32
  }
  func.func @transform_2(%arg0: i32) -> (i32, i32) {
    %c0_i32 = arith.constant 0 : i32
    %c0_i32_0 = arith.constant 0 : i32
    %c0_i32_1 = arith.constant 0 : i32
    return %c0_i32, %c0_i32_0 : i32, i32
  }
  func.func @transform_3(%arg0: i32) -> (i32, i32) {
    %c0_i32 = arith.constant 0 : i32
    %c0_i32_0 = arith.constant 0 : i32
    return %c0_i32, %arg0 : i32, i32
  }
}

module attributes {stable_mosaic.version = 11 : i64} {
  func.func @_dec12_kernel(%arg0: i32, %arg1: memref<64x8xf32, #tpu.memory_space<vmem>>, %arg2: memref<64x1xf32, #tpu.memory_space<vmem>>, %arg3: memref<512x64xf32, #tpu.memory_space<vmem>>, %arg4: memref<512x1xf32, #tpu.memory_space<vmem>>, %arg5: memref<8x384xf32, #tpu.memory_space<vmem>>, %arg6: memref<512x384xf32, #tpu.memory_space<vmem>>) attributes {dimension_semantics = [#tpu.dimension_semantics<parallel>], iteration_bounds = array<i64: 1>, scalar_prefetch = 0 : i64, scratch_operands = 0 : i64, tpu.core_type = #tpu.core_type<tc>, window_params = [{pipeline_mode = #tpu.pipeline_mode<synchronous>, transform_indices = @transform_0, window_bounds = array<i64: 64, 8>}, {pipeline_mode = #tpu.pipeline_mode<synchronous>, transform_indices = @transform_1, window_bounds = array<i64: 64, 1>}, {pipeline_mode = #tpu.pipeline_mode<synchronous>, transform_indices = @transform_2, window_bounds = array<i64: 512, 64>}, {pipeline_mode = #tpu.pipeline_mode<synchronous>, transform_indices = @transform_3, window_bounds = array<i64: 512, 1>}, {transform_indices = @transform_4, window_bounds = array<i64: 8, 384>}, {transform_indices = @transform_5, window_bounds = array<i64: 512, 384>}]} {
    %c0 = arith.constant 0 : index
    %c0_0 = arith.constant 0 : index
    %0 = vector.load %arg1[%c0, %c0_0] : memref<64x8xf32, #tpu.memory_space<vmem>>, vector<64x8xf32>
    %c0_1 = arith.constant 0 : index
    %c0_2 = arith.constant 0 : index
    %1 = vector.load %arg5[%c0_1, %c0_2] : memref<8x384xf32, #tpu.memory_space<vmem>>, vector<8x384xf32>
    %cst = arith.constant dense<0.000000e+00> : vector<64x384xf32>
    %2 = tpu.matmul %0, %1, %cst {dimension_numbers = #tpu.dot_dimension_numbers<[1], [0], [0], [1], [0, 0, 1, 1], [], []>} : vector<64x8xf32>, vector<8x384xf32>, vector<64x384xf32> -> vector<64x384xf32>
    %c0_3 = arith.constant 0 : index
    %c0_4 = arith.constant 0 : index
    %3 = vector.load %arg2[%c0_3, %c0_4] : memref<64x1xf32, #tpu.memory_space<vmem>>, vector<64x1xf32>
    %4 = vector.broadcast %3 : vector<64x1xf32> to vector<64x384xf32>
    %5 = arith.addf %2, %4 : vector<64x384xf32>
    %cst_5 = arith.constant 0.000000e+00 : f32
    %6 = vector.broadcast %cst_5 : f32 to vector<64x384xf32>
    %7 = arith.maximumf %5, %6 : vector<64x384xf32>
    %c0_6 = arith.constant 0 : index
    %c0_7 = arith.constant 0 : index
    %8 = vector.load %arg3[%c0_6, %c0_7] : memref<512x64xf32, #tpu.memory_space<vmem>>, vector<512x64xf32>
    %cst_8 = arith.constant dense<0.000000e+00> : vector<512x384xf32>
    %9 = tpu.matmul %8, %7, %cst_8 {dimension_numbers = #tpu.dot_dimension_numbers<[1], [0], [0], [1], [0, 0, 1, 1], [], []>} : vector<512x64xf32>, vector<64x384xf32>, vector<512x384xf32> -> vector<512x384xf32>
    %c0_9 = arith.constant 0 : index
    %c0_10 = arith.constant 0 : index
    %10 = vector.load %arg4[%c0_9, %c0_10] : memref<512x1xf32, #tpu.memory_space<vmem>>, vector<512x1xf32>
    %11 = vector.broadcast %10 : vector<512x1xf32> to vector<512x384xf32>
    %12 = arith.addf %9, %11 : vector<512x384xf32>
    %cst_11 = arith.constant 0.000000e+00 : f32
    %13 = vector.broadcast %cst_11 : f32 to vector<512x384xf32>
    %14 = arith.maximumf %12, %13 : vector<512x384xf32>
    %c0_12 = arith.constant 0 : index
    %c0_13 = arith.constant 0 : index
    %15 = vector.load %arg6[%c0_12, %c0_13] : memref<512x384xf32, #tpu.memory_space<vmem>>, vector<512x384xf32>
    tpu.vector_store %arg6[%c0_12, %c0_13], %14 {strides = array<i32>} : memref<512x384xf32, #tpu.memory_space<vmem>>, vector<512x384xf32>,
    return
  }
  func.func @transform_0(%arg0: i32) -> (i32, i32) {
    %c0_i32 = arith.constant 0 : i32
    %c0_i32_0 = arith.constant 0 : i32
    %c0_i32_1 = arith.constant 0 : i32
    return %c0_i32, %c0_i32_0 : i32, i32
  }
  func.func @transform_1(%arg0: i32) -> (i32, i32) {
    %c0_i32 = arith.constant 0 : i32
    %c0_i32_0 = arith.constant 0 : i32
    %c0_i32_1 = arith.constant 0 : i32
    return %c0_i32, %c0_i32_0 : i32, i32
  }
  func.func @transform_2(%arg0: i32) -> (i32, i32) {
    %c0_i32 = arith.constant 0 : i32
    %c0_i32_0 = arith.constant 0 : i32
    %c0_i32_1 = arith.constant 0 : i32
    return %c0_i32, %c0_i32_0 : i32, i32
  }
  func.func @transform_3(%arg0: i32) -> (i32, i32) {
    %c0_i32 = arith.constant 0 : i32
    %c0_i32_0 = arith.constant 0 : i32
    %c0_i32_1 = arith.constant 0 : i32
    return %c0_i32, %c0_i32_0 : i32, i32
  }
  func.func @transform_4(%arg0: i32) -> (i32, i32) {
    %c0_i32 = arith.constant 0 : i32
    %c0_i32_0 = arith.constant 0 : i32
    return %c0_i32, %arg0 : i32, i32
  }
  func.func @transform_5(%arg0: i32) -> (i32, i32) {
    %c0_i32 = arith.constant 0 : i32
    %c0_i32_0 = arith.constant 0 : i32
    return %c0_i32, %arg0 : i32, i32
  }
}

module attributes {stable_mosaic.version = 11 : i64} {
  func.func @_matmul_bias_act_kernel(%arg0: i32, %arg1: memref<8x288xbf16, #tpu.memory_space<vmem>>, %arg2: memref<288x4096xbf16, #tpu.memory_space<vmem>>, %arg3: memref<8x1xf32, #tpu.memory_space<vmem>>, %arg4: memref<8x4096xf32, #tpu.memory_space<vmem>>) attributes {dimension_semantics = [#tpu.dimension_semantics<parallel>], iteration_bounds = array<i64: 1>, scalar_prefetch = 0 : i64, scratch_operands = 0 : i64, tpu.core_type = #tpu.core_type<tc>, window_params = [{pipeline_mode = #tpu.pipeline_mode<synchronous>, transform_indices = @transform_0, window_bounds = array<i64: 8, 288>}, {transform_indices = @transform_1, window_bounds = array<i64: 288, 4096>}, {pipeline_mode = #tpu.pipeline_mode<synchronous>, transform_indices = @transform_2, window_bounds = array<i64: 8, 1>}, {transform_indices = @transform_3, window_bounds = array<i64: 8, 4096>}]} {
    %c0 = arith.constant 0 : index
    %c0_0 = arith.constant 0 : index
    %0 = vector.load %arg1[%c0, %c0_0] : memref<8x288xbf16, #tpu.memory_space<vmem>>, vector<8x288xbf16>
    %c0_1 = arith.constant 0 : index
    %c0_2 = arith.constant 0 : index
    %1 = vector.load %arg2[%c0_1, %c0_2] : memref<288x4096xbf16, #tpu.memory_space<vmem>>, vector<288x4096xbf16>
    %cst = arith.constant dense<0.000000e+00> : vector<8x4096xf32>
    %2 = tpu.matmul %0, %1, %cst {dimension_numbers = #tpu.dot_dimension_numbers<[1], [0], [0], [1], [0, 0, 1, 1], [], []>} : vector<8x288xbf16>, vector<288x4096xbf16>, vector<8x4096xf32> -> vector<8x4096xf32>
    %c0_3 = arith.constant 0 : index
    %c0_4 = arith.constant 0 : index
    %3 = vector.load %arg3[%c0_3, %c0_4] : memref<8x1xf32, #tpu.memory_space<vmem>>, vector<8x1xf32>
    %4 = vector.broadcast %3 : vector<8x1xf32> to vector<8x4096xf32>
    %5 = arith.addf %2, %4 : vector<8x4096xf32>
    %6 = math.absf %5 : vector<8x4096xf32>
    %cst_5 = arith.constant 0.000000e+00 : f32
    %7 = vector.broadcast %cst_5 : f32 to vector<8x4096xf32>
    %8 = arith.subf %7, %6 : vector<8x4096xf32>
    %9 = math.exp %8 : vector<8x4096xf32>
    %cst_6 = arith.constant 1.000000e+00 : f32
    %10 = vector.broadcast %cst_6 : f32 to vector<8x4096xf32>
    %11 = arith.addf %10, %9 : vector<8x4096xf32>
    %12 = tpu.reciprocal %11 : vector<8x4096xf32> -> vector<8x4096xf32>
    %cst_7 = arith.constant 0.000000e+00 : f32
    %13 = vector.broadcast %cst_7 : f32 to vector<8x4096xf32>
    %14 = arith.cmpf oge, %5, %13 : vector<8x4096xf32>
    %15 = arith.mulf %9, %12 : vector<8x4096xf32>
    %16 = arith.select %14, %12, %15 : vector<8x4096xi1>, vector<8x4096xf32>
    %c0_8 = arith.constant 0 : index
    %c0_9 = arith.constant 0 : index
    %17 = vector.load %arg4[%c0_8, %c0_9] : memref<8x4096xf32, #tpu.memory_space<vmem>>, vector<8x4096xf32>
    tpu.vector_store %arg4[%c0_8, %c0_9], %16 {strides = array<i32>} : memref<8x4096xf32, #tpu.memory_space<vmem>>, vector<8x4096xf32>,
    return
  }
  func.func @transform_0(%arg0: i32) -> (i32, i32) {
    %c0_i32 = arith.constant 0 : i32
    %c0_i32_0 = arith.constant 0 : i32
    %c0_i32_1 = arith.constant 0 : i32
    return %c0_i32, %c0_i32_0 : i32, i32
  }
  func.func @transform_1(%arg0: i32) -> (i32, i32) {
    %c0_i32 = arith.constant 0 : i32
    %c0_i32_0 = arith.constant 0 : i32
    return %c0_i32, %arg0 : i32, i32
  }
  func.func @transform_2(%arg0: i32) -> (i32, i32) {
    %c0_i32 = arith.constant 0 : i32
    %c0_i32_0 = arith.constant 0 : i32
    %c0_i32_1 = arith.constant 0 : i32
    return %c0_i32, %c0_i32_0 : i32, i32
  }
  func.func @transform_3(%arg0: i32) -> (i32, i32) {
    %c0_i32 = arith.constant 0 : i32
    %c0_i32_0 = arith.constant 0 : i32
    return %c0_i32, %arg0 : i32, i32
  }
}

</mosaic_0001>

<bundles_post_ra>
// kernel: mul.46
= control target key start
LH: loop header
LB: loop body
LE: loop exit
PB: predicated region body
PF: predicated region fallthrough
CT: control target
= control target key end

     0   :  { %vm16_vm0 = vcmask 261120   ;;  %s61_s0 = inlined_call_operand.vmem [shape: f32[32,3,3], index: 0, kind: input, shape index: {}]   ;;  %s62_s1 = inlined_call_operand.vmem [shape: f32[32,9], index: 1, kind: output, shape index: {}]  }
   0x1   :  { %v29_v0 = vld [vmem:[%s61_s0 + $0x8] sm:$0xf]  ;;  %v30_v1 = vld [vmem:[%s61_s0 + $0x4] sm:$0xf]  ;;  %v13_v2 = vld [vmem:[%s61_s0] sm:$0xf] }
   0x2   :  { %8 = vst [vmem:[#allocation0 + $0x10] sm:$0xf] %v29_v0  ;;  %12 = vst [vmem:[#allocation0 + $0x8] sm:$0xf] %v30_v1 }
   0x3   :  { %14 = vst [vmem:[#allocation0] sm:$0xf] %v13_v2 }
   0x9   :  { %v19_v4 = vld [vmem:[#allocation0 + $0x8] sm:$0x7]   ;;  %v24_v5 = vld [vmem:[#allocation0 + $0x10] sm:$0x7]  }
   0xa   :  { %v15_v3 = vld [vmem:[#allocation0] sm:$0x7]   ;;  %31 = vst.msk [vmem:[%s62_s1 + $0x3] sm:$0x7] %vm16_vm0, %v19_v4   ;;  %32 = vst.msk [vmem:[%s62_s1 + $0x6] sm:$0x7] %vm16_vm0, %v24_v5  }
   0xb   :  { %17 = vst.msk [vmem:[%s62_s1] sm:$0x7] %vm16_vm0, %v15_v3  }

// kernel: post_print_denoiser_forward.6
= control target key start
LH: loop header
LB: loop body
LE: loop exit
PB: predicated region body
PF: predicated region fallthrough
CT: control target
= control target key end

     0   :  { %v1000_v3 = vmov 0   ;;  %vm216_vm0 = vcmask 1043456   ;;  %vm191_vm1 = vcmask 326656   ;;  %s1603_s2 = inlined_call_operand.vmem [shape: bf16[40,1024], index: 2, kind: input, shape index: {}]   ;;  %s1604_s0 = inlined_call_operand.vmem [shape: bf16[128,40], index: 0, kind: input, shape index: {}]   ;;  %s1605_s1 = inlined_call_operand.vmem [shape: f32[32,1], index: 1, kind: input, shape index: {}]   ;;  %s1606_s3 = inlined_call_operand.vmem [shape: f32[32,1024], index: 3, kind: output, shape index: {}]  }
   0x1   :  { %v31_v0 = vld [vmem:[%s1603_s2] sm:$0xff]  ;;  %v32_v2 = vld [vmem:[%s1603_s2 + $0x8] sm:$0xff]  ;;  %273 = vmatprep.mubr.bf16.mxu0 %v1000_v3  ;;  %386 = vmatprep.mubr.bf16.mxu1 %v1000_v3  ;;  %v33_v21 = vld [vmem:[%s1603_s2 + $0x10] sm:$0xff] }
   0x2   :  { %v35_v1 = vld [vmem:[%s1603_s2 + $0x20] sm:$0xff]  ;;  %v36_v5 = vld [vmem:[%s1603_s2 + $0x28] sm:$0xff]  ;;  %982 = vset.pattern.permute.xlu0 %v1000_v3  ;;  %983 = vset.pattern.permute.xlu1 %v1000_v3  ;;  %v37_v24 = vld [vmem:[%s1603_s2 + $0x30] sm:$0xff] }
   0x3   :  { %v922_v4 = vcombine.high %v31_v0, %v35_v1  ;;  %v921_v6 = vcombine.low %v31_v0, %v35_v1  ;;  %v39_v7 = vld [vmem:[%s1603_s2 + $0x40] sm:$0xff]  ;;  %v924_v9 = vcombine.high %v32_v2, %v36_v5  ;;  %v923_v10 = vcombine.low %v32_v2, %v36_v5  ;;  %v40_v12 = vld [vmem:[%s1603_s2 + $0x48] sm:$0xff]  ;;  %v34_v25 = vld [vmem:[%s1603_s2 + $0x18] sm:$0xff] }
   0x4   :  { %v43_v8 = vld [vmem:[%s1603_s2 + $0x60] sm:$0xff]  ;;  %v44_v13 = vld [vmem:[%s1603_s2 + $0x68] sm:$0xff]  ;;  %v38_v26 = vld [vmem:[%s1603_s2 + $0x38] sm:$0xff]  ;;  %v926_v29 = vcombine.high %v33_v21, %v37_v24  ;;  %v925_v34 = vcombine.low %v33_v21, %v37_v24 }
   0x5   :  { %v930_v11 = vcombine.high %v39_v7, %v43_v8  ;;  %v47_v14 = vld [vmem:[%s1603_s2 + $0x80] sm:$0xff]  ;;  %241 = vmatprep.subr.bf16.mxu0 %v922_v4  ;;  %v932_v15 = vcombine.high %v40_v12, %v44_v13  ;;  %v48_v16 = vld [vmem:[%s1603_s2 + $0x88] sm:$0xff]  ;;  %354 = vmatprep.subr.bf16.mxu1 %v924_v9  ;;  %v929_v17 = vcombine.low %v39_v7, %v43_v8  ;;  %v41_v32 = vld [vmem:[%s1603_s2 + $0x50] sm:$0xff] }
   0x6   :  { %242 = vmatpush1.bf16.msra.mxu0 %v921_v6  ;;  %355 = vmatpush1.bf16.msra.mxu1 %v923_v10  ;;  %v931_v18 = vcombine.low %v40_v12, %v44_v13  ;;  %v938_v19 = vcombine.high %v47_v14, %v47_v14  ;;  %v937_v20 = vcombine.low %v47_v14, %v47_v14  ;;  %v1072_v28 = vld [vmem:[%s1604_s0] sm:$0xff]   ;;  %v45_v33 = vld [vmem:[%s1603_s2 + $0x70] sm:$0xff]  ;;  %v42_v35 = vld [vmem:[%s1603_s2 + $0x58] sm:$0xff] }
   0x7   :  { %243 = vmatprep.subr.bf16.mxu0 %v930_v11  ;;  %356 = vmatprep.subr.bf16.mxu1 %v932_v15  ;;  %v940_v22 = vcombine.high %v48_v16, %v48_v16  ;;  %v939_v23 = vcombine.low %v48_v16, %v48_v16  ;;  %v928_v31 = vcombine.high %v34_v25, %v38_v26  ;;  %v46_v36 = vld [vmem:[%s1603_s2 + $0x78] sm:$0xff]  ;;  %v49_v39 = vld [vmem:[%s1603_s2 + $0x90] sm:$0xff]  ;;  %v789_v40 = vld [vmem:[%s1605_s1] sm:$0xff] }
   0x8   :  { %v218_v27 = vsel %vm216_vm0, %v937_v20, 0  ;;  %v927_v37 = vcombine.low %v34_v25, %v38_v26  ;;  %v934_v38 = vcombine.high %v41_v32, %v45_v33  ;;  %v936_v41 = vcombine.high %v42_v35, %v46_v36  ;;  %v50_v42 = vld [vmem:[%s1603_s2 + $0x98] sm:$0xff]  ;;  %795 = vperm.xlu0 %982, %v789_v40   ;;  %v790_v44 = vld [vmem:[%s1605_s1 + $0x8] sm:$0xff]  ;;  %v791_v47 = vld [vmem:[%s1605_s1 + $0x10] sm:$0xff] }
   0x9   :  { %v224_v30 = vsel %vm216_vm0, %v939_v23, 0  ;;  %v933_v43 = vcombine.low %v41_v32, %v45_v33  ;;  %v935_v45 = vcombine.low %v42_v35, %v46_v36  ;;  %v942_v46 = vcombine.high %v49_v39, %v49_v39  ;;  %v989_v50 = vld [vmem:[%s1604_s0 + $0x8] sm:$0xff]   ;;  %805 = vperm.xlu1 %983, %v791_v47   ;;  %v792_v54 = vld [vmem:[%s1605_s1 + $0x18] sm:$0xff]  ;;  %v990_v55 = vld [vmem:[%s1604_s0 + $0x10] sm:$0xff]  }
   0xa   :  { %244 = vmatpush1.bf16.msra.mxu0 %v929_v17  ;;  %357 = vmatpush1.bf16.msra.mxu1 %v931_v18  ;;  %v944_v48 = vcombine.high %v50_v42, %v50_v42  ;;  %v941_v49 = vcombine.low %v49_v39, %v49_v39  ;;  %v943_v51 = vcombine.low %v50_v42, %v50_v42  ;;  %v991_v56 = vld [vmem:[%s1604_s0 + $0x18] sm:$0xff]   ;;  %v992_v57 = vld [vmem:[%s1604_s0 + $0x20] sm:$0xff]   ;;  %v993_v58 = vld [vmem:[%s1604_s0 + $0x28] sm:$0xff]  }
   0xb   :  { %945 = vmatprep.subr.msk.bf16.mxu0 %vm216_vm0, %v938_v19  ;;  %954 = vmatprep.subr.msk.bf16.mxu1 %vm216_vm0, %v940_v22  ;;  %v998_v59 = vld [vmem:[%s1604_s0 + $0x30] sm:$0xff]   ;;  %v999_v60 = vld [vmem:[%s1604_s0 + $0x38] sm:$0xff]  }
   0xc   :  { %800 = vperm.xlu0 %982, %v790_v44   ;;  %v230_v52 = vsel %vm216_vm0, %v941_v49, 0  ;;  %v236_v53 = vsel %vm216_vm0, %v943_v51, 0 }
   0xd   :  { %810 = vperm.xlu1 %983, %v792_v54  }
   0xe   :  { %246 = vmatpush1.bf16.msra.mxu0 %v218_v27  ;;  %359 = vmatpush1.bf16.msra.mxu1 %v224_v30 }
   0xf   :  { %467 = vmatprep.subr.bf16.mxu0 %v926_v29  ;;  %580 = vmatprep.subr.bf16.mxu1 %v928_v31 }
  0x11   :  { %946 = vmatmul.mubr.msk.bf16.vlgmr.msra.gmra.mrb[0].mxu0 %vm191_vm1, %v1072_v28  ;;  %955 = vmatmul.mubr.msk.bf16.vlgmr.msra.gmra.mrb[0].mxu1 %vm191_vm1, %v1072_v28 }
  0x12   :  { %468 = vmatpush1.bf16.msra.mxu0 %v925_v34  ;;  %581 = vmatpush1.bf16.msra.mxu1 %v927_v37 }
  0x13   :  { %283 = vmatprep.mubr.bf16.mxu0 %v1000_v3  ;;  %396 = vmatprep.mubr.bf16.mxu1 %v1000_v3 }
  0x14   :  { %469 = vmatprep.subr.bf16.mxu0 %v934_v38  ;;  %582 = vmatprep.subr.bf16.mxu1 %v936_v41 }
  0x16   :  { %470 = vmatpush1.bf16.msra.mxu0 %v933_v43  ;;  %583 = vmatpush1.bf16.msra.mxu1 %v935_v45 }
  0x17   :  { %963 = vmatprep.subr.msk.bf16.mxu0 %vm216_vm0, %v942_v46  ;;  %972 = vmatprep.subr.msk.bf16.mxu1 %vm216_vm0, %v944_v48 }
  0x19   :  { %947 = vmatmul.mubr.msk.bf16.gmra.mrb[4].mxu0 %vm191_vm1, %v989_v50  ;;  %956 = vmatmul.mubr.msk.bf16.gmra.mrb[4].mxu1 %vm191_vm1, %v989_v50 }
  0x1a   :  { %293 = vmatprep.mubr.bf16.mxu0 %v1000_v3  ;;  %406 = vmatprep.mubr.bf16.mxu1 %v1000_v3 }
  0x1b   :  { %472 = vmatpush1.bf16.msra.mxu0 %v230_v52  ;;  %585 = vmatpush1.bf16.msra.mxu1 %v236_v53 }
  0x21   :  { %948 = vmatmul.mubr.msk.bf16.gmra.mrb[8].mxu0 %vm191_vm1, %v990_v55  ;;  %957 = vmatmul.mubr.msk.bf16.gmra.mrb[8].mxu1 %vm191_vm1, %v990_v55 }
  0x22   :  { %303 = vmatprep.mubr.bf16.mxu0 %v1000_v3  ;;  %416 = vmatprep.mubr.bf16.mxu1 %v1000_v3 }
  0x29   :  { %949 = vmatmul.mubr.msk.bf16.gmra.mrb[12].mxu0 %vm191_vm1, %v991_v56  ;;  %958 = vmatmul.mubr.msk.bf16.gmra.mrb[12].mxu1 %vm191_vm1, %v991_v56 }
  0x2a   :  { %313 = vmatprep.mubr.bf16.mxu0 %v1000_v3  ;;  %426 = vmatprep.mubr.bf16.mxu1 %v1000_v3 }
  0x31   :  { %950 = vmatmul.mubr.msk.bf16.gmra.mrb[16].mxu0 %vm191_vm1, %v992_v57  ;;  %959 = vmatmul.mubr.msk.bf16.gmra.mrb[16].mxu1 %vm191_vm1, %v992_v57 }
  0x32   :  { %323 = vmatprep.mubr.bf16.mxu0 %v1000_v3  ;;  %436 = vmatprep.mubr.bf16.mxu1 %v1000_v3 }
  0x39   :  { %951 = vmatmul.mubr.msk.bf16.gmra.mrb[20].mxu0 %vm191_vm1, %v993_v58  ;;  %960 = vmatmul.mubr.msk.bf16.gmra.mrb[20].mxu1 %vm191_vm1, %v993_v58 }
  0x3a   :  { %333 = vmatprep.mubr.bf16.mxu0 %v1000_v3  ;;  %446 = vmatprep.mubr.bf16.mxu1 %v1000_v3 }
  0x41   :  { %952 = vmatmul.mubr.msk.bf16.gmra.mrb[24].mxu0 %vm191_vm1, %v998_v59  ;;  %961 = vmatmul.mubr.msk.bf16.gmra.mrb[24].mxu1 %vm191_vm1, %v998_v59 }
  0x42   :  { %343 = vmatprep.mubr.bf16.mxu0 %v1000_v3  ;;  %456 = vmatprep.mubr.bf16.mxu1 %v1000_v3 }
  0x49   :  { %953 = vmatmul.mubr.msk.bf16.gmra.mrb[28].mxu0 %vm191_vm1, %v999_v60  ;;  %962 = vmatmul.mubr.msk.bf16.gmra.mrb[28].mxu1 %vm191_vm1, %v999_v60 }
  0x4a   :  { %499 = vmatprep.mubr.bf16.mxu0 %v1000_v3  ;;  %612 = vmatprep.mubr.bf16.mxu1 %v1000_v3 }
  0x51   :  { %964 = vmatmul.mubr.msk.bf16.vlgmr.msra.gmra.mrb[32].mxu0 %vm191_vm1, %v1072_v28  ;;  %973 = vmatmul.mubr.msk.bf16.vlgmr.msra.gmra.mrb[32].mxu1 %vm191_vm1, %v1072_v28 }
  0x52   :  { %509 = vmatprep.mubr.bf16.mxu0 %v1000_v3  ;;  %622 = vmatprep.mubr.bf16.mxu1 %v1000_v3 }
  0x59   :  { %965 = vmatmul.mubr.msk.bf16.gmra.mrb[36].mxu0 %vm191_vm1, %v989_v50  ;;  %974 = vmatmul.mubr.msk.bf16.gmra.mrb[36].mxu1 %vm191_vm1, %v989_v50 }
  0x5a   :  { %519 = vmatprep.mubr.bf16.mxu0 %v1000_v3  ;;  %632 = vmatprep.mubr.bf16.mxu1 %v1000_v3 }
  0x61   :  { %966 = vmatmul.mubr.msk.bf16.gmra.mrb[40].mxu0 %vm191_vm1, %v990_v55  ;;  %975 = vmatmul.mubr.msk.bf16.gmra.mrb[40].mxu1 %vm191_vm1, %v990_v55 }
  0x62   :  { %529 = vmatprep.mubr.bf16.mxu0 %v1000_v3  ;;  %642 = vmatprep.mubr.bf16.mxu1 %v1000_v3 }
  0x69   :  { %967 = vmatmul.mubr.msk.bf16.gmra.mrb[44].mxu0 %vm191_vm1, %v991_v56  ;;  %976 = vmatmul.mubr.msk.bf16.gmra.mrb[44].mxu1 %vm191_vm1, %v991_v56 }
  0x6a   :  { %539 = vmatprep.mubr.bf16.mxu0 %v1000_v3  ;;  %652 = vmatprep.mubr.bf16.mxu1 %v1000_v3 }
  0x71   :  { %968 = vmatmul.mubr.msk.bf16.gmra.mrb[48].mxu0 %vm191_vm1, %v992_v57  ;;  %977 = vmatmul.mubr.msk.bf16.gmra.mrb[48].mxu1 %vm191_vm1, %v992_v57 }
  0x72   :  { %549 = vmatprep.mubr.bf16.mxu0 %v1000_v3  ;;  %662 = vmatprep.mubr.bf16.mxu1 %v1000_v3 }
  0x79   :  { %969 = vmatmul.mubr.msk.bf16.gmra.mrb[52].mxu0 %vm191_vm1, %v993_v58  ;;  %978 = vmatmul.mubr.msk.bf16.gmra.mrb[52].mxu1 %vm191_vm1, %v993_v58 }
  0x7a   :  { %559 = vmatprep.mubr.bf16.mxu0 %v1000_v3  ;;  %672 = vmatprep.mubr.bf16.mxu1 %v1000_v3 }
  0x81   :  { %970 = vmatmul.mubr.msk.bf16.gmra.mrb[56].mxu0 %vm191_vm1, %v998_v59  ;;  %979 = vmatmul.mubr.msk.bf16.gmra.mrb[56].mxu1 %vm191_vm1, %v998_v59 }
  0x82   :  { %569 = vmatprep.mubr.bf16.mxu0 %v1000_v3  ;;  %682 = vmatprep.mubr.bf16.mxu1 %v1000_v3 }
  0x89   :  { %971 = vmatmul.mubr.msk.bf16.gmra.mrb[60].mxu0 %vm191_vm1, %v999_v60  ;;  %980 = vmatmul.mubr.msk.bf16.gmra.mrb[60].mxu1 %vm191_vm1, %v999_v60 }
  0xe4   :  { %v1197_v61 = vpop.f32.mrb[0].mxu0  ;;  %v1199_v62 = vpop.f32.mrb[0].mxu1 }
  0xe5   :  { %v1201_v63 = vpop.f32.mrb[1].mxu0  ;;  %v1203_v0 = vpop.f32.mrb[1].mxu1 }
  0xe6   :  { %v1205_v1 = vpop.f32.mrb[2].mxu0  ;;  %v1207_v2 = vpop.f32.mrb[2].mxu1 }
  0xe7   :  { %v1209_v4 = vpop.f32.mrb[3].mxu0  ;;  %v1211_v5 = vpop.f32.mrb[3].mxu1 }
  0xec   :  { %v1213_v3 = vpop.f32.mrb[4].mxu0  ;;  %v1215_v6 = vpop.f32.mrb[4].mxu1 }
  0xed   :  { %v1217_v7 = vpop.f32.mrb[5].mxu0  ;;  %v1219_v8 = vpop.f32.mrb[5].mxu1 }
  0xee   :  { %v1221_v9 = vpop.f32.mrb[6].mxu0  ;;  %v1223_v10 = vpop.f32.mrb[6].mxu1 }
  0xef   :  { %v1225_v11 = vpop.f32.mrb[7].mxu0  ;;  %v1227_v12 = vpop.f32.mrb[7].mxu1 }
  0xf4   :  { %v295_v13 = vpop.f32.mrb[8].mxu0  ;;  %v408_v15 = vpop.f32.mrb[8].mxu1 }
  0xf5   :  { %v693_v14 = vmax.f32 %v1197_v61, %v295_v13  ;;  %v297_v16 = vpop.f32.mrb[9].mxu0  ;;  %v695_v17 = vmax.f32 %v1199_v62, %v408_v15  ;;  %v1232_v19 = vpop.f32.mrb[9].mxu1 }
  0xf6   :  { %v694_v18 = vmax.f32 %v1201_v63, %v297_v16  ;;  %v1234_v20 = vpop.f32.mrb[10].mxu0  ;;  %v696_v21 = vmax.f32 %v1203_v0, %v1232_v19  ;;  %v1240_v23 = vpop.f32.mrb[10].mxu1 }
  0xf7   :  { %v701_v22 = vmax.f32 %v1205_v1, %v1234_v20  ;;  %v1242_v24 = vpop.f32.mrb[11].mxu0  ;;  %v1248_v27 = vpop.f32.mrb[11].mxu1 }
  0xf8   :  { %v1300_v61 = vpop.permute.xlu0 %795 }
  0xfc   :  { %v1252_v29 = vpop.f32.mrb[12].mxu0  ;;  %v1256_v31 = vpop.f32.mrb[12].mxu1 }
  0xfd   :  { %v1258_v32 = vpop.f32.mrb[13].mxu0  ;;  %v1264_v35 = vpop.f32.mrb[13].mxu1 }
  0xfe   :  { %v1266_v36 = vpop.f32.mrb[14].mxu0  ;;  %v1272_v39 = vpop.f32.mrb[14].mxu1 }
  0xff   :  { %v1274_v40 = vpop.f32.mrb[15].mxu0  ;;  %v1280_v43 = vpop.f32.mrb[15].mxu1 }
 0x100   :  { %v1302_v26 = vpop.permute.xlu0 %800 }
 0x104   :  { %v315_v45 = vpop.f32.mrb[16].mxu0  ;;  %v428_v46 = vpop.f32.mrb[16].mxu1 }
 0x105   :  { %v317_v47 = vpop.f32.mrb[17].mxu0  ;;  %v430_v48 = vpop.f32.mrb[17].mxu1 }
 0x106   :  { %v319_v49 = vpop.f32.mrb[18].mxu0  ;;  %v432_v50 = vpop.f32.mrb[18].mxu1 }
 0x107   :  { %v321_v51 = vpop.f32.mrb[19].mxu0  ;;  %v434_v52 = vpop.f32.mrb[19].mxu1 }
 0x10c   :  { %v1284_v53 = vpop.f32.mrb[20].mxu0  ;;  %v1286_v54 = vpop.f32.mrb[20].mxu1 }
 0x10d   :  { %v1288_v55 = vpop.f32.mrb[21].mxu0  ;;  %v1290_v56 = vpop.f32.mrb[21].mxu1 }
 0x10e   :  { %v1292_v57 = vpop.f32.mrb[22].mxu0  ;;  %v1294_v58 = vpop.f32.mrb[22].mxu1 }
 0x10f   :  { %v1296_v59 = vpop.f32.mrb[23].mxu0  ;;  %v1298_v60 = vpop.f32.mrb[23].mxu1 }
 0x114   :  { %v335_v62 = vpop.f32.mrb[24].mxu0  ;;  %v448_v0 = vpop.f32.mrb[24].mxu1 }
 0x115   :  { %v725_v63 = vmax.f32 %v315_v45, %v335_v62  ;;  %v337_v1 = vpop.f32.mrb[25].mxu0  ;;  %v727_v13 = vmax.f32 %v428_v46, %v448_v0  ;;  %v450_v16 = vpop.f32.mrb[25].mxu1 }
 0x116   :  { %v726_v15 = vmax.f32 %v317_v47, %v337_v1  ;;  %v339_v19 = vpop.f32.mrb[26].mxu0  ;;  %v728_v44 = vmax.f32 %v430_v48, %v450_v16  ;;  %v452_v41 = vpop.f32.mrb[26].mxu1  ;;  %v1607_v48 = vmax.f32 %v1207_v2, %v1240_v23  ;;  %v1610_v1 = vmax.f32 %v1213_v3, %v1252_v29 }
 0x117   :  { %v757_v20 = vmax.f32 %v693_v14, %v725_v63  ;;  %v733_v42 = vmax.f32 %v319_v49, %v339_v19  ;;  %v341_v38 = vpop.f32.mrb[27].mxu0  ;;  %v759_v37 = vmax.f32 %v695_v17, %v727_v13  ;;  %v735_v33 = vmax.f32 %v432_v50, %v452_v41  ;;  %v454_v28 = vpop.f32.mrb[27].mxu1 }
 0x118   :  { %v758_v34 = vmax.f32 %v694_v18, %v726_v15  ;;  %v734_v30 = vmax.f32 %v321_v51, %v341_v38  ;;  %v760_v25 = vmax.f32 %v696_v21, %v728_v44  ;;  %v736_v46 = vmax.f32 %v434_v52, %v454_v28  ;;  %v1313_v38 = vpop.permute.xlu1 %805 }
 0x119   :  { %v813_v45 = vadd.f32 %v1300_v61, %v757_v20  ;;  %v765_v62 = vmax.f32 %v701_v22, %v733_v42  ;;  %v815_v14 = vadd.f32 %v1300_v61, %v759_v37  ;;  %v767_v49 = vmax.f32 %v1607_v48, %v735_v33 }
 0x11a   :  { %v814_v47 = vadd.f32 %v1300_v61, %v758_v34  ;;  %v1608_v17 = vmax.f32 %v1209_v4, %v1242_v24  ;;  %v816_v21 = vadd.f32 %v1300_v61, %v760_v25  ;;  %v1609_v22 = vmax.f32 %v1211_v5, %v1248_v27 }
 0x11b   :  { %v845_v41 = vmax.f32 %v813_v45, 0.0  ;;  %v821_v34 = vadd.f32 %v1302_v26, %v765_v62  ;;  %v847_v42 = vmax.f32 %v815_v14, 0.0  ;;  %v823_v23 = vadd.f32 %v1302_v26, %v767_v49 }
 0x11c   :  { %v766_v18 = vmax.f32 %v1608_v17, %v734_v30  ;;  %v768_v28 = vmax.f32 %v1609_v22, %v736_v46  ;;  %v846_v37 = vmax.f32 %v814_v47, 0.0  ;;  %v345_v33 = vpop.f32.mrb[28].mxu0  ;;  %v848_v4 = vmax.f32 %v816_v21, 0.0  ;;  %v458_v27 = vpop.f32.mrb[28].mxu1 }
 0x11d   :  { %877 = vst [vmem:[%s1606_s3] sm:$0xff] %v845_v41  ;;  %v853_v25 = vmax.f32 %v821_v34, 0.0  ;;  %v741_v5 = vmax.f32 %v1284_v53, %v345_v33  ;;  %v347_v30 = vpop.f32.mrb[29].mxu0  ;;  %879 = vst [vmem:[%s1606_s3 + $0x10] sm:$0xff] %v847_v42  ;;  %v855_v50 = vmax.f32 %v823_v23, 0.0  ;;  %v743_v51 = vmax.f32 %v1286_v54, %v458_v27  ;;  %v460_v63 = vpop.f32.mrb[29].mxu1 }
 0x11e   :  { %v822_v2 = vadd.f32 %v1302_v26, %v766_v18  ;;  %v824_v24 = vadd.f32 %v1302_v26, %v768_v28  ;;  %878 = vst [vmem:[%s1606_s3 + $0x8] sm:$0xff] %v846_v37  ;;  %v742_v52 = vmax.f32 %v1288_v55, %v347_v30  ;;  %v349_v0 = vpop.f32.mrb[30].mxu0  ;;  %880 = vst [vmem:[%s1606_s3 + $0x18] sm:$0xff] %v848_v4  ;;  %v462_v55 = vpop.f32.mrb[30].mxu1 }
 0x11f   :  { %885 = vst [vmem:[%s1606_s3 + $0x40] sm:$0xff] %v853_v25  ;;  %v773_v13 = vmax.f32 %v1610_v1, %v741_v5  ;;  %v744_v15 = vmax.f32 %v1290_v56, %v460_v63  ;;  %v749_v54 = vmax.f32 %v1292_v57, %v349_v0  ;;  %v351_v16 = vpop.f32.mrb[31].mxu0  ;;  %887 = vst [vmem:[%s1606_s3 + $0x50] sm:$0xff] %v855_v50  ;;  %v464_v45 = vpop.f32.mrb[31].mxu1 }
 0x120   :  { %v854_v44 = vmax.f32 %v822_v2, 0.0  ;;  %v856_v53 = vmax.f32 %v824_v24, 0.0  ;;  %v1611_v19 = vmax.f32 %v1215_v6, %v1256_v31  ;;  %v1612_v3 = vmax.f32 %v1217_v7, %v1258_v32  ;;  %v1360_v62 = vpop.permute.xlu1 %810 }
 0x121   :  { %v751_v56 = vmax.f32 %v1294_v58, %v462_v55  ;;  %v750_v57 = vmax.f32 %v1296_v59, %v351_v16  ;;  %v1613_v46 = vmax.f32 %v1219_v8, %v1264_v35  ;;  %v829_v31 = vadd.f32 %v1313_v38, %v773_v13 }
 0x122   :  { %886 = vst [vmem:[%s1606_s3 + $0x48] sm:$0xff] %v854_v44  ;;  %v775_v20 = vmax.f32 %v1611_v19, %v743_v51  ;;  %v774_v29 = vmax.f32 %v1612_v3, %v742_v52  ;;  %888 = vst [vmem:[%s1606_s3 + $0x58] sm:$0xff] %v856_v53  ;;  %v1614_v7 = vmax.f32 %v1221_v9, %v1266_v36 }
 0x123   :  { %v776_v6 = vmax.f32 %v1613_v46, %v744_v15  ;;  %v752_v58 = vmax.f32 %v1298_v60, %v464_v45  ;;  %v1615_v14 = vmax.f32 %v1223_v10, %v1272_v39  ;;  %v1616_v8 = vmax.f32 %v1225_v11, %v1274_v40 }
 0x124   :  { %v781_v32 = vmax.f32 %v1614_v7, %v749_v54  ;;  %v830_v59 = vadd.f32 %v1313_v38, %v774_v29  ;;  %v831_v47 = vadd.f32 %v1313_v38, %v775_v20  ;;  %v861_v17 = vmax.f32 %v829_v31, 0.0  ;;  %v1388_v39 = vpop.f32.mrb[32].mxu0 }
 0x125   :  { %v783_v48 = vmax.f32 %v1615_v14, %v751_v56  ;;  %v782_v35 = vmax.f32 %v1616_v8, %v750_v57  ;;  %v832_v49 = vadd.f32 %v1313_v38, %v776_v6  ;;  %v1617_v9 = vmax.f32 %v1227_v12, %v1280_v43  ;;  %v1394_v12 = vpop.f32.mrb[32].mxu1  ;;  %v1396_v43 = vpop.f32.mrb[33].mxu0 }
 0x126   :  { %v837_v60 = vadd.f32 %v1360_v62, %v781_v32  ;;  %v862_v18 = vmax.f32 %v830_v59, 0.0  ;;  %v863_v21 = vmax.f32 %v831_v47, 0.0  ;;  %893 = vst [vmem:[%s1606_s3 + $0x80] sm:$0xff] %v861_v17  ;;  %v1404_v37 = vpop.f32.mrb[33].mxu1  ;;  %v1406_v42 = vpop.f32.mrb[34].mxu0 }
 0x127   :  { %v784_v36 = vmax.f32 %v1617_v9, %v752_v58  ;;  %v838_v41 = vadd.f32 %v1360_v62, %v782_v35  ;;  %v839_v10 = vadd.f32 %v1360_v62, %v783_v48  ;;  %v864_v22 = vmax.f32 %v832_v49, 0.0  ;;  %v1414_v23 = vpop.f32.mrb[34].mxu1  ;;  %v1416_v33 = vpop.f32.mrb[35].mxu0 }
 0x128   :  { %v869_v40 = vmax.f32 %v837_v60, 0.0  ;;  %894 = vst [vmem:[%s1606_s3 + $0x88] sm:$0xff] %v862_v18  ;;  %895 = vst [vmem:[%s1606_s3 + $0x90] sm:$0xff] %v863_v21  ;;  %v1424_v4 = vpop.f32.mrb[35].mxu1 }
 0x129   :  { %v840_v11 = vadd.f32 %v1360_v62, %v784_v36  ;;  %v870_v28 = vmax.f32 %v838_v41, 0.0  ;;  %v871_v34 = vmax.f32 %v839_v10, 0.0  ;;  %896 = vst [vmem:[%s1606_s3 + $0x98] sm:$0xff] %v864_v22 }
 0x12a   :  { %901 = vst [vmem:[%s1606_s3 + $0xc0] sm:$0xff] %v869_v40 }
 0x12b   :  { %v872_v2 = vmax.f32 %v840_v11, 0.0  ;;  %902 = vst [vmem:[%s1606_s3 + $0xc8] sm:$0xff] %v870_v28  ;;  %903 = vst [vmem:[%s1606_s3 + $0xd0] sm:$0xff] %v871_v34 }
 0x12c   :  { %v1429_v24 = vpop.f32.mrb[36].mxu0  ;;  %v1431_v25 = vpop.f32.mrb[36].mxu1 }
 0x12d   :  { %904 = vst [vmem:[%s1606_s3 + $0xd8] sm:$0xff] %v872_v2  ;;  %v1433_v5 = vpop.f32.mrb[37].mxu0  ;;  %v1435_v27 = vpop.f32.mrb[37].mxu1 }
 0x12e   :  { %v1437_v30 = vpop.f32.mrb[38].mxu0  ;;  %v1439_v44 = vpop.f32.mrb[38].mxu1 }
 0x12f   :  { %v1441_v50 = vpop.f32.mrb[39].mxu0  ;;  %v1443_v51 = vpop.f32.mrb[39].mxu1 }
 0x134   :  { %v521_v52 = vpop.f32.mrb[40].mxu0  ;;  %v634_v0 = vpop.f32.mrb[40].mxu1 }
 0x135   :  { %v697_v63 = vmax.f32 %v1388_v39, %v521_v52  ;;  %v523_v53 = vpop.f32.mrb[41].mxu0  ;;  %v699_v1 = vmax.f32 %v1394_v12, %v634_v0  ;;  %v636_v15 = vpop.f32.mrb[41].mxu1 }
 0x136   :  { %v698_v13 = vmax.f32 %v1396_v43, %v523_v53  ;;  %v525_v54 = vpop.f32.mrb[42].mxu0  ;;  %v700_v55 = vmax.f32 %v1404_v37, %v636_v15  ;;  %v1450_v19 = vpop.f32.mrb[42].mxu1 }
 0x137   :  { %v705_v16 = vmax.f32 %v1406_v42, %v525_v54  ;;  %v1452_v20 = vpop.f32.mrb[43].mxu0  ;;  %v707_v3 = vmax.f32 %v1414_v23, %v1450_v19  ;;  %v1458_v56 = vpop.f32.mrb[43].mxu1 }
 0x138   :  { %v706_v29 = vmax.f32 %v1416_v33, %v1452_v20  ;;  %v708_v57 = vmax.f32 %v1424_v4, %v1458_v56 }
 0x13c   :  { %v1462_v45 = vpop.f32.mrb[44].mxu0  ;;  %v1466_v6 = vpop.f32.mrb[44].mxu1 }
 0x13d   :  { %v1468_v31 = vpop.f32.mrb[45].mxu0  ;;  %v1474_v58 = vpop.f32.mrb[45].mxu1 }
 0x13e   :  { %v1476_v59 = vpop.f32.mrb[46].mxu0  ;;  %v1482_v48 = vpop.f32.mrb[46].mxu1 }
 0x13f   :  { %v1484_v8 = vpop.f32.mrb[47].mxu0  ;;  %v1490_v17 = vpop.f32.mrb[47].mxu1 }
 0x144   :  { %v541_v36 = vpop.f32.mrb[48].mxu0  ;;  %v654_v60 = vpop.f32.mrb[48].mxu1 }
 0x145   :  { %v543_v18 = vpop.f32.mrb[49].mxu0  ;;  %v656_v21 = vpop.f32.mrb[49].mxu1 }
 0x146   :  { %v545_v41 = vpop.f32.mrb[50].mxu0  ;;  %v658_v10 = vpop.f32.mrb[50].mxu1 }
 0x147   :  { %v547_v39 = vpop.f32.mrb[51].mxu0  ;;  %v660_v22 = vpop.f32.mrb[51].mxu1 }
 0x14c   :  { %v551_v11 = vpop.f32.mrb[52].mxu0  ;;  %v1494_v40 = vpop.f32.mrb[52].mxu1 }
 0x14d   :  { %v1496_v12 = vpop.f32.mrb[53].mxu0  ;;  %v1498_v43 = vpop.f32.mrb[53].mxu1 }
 0x14e   :  { %v1500_v28 = vpop.f32.mrb[54].mxu0  ;;  %v1502_v34 = vpop.f32.mrb[54].mxu1 }
 0x14f   :  { %v1504_v37 = vpop.f32.mrb[55].mxu0  ;;  %v1506_v42 = vpop.f32.mrb[55].mxu1 }
 0x154   :  { %v561_v2 = vpop.f32.mrb[56].mxu0  ;;  %v674_v33 = vpop.f32.mrb[56].mxu1 }
 0x155   :  { %v729_v23 = vmax.f32 %v541_v36, %v561_v2  ;;  %v563_v4 = vpop.f32.mrb[57].mxu0  ;;  %v731_v52 = vmax.f32 %v654_v60, %v674_v33  ;;  %v676_v53 = vpop.f32.mrb[57].mxu1 }
 0x156   :  { %v730_v0 = vmax.f32 %v543_v18, %v563_v4  ;;  %v565_v15 = vpop.f32.mrb[58].mxu0  ;;  %v732_v19 = vmax.f32 %v656_v21, %v676_v53  ;;  %v678_v56 = vpop.f32.mrb[58].mxu1 }
 0x157   :  { %v761_v54 = vmax.f32 %v697_v63, %v729_v23  ;;  %v737_v20 = vmax.f32 %v545_v41, %v565_v15  ;;  %v567_v9 = vpop.f32.mrb[59].mxu0  ;;  %v763_v49 = vmax.f32 %v699_v1, %v731_v52  ;;  %v739_v14 = vmax.f32 %v658_v10, %v678_v56  ;;  %v680_v32 = vpop.f32.mrb[59].mxu1 }
 0x158   :  { %v762_v35 = vmax.f32 %v698_v13, %v730_v0  ;;  %v738_v47 = vmax.f32 %v547_v39, %v567_v9  ;;  %v764_v46 = vmax.f32 %v700_v55, %v732_v19  ;;  %v740_v2 = vmax.f32 %v660_v22, %v680_v32 }
 0x159   :  { %v817_v7 = vadd.f32 %v1300_v61, %v761_v54  ;;  %v769_v36 = vmax.f32 %v705_v16, %v737_v20  ;;  %v819_v60 = vadd.f32 %v1300_v61, %v763_v49  ;;  %v771_v33 = vmax.f32 %v707_v3, %v739_v14 }
 0x15a   :  { %v818_v18 = vadd.f32 %v1300_v61, %v762_v35  ;;  %v770_v63 = vmax.f32 %v706_v29, %v738_v47  ;;  %v820_v41 = vadd.f32 %v1300_v61, %v764_v46  ;;  %v772_v13 = vmax.f32 %v708_v57, %v740_v2 }
 0x15b   :  { %v849_v21 = vmax.f32 %v817_v7, 0.0  ;;  %v825_v1 = vadd.f32 %v1302_v26, %v769_v36  ;;  %v851_v10 = vmax.f32 %v819_v60, 0.0  ;;  %v827_v39 = vadd.f32 %v1302_v26, %v771_v33 }
 0x15c   :  { %v850_v9 = vmax.f32 %v818_v18, 0.0  ;;  %v826_v55 = vadd.f32 %v1302_v26, %v770_v63  ;;  %v571_v16 = vpop.f32.mrb[60].mxu0  ;;  %v852_v32 = vmax.f32 %v820_v41, 0.0  ;;  %v828_v29 = vadd.f32 %v1302_v26, %v772_v13  ;;  %v684_v61 = vpop.f32.mrb[60].mxu1 }
 0x15d   :  { %881 = vst [vmem:[%s1606_s3 + $0x20] sm:$0xff] %v849_v21  ;;  %v857_v3 = vmax.f32 %v825_v1, 0.0  ;;  %v745_v7 = vmax.f32 %v551_v11, %v571_v16  ;;  %v573_v46 = vpop.f32.mrb[61].mxu0  ;;  %883 = vst [vmem:[%s1606_s3 + $0x30] sm:$0xff] %v851_v10  ;;  %v859_v57 = vmax.f32 %v827_v39, 0.0  ;;  %v747_v14 = vmax.f32 %v1494_v40, %v684_v61  ;;  %v686_v49 = vpop.f32.mrb[61].mxu1 }
 0x15e   :  { %882 = vst [vmem:[%s1606_s3 + $0x28] sm:$0xff] %v850_v9  ;;  %v858_v47 = vmax.f32 %v826_v55, 0.0  ;;  %v746_v35 = vmax.f32 %v1496_v12, %v573_v46  ;;  %v575_v22 = vpop.f32.mrb[62].mxu0  ;;  %884 = vst [vmem:[%s1606_s3 + $0x38] sm:$0xff] %v852_v32  ;;  %v860_v26 = vmax.f32 %v828_v29, 0.0  ;;  %v1618_v11 = vmax.f32 %v1429_v24, %v1462_v45  ;;  %v688_v12 = vpop.f32.mrb[62].mxu1 }
 0x15f   :  { %889 = vst [vmem:[%s1606_s3 + $0x60] sm:$0xff] %v857_v3  ;;  %v748_v4 = vmax.f32 %v1498_v43, %v686_v49  ;;  %v753_v40 = vmax.f32 %v1500_v28, %v575_v22  ;;  %v577_v52 = vpop.f32.mrb[63].mxu0  ;;  %891 = vst [vmem:[%s1606_s3 + $0x70] sm:$0xff] %v859_v57  ;;  %v1619_v0 = vmax.f32 %v1431_v25, %v1466_v6  ;;  %v690_v15 = vpop.f32.mrb[63].mxu1 }
 0x160   :  { %v777_v23 = vmax.f32 %v1618_v11, %v745_v7  ;;  %890 = vst [vmem:[%s1606_s3 + $0x68] sm:$0xff] %v858_v47  ;;  %v1620_v24 = vmax.f32 %v1433_v5, %v1468_v31  ;;  %v755_v43 = vmax.f32 %v1502_v34, %v688_v12  ;;  %v754_v28 = vmax.f32 %v1504_v37, %v577_v52 }
 0x161   :  { %v779_v53 = vmax.f32 %v1619_v0, %v747_v14  ;;  %892 = vst [vmem:[%s1606_s3 + $0x78] sm:$0xff] %v860_v26  ;;  %v1621_v19 = vmax.f32 %v1435_v27, %v1474_v58  ;;  %v1622_v6 = vmax.f32 %v1437_v30, %v1476_v59  ;;  %v756_v31 = vmax.f32 %v1506_v42, %v690_v15 }
 0x162   :  { %v778_v45 = vmax.f32 %v1620_v24, %v746_v35  ;;  %v833_v54 = vadd.f32 %v1313_v38, %v777_v23  ;;  %v1623_v20 = vmax.f32 %v1439_v44, %v1482_v48  ;;  %v1624_v36 = vmax.f32 %v1441_v50, %v1484_v8 }
 0x163   :  { %v780_v25 = vmax.f32 %v1621_v19, %v748_v4  ;;  %v785_v5 = vmax.f32 %v1622_v6, %v753_v40  ;;  %v835_v34 = vadd.f32 %v1313_v38, %v779_v53  ;;  %v1625_v59 = vmax.f32 %v1443_v51, %v1490_v17 }
 0x164   :  { %v834_v37 = vadd.f32 %v1313_v38, %v778_v45  ;;  %v787_v56 = vmax.f32 %v1623_v20, %v755_v43  ;;  %v786_v2 = vmax.f32 %v1624_v36, %v754_v28  ;;  %v865_v27 = vmax.f32 %v833_v54, 0.0 }
 0x165   :  { %v836_v58 = vadd.f32 %v1313_v38, %v780_v25  ;;  %v841_v30 = vadd.f32 %v1360_v62, %v785_v5  ;;  %v788_v42 = vmax.f32 %v1625_v59, %v756_v31  ;;  %v867_v60 = vmax.f32 %v835_v34, 0.0 }
 0x166   :  { %v866_v18 = vmax.f32 %v834_v37, 0.0  ;;  %v843_v33 = vadd.f32 %v1360_v62, %v787_v56  ;;  %v842_v44 = vadd.f32 %v1360_v62, %v786_v2  ;;  %897 = vst [vmem:[%s1606_s3 + $0xa0] sm:$0xff] %v865_v27 }
 0x167   :  { %v868_v50 = vmax.f32 %v836_v58, 0.0  ;;  %v873_v48 = vmax.f32 %v841_v30, 0.0  ;;  %v844_v38 = vadd.f32 %v1360_v62, %v788_v42  ;;  %899 = vst [vmem:[%s1606_s3 + $0xb0] sm:$0xff] %v867_v60 }
 0x168   :  { %898 = vst [vmem:[%s1606_s3 + $0xa8] sm:$0xff] %v866_v18  ;;  %v875_v51 = vmax.f32 %v843_v33, 0.0  ;;  %v874_v8 = vmax.f32 %v842_v44, 0.0 }
 0x169   :  { %900 = vst [vmem:[%s1606_s3 + $0xb8] sm:$0xff] %v868_v50  ;;  %905 = vst [vmem:[%s1606_s3 + $0xe0] sm:$0xff] %v873_v48  ;;  %v876_v17 = vmax.f32 %v844_v38, 0.0 }
 0x16a   :  { %907 = vst [vmem:[%s1606_s3 + $0xf0] sm:$0xff] %v875_v51  ;;  %906 = vst [vmem:[%s1606_s3 + $0xe8] sm:$0xff] %v874_v8 }
 0x16b   :  { %908 = vst [vmem:[%s1606_s3 + $0xf8] sm:$0xff] %v876_v17 }

// kernel: mul.32
= control target key start
LH: loop header
LB: loop body
LE: loop exit
PB: predicated region body
PF: predicated region fallthrough
CT: control target
= control target key end

     0   :  { %vm322_vm0 = vcmask 1047556   ;;  %vm241_vm1 = vcmask 261120   ;;  %s567_s4 = smov 96   ;;  %s568_s15 = smov 64   ;;  %vm326_vm2 = vcmask 1048320   ;;  %vm369_vm3 = vcmask 785920   ;;  %s840_s0 = inlined_call_operand.vmem [shape: f32[16,3,3,32], index: 0, kind: input, shape index: {}]   ;;  %s841_s1 = inlined_call_operand.vmem [shape: f32[16,288], index: 1, kind: output, shape index: {}]  }
   0x1   :  { %v518_v0 = vld [vmem:[%s840_s0 + $0x58] sm:$0xf]  ;;  %v521_v1 = vld [vmem:[%s840_s0 + $0x4c] sm:$0xf]  ;;  %v524_v2 = vld [vmem:[%s840_s0 + $0x40] sm:$0xf] }
   0x2   :  { %133 = vst [vmem:[#allocation0 + $0xb0] sm:$0xf] %v518_v0  ;;  %148 = vst [vmem:[#allocation0 + $0x98] sm:$0xf] %v521_v1  ;;  %v527_v3 = vld [vmem:[%s840_s0 + $0x34] sm:$0xf] }
   0x3   :  { %163 = vst [vmem:[#allocation0 + $0x80] sm:$0xf] %v524_v2  ;;  %v530_v4 = vld [vmem:[%s840_s0 + $0x28] sm:$0xf]  ;;  %v533_v5 = vld [vmem:[%s840_s0 + $0x1c] sm:$0xf] }
   0x4   :  { %178 = vst [vmem:[#allocation0 + $0x68] sm:$0xf] %v527_v3  ;;  %193 = vst [vmem:[#allocation0 + $0x50] sm:$0xf] %v530_v4  ;;  %v536_v6 = vld [vmem:[%s840_s0 + $0x10] sm:$0xf] }
   0x5   :  { %208 = vst [vmem:[#allocation0 + $0x38] sm:$0xf] %v533_v5  ;;  %v539_v7 = vld [vmem:[%s840_s0 + $0x4] sm:$0xf]  ;;  %223 = vst [vmem:[#allocation0 + $0x20] sm:$0xf] %v536_v6 }
   0x6   :  { %237 = vst [vmem:[#allocation0 + $0x8] sm:$0xf] %v539_v7  ;;  %v517_v8 = vld [vmem:[%s840_s0 + $0x5c] sm:$0xf]  ;;  %v519_v9 = vld [vmem:[%s840_s0 + $0x54] sm:$0xf] }
   0x7   :  { %v520_v10 = vld [vmem:[%s840_s0 + $0x50] sm:$0xf]  ;;  %128 = vst [vmem:[#allocation0 + $0xb8] sm:$0xf] %v517_v8  ;;  %138 = vst [vmem:[#allocation0 + $0xa8] sm:$0xf] %v519_v9 }
   0x8   :  { %143 = vst [vmem:[#allocation0 + $0xa0] sm:$0xf] %v520_v10  ;;  %v522_v11 = vld [vmem:[%s840_s0 + $0x48] sm:$0xf]  ;;  %v523_v12 = vld [vmem:[%s840_s0 + $0x44] sm:$0xf] }
   0x9   :  { %v525_v13 = vld [vmem:[%s840_s0 + $0x3c] sm:$0xf]  ;;  %153 = vst [vmem:[#allocation0 + $0x90] sm:$0xf] %v522_v11  ;;  %158 = vst [vmem:[#allocation0 + $0x88] sm:$0xf] %v523_v12 }
   0xa   :  { %168 = vst [vmem:[#allocation0 + $0x78] sm:$0xf] %v525_v13  ;;  %v526_v14 = vld [vmem:[%s840_s0 + $0x38] sm:$0xf]  ;;  %v528_v15 = vld [vmem:[%s840_s0 + $0x30] sm:$0xf] }
   0xb   :  { %v529_v16 = vld [vmem:[%s840_s0 + $0x2c] sm:$0xf]  ;;  %173 = vst [vmem:[#allocation0 + $0x70] sm:$0xf] %v526_v14  ;;  %183 = vst [vmem:[#allocation0 + $0x60] sm:$0xf] %v528_v15 }
   0xc   :  { %188 = vst [vmem:[#allocation0 + $0x58] sm:$0xf] %v529_v16  ;;  %v531_v17 = vld [vmem:[%s840_s0 + $0x24] sm:$0xf]  ;;  %v532_v18 = vld [vmem:[%s840_s0 + $0x20] sm:$0xf] }
   0xd   :  { %v534_v19 = vld [vmem:[%s840_s0 + $0x18] sm:$0xf]  ;;  %198 = vst [vmem:[#allocation0 + $0x48] sm:$0xf] %v531_v17  ;;  %203 = vst [vmem:[#allocation0 + $0x40] sm:$0xf] %v532_v18 }
   0xe   :  { %213 = vst [vmem:[#allocation0 + $0x30] sm:$0xf] %v534_v19  ;;  %v535_v20 = vld [vmem:[%s840_s0 + $0x14] sm:$0xf]  ;;  %v537_v21 = vld [vmem:[%s840_s0 + $0xc] sm:$0xf] }
   0xf   :  { %v538_v22 = vld [vmem:[%s840_s0 + $0x8] sm:$0xf]  ;;  %218 = vst [vmem:[#allocation0 + $0x28] sm:$0xf] %v535_v20  ;;  %228 = vst [vmem:[#allocation0 + $0x18] sm:$0xf] %v537_v21 }
  0x10   :  { %233 = vst [vmem:[#allocation0 + $0x10] sm:$0xf] %v538_v22  ;;  %v238_v23 = vld [vmem:[%s840_s0] sm:$0xf]  ;;  %v494_v24 = vld [vmem:[%s840_s0 + $0xb8] sm:$0xf] }
  0x11   :  { %v321_v25 = vld [vmem:[#allocation0 + $0x8] ss:$24 sm:$0xf0]   ;;  %239 = vst [vmem:[#allocation0] sm:$0xf] %v238_v23  ;;  %s569_s20 = smov 32  }
  0x12   :  { %13 = vst [vmem:[#allocation0 + $0x170] sm:$0xf] %v494_v24  ;;  %v497_v26 = vld [vmem:[%s840_s0 + $0xac] sm:$0xf]  ;;  %v500_v28 = vld [vmem:[%s840_s0 + $0xa0] sm:$0xf] }
  0x13   :  { %v319_v27 = vld [vmem:[#allocation0 + $0x8] ss:$24 sm:$0xf]   ;;  %28 = vst [vmem:[#allocation0 + $0x158] sm:$0xf] %v497_v26  ;;  %vm412_vm4 = vcmask 523520  }
  0x14   :  { %v323_v29 = vsel %vm322_vm0, %v321_v25, %v319_v27  ;;  %v274_v30 = vld [vmem:[#allocation0 + $0xa8] ss:$9 sm:$0x7]   ;;  %43 = vst [vmem:[#allocation0 + $0x140] sm:$0xf] %v500_v28 }
  0x15   :  { %v503_v31 = vld [vmem:[%s840_s0 + $0x94] sm:$0xf]  ;;  %324 = vrot.lane.b32.xlu0 %v323_v29, %s567_s4  ;;  %v264_v32 = vld [vmem:[#allocation0 + $0x78] ss:$9 sm:$0x7]  }
  0x16   :  { %v269_v33 = vld [vmem:[#allocation0 + $0x90] ss:$9 sm:$0x7]   ;;  %546 = vst.msk [vmem:[%s841_s1 + $0x7] ss:$8 sm:$0x7] %vm241_vm1, %v274_v30  }
  0x17   :  { %58 = vst [vmem:[#allocation0 + $0x128] sm:$0xf] %v503_v31  ;;  %v259_v34 = vld [vmem:[#allocation0 + $0x60] ss:$9 sm:$0x7]  }
  0x18   :  { %544 = vst.msk [vmem:[%s841_s1 + $0x5] ss:$8 sm:$0x7] %vm241_vm1, %v264_v32   ;;  %545 = vst.msk [vmem:[%s841_s1 + $0x6] ss:$8 sm:$0x7] %vm241_vm1, %v269_v33  }
  0x19   :  { %v342_v35 = vld [vmem:[#allocation0 + $0x11] ss:$24 sm:$0xf0]   ;;  %543 = vst.msk [vmem:[%s841_s1 + $0x4] ss:$8 sm:$0x7] %vm241_vm1, %v259_v34  }
  0x1a   :  { %v249_v36 = vld [vmem:[#allocation0 + $0x30] ss:$9 sm:$0x7]   ;;  %v254_v37 = vld [vmem:[#allocation0 + $0x48] ss:$9 sm:$0x7]  }
  0x1b   :  { %v244_v38 = vld [vmem:[#allocation0 + $0x18] ss:$9 sm:$0x7]   ;;  %541 = vst.msk [vmem:[%s841_s1 + $0x2] ss:$8 sm:$0x7] %vm241_vm1, %v249_v36  }
  0x1c   :  { %542 = vst.msk [vmem:[%s841_s1 + $0x3] ss:$8 sm:$0x7] %vm241_vm1, %v254_v37   ;;  %v340_v39 = vld [vmem:[#allocation0 + $0x11] ss:$24 sm:$0xf]  }
  0x1d   :  { %v240_v40 = vld [vmem:[#allocation0] ss:$9 sm:$0x7]   ;;  %540 = vst.msk [vmem:[%s841_s1 + $0x1] ss:$8 sm:$0x7] %vm241_vm1, %v244_v38   ;;  %v344_v41 = vsel %vm322_vm0, %v342_v35, %v340_v39 }
  0x1e   :  { %v505_v42 = vld [vmem:[%s840_s0 + $0x8c] sm:$0xf]  ;;  %242 = vst.msk [vmem:[%s841_s1] ss:$8 sm:$0x7] %vm241_vm1, %v240_v40   ;;  %345 = vrot.lane.b32.xlu1 %v344_v41, %s567_s4 }
  0x1f   :  { %68 = vst [vmem:[#allocation0 + $0x118] sm:$0xf] %v505_v42  ;;  %v506_v43 = vld [vmem:[%s840_s0 + $0x88] sm:$0xf]  ;;  %v507_v44 = vld [vmem:[%s840_s0 + $0x84] sm:$0xf] }
  0x20   :  { %v508_v45 = vld [vmem:[%s840_s0 + $0x80] sm:$0xf]  ;;  %73 = vst [vmem:[#allocation0 + $0x110] sm:$0xf] %v506_v43  ;;  %78 = vst [vmem:[#allocation0 + $0x108] sm:$0xf] %v507_v44 }
  0x21   :  { %83 = vst [vmem:[#allocation0 + $0x100] sm:$0xf] %v508_v45  ;;  %v509_v46 = vld [vmem:[%s840_s0 + $0x7c] sm:$0xf]  ;;  %v510_v47 = vld [vmem:[%s840_s0 + $0x78] sm:$0xf] }
  0x22   :  { %v512_v48 = vld [vmem:[%s840_s0 + $0x70] sm:$0xf]  ;;  %88 = vst [vmem:[#allocation0 + $0xf8] sm:$0xf] %v509_v46  ;;  %93 = vst [vmem:[#allocation0 + $0xf0] sm:$0xf] %v510_v47 }
  0x23   :  { %103 = vst [vmem:[#allocation0 + $0xe0] sm:$0xf] %v512_v48  ;;  %v515_v49 = vld [vmem:[%s840_s0 + $0x64] sm:$0xf]  ;;  %v493_v50 = vld [vmem:[%s840_s0 + $0xbc] sm:$0xf] }
  0x24   :  { %118 = vst [vmem:[#allocation0 + $0xc8] sm:$0xf] %v515_v49  ;;  %v496_v51 = vld [vmem:[%s840_s0 + $0xb0] sm:$0xf]  ;;  %v499_v52 = vld [vmem:[%s840_s0 + $0xa4] sm:$0xf] }
  0x25   :  { %8 = vst [vmem:[#allocation0 + $0x178] sm:$0xf] %v493_v50  ;;  %23 = vst [vmem:[#allocation0 + $0x160] sm:$0xf] %v496_v51  ;;  %v502_v53 = vld [vmem:[%s840_s0 + $0x98] sm:$0xf] }
  0x26   :  { %38 = vst [vmem:[#allocation0 + $0x148] sm:$0xf] %v499_v52  ;;  %v511_v54 = vld [vmem:[%s840_s0 + $0x74] sm:$0xf]  ;;  %v514_v55 = vld [vmem:[%s840_s0 + $0x68] sm:$0xf] }
  0x27   :  { %53 = vst [vmem:[#allocation0 + $0x130] sm:$0xf] %v502_v53  ;;  %98 = vst [vmem:[#allocation0 + $0xe8] sm:$0xf] %v511_v54  ;;  %v495_v56 = vld [vmem:[%s840_s0 + $0xb4] sm:$0xf] }
  0x28   :  { %113 = vst [vmem:[#allocation0 + $0xd0] sm:$0xf] %v514_v55  ;;  %v498_v57 = vld [vmem:[%s840_s0 + $0xa8] sm:$0xf]  ;;  %v501_v58 = vld [vmem:[%s840_s0 + $0x9c] sm:$0xf] }
  0x29   :  { %18 = vst [vmem:[#allocation0 + $0x168] sm:$0xf] %v495_v56  ;;  %33 = vst [vmem:[#allocation0 + $0x150] sm:$0xf] %v498_v57  ;;  %v504_v59 = vld [vmem:[%s840_s0 + $0x90] sm:$0xf] }
  0x2a   :  { %48 = vst [vmem:[#allocation0 + $0x138] sm:$0xf] %v501_v58  ;;  %v353_v60 = vld [vmem:[#allocation0 + $0xc8] ss:$24 sm:$0xf0]  }
  0x2b   :  { %63 = vst [vmem:[#allocation0 + $0x120] sm:$0xf] %v504_v59  ;;  %v513_v61 = vld [vmem:[%s840_s0 + $0x6c] sm:$0xf]  ;;  %v516_v63 = vld [vmem:[%s840_s0 + $0x60] sm:$0xf] }
  0x2c   :  { %v294_v62 = vld [vmem:[#allocation0 + $0x108] ss:$9 sm:$0x7]   ;;  %108 = vst [vmem:[#allocation0 + $0xd8] sm:$0xf] %v513_v61 }
  0x2d   :  { %v289_v0 = vld [vmem:[#allocation0 + $0xf0] ss:$9 sm:$0x7]   ;;  %550 = vst.msk [vmem:[%s841_s1 + $0x1b] ss:$8 sm:$0x7] %vm241_vm1, %v294_v62  }
  0x2e   :  { %123 = vst [vmem:[#allocation0 + $0xc0] sm:$0xf] %v516_v63  ;;  %549 = vst.msk [vmem:[%s841_s1 + $0x1a] ss:$8 sm:$0x7] %vm241_vm1, %v289_v0  }
  0x2f   :  { %v351_v1 = vld [vmem:[#allocation0 + $0xc8] ss:$24 sm:$0xf]   ;;  %v362_v3 = vld [vmem:[#allocation0 + $0x2] ss:$24 sm:$0xf]  }
  0x30   :  { %v355_v2 = vsel %vm322_vm0, %v353_v60, %v351_v1  ;;  %v364_v4 = vld [vmem:[#allocation0 + $0x2] ss:$24 sm:$0xf0]   ;;  %v329_v5 = vld [vmem:[#allocation0 + $0xd1] ss:$24 sm:$0xf]  }
  0x31   :  { %356 = vrot.lane.b32.xlu1 %v355_v2, %s567_s4  ;;  %v331_v6 = vld [vmem:[#allocation0 + $0xd1] ss:$24 sm:$0xf0]   ;;  %v372_v11 = vld [vmem:[#allocation0 + $0xd0] ss:$24 sm:$0xf]   ;;  %v366_v16 = vsel %vm322_vm0, %v364_v4, %v362_v3 }
  0x32   :  { %v333_v7 = vsel %vm322_vm0, %v331_v6, %v329_v5  ;;  %v304_v8 = vld [vmem:[#allocation0 + $0x138] ss:$9 sm:$0x7]   ;;  %v309_v9 = vld [vmem:[#allocation0 + $0x150] ss:$9 sm:$0x7]  }
  0x33   :  { %334 = vrot.lane.b32.xlu0 %v333_v7, %s567_s4  ;;  %v299_v10 = vld [vmem:[#allocation0 + $0x120] ss:$9 sm:$0x7]   ;;  %552 = vst.msk [vmem:[%s841_s1 + $0x1d] ss:$8 sm:$0x7] %vm241_vm1, %v304_v8  }
  0x34   :  { %553 = vst.msk [vmem:[%s841_s1 + $0x1e] ss:$8 sm:$0x7] %vm241_vm1, %v309_v9   ;;  %v383_v12 = vld [vmem:[#allocation0 + $0x10] ss:$24 sm:$0xf]  }
  0x35   :  { %v385_v13 = vld [vmem:[#allocation0 + $0x10] ss:$24 sm:$0xf0]   ;;  %551 = vst.msk [vmem:[%s841_s1 + $0x1c] ss:$8 sm:$0x7] %vm241_vm1, %v299_v10  }
  0x36   :  { %v374_v14 = vld [vmem:[#allocation0 + $0xd0] ss:$24 sm:$0xf0]   ;;  %v394_v20 = vld [vmem:[#allocation0 + $0xc2] ss:$24 sm:$0xf]   ;;  %v387_v23 = vsel %vm322_vm0, %v385_v13, %v383_v12 }
  0x37   :  { %v314_v15 = vld [vmem:[#allocation0 + $0x168] ss:$9 sm:$0x7]   ;;  %v376_v17 = vsel %vm322_vm0, %v374_v14, %v372_v11  ;;  %v279_v18 = vld [vmem:[#allocation0 + $0xc0] ss:$9 sm:$0x7]   ;;  %367 = vrot.lane.b32.xlu0 %v366_v16, %s568_s15 }
  0x38   :  { %554 = vst.msk [vmem:[%s841_s1 + $0x1f] ss:$8 sm:$0x7] %vm241_vm1, %v314_v15   ;;  %v284_v19 = vld [vmem:[#allocation0 + $0xd8] ss:$9 sm:$0x7]   ;;  %377 = vrot.lane.b32.xlu1 %v376_v17, %s568_s15 }
  0x39   :  { %547 = vst.msk [vmem:[%s841_s1 + $0x18] ss:$8 sm:$0x7] %vm241_vm1, %v279_v18   ;;  %548 = vst.msk [vmem:[%s841_s1 + $0x19] ss:$8 sm:$0x7] %vm241_vm1, %v284_v19  }
  0x3a   :  { %v396_v21 = vld [vmem:[#allocation0 + $0xc2] ss:$24 sm:$0xf0]   ;;  %v405_v26 = vld [vmem:[#allocation0 + $0x1] ss:$24 sm:$0xf]  }
  0x3b   :  { %v398_v22 = vsel %vm322_vm0, %v396_v21, %v394_v20  ;;  %v415_v24 = vld [vmem:[#allocation0 + $0xca] ss:$24 sm:$0xf]   ;;  %v407_v27 = vld [vmem:[#allocation0 + $0x1] ss:$24 sm:$0xf0]   ;;  %388 = vrot.lane.b32.xlu0 %v387_v23, %s568_s15 }
  0x3c   :  { %v417_v25 = vld [vmem:[#allocation0 + $0xca] ss:$24 sm:$0xf0]   ;;  %399 = vrot.lane.b32.xlu1 %v398_v22, %s568_s15  ;;  %v409_v29 = vsel %vm322_vm0, %v407_v27, %v405_v26  ;;  %v437_v30 = vld [vmem:[#allocation0 + $0xc1] ss:$24 sm:$0xf]  }
  0x3d   :  { %v419_v28 = vsel %vm322_vm0, %v417_v25, %v415_v24  ;;  %v439_v31 = vld [vmem:[#allocation0 + $0xc1] ss:$24 sm:$0xf0]   ;;  %v426_v32 = vld [vmem:[#allocation0 + $0xa] ss:$24 sm:$0xf]  }
  0x3e   :  { %v428_v33 = vld [vmem:[#allocation0 + $0xa] ss:$24 sm:$0xf0]   ;;  %v441_v34 = vsel %vm322_vm0, %v439_v31, %v437_v30 }
  0x3f   :  { %410 = vrot.lane.b32.xlu0 %v409_v29, %s569_s20  ;;  %v430_v35 = vsel %vm322_vm0, %v428_v33, %v426_v32 }
  0x40   :  { %420 = vrot.lane.b32.xlu1 %v419_v28, %s569_s20 }
  0x43   :  { %431 = vrot.lane.b32.xlu0 %v430_v35, %s569_s20 }
  0x44   :  { %442 = vrot.lane.b32.xlu1 %v441_v34, %s569_s20 }
  0x87   :  { %v325_v36 = vpop.permute.xlu0 %324  }
  0x88   :  { %327 = vst.msk [vmem:[%s841_s1] sm:$0xff] %vm326_vm2, %v325_v36  }
  0x90   :  { %v346_v37 = vpop.permute.xlu1 %345  }
  0x91   :  { %556 = vst.msk [vmem:[%s841_s1 + $0x8] sm:$0xff] %vm326_vm2, %v346_v37  }
  0xa3   :  { %v357_v38 = vpop.permute.xlu1 %356  }
  0xa4   :  { %557 = vst.msk [vmem:[%s841_s1 + $0x18] sm:$0xff] %vm326_vm2, %v357_v38  }
  0xa5   :  { %v335_v39 = vpop.permute.xlu0 %334  }
  0xa6   :  { %555 = vst.msk [vmem:[%s841_s1 + $0x20] sm:$0xff] %vm326_vm2, %v335_v39  }
  0xa9   :  { %v368_v41 = vpop.permute.xlu0 %367  }
  0xaa   :  { %v378_v40 = vpop.permute.xlu1 %377   ;;  %370 = vst.msk [vmem:[%s841_s1] sm:$0xff] %vm369_vm3, %v368_v41  }
  0xab   :  { %558 = vst.msk [vmem:[%s841_s1 + $0x20] sm:$0xff] %vm369_vm3, %v378_v40  }
  0xad   :  { %v389_v43 = vpop.permute.xlu0 %388  }
  0xae   :  { %v400_v42 = vpop.permute.xlu1 %399   ;;  %559 = vst.msk [vmem:[%s841_s1 + $0x8] sm:$0xff] %vm369_vm3, %v389_v43  }
  0xaf   :  { %560 = vst.msk [vmem:[%s841_s1 + $0x18] sm:$0xff] %vm369_vm3, %v400_v42  }
  0xb1   :  { %v411_v45 = vpop.permute.xlu0 %410  }
  0xb2   :  { %v421_v44 = vpop.permute.xlu1 %420   ;;  %413 = vst.msk [vmem:[%s841_s1] sm:$0xff] %vm412_vm4, %v411_v45  }
  0xb3   :  { %561 = vst.msk [vmem:[%s841_s1 + $0x20] sm:$0xff] %vm412_vm4, %v421_v44  }
  0xb5   :  { %v432_v47 = vpop.permute.xlu0 %431  }
  0xb6   :  { %v443_v46 = vpop.permute.xlu1 %442   ;;  %562 = vst.msk [vmem:[%s841_s1 + $0x8] sm:$0xff] %vm412_vm4, %v432_v47  }
  0xb7   :  { %563 = vst.msk [vmem:[%s841_s1 + $0x18] sm:$0xff] %vm412_vm4, %v443_v46  }

// kernel: post_print_denoiser_forward.7
= control target key start
LH: loop header
LB: loop body
LE: loop exit
PB: predicated region body
PF: predicated region fallthrough
CT: control target
= control target key end

     0   :  { %v2038_v38 = vmov 0   ;;  %s2622_s2 = inlined_call_operand.vmem [shape: bf16[1152,256], index: 2, kind: input, shape index: {}]   ;;  %s2623_s0 = inlined_call_operand.vmem [shape: bf16[64,1152], index: 0, kind: input, shape index: {}]   ;;  %s2624_s1 = inlined_call_operand.vmem [shape: f32[16,1], index: 1, kind: input, shape index: {}]   ;;  %s2625_s3 = inlined_call_operand.vmem [shape: f32[16,256], index: 3, kind: output, shape index: {}]  }
   0x1   :  { %v1770_v0 = vld [vmem:[%s2622_s2 + $0x4] ss:$8 sps:$4 sm:$0xff]   ;;  %v1774_v2 = vld [vmem:[%s2622_s2] ss:$8 sps:$4 sm:$0xff]   ;;  %v1776_v4 = vld [vmem:[%s2622_s2 + $0x14] ss:$8 sps:$4 sm:$0xff]   ;;  %1769 = vset.pattern.permute.xlu0 %v2038_v38 }
   0x2   :  { %v1772_v1 = vld [vmem:[%s2622_s2 + $0x204] ss:$8 sps:$4 sm:$0xff]   ;;  %1103 = vmatprep.subr.bf16.mxu1 %v1770_v0  ;;  %v1775_v3 = vld [vmem:[%s2622_s2 + $0x200] ss:$8 sps:$4 sm:$0xff]   ;;  %v1778_v5 = vld [vmem:[%s2622_s2 + $0x214] ss:$8 sps:$4 sm:$0xff]  }
   0x3   :  { %1249 = vmatprep.subr.bf16.mxu0 %v1772_v1  ;;  %1104 = vmatpush1.bf16.msra.mxu1 %v1774_v2  ;;  %v1780_v6 = vld [vmem:[%s2622_s2 + $0x10] ss:$8 sps:$4 sm:$0xff]   ;;  %v1782_v8 = vld [vmem:[%s2622_s2 + $0x24] ss:$8 sps:$4 sm:$0xff]   ;;  %v1786_v10 = vld [vmem:[%s2622_s2 + $0x20] ss:$8 sps:$4 sm:$0xff]  }
   0x4   :  { %1250 = vmatpush1.bf16.msra.mxu0 %v1775_v3  ;;  %1105 = vmatprep.subr.bf16.mxu1 %v1776_v4  ;;  %v1781_v7 = vld [vmem:[%s2622_s2 + $0x210] ss:$8 sps:$4 sm:$0xff]   ;;  %v1784_v9 = vld [vmem:[%s2622_s2 + $0x224] ss:$8 sps:$4 sm:$0xff]   ;;  %v1787_v11 = vld [vmem:[%s2622_s2 + $0x220] ss:$8 sps:$4 sm:$0xff]  }
   0x5   :  { %1251 = vmatprep.subr.bf16.mxu0 %v1778_v5  ;;  %v1788_v12 = vld [vmem:[%s2622_s2 + $0x34] ss:$8 sps:$4 sm:$0xff]   ;;  %v1792_v14 = vld [vmem:[%s2622_s2 + $0x30] ss:$8 sps:$4 sm:$0xff]   ;;  %v1794_v16 = vld [vmem:[%s2622_s2 + $0x44] ss:$8 sps:$4 sm:$0xff]  }
   0x6   :  { %v1790_v13 = vld [vmem:[%s2622_s2 + $0x234] ss:$8 sps:$4 sm:$0xff]   ;;  %v1793_v15 = vld [vmem:[%s2622_s2 + $0x230] ss:$8 sps:$4 sm:$0xff]   ;;  %v1796_v17 = vld [vmem:[%s2622_s2 + $0x244] ss:$8 sps:$4 sm:$0xff]  }
   0x7   :  { %1106 = vmatpush1.bf16.msra.mxu1 %v1780_v6  ;;  %v1798_v18 = vld [vmem:[%s2622_s2 + $0x40] ss:$8 sps:$4 sm:$0xff]   ;;  %v1800_v20 = vld [vmem:[%s2622_s2 + $0x54] ss:$8 sps:$4 sm:$0xff]   ;;  %v1804_v22 = vld [vmem:[%s2622_s2 + $0x50] ss:$8 sps:$4 sm:$0xff]  }
   0x8   :  { %1252 = vmatpush1.bf16.msra.mxu0 %v1781_v7  ;;  %1107 = vmatprep.subr.bf16.mxu1 %v1782_v8  ;;  %v1799_v19 = vld [vmem:[%s2622_s2 + $0x240] ss:$8 sps:$4 sm:$0xff]   ;;  %v1802_v21 = vld [vmem:[%s2622_s2 + $0x254] ss:$8 sps:$4 sm:$0xff]   ;;  %v1805_v23 = vld [vmem:[%s2622_s2 + $0x250] ss:$8 sps:$4 sm:$0xff]  }
   0x9   :  { %1253 = vmatprep.subr.bf16.mxu0 %v1784_v9  ;;  %v1806_v24 = vld [vmem:[%s2622_s2 + $0x64] ss:$8 sps:$4 sm:$0xff]   ;;  %v1810_v26 = vld [vmem:[%s2622_s2 + $0x60] ss:$8 sps:$4 sm:$0xff]   ;;  %v1812_v28 = vld [vmem:[%s2622_s2 + $0x74] ss:$8 sps:$4 sm:$0xff]  }
   0xa   :  { %v1808_v25 = vld [vmem:[%s2622_s2 + $0x264] ss:$8 sps:$4 sm:$0xff]   ;;  %v1811_v27 = vld [vmem:[%s2622_s2 + $0x260] ss:$8 sps:$4 sm:$0xff]   ;;  %v1814_v29 = vld [vmem:[%s2622_s2 + $0x274] ss:$8 sps:$4 sm:$0xff]  }
   0xb   :  { %1108 = vmatpush1.bf16.msra.mxu1 %v1786_v10  ;;  %v1816_v30 = vld [vmem:[%s2622_s2 + $0x70] ss:$8 sps:$4 sm:$0xff]   ;;  %v1818_v32 = vld [vmem:[%s2622_s2 + $0x84] ss:$8 sps:$4 sm:$0xff]   ;;  %v1822_v34 = vld [vmem:[%s2622_s2 + $0x80] ss:$8 sps:$4 sm:$0xff]  }
   0xc   :  { %1254 = vmatpush1.bf16.msra.mxu0 %v1787_v11  ;;  %1109 = vmatprep.subr.bf16.mxu1 %v1788_v12  ;;  %v1817_v31 = vld [vmem:[%s2622_s2 + $0x270] ss:$8 sps:$4 sm:$0xff]   ;;  %v1820_v33 = vld [vmem:[%s2622_s2 + $0x284] ss:$8 sps:$4 sm:$0xff]   ;;  %v1823_v35 = vld [vmem:[%s2622_s2 + $0x280] ss:$8 sps:$4 sm:$0xff]  }
   0xd   :  { %1255 = vmatprep.subr.bf16.mxu0 %v1790_v13  ;;  %v1824_v36 = vld [vmem:[%s2622_s2 + $0x94] ss:$8 sps:$4 sm:$0xff]   ;;  %v1828_v39 = vld [vmem:[%s2622_s2 + $0x90] ss:$8 sps:$4 sm:$0xff]   ;;  %v1830_v41 = vld [vmem:[%s2622_s2 + $0xa4] ss:$8 sps:$4 sm:$0xff]  }
   0xe   :  { %v1826_v37 = vld [vmem:[%s2622_s2 + $0x294] ss:$8 sps:$4 sm:$0xff]   ;;  %v1829_v40 = vld [vmem:[%s2622_s2 + $0x290] ss:$8 sps:$4 sm:$0xff]   ;;  %v1832_v42 = vld [vmem:[%s2622_s2 + $0x2a4] ss:$8 sps:$4 sm:$0xff]  }
   0xf   :  { %1110 = vmatpush1.bf16.msra.mxu1 %v1792_v14  ;;  %v1834_v43 = vld [vmem:[%s2622_s2 + $0xa0] ss:$8 sps:$4 sm:$0xff]   ;;  %v1836_v45 = vld [vmem:[%s2622_s2 + $0xb4] ss:$8 sps:$4 sm:$0xff]   ;;  %v1840_v47 = vld [vmem:[%s2622_s2 + $0xb0] ss:$8 sps:$4 sm:$0xff]  }
  0x10   :  { %1256 = vmatpush1.bf16.msra.mxu0 %v1793_v15  ;;  %1111 = vmatprep.subr.bf16.mxu1 %v1794_v16  ;;  %v1835_v44 = vld [vmem:[%s2622_s2 + $0x2a0] ss:$8 sps:$4 sm:$0xff]   ;;  %v1838_v46 = vld [vmem:[%s2622_s2 + $0x2b4] ss:$8 sps:$4 sm:$0xff]   ;;  %v1841_v48 = vld [vmem:[%s2622_s2 + $0x2b0] ss:$8 sps:$4 sm:$0xff]  }
  0x11   :  { %1257 = vmatprep.subr.bf16.mxu0 %v1796_v17  ;;  %v1868_v49 = vld [vmem:[%s2623_s0 + $0x4] ss:$36 sps:$4 sm:$0xff]   ;;  %v1874_v52 = vld [vmem:[%s2623_s0 + $0x14] ss:$36 sps:$4 sm:$0xff]  }
  0x12   :  { %v1842_v50 = vld [vmem:[%s2622_s2 + $0xc4] ss:$8 sps:$4 sm:$0xff]   ;;  %1135 = vmatprep.mubr.bf16.mxu1 %v1868_v49  ;;  %v1846_v53 = vld [vmem:[%s2622_s2 + $0xc0] ss:$8 sps:$4 sm:$0xff]   ;;  %v1848_v55 = vld [vmem:[%s2622_s2 + $0xd4] ss:$8 sps:$4 sm:$0xff]   ;;  %1281 = vmatprep.mubr.bf16.mxu0 %v1874_v52 }
  0x13   :  { %1112 = vmatpush1.bf16.msra.mxu1 %v1798_v18  ;;  %v1844_v51 = vld [vmem:[%s2622_s2 + $0x2c4] ss:$8 sps:$4 sm:$0xff]   ;;  %v1847_v54 = vld [vmem:[%s2622_s2 + $0x2c0] ss:$8 sps:$4 sm:$0xff]   ;;  %v1850_v56 = vld [vmem:[%s2622_s2 + $0x2d4] ss:$8 sps:$4 sm:$0xff]  }
  0x14   :  { %1258 = vmatpush1.bf16.msra.mxu0 %v1799_v19  ;;  %1113 = vmatprep.subr.bf16.mxu1 %v1800_v20  ;;  %v1852_v57 = vld [vmem:[%s2622_s2 + $0xd0] ss:$8 sps:$4 sm:$0xff]   ;;  %v1854_v59 = vld [vmem:[%s2622_s2 + $0xe4] ss:$8 sps:$4 sm:$0xff]   ;;  %v1858_v61 = vld [vmem:[%s2622_s2 + $0xe0] ss:$8 sps:$4 sm:$0xff]  }
  0x15   :  { %1259 = vmatprep.subr.bf16.mxu0 %v1802_v21  ;;  %v1853_v58 = vld [vmem:[%s2622_s2 + $0x2d0] ss:$8 sps:$4 sm:$0xff]   ;;  %v1856_v60 = vld [vmem:[%s2622_s2 + $0x2e4] ss:$8 sps:$4 sm:$0xff]   ;;  %v1859_v62 = vld [vmem:[%s2622_s2 + $0x2e0] ss:$8 sps:$4 sm:$0xff]  }
  0x16   :  { %v1860_v63 = vld [vmem:[%s2622_s2 + $0xf4] ss:$8 sps:$4 sm:$0xff]   ;;  %v1864_v1 = vld [vmem:[%s2622_s2 + $0xf0] ss:$8 sps:$4 sm:$0xff]   ;;  %v1871_v3 = vld [vmem:[%s2622_s2 + $0x104] ss:$8 sps:$4 sm:$0xff]  }
  0x17   :  { %1114 = vmatpush1.bf16.msra.mxu1 %v1804_v22  ;;  %v1862_v0 = vld [vmem:[%s2622_s2 + $0x2f4] ss:$8 sps:$4 sm:$0xff]   ;;  %v1865_v2 = vld [vmem:[%s2622_s2 + $0x2f0] ss:$8 sps:$4 sm:$0xff]   ;;  %v1877_v4 = vld [vmem:[%s2622_s2 + $0x304] ss:$8 sps:$4 sm:$0xff]  }
  0x18   :  { %1260 = vmatpush1.bf16.msra.mxu0 %v1805_v23  ;;  %1115 = vmatprep.subr.bf16.mxu1 %v1806_v24  ;;  %v1866_v5 = vld [vmem:[%s2623_s0] ss:$36 sps:$4 sm:$0xff]   ;;  %v1872_v7 = vld [vmem:[%s2623_s0 + $0x10] ss:$36 sps:$4 sm:$0xff]   ;;  %v1936_v21 = vld [vmem:[%s2623_s0 + $0x48] ss:$36 sps:$4 sm:$0xff]  }
  0x19   :  { %1261 = vmatprep.subr.bf16.mxu0 %v1808_v25  ;;  %v1869_v6 = vld [vmem:[%s2622_s2 + $0x100] ss:$8 sps:$4 sm:$0xff]   ;;  %v1880_v9 = vld [vmem:[%s2622_s2 + $0x114] ss:$8 sps:$4 sm:$0xff]   ;;  %v1878_v11 = vld [vmem:[%s2622_s2 + $0x110] ss:$8 sps:$4 sm:$0xff]  }
  0x1a   :  { %v1875_v8 = vld [vmem:[%s2622_s2 + $0x300] ss:$8 sps:$4 sm:$0xff]   ;;  %v1883_v10 = vld [vmem:[%s2622_s2 + $0x314] ss:$8 sps:$4 sm:$0xff]   ;;  %v1881_v12 = vld [vmem:[%s2622_s2 + $0x310] ss:$8 sps:$4 sm:$0xff]  }
  0x1b   :  { %1116 = vmatpush1.bf16.msra.mxu1 %v1810_v26  ;;  %v1886_v13 = vld [vmem:[%s2622_s2 + $0x124] ss:$8 sps:$4 sm:$0xff]   ;;  %v1884_v15 = vld [vmem:[%s2622_s2 + $0x120] ss:$8 sps:$4 sm:$0xff]   ;;  %v1892_v17 = vld [vmem:[%s2622_s2 + $0x134] ss:$8 sps:$4 sm:$0xff]  }
  0x1c   :  { %1262 = vmatpush1.bf16.msra.mxu0 %v1811_v27  ;;  %1117 = vmatprep.subr.bf16.mxu1 %v1812_v28  ;;  %v1889_v14 = vld [vmem:[%s2622_s2 + $0x324] ss:$8 sps:$4 sm:$0xff]   ;;  %v1887_v16 = vld [vmem:[%s2622_s2 + $0x320] ss:$8 sps:$4 sm:$0xff]   ;;  %v1895_v18 = vld [vmem:[%s2622_s2 + $0x334] ss:$8 sps:$4 sm:$0xff]  }
  0x1d   :  { %1263 = vmatprep.subr.bf16.mxu0 %v1814_v29  ;;  %v1932_v19 = vld [vmem:[%s2623_s0 + $0x4c] ss:$36 sps:$4 sm:$0xff]   ;;  %v1934_v20 = vld [vmem:[%s2623_s0 + $0x5c] ss:$36 sps:$4 sm:$0xff]  }
  0x1e   :  { %v1890_v22 = vld [vmem:[%s2622_s2 + $0x130] ss:$8 sps:$4 sm:$0xff]   ;;  %v1898_v25 = vld [vmem:[%s2622_s2 + $0x144] ss:$8 sps:$4 sm:$0xff]   ;;  %v1896_v27 = vld [vmem:[%s2622_s2 + $0x140] ss:$8 sps:$4 sm:$0xff]  }
  0x1f   :  { %1118 = vmatpush1.bf16.msra.mxu1 %v1816_v30  ;;  %v1893_v23 = vld [vmem:[%s2622_s2 + $0x330] ss:$8 sps:$4 sm:$0xff]   ;;  %v1901_v26 = vld [vmem:[%s2622_s2 + $0x344] ss:$8 sps:$4 sm:$0xff]   ;;  %v1899_v28 = vld [vmem:[%s2622_s2 + $0x340] ss:$8 sps:$4 sm:$0xff]  }
  0x20   :  { %1264 = vmatpush1.bf16.msra.mxu0 %v1817_v31  ;;  %1119 = vmatprep.subr.bf16.mxu1 %v1818_v32  ;;  %v1940_v24 = vld [vmem:[%s2623_s0 + $0x58] ss:$36 sps:$4 sm:$0xff]   ;;  %v1952_v32 = vld [vmem:[%s2623_s0 + $0xa4] ss:$36 sps:$4 sm:$0xff]  }
  0x21   :  { %1265 = vmatprep.subr.bf16.mxu0 %v1820_v33  ;;  %v1904_v29 = vld [vmem:[%s2622_s2 + $0x154] ss:$8 sps:$4 sm:$0xff]   ;;  %v1976_v49 = vld [vmem:[%s2623_s0 + $0xe8] ss:$36 sps:$4 sm:$0xff]  }
  0x22   :  { %v1907_v30 = vld [vmem:[%s2622_s2 + $0x354] ss:$8 sps:$4 sm:$0xff]   ;;  %v1920_v52 = vld [vmem:[%s2622_s2 + $0x180] ss:$8 sps:$4 sm:$0xff]  }
  0x23   :  { %1120 = vmatpush1.bf16.msra.mxu1 %v1822_v34  ;;  %v1950_v31 = vld [vmem:[%s2623_s0 + $0x94] ss:$36 sps:$4 sm:$0xff]  }
  0x24   :  { %1266 = vmatpush1.bf16.msra.mxu0 %v1823_v35  ;;  %1121 = vmatprep.subr.bf16.mxu1 %v1824_v36  ;;  %v1954_v33 = vld [vmem:[%s2623_s0 + $0x90] ss:$36 sps:$4 sm:$0xff]   ;;  %v1958_v36 = vld [vmem:[%s2623_s0 + $0xa0] ss:$36 sps:$4 sm:$0xff]  }
  0x25   :  { %1267 = vmatprep.subr.bf16.mxu0 %v1826_v37  ;;  %v1902_v34 = vld [vmem:[%s2622_s2 + $0x150] ss:$8 sps:$4 sm:$0xff]   ;;  %v1910_v37 = vld [vmem:[%s2622_s2 + $0x164] ss:$8 sps:$4 sm:$0xff]  }
  0x26   :  { %v1905_v35 = vld [vmem:[%s2622_s2 + $0x350] ss:$8 sps:$4 sm:$0xff]  }
  0x27   :  { %1122 = vmatpush1.bf16.msra.mxu1 %v1828_v39  ;;  %v1913_v39 = vld [vmem:[%s2622_s2 + $0x364] ss:$8 sps:$4 sm:$0xff]  }
  0x28   :  { %1268 = vmatpush1.bf16.msra.mxu0 %v1829_v40  ;;  %1123 = vmatprep.subr.bf16.mxu1 %v1830_v41  ;;  %v1908_v40 = vld [vmem:[%s2622_s2 + $0x160] ss:$8 sps:$4 sm:$0xff]  }
  0x29   :  { %1269 = vmatprep.subr.bf16.mxu0 %v1832_v42  ;;  %v1911_v41 = vld [vmem:[%s2622_s2 + $0x360] ss:$8 sps:$4 sm:$0xff]   ;;  %v1916_v42 = vld [vmem:[%s2622_s2 + $0x174] ss:$8 sps:$4 sm:$0xff]  }
  0x2b   :  { %1124 = vmatpush1.bf16.msra.mxu1 %v1834_v43  ;;  %v1919_v43 = vld [vmem:[%s2622_s2 + $0x374] ss:$8 sps:$4 sm:$0xff]  }
  0x2c   :  { %1270 = vmatpush1.bf16.msra.mxu0 %v1835_v44  ;;  %1125 = vmatprep.subr.bf16.mxu1 %v1836_v45  ;;  %v1968_v44 = vld [vmem:[%s2623_s0 + $0xdc] ss:$36 sps:$4 sm:$0xff]   ;;  %v1970_v45 = vld [vmem:[%s2623_s0 + $0xec] ss:$36 sps:$4 sm:$0xff]  }
  0x2d   :  { %1271 = vmatprep.subr.bf16.mxu0 %v1838_v46  ;;  %v1972_v46 = vld [vmem:[%s2623_s0 + $0xd8] ss:$36 sps:$4 sm:$0xff]  }
  0x2f   :  { %1126 = vmatpush1.bf16.msra.mxu1 %v1840_v47  ;;  %v1914_v47 = vld [vmem:[%s2622_s2 + $0x170] ss:$8 sps:$4 sm:$0xff]  }
  0x30   :  { %1272 = vmatpush1.bf16.msra.mxu0 %v1841_v48  ;;  %1127 = vmatprep.subr.bf16.mxu1 %v1842_v50  ;;  %v1917_v48 = vld [vmem:[%s2622_s2 + $0x370] ss:$8 sps:$4 sm:$0xff]   ;;  %v1922_v50 = vld [vmem:[%s2622_s2 + $0x184] ss:$8 sps:$4 sm:$0xff]  }
  0x31   :  { %1273 = vmatprep.subr.bf16.mxu0 %v1844_v51  ;;  %v1925_v51 = vld [vmem:[%s2622_s2 + $0x384] ss:$8 sps:$4 sm:$0xff]  }
  0x33   :  { %1128 = vmatpush1.bf16.msra.mxu1 %v1846_v53  ;;  %v1923_v53 = vld [vmem:[%s2622_s2 + $0x380] ss:$8 sps:$4 sm:$0xff]  }
  0x34   :  { %1274 = vmatpush1.bf16.msra.mxu0 %v1847_v54  ;;  %1129 = vmatprep.subr.bf16.mxu1 %v1848_v55  ;;  %v1928_v54 = vld [vmem:[%s2622_s2 + $0x194] ss:$8 sps:$4 sm:$0xff]  }
  0x35   :  { %1275 = vmatprep.subr.bf16.mxu0 %v1850_v56  ;;  %v1931_v55 = vld [vmem:[%s2622_s2 + $0x394] ss:$8 sps:$4 sm:$0xff]   ;;  %v1988_v56 = vld [vmem:[%s2623_s0 + $0xc] ss:$36 sps:$4 sm:$0xff]  }
  0x37   :  { %1130 = vmatpush1.bf16.msra.mxu1 %v1852_v57  ;;  %v1991_v57 = vld [vmem:[%s2623_s0 + $0x1c] ss:$36 sps:$4 sm:$0xff]  }
  0x38   :  { %1276 = vmatpush1.bf16.msra.mxu0 %v1853_v58  ;;  %1131 = vmatprep.subr.bf16.mxu1 %v1854_v59  ;;  %v1926_v58 = vld [vmem:[%s2622_s2 + $0x190] ss:$8 sps:$4 sm:$0xff]  }
  0x39   :  { %1277 = vmatprep.subr.bf16.mxu0 %v1856_v60  ;;  %v1929_v59 = vld [vmem:[%s2622_s2 + $0x390] ss:$8 sps:$4 sm:$0xff]   ;;  %v1939_v60 = vld [vmem:[%s2622_s2 + $0x1a4] ss:$8 sps:$4 sm:$0xff]  }
  0x3b   :  { %1132 = vmatpush1.bf16.msra.mxu1 %v1858_v61  ;;  %v1943_v61 = vld [vmem:[%s2622_s2 + $0x3a4] ss:$8 sps:$4 sm:$0xff]  }
  0x3c   :  { %1278 = vmatpush1.bf16.msra.mxu0 %v1859_v62  ;;  %1133 = vmatprep.subr.bf16.mxu1 %v1860_v63  ;;  %v1937_v62 = vld [vmem:[%s2622_s2 + $0x1a0] ss:$8 sps:$4 sm:$0xff]  }
  0x3d   :  { %1279 = vmatprep.subr.bf16.mxu0 %v1862_v0  ;;  %v1941_v63 = vld [vmem:[%s2622_s2 + $0x3a0] ss:$8 sps:$4 sm:$0xff]   ;;  %v1946_v0 = vld [vmem:[%s2622_s2 + $0x1b4] ss:$8 sps:$4 sm:$0xff]  }
  0x3f   :  { %1134 = vmatpush1.bf16.msra.mxu1 %v1864_v1  ;;  %v1949_v1 = vld [vmem:[%s2622_s2 + $0x3b4] ss:$8 sps:$4 sm:$0xff]  }
  0x40   :  { %1280 = vmatpush1.bf16.msra.mxu0 %v1865_v2  ;;  %1176 = vmatprep.subr.bf16.mxu1 %v1871_v3  ;;  %v1944_v2 = vld [vmem:[%s2622_s2 + $0x1b0] ss:$8 sps:$4 sm:$0xff]  }
  0x41   :  { %1322 = vmatprep.subr.bf16.mxu0 %v1877_v4  ;;  %v1947_v3 = vld [vmem:[%s2622_s2 + $0x3b0] ss:$8 sps:$4 sm:$0xff]   ;;  %v1957_v4 = vld [vmem:[%s2622_s2 + $0x1c4] ss:$8 sps:$4 sm:$0xff]  }
  0x42   :  { %1136 = vmatmul.mubr.bf16.vlgmr.msra.gmra.mrb[0].mxu1 %v1866_v5  ;;  %v1961_v5 = vld [vmem:[%s2622_s2 + $0x3c4] ss:$8 sps:$4 sm:$0xff]  }
  0x43   :  { %1282 = vmatmul.mubr.bf16.vlgmr.msra.gmra.mrb[0].mxu0 %v1872_v7  ;;  %1177 = vmatpush1.bf16.msra.mxu1 %v1869_v6  ;;  %v1955_v6 = vld [vmem:[%s2622_s2 + $0x1c0] ss:$8 sps:$4 sm:$0xff]  }
  0x44   :  { %1323 = vmatpush1.bf16.msra.mxu0 %v1875_v8  ;;  %1178 = vmatprep.subr.bf16.mxu1 %v1880_v9  ;;  %v1959_v7 = vld [vmem:[%s2622_s2 + $0x3c0] ss:$8 sps:$4 sm:$0xff]   ;;  %v1964_v8 = vld [vmem:[%s2622_s2 + $0x1d4] ss:$8 sps:$4 sm:$0xff]  }
  0x45   :  { %1324 = vmatprep.subr.bf16.mxu0 %v1883_v10  ;;  %1145 = vmatprep.mubr.bf16.mxu1 %v1932_v19  ;;  %v1967_v9 = vld [vmem:[%s2622_s2 + $0x3d4] ss:$8 sps:$4 sm:$0xff]   ;;  %v1962_v10 = vld [vmem:[%s2622_s2 + $0x1d0] ss:$8 sps:$4 sm:$0xff]   ;;  %v1481_v19 = vld [vmem:[%s2624_s1 + $0x8] sm:$0xff] }
  0x46   :  { %1291 = vmatprep.mubr.bf16.mxu0 %v1934_v20  ;;  %v1980_v20 = vld [vmem:[%s2622_s2 + $0x1f0] ss:$8 sps:$4 sm:$0xff]  }
  0x47   :  { %1179 = vmatpush1.bf16.msra.mxu1 %v1878_v11  ;;  %v1965_v11 = vld [vmem:[%s2622_s2 + $0x3d0] ss:$8 sps:$4 sm:$0xff]  }
  0x48   :  { %1325 = vmatpush1.bf16.msra.mxu0 %v1881_v12  ;;  %1180 = vmatprep.subr.bf16.mxu1 %v1886_v13  ;;  %v1975_v12 = vld [vmem:[%s2622_s2 + $0x1e4] ss:$8 sps:$4 sm:$0xff]  }
  0x49   :  { %1326 = vmatprep.subr.bf16.mxu0 %v1889_v14  ;;  %v1979_v13 = vld [vmem:[%s2622_s2 + $0x3e4] ss:$8 sps:$4 sm:$0xff]   ;;  %v1973_v14 = vld [vmem:[%s2622_s2 + $0x1e0] ss:$8 sps:$4 sm:$0xff]  }
  0x4a   :  { %1146 = vmatmul.mubr.bf16.gmra.mrb[4].mxu1 %v1936_v21  ;;  %v1983_v21 = vld [vmem:[%s2622_s2 + $0x3f0] ss:$8 sps:$4 sm:$0xff]  }
  0x4b   :  { %1181 = vmatpush1.bf16.msra.mxu1 %v1884_v15  ;;  %1292 = vmatmul.mubr.bf16.gmra.mrb[4].mxu0 %v1940_v24  ;;  %v1977_v15 = vld [vmem:[%s2622_s2 + $0x3e0] ss:$8 sps:$4 sm:$0xff]   ;;  %v1989_v24 = vld [vmem:[%s2623_s0 + $0x18] ss:$36 sps:$4 sm:$0xff]  }
  0x4c   :  { %1327 = vmatpush1.bf16.msra.mxu0 %v1887_v16  ;;  %1182 = vmatprep.subr.bf16.mxu1 %v1892_v17  ;;  %v1982_v16 = vld [vmem:[%s2622_s2 + $0x1f4] ss:$8 sps:$4 sm:$0xff]  }
  0x4d   :  { %1328 = vmatprep.subr.bf16.mxu0 %v1895_v18  ;;  %1155 = vmatprep.mubr.bf16.mxu1 %v1950_v31  ;;  %v1985_v17 = vld [vmem:[%s2622_s2 + $0x3f4] ss:$8 sps:$4 sm:$0xff]   ;;  %v1480_v18 = vld [vmem:[%s2624_s1] sm:$0xff] }
  0x4e   :  { %1301 = vmatprep.mubr.bf16.mxu0 %v1952_v32  ;;  %1484 = vperm.xlu0 %1769, %v1480_v18   ;;  %v2002_v31 = vld [vmem:[%s2623_s0 + $0x50] ss:$36 sps:$4 sm:$0xff]   ;;  %v2003_v32 = vld [vmem:[%s2623_s0 + $0x60] ss:$36 sps:$4 sm:$0xff]  }
  0x4f   :  { %1183 = vmatpush1.bf16.msra.mxu1 %v1890_v22  ;;  %v1994_v22 = vld [vmem:[%s2622_s2 + $0x404] ss:$8 sps:$4 sm:$0xff]  }
  0x50   :  { %1329 = vmatpush1.bf16.msra.mxu0 %v1893_v23  ;;  %1184 = vmatprep.subr.bf16.mxu1 %v1898_v25  ;;  %v1986_v23 = vld [vmem:[%s2623_s0 + $0x8] ss:$36 sps:$4 sm:$0xff]  }
  0x51   :  { %1330 = vmatprep.subr.bf16.mxu0 %v1901_v26  ;;  %v1992_v25 = vld [vmem:[%s2622_s2 + $0x400] ss:$8 sps:$4 sm:$0xff]   ;;  %v1997_v26 = vld [vmem:[%s2622_s2 + $0x414] ss:$8 sps:$4 sm:$0xff]  }
  0x52   :  { %1156 = vmatmul.mubr.bf16.gmra.mrb[8].mxu1 %v1954_v33  ;;  %1489 = vperm.xlu0 %1769, %v1481_v19   ;;  %v2004_v33 = vld [vmem:[%s2622_s2 + $0x420] ss:$8 sps:$4 sm:$0xff]  }
  0x53   :  { %1185 = vmatpush1.bf16.msra.mxu1 %v1896_v27  ;;  %1302 = vmatmul.mubr.bf16.gmra.mrb[8].mxu0 %v1958_v36  ;;  %v1998_v27 = vld [vmem:[%s2623_s0 + $0x54] ss:$36 sps:$4 sm:$0xff]   ;;  %v2012_v36 = vld [vmem:[%s2623_s0 + $0xac] ss:$36 sps:$4 sm:$0xff]  }
  0x54   :  { %1331 = vmatpush1.bf16.msra.mxu0 %v1899_v28  ;;  %1186 = vmatprep.subr.bf16.mxu1 %v1904_v29  ;;  %v2000_v28 = vld [vmem:[%s2623_s0 + $0x64] ss:$36 sps:$4 sm:$0xff]   ;;  %v1995_v29 = vld [vmem:[%s2622_s2 + $0x410] ss:$8 sps:$4 sm:$0xff]  }
  0x55   :  { %1332 = vmatprep.subr.bf16.mxu0 %v1907_v30  ;;  %1165 = vmatprep.mubr.bf16.mxu1 %v1968_v44  ;;  %v2006_v30 = vld [vmem:[%s2622_s2 + $0x424] ss:$8 sps:$4 sm:$0xff]  }
  0x56   :  { %1311 = vmatprep.mubr.bf16.mxu0 %v1970_v45  ;;  %v2022_v44 = vld [vmem:[%s2623_s0 + $0xe4] ss:$36 sps:$4 sm:$0xff]   ;;  %v2024_v45 = vld [vmem:[%s2623_s0 + $0xf4] ss:$36 sps:$4 sm:$0xff]  }
  0x57   :  { %1187 = vmatpush1.bf16.msra.mxu1 %v1902_v34  ;;  %v2009_v34 = vld [vmem:[%s2622_s2 + $0x434] ss:$8 sps:$4 sm:$0xff]  }
  0x58   :  { %1333 = vmatpush1.bf16.msra.mxu0 %v1905_v35  ;;  %1188 = vmatprep.subr.bf16.mxu1 %v1910_v37  ;;  %v2010_v35 = vld [vmem:[%s2623_s0 + $0x9c] ss:$36 sps:$4 sm:$0xff]   ;;  %v2007_v37 = vld [vmem:[%s2622_s2 + $0x430] ss:$8 sps:$4 sm:$0xff]  }
  0x59   :  { %1334 = vmatprep.subr.bf16.mxu0 %v1913_v39  ;;  %v2018_v39 = vld [vmem:[%s2622_s2 + $0x444] ss:$8 sps:$4 sm:$0xff]  }
  0x5a   :  { %1166 = vmatmul.mubr.bf16.gmra.mrb[12].mxu1 %v1972_v46  ;;  %v2019_v46 = vld [vmem:[%s2622_s2 + $0x450] ss:$8 sps:$4 sm:$0xff]  }
  0x5b   :  { %1189 = vmatpush1.bf16.msra.mxu1 %v1908_v40  ;;  %1312 = vmatmul.mubr.bf16.gmra.mrb[12].mxu0 %v1976_v49  ;;  %v2014_v40 = vld [vmem:[%s2623_s0 + $0x98] ss:$36 sps:$4 sm:$0xff]   ;;  %v2027_v49 = vld [vmem:[%s2623_s0 + $0xf0] ss:$36 sps:$4 sm:$0xff]  }
  0x5c   :  { %1335 = vmatpush1.bf16.msra.mxu0 %v1911_v41  ;;  %1190 = vmatprep.subr.bf16.mxu1 %v1916_v42  ;;  %v2015_v41 = vld [vmem:[%s2623_s0 + $0xa8] ss:$36 sps:$4 sm:$0xff]  }
  0x5d   :  { %1336 = vmatprep.subr.bf16.mxu0 %v1919_v43  ;;  %1208 = vmatprep.mubr.bf16.mxu1 %v1988_v56  ;;  %v2016_v42 = vld [vmem:[%s2622_s2 + $0x440] ss:$8 sps:$4 sm:$0xff]   ;;  %v2021_v43 = vld [vmem:[%s2622_s2 + $0x454] ss:$8 sps:$4 sm:$0xff]  }
  0x5e   :  { %1354 = vmatprep.mubr.bf16.mxu0 %v1991_v57  ;;  %v2037_v56 = vld [vmem:[%s2623_s0 + $0xf8] ss:$36 sps:$4 sm:$0xff]  }
  0x5f   :  { %1191 = vmatpush1.bf16.msra.mxu1 %v1914_v47  ;;  %v2030_v47 = vld [vmem:[%s2622_s2 + $0x464] ss:$8 sps:$4 sm:$0xff]  }
  0x60   :  { %1337 = vmatpush1.bf16.msra.mxu0 %v1917_v48  ;;  %1192 = vmatprep.subr.bf16.mxu1 %v1922_v50  ;;  %v2026_v48 = vld [vmem:[%s2623_s0 + $0xe0] ss:$36 sps:$4 sm:$0xff]  }
  0x61   :  { %1338 = vmatprep.subr.bf16.mxu0 %v1925_v51  ;;  %v2028_v50 = vld [vmem:[%s2622_s2 + $0x460] ss:$8 sps:$4 sm:$0xff]   ;;  %v2033_v51 = vld [vmem:[%s2622_s2 + $0x474] ss:$8 sps:$4 sm:$0xff]  }
  0x63   :  { %1193 = vmatpush1.bf16.msra.mxu1 %v1920_v52  ;;  %v2031_v52 = vld [vmem:[%s2622_s2 + $0x470] ss:$8 sps:$4 sm:$0xff]  }
  0x64   :  { %1339 = vmatpush1.bf16.msra.mxu0 %v1923_v53  ;;  %1194 = vmatprep.subr.bf16.mxu1 %v1928_v54  ;;  %v2034_v53 = vld [vmem:[%s2623_s0 + $0x20] ss:$36 sps:$4 sm:$0xff]   ;;  %v2035_v54 = vld [vmem:[%s2623_s0 + $0xb0] ss:$36 sps:$4 sm:$0xff]  }
  0x65   :  { %1340 = vmatprep.subr.bf16.mxu0 %v1931_v55  ;;  %v2036_v55 = vld [vmem:[%s2623_s0 + $0x68] ss:$36 sps:$4 sm:$0xff]  }
  0x67   :  { %1195 = vmatpush1.bf16.msra.mxu1 %v1926_v58 }
  0x68   :  { %1341 = vmatpush1.bf16.msra.mxu0 %v1929_v59  ;;  %1196 = vmatprep.subr.bf16.mxu1 %v1939_v60 }
  0x69   :  { %1342 = vmatprep.subr.bf16.mxu0 %v1943_v61 }
  0x6b   :  { %1197 = vmatpush1.bf16.msra.mxu1 %v1937_v62 }
  0x6c   :  { %1343 = vmatpush1.bf16.msra.mxu0 %v1941_v63  ;;  %1198 = vmatprep.subr.bf16.mxu1 %v1946_v0 }
  0x6d   :  { %1344 = vmatprep.subr.bf16.mxu0 %v1949_v1 }
  0x6f   :  { %1199 = vmatpush1.bf16.msra.mxu1 %v1944_v2 }
  0x70   :  { %1345 = vmatpush1.bf16.msra.mxu0 %v1947_v3  ;;  %1200 = vmatprep.subr.bf16.mxu1 %v1957_v4 }
  0x71   :  { %1346 = vmatprep.subr.bf16.mxu0 %v1961_v5 }
  0x73   :  { %1201 = vmatpush1.bf16.msra.mxu1 %v1955_v6 }
  0x74   :  { %1347 = vmatpush1.bf16.msra.mxu0 %v1959_v7  ;;  %1202 = vmatprep.subr.bf16.mxu1 %v1964_v8 }
  0x75   :  { %1348 = vmatprep.subr.bf16.mxu0 %v1967_v9 }
  0x77   :  { %1203 = vmatpush1.bf16.msra.mxu1 %v1962_v10 }
  0x78   :  { %1349 = vmatpush1.bf16.msra.mxu0 %v1965_v11  ;;  %1204 = vmatprep.subr.bf16.mxu1 %v1975_v12 }
  0x79   :  { %1350 = vmatprep.subr.bf16.mxu0 %v1979_v13 }
  0x7b   :  { %1205 = vmatpush1.bf16.msra.mxu1 %v1973_v14 }
  0x7c   :  { %1351 = vmatpush1.bf16.msra.mxu0 %v1977_v15  ;;  %1206 = vmatprep.subr.bf16.mxu1 %v1982_v16 }
  0x7d   :  { %1352 = vmatprep.subr.bf16.mxu0 %v1985_v17 }
  0x7f   :  { %1207 = vmatpush1.bf16.msra.mxu1 %v1980_v20 }
  0x80   :  { %1353 = vmatpush1.bf16.msra.mxu0 %v1983_v21  ;;  %1688 = vmatprep.subr.bf16.mxu1 %v1994_v22 }
  0x81   :  { %1395 = vmatprep.subr.bf16.mxu0 %v1994_v22 }
  0x82   :  { %1209 = vmatmul.mubr.bf16.vlgmr.msra.gmra.mrb[0].mxu1 %v1986_v23 }
  0x83   :  { %1355 = vmatmul.mubr.bf16.vlgmr.msra.gmra.mrb[0].mxu0 %v1989_v24  ;;  %1696 = vmatpush1.bf16.msra.mxu1 %v1992_v25 }
  0x84   :  { %1396 = vmatpush1.bf16.msra.mxu0 %v1992_v25  ;;  %1689 = vmatprep.subr.bf16.mxu1 %v1997_v26 }
  0x85   :  { %1397 = vmatprep.subr.bf16.mxu0 %v1997_v26  ;;  %1218 = vmatprep.mubr.bf16.mxu1 %v1998_v27 }
  0x86   :  { %1364 = vmatprep.mubr.bf16.mxu0 %v2000_v28 }
  0x87   :  { %1697 = vmatpush1.bf16.msra.mxu1 %v1995_v29 }
  0x88   :  { %1398 = vmatpush1.bf16.msra.mxu0 %v1995_v29  ;;  %1690 = vmatprep.subr.bf16.mxu1 %v2006_v30 }
  0x89   :  { %1399 = vmatprep.subr.bf16.mxu0 %v2006_v30 }
  0x8a   :  { %1219 = vmatmul.mubr.bf16.gmra.mrb[4].mxu1 %v2002_v31 }
  0x8b   :  { %1365 = vmatmul.mubr.bf16.gmra.mrb[4].mxu0 %v2003_v32  ;;  %1698 = vmatpush1.bf16.msra.mxu1 %v2004_v33 }
  0x8c   :  { %1400 = vmatpush1.bf16.msra.mxu0 %v2004_v33  ;;  %1691 = vmatprep.subr.bf16.mxu1 %v2009_v34 }
  0x8d   :  { %1401 = vmatprep.subr.bf16.mxu0 %v2009_v34  ;;  %1228 = vmatprep.mubr.bf16.mxu1 %v2010_v35 }
  0x8e   :  { %1374 = vmatprep.mubr.bf16.mxu0 %v2012_v36 }
  0x8f   :  { %1699 = vmatpush1.bf16.msra.mxu1 %v2007_v37 }
  0x90   :  { %1402 = vmatpush1.bf16.msra.mxu0 %v2007_v37  ;;  %1692 = vmatprep.subr.bf16.mxu1 %v2018_v39 }
  0x91   :  { %1403 = vmatprep.subr.bf16.mxu0 %v2018_v39 }
  0x92   :  { %1229 = vmatmul.mubr.bf16.gmra.mrb[8].mxu1 %v2014_v40 }
  0x93   :  { %1375 = vmatmul.mubr.bf16.gmra.mrb[8].mxu0 %v2015_v41  ;;  %1700 = vmatpush1.bf16.msra.mxu1 %v2016_v42 }
  0x94   :  { %1404 = vmatpush1.bf16.msra.mxu0 %v2016_v42  ;;  %1693 = vmatprep.subr.bf16.mxu1 %v2021_v43 }
  0x95   :  { %1405 = vmatprep.subr.bf16.mxu0 %v2021_v43  ;;  %1238 = vmatprep.mubr.bf16.mxu1 %v2022_v44 }
  0x96   :  { %1384 = vmatprep.mubr.bf16.mxu0 %v2024_v45 }
  0x97   :  { %1701 = vmatpush1.bf16.msra.mxu1 %v2019_v46 }
  0x98   :  { %1406 = vmatpush1.bf16.msra.mxu0 %v2019_v46  ;;  %1694 = vmatprep.subr.bf16.mxu1 %v2030_v47 }
  0x99   :  { %1407 = vmatprep.subr.bf16.mxu0 %v2030_v47 }
  0x9a   :  { %1239 = vmatmul.mubr.bf16.gmra.mrb[12].mxu1 %v2026_v48 }
  0x9b   :  { %1385 = vmatmul.mubr.bf16.gmra.mrb[12].mxu0 %v2027_v49  ;;  %1702 = vmatpush1.bf16.msra.mxu1 %v2028_v50 }
  0x9c   :  { %1408 = vmatpush1.bf16.msra.mxu0 %v2028_v50  ;;  %1695 = vmatprep.subr.bf16.mxu1 %v2033_v51 }
  0x9d   :  { %1409 = vmatprep.subr.bf16.mxu0 %v2033_v51  ;;  %1427 = vmatprep.mubr.bf16.mxu0 %v2038_v38 }
  0x9e   :  { %1447 = vmatprep.mubr.bf16.mxu1 %v2038_v38 }
  0x9f   :  { %1703 = vmatpush1.bf16.msra.mxu1 %v2031_v52 }
  0xa0   :  { %1410 = vmatpush1.bf16.msra.mxu0 %v2031_v52 }
  0xa2   :  { %1448 = vmatmul.mubr.bf16.vlgmr.msra.gmra.mrb[16].mxu1 %v2035_v54 }
  0xa3   :  { %1428 = vmatmul.mubr.bf16.vlgmr.msra.gmra.mrb[0].mxu0 %v2034_v53  ;;  %1457 = vmatprep.mubr.bf16.mxu1 %v2038_v38 }
  0xa4   :  { %1437 = vmatprep.mubr.bf16.mxu0 %v2038_v38 }
  0xaa   :  { %1458 = vmatmul.mubr.bf16.gmra.mrb[20].mxu1 %v2037_v56 }
  0xab   :  { %1438 = vmatmul.mubr.bf16.gmra.mrb[4].mxu0 %v2036_v55 }
  0xcd   :  { %v1485_v41 = vpop.permute.xlu0 %1484 }
 0x155   :  { %v1210_v57 = vpop.f32.mrb[0].mxu1 }
 0x156   :  { %v1212_v58 = vpop.f32.mrb[1].mxu1 }
 0x157   :  { %v1214_v59 = vpop.f32.mrb[2].mxu1 }
 0x158   :  { %v1216_v60 = vpop.f32.mrb[3].mxu1 }
 0x15d   :  { %v1220_v61 = vpop.f32.mrb[4].mxu1 }
 0x15e   :  { %v1222_v62 = vpop.f32.mrb[5].mxu1 }
 0x15f   :  { %v1224_v63 = vpop.f32.mrb[6].mxu1 }
 0x160   :  { %v1226_v0 = vpop.f32.mrb[7].mxu1 }
 0x165   :  { %v1230_v1 = vpop.f32.mrb[8].mxu1 }
 0x166   :  { %v1376_v38 = vpop.f32.mrb[8].mxu0  ;;  %v1232_v3 = vpop.f32.mrb[9].mxu1 }
 0x167   :  { %v1712_v2 = vadd.f32 %v1376_v38, %v1230_v1  ;;  %v1378_v4 = vpop.f32.mrb[9].mxu0  ;;  %v1234_v6 = vpop.f32.mrb[10].mxu1 }
 0x168   :  { %v1714_v5 = vadd.f32 %v1378_v4, %v1232_v3  ;;  %v1380_v7 = vpop.f32.mrb[10].mxu0  ;;  %v1236_v9 = vpop.f32.mrb[11].mxu1 }
 0x169   :  { %v1716_v8 = vadd.f32 %v1380_v7, %v1234_v6  ;;  %v1382_v10 = vpop.f32.mrb[11].mxu0 }
 0x16a   :  { %v1718_v11 = vadd.f32 %v1382_v10, %v1236_v9 }
 0x16d   :  { %v1240_v12 = vpop.f32.mrb[12].mxu1 }
 0x16e   :  { %v1386_v13 = vpop.f32.mrb[12].mxu0  ;;  %v1242_v15 = vpop.f32.mrb[13].mxu1 }
 0x16f   :  { %v1720_v14 = vadd.f32 %v1386_v13, %v1240_v12  ;;  %v1388_v16 = vpop.f32.mrb[13].mxu0  ;;  %v1244_v18 = vpop.f32.mrb[14].mxu1 }
 0x170   :  { %v1722_v17 = vadd.f32 %v1388_v16, %v1242_v15  ;;  %v1390_v19 = vpop.f32.mrb[14].mxu0  ;;  %v1246_v21 = vpop.f32.mrb[15].mxu1 }
 0x171   :  { %v1724_v20 = vadd.f32 %v1390_v19, %v1244_v18  ;;  %v1392_v22 = vpop.f32.mrb[15].mxu0 }
 0x172   :  { %v1726_v23 = vadd.f32 %v1392_v22, %v1246_v21 }
 0x175   :  { %v1449_v25 = vpop.f32.mrb[16].mxu1 }
 0x176   :  { %v1429_v24 = vpop.f32.mrb[0].mxu0  ;;  %v1713_v27 = vadd.f32 %v1712_v2, %v1449_v25  ;;  %v1451_v29 = vpop.f32.mrb[17].mxu1 }
 0x177   :  { %v1704_v26 = vadd.f32 %v1429_v24, %v1210_v57  ;;  %v1431_v28 = vpop.f32.mrb[1].mxu0  ;;  %v1715_v31 = vadd.f32 %v1714_v5, %v1451_v29  ;;  %v1453_v33 = vpop.f32.mrb[18].mxu1 }
 0x178   :  { %v1705_v30 = vadd.f32 %v1431_v28, %v1212_v58  ;;  %v1433_v32 = vpop.f32.mrb[2].mxu0  ;;  %v1717_v35 = vadd.f32 %v1716_v8, %v1453_v33  ;;  %v1455_v37 = vpop.f32.mrb[19].mxu1 }
 0x179   :  { %v1706_v34 = vadd.f32 %v1433_v32, %v1214_v59  ;;  %v1435_v36 = vpop.f32.mrb[3].mxu0  ;;  %v1719_v40 = vadd.f32 %v1718_v11, %v1455_v37  ;;  %v1490_v8 = vpop.permute.xlu0 %1489 }
 0x17a   :  { %v1707_v39 = vadd.f32 %v1435_v36, %v1216_v60 }
 0x17d   :  { %v1459_v43 = vpop.f32.mrb[20].mxu1 }
 0x17e   :  { %v1439_v42 = vpop.f32.mrb[4].mxu0  ;;  %v1721_v45 = vadd.f32 %v1720_v14, %v1459_v43  ;;  %v1461_v47 = vpop.f32.mrb[21].mxu1 }
 0x17f   :  { %v1708_v44 = vadd.f32 %v1439_v42, %v1220_v61  ;;  %v1441_v46 = vpop.f32.mrb[5].mxu0  ;;  %v1723_v49 = vadd.f32 %v1722_v17, %v1461_v47  ;;  %v1463_v51 = vpop.f32.mrb[22].mxu1 }
 0x180   :  { %v1709_v48 = vadd.f32 %v1441_v46, %v1222_v62  ;;  %v1443_v50 = vpop.f32.mrb[6].mxu0  ;;  %v1472_v53 = vmax.f32 %v1713_v27, %v1721_v45  ;;  %v1725_v55 = vadd.f32 %v1724_v20, %v1463_v51  ;;  %v1465_v57 = vpop.f32.mrb[23].mxu1 }
 0x181   :  { %v1468_v52 = vmax.f32 %v1704_v26, %v1708_v44  ;;  %v1710_v54 = vadd.f32 %v1443_v50, %v1224_v63  ;;  %v1445_v56 = vpop.f32.mrb[7].mxu0  ;;  %v1473_v59 = vmax.f32 %v1715_v31, %v1723_v49  ;;  %v1727_v1 = vadd.f32 %v1726_v23, %v1465_v57 }
 0x182   :  { %v1469_v58 = vmax.f32 %v1705_v30, %v1709_v48  ;;  %v1711_v60 = vadd.f32 %v1445_v56, %v1226_v0  ;;  %v1474_v61 = vmax.f32 %v1717_v35, %v1725_v55 }
 0x183   :  { %v1476_v38 = vmax.f32 %v1468_v52, %v1472_v53  ;;  %v1470_v2 = vmax.f32 %v1706_v34, %v1710_v54  ;;  %v1475_v5 = vmax.f32 %v1719_v40, %v1727_v1 }
 0x184   :  { %v1477_v3 = vmax.f32 %v1469_v58, %v1473_v59  ;;  %v1471_v4 = vmax.f32 %v1707_v39, %v1711_v60 }
 0x185   :  { %v1492_v62 = vadd.f32 %v1485_v41, %v1476_v38  ;;  %v1478_v6 = vmax.f32 %v1470_v2, %v1474_v61 }
 0x186   :  { %v1493_v7 = vadd.f32 %v1485_v41, %v1477_v3  ;;  %v1479_v9 = vmax.f32 %v1471_v4, %v1475_v5 }
 0x187   :  { %v1496_v10 = vmax.f32 %v1492_v62, 0.0  ;;  %v1494_v63 = vadd.f32 %v1490_v8, %v1478_v6 }
 0x188   :  { %v1497_v11 = vmax.f32 %v1493_v7, 0.0  ;;  %v1495_v12 = vadd.f32 %v1490_v8, %v1479_v9 }
 0x189   :  { %1500 = vst [vmem:[%s2625_s3] sm:$0xff] %v1496_v10  ;;  %v1498_v0 = vmax.f32 %v1494_v63, 0.0 }
 0x18a   :  { %1501 = vst [vmem:[%s2625_s3 + $0x8] sm:$0xff] %v1497_v11  ;;  %v1499_v13 = vmax.f32 %v1495_v12, 0.0 }
 0x18b   :  { %1502 = vst [vmem:[%s2625_s3 + $0x10] sm:$0xff] %v1498_v0 }
 0x18c   :  { %1503 = vst [vmem:[%s2625_s3 + $0x18] sm:$0xff] %v1499_v13 }

// kernel: mul.18
= control target key start
LH: loop header
LB: loop body
LE: loop exit
PB: predicated region body
PF: predicated region fallthrough
CT: control target
= control target key end

     0   :  { %vm170_vm0 = vcmask 1047556   ;;  %s296_s25 = smov 80   ;;  %vm122_vm1 = vcmask 130048   ;;  %s297_s26 = smov 96   ;;  %vm174_vm2 = vcmask 1048448   ;;  %vm184_vm3 = vcmask 917248   ;;  %s444_s0 = inlined_call_operand.vmem [shape: f32[8,3,3,16], index: 0, kind: input, shape index: {}]   ;;  %s445_s1 = inlined_call_operand.vmem [shape: f32[8,144], index: 1, kind: output, shape index: {}]  }
   0x1   :  { %v258_v0 = vld [vmem:[%s444_s0 + $0x5c] sm:$0xf]  ;;  %v261_v1 = vld [vmem:[%s444_s0 + $0x50] sm:$0xf]  ;;  %v264_v2 = vld [vmem:[%s444_s0 + $0x44] sm:$0xf] }
   0x2   :  { %8 = vst [vmem:[#allocation0 + $0xb8] sm:$0xf] %v258_v0  ;;  %23 = vst [vmem:[#allocation0 + $0xa0] sm:$0xf] %v261_v1  ;;  %v267_v3 = vld [vmem:[%s444_s0 + $0x38] sm:$0xf] }
   0x3   :  { %38 = vst [vmem:[#allocation0 + $0x88] sm:$0xf] %v264_v2  ;;  %v270_v4 = vld [vmem:[%s444_s0 + $0x2c] sm:$0xf]  ;;  %v273_v5 = vld [vmem:[%s444_s0 + $0x20] sm:$0xf] }
   0x4   :  { %53 = vst [vmem:[#allocation0 + $0x70] sm:$0xf] %v267_v3  ;;  %68 = vst [vmem:[#allocation0 + $0x58] sm:$0xf] %v270_v4  ;;  %v276_v6 = vld [vmem:[%s444_s0 + $0x14] sm:$0xf] }
   0x5   :  { %83 = vst [vmem:[#allocation0 + $0x40] sm:$0xf] %v273_v5  ;;  %v279_v7 = vld [vmem:[%s444_s0 + $0x8] sm:$0xf]  ;;  %98 = vst [vmem:[#allocation0 + $0x28] sm:$0xf] %v276_v6 }
   0x6   :  { %113 = vst [vmem:[#allocation0 + $0x10] sm:$0xf] %v279_v7  ;;  %v259_v8 = vld [vmem:[%s444_s0 + $0x58] sm:$0xf]  ;;  %v262_v9 = vld [vmem:[%s444_s0 + $0x4c] sm:$0xf] }
   0x7   :  { %v265_v10 = vld [vmem:[%s444_s0 + $0x40] sm:$0xf]  ;;  %13 = vst [vmem:[#allocation0 + $0xb0] sm:$0xf] %v259_v8  ;;  %28 = vst [vmem:[#allocation0 + $0x98] sm:$0xf] %v262_v9 }
   0x8   :  { %43 = vst [vmem:[#allocation0 + $0x80] sm:$0xf] %v265_v10  ;;  %v268_v11 = vld [vmem:[%s444_s0 + $0x34] sm:$0xf]  ;;  %v271_v12 = vld [vmem:[%s444_s0 + $0x28] sm:$0xf] }
   0x9   :  { %v274_v13 = vld [vmem:[%s444_s0 + $0x1c] sm:$0xf]  ;;  %58 = vst [vmem:[#allocation0 + $0x68] sm:$0xf] %v268_v11  ;;  %73 = vst [vmem:[#allocation0 + $0x50] sm:$0xf] %v271_v12 }
   0xa   :  { %88 = vst [vmem:[#allocation0 + $0x38] sm:$0xf] %v274_v13  ;;  %v277_v14 = vld [vmem:[%s444_s0 + $0x10] sm:$0xf]  ;;  %v280_v15 = vld [vmem:[%s444_s0 + $0x4] sm:$0xf] }
   0xb   :  { %103 = vst [vmem:[#allocation0 + $0x20] sm:$0xf] %v277_v14  ;;  %117 = vst [vmem:[#allocation0 + $0x8] sm:$0xf] %v280_v15  ;;  %v260_v16 = vld [vmem:[%s444_s0 + $0x54] sm:$0xf] }
   0xc   :  { %v263_v17 = vld [vmem:[%s444_s0 + $0x48] sm:$0xf]  ;;  %18 = vst [vmem:[#allocation0 + $0xa8] sm:$0xf] %v260_v16  ;;  %v266_v18 = vld [vmem:[%s444_s0 + $0x3c] sm:$0xf] }
   0xd   :  { %33 = vst [vmem:[#allocation0 + $0x90] sm:$0xf] %v263_v17  ;;  %v269_v19 = vld [vmem:[%s444_s0 + $0x30] sm:$0xf]  ;;  %v272_v20 = vld [vmem:[%s444_s0 + $0x24] sm:$0xf] }
   0xe   :  { %48 = vst [vmem:[#allocation0 + $0x78] sm:$0xf] %v266_v18  ;;  %63 = vst [vmem:[#allocation0 + $0x60] sm:$0xf] %v269_v19  ;;  %v275_v21 = vld [vmem:[%s444_s0 + $0x18] sm:$0xf] }
   0xf   :  { %78 = vst [vmem:[#allocation0 + $0x48] sm:$0xf] %v272_v20  ;;  %v278_v22 = vld [vmem:[%s444_s0 + $0xc] sm:$0xf]  ;;  %v118_v23 = vld [vmem:[%s444_s0] sm:$0xf] }
  0x10   :  { %v169_v24 = vld [vmem:[#allocation0 + $0x11] ss:$24 sm:$0xf0]   ;;  %v179_v25 = vld [vmem:[#allocation0 + $0x10] ss:$24 sm:$0xf0]  }
  0x11   :  { %93 = vst [vmem:[#allocation0 + $0x30] sm:$0xf] %v275_v21  ;;  %108 = vst [vmem:[#allocation0 + $0x18] sm:$0xf] %v278_v22  ;;  %s295_s0 = smov 112   ;;  %s120_s27 = smov 3 }
  0x12   :  { %119 = vst [vmem:[#allocation0] sm:$0xf] %v118_v23  ;;  %v167_v26 = vld [vmem:[#allocation0 + $0x11] ss:$24 sm:$0xf]   ;;  %s125_s28 = smov 3 }
  0x13   :  { %v177_v27 = vld [vmem:[#allocation0 + $0x10] ss:$24 sm:$0xf]   ;;  %v171_v28 = vsel %vm170_vm0, %v169_v24, %v167_v26  ;;  %v189_v29 = vld [vmem:[#allocation0 + $0xa] ss:$24 sm:$0xf0]  }
  0x14   :  { %172 = vrot.lane.b32.xlu0 %v171_v28, %s295_s0  ;;  %v199_v30 = vld [vmem:[#allocation0 + $0x9] ss:$24 sm:$0xf0]   ;;  %v187_v31 = vld [vmem:[#allocation0 + $0xa] ss:$24 sm:$0xf]   ;;  %v181_v32 = vsel %vm170_vm0, %v179_v25, %v177_v27 }
  0x15   :  { %v197_v33 = vld [vmem:[#allocation0 + $0x9] ss:$24 sm:$0xf]   ;;  %v191_v34 = vsel %vm170_vm0, %v189_v29, %v187_v31  ;;  %v207_v35 = vld [vmem:[#allocation0 + $0x8] ss:$24 sm:$0xf]  }
  0x16   :  { %v209_v36 = vld [vmem:[#allocation0 + $0x8] ss:$24 sm:$0xf0]   ;;  %192 = vrot.lane.b32.xlu1 %v191_v34, %s296_s25  ;;  %v219_v37 = vld [vmem:[#allocation0 + $0x2] ss:$24 sm:$0xf0]   ;;  %v201_v38 = vsel %vm170_vm0, %v199_v30, %v197_v33 }
  0x17   :  { %v229_v40 = vld [vmem:[#allocation0 + $0x1] ss:$24 sm:$0xf0]   ;;  %v211_v41 = vsel %vm170_vm0, %v209_v36, %v207_v35  ;;  %s131_s29 = smov 3  ;;  %s137_s30 = smov 3  ;;  %vm194_vm4 = vcmask 786048  }
  0x18   :  { %182 = vrot.lane.b32.xlu0 %v181_v32, %s297_s26  ;;  %v126_v44 = vld [vmem:[#allocation0 + $0x18] ss:$18 sm:%s125_s28]   ;;  %s298_s2 = smov 64   ;;  %v138_v46 = vld [vmem:[#allocation0 + $0x48] ss:$18 sm:%s137_s30]   ;;  %s143_s7 = smov 3 }
  0x19   :  { %v217_v39 = vld [vmem:[#allocation0 + $0x2] ss:$24 sm:$0xf]   ;;  %v227_v42 = vld [vmem:[#allocation0 + $0x1] ss:$24 sm:$0xf]  }
  0x1a   :  { %v121_v43 = vld [vmem:[#allocation0] ss:$18 sm:%s120_s27]   ;;  %202 = vrot.lane.b32.xlu1 %v201_v38, %s298_s2  ;;  %281 = vst.msk [vmem:[%s445_s1 + $0x1] ss:$8 sm:$0x3] %vm122_vm1, %v126_v44   ;;  %s149_s8 = smov 3  ;;  %v221_v47 = vsel %vm170_vm0, %v219_v37, %v217_v39  ;;  %v231_v50 = vsel %vm170_vm0, %v229_v40, %v227_v42 }
  0x1b   :  { %123 = vst.msk [vmem:[%s445_s1] ss:$8 sm:$0x3] %vm122_vm1, %v121_v43   ;;  %v132_v45 = vld [vmem:[#allocation0 + $0x30] ss:$18 sm:%s131_s29]   ;;  %s299_s9 = smov 48  }
  0x1c   :  { %212 = vrot.lane.b32.xlu0 %v211_v41, %s299_s9  ;;  %282 = vst.msk [vmem:[%s445_s1 + $0x2] ss:$8 sm:$0x3] %vm122_vm1, %v132_v45   ;;  %283 = vst.msk [vmem:[%s445_s1 + $0x3] ss:$8 sm:$0x3] %vm122_vm1, %v138_v46  }
  0x1d   :  { %v150_v48 = vld [vmem:[#allocation0 + $0x78] ss:$18 sm:%s149_s8]   ;;  %s155_s14 = smov 3  ;;  %s161_s15 = smov 3  ;;  %vm204_vm5 = vcmask 654848   ;;  %vm214_vm6 = vcmask 523648  }
  0x1e   :  { %v144_v49 = vld [vmem:[#allocation0 + $0x60] ss:$18 sm:%s143_s7]   ;;  %285 = vst.msk [vmem:[%s445_s1 + $0x5] ss:$8 sm:$0x3] %vm122_vm1, %v150_v48   ;;  %s300_s24 = smov 32  }
  0x1f   :  { %v156_v51 = vld [vmem:[#allocation0 + $0x90] ss:$18 sm:%s155_s14]   ;;  %284 = vst.msk [vmem:[%s445_s1 + $0x4] ss:$8 sm:$0x3] %vm122_vm1, %v144_v49   ;;  %222 = vrot.lane.b32.xlu1 %v221_v47, %s300_s24  ;;  %s301_s0 = smov 16  }
  0x20   :  { %v162_v52 = vld [vmem:[#allocation0 + $0xa8] ss:$18 sm:%s161_s15]   ;;  %286 = vst.msk [vmem:[%s445_s1 + $0x6] ss:$8 sm:$0x3] %vm122_vm1, %v156_v51   ;;  %232 = vrot.lane.b32.xlu0 %v231_v50, %s301_s0  ;;  %vm224_vm7 = vcmask 392448  }
  0x21   :  { %287 = vst.msk [vmem:[%s445_s1 + $0x7] ss:$8 sm:$0x3] %vm122_vm1, %v162_v52   ;;  %vm234_vm8 = vcmask 261248  }
  0x86   :  { %v173_v53 = vpop.permute.xlu0 %172  }
  0x87   :  { %175 = vst.msk [vmem:[%s445_s1] sm:$0xff] %vm174_vm2, %v173_v53  }
  0x88   :  { %v193_v54 = vpop.permute.xlu1 %192  }
  0x8a   :  { %v183_v55 = vpop.permute.xlu0 %182  }
  0x8b   :  { %185 = vst.msk [vmem:[%s445_s1] sm:$0xff] %vm184_vm3, %v183_v55  }
  0x8c   :  { %195 = vst.msk [vmem:[%s445_s1] sm:$0xff] %vm194_vm4, %v193_v54   ;;  %v203_v56 = vpop.permute.xlu1 %202  }
  0x8d   :  { %205 = vst.msk [vmem:[%s445_s1] sm:$0xff] %vm204_vm5, %v203_v56  }
  0x8e   :  { %v213_v57 = vpop.permute.xlu0 %212  }
  0x8f   :  { %215 = vst.msk [vmem:[%s445_s1] sm:$0xff] %vm214_vm6, %v213_v57  }
  0x91   :  { %v223_v58 = vpop.permute.xlu1 %222  }
  0x92   :  { %225 = vst.msk [vmem:[%s445_s1] sm:$0xff] %vm224_vm7, %v223_v58   ;;  %v233_v59 = vpop.permute.xlu0 %232  }
  0x93   :  { %235 = vst.msk [vmem:[%s445_s1] sm:$0xff] %vm234_vm8, %v233_v59  }

// kernel: post_print_denoiser_forward.8
= control target key start
LH: loop header
LB: loop body
LE: loop exit
PB: predicated region body
PF: predicated region fallthrough
CT: control target
= control target key end

     0   :  { %v709_v1 = vmov 0   ;;  %vm365_vm0 = vcmask 523264   ;;  %s876_s2 = inlined_call_operand.vmem [shape: bf16[576,128], index: 2, kind: input, shape index: {}]   ;;  %s877_s0 = inlined_call_operand.vmem [shape: bf16[32,576], index: 0, kind: input, shape index: {}]   ;;  %s878_s1 = inlined_call_operand.vmem [shape: f32[8,1], index: 1, kind: input, shape index: {}]   ;;  %s879_s3 = inlined_call_operand.vmem [shape: f32[8,128], index: 3, kind: output, shape index: {}]  }
   0x1   :  { %v659_v0 = vld [vmem:[%s876_s2 + $0x40] sm:$0xff]   ;;  %658 = vset.pattern.permute.xlu0 %v709_v1  ;;  %v663_v5 = vld [vmem:[%s876_s2 + $0x48] sm:$0xff]   ;;  %v667_v9 = vld [vmem:[%s876_s2 + $0x50] sm:$0xff]  }
   0x2   :  { %v660_v2 = vld [vmem:[%s876_s2 + $0xc0] sm:$0xff]   ;;  %583 = vmatprep.subr.bf16.mxu0 %v659_v0  ;;  %v664_v6 = vld [vmem:[%s876_s2 + $0xc8] sm:$0xff]   ;;  %v668_v10 = vld [vmem:[%s876_s2 + $0xd0] sm:$0xff]  }
   0x3   :  { %v661_v3 = vld [vmem:[%s876_s2] sm:$0xff]   ;;  %611 = vmatprep.subr.bf16.mxu1 %v660_v2  ;;  %v665_v7 = vld [vmem:[%s876_s2 + $0x8] sm:$0xff]   ;;  %v669_v11 = vld [vmem:[%s876_s2 + $0x10] sm:$0xff]  }
   0x4   :  { %v662_v4 = vld [vmem:[%s876_s2 + $0x80] sm:$0xff]   ;;  %584 = vmatpush3.bf16.msra.mxu0 %v661_v3  ;;  %v666_v8 = vld [vmem:[%s876_s2 + $0x88] sm:$0xff]   ;;  %v670_v12 = vld [vmem:[%s876_s2 + $0x90] sm:$0xff]  }
   0x5   :  { %612 = vmatpush3.bf16.msra.mxu1 %v662_v4  ;;  %585 = vmatprep.subr.bf16.mxu0 %v663_v5  ;;  %v671_v13 = vld [vmem:[%s876_s2 + $0x58] sm:$0xff]   ;;  %v675_v17 = vld [vmem:[%s876_s2 + $0x60] sm:$0xff]   ;;  %v679_v21 = vld [vmem:[%s876_s2 + $0x68] sm:$0xff]  }
   0x6   :  { %613 = vmatprep.subr.bf16.mxu1 %v664_v6  ;;  %v672_v14 = vld [vmem:[%s876_s2 + $0xd8] sm:$0xff]   ;;  %v676_v18 = vld [vmem:[%s876_s2 + $0xe0] sm:$0xff]   ;;  %v680_v22 = vld [vmem:[%s876_s2 + $0xe8] sm:$0xff]  }
   0x7   :  { %v673_v15 = vld [vmem:[%s876_s2 + $0x18] sm:$0xff]   ;;  %v677_v19 = vld [vmem:[%s876_s2 + $0x20] sm:$0xff]   ;;  %v681_v23 = vld [vmem:[%s876_s2 + $0x28] sm:$0xff]  }
   0x8   :  { %586 = vmatpush3.bf16.msra.mxu0 %v665_v7  ;;  %v674_v16 = vld [vmem:[%s876_s2 + $0x98] sm:$0xff]   ;;  %v678_v20 = vld [vmem:[%s876_s2 + $0xa0] sm:$0xff]   ;;  %v682_v24 = vld [vmem:[%s876_s2 + $0xa8] sm:$0xff]  }
   0x9   :  { %614 = vmatpush3.bf16.msra.mxu1 %v666_v8  ;;  %587 = vmatprep.subr.bf16.mxu0 %v667_v9  ;;  %v683_v25 = vld [vmem:[%s876_s2 + $0x70] sm:$0xff]   ;;  %v687_v29 = vld [vmem:[%s876_s2 + $0x78] sm:$0xff]   ;;  %v696_v36 = vld [vmem:[%s877_s0 + $0xc] ss:$20 sps:$4 sm:$0xff]  }
   0xa   :  { %615 = vmatprep.subr.bf16.mxu1 %v668_v10  ;;  %v684_v26 = vld [vmem:[%s876_s2 + $0xf0] sm:$0xff]   ;;  %v688_v30 = vld [vmem:[%s876_s2 + $0xf8] sm:$0xff]   ;;  %v697_v37 = vld [vmem:[%s876_s2 + $0x100] sm:$0xff]   ;;  %453 = vmatprep.mubr.bf16.mxu1 %v696_v36 }
   0xb   :  { %v685_v27 = vld [vmem:[%s876_s2 + $0x30] sm:$0xff]   ;;  %v689_v31 = vld [vmem:[%s876_s2 + $0x38] sm:$0xff]   ;;  %v698_v38 = vld [vmem:[%s876_s2 + $0x108] sm:$0xff]  }
   0xc   :  { %588 = vmatpush3.bf16.msra.mxu0 %v669_v11  ;;  %v686_v28 = vld [vmem:[%s876_s2 + $0xb0] sm:$0xff]   ;;  %v690_v32 = vld [vmem:[%s876_s2 + $0xb8] sm:$0xff]   ;;  %v699_v39 = vld [vmem:[%s877_s0 + $0x2c] ss:$20 sps:$4 sm:$0xff]  }
   0xd   :  { %616 = vmatpush3.bf16.msra.mxu1 %v670_v12  ;;  %589 = vmatprep.subr.bf16.mxu0 %v671_v13  ;;  %v691_v33 = vld [vmem:[%s877_s0] ss:$20 sps:$4 sm:$0xff]   ;;  %v693_v34 = vld [vmem:[%s877_s0 + $0x4] ss:$20 sps:$4 sm:$0xff]   ;;  %v694_v35 = vld [vmem:[%s877_s0 + $0x8] ss:$20 sps:$4 sm:$0xff]  }
   0xe   :  { %617 = vmatprep.subr.bf16.mxu1 %v672_v14  ;;  %404 = vmatprep.mubr.bf16.mxu0 %v693_v34  ;;  %v701_v40 = vld [vmem:[%s877_s0 + $0x34] ss:$20 sps:$4 sm:$0xff]   ;;  %v704_v43 = vld [vmem:[%s877_s0 + $0x30] ss:$20 sps:$4 sm:$0xff]   ;;  %v706_v45 = vld [vmem:[%s876_s2 + $0x118] sm:$0xff]  }
   0xf   :  { %v703_v41 = vld [vmem:[%s877_s0 + $0x28] ss:$20 sps:$4 sm:$0xff]   ;;  %v705_v42 = vld [vmem:[%s876_s2 + $0x110] sm:$0xff]   ;;  %v522_v46 = vld [vmem:[%s878_s1] sm:$0xff] }
  0x10   :  { %590 = vmatpush3.bf16.msra.mxu0 %v673_v15  ;;  %v707_v44 = vld [vmem:[%s877_s0 + $0x10] ss:$20 sps:$4 sm:$0xff]   ;;  %525 = vperm.xlu0 %658, %v522_v46   ;;  %v708_v47 = vld [vmem:[%s877_s0 + $0x38] ss:$20 sps:$4 sm:$0xff]  }
  0x11   :  { %618 = vmatpush3.bf16.msra.mxu1 %v674_v16  ;;  %591 = vmatprep.subr.bf16.mxu0 %v675_v17 }
  0x12   :  { %619 = vmatprep.subr.bf16.mxu1 %v676_v18 }
  0x14   :  { %592 = vmatpush3.bf16.msra.mxu0 %v677_v19 }
  0x15   :  { %620 = vmatpush3.bf16.msra.mxu1 %v678_v20  ;;  %593 = vmatprep.subr.bf16.mxu0 %v679_v21 }
  0x16   :  { %621 = vmatprep.subr.bf16.mxu1 %v680_v22 }
  0x18   :  { %594 = vmatpush3.bf16.msra.mxu0 %v681_v23 }
  0x19   :  { %622 = vmatpush3.bf16.msra.mxu1 %v682_v24  ;;  %595 = vmatprep.subr.bf16.mxu0 %v683_v25 }
  0x1a   :  { %623 = vmatprep.subr.bf16.mxu1 %v684_v26 }
  0x1c   :  { %596 = vmatpush3.bf16.msra.mxu0 %v685_v27 }
  0x1d   :  { %624 = vmatpush3.bf16.msra.mxu1 %v686_v28  ;;  %597 = vmatprep.subr.bf16.mxu0 %v687_v29 }
  0x1e   :  { %625 = vmatprep.subr.bf16.mxu1 %v688_v30 }
  0x20   :  { %598 = vmatpush3.bf16.msra.mxu0 %v689_v31 }
  0x21   :  { %626 = vmatpush3.bf16.msra.mxu1 %v690_v32  ;;  %645 = vmatprep.subr.bf16.mxu0 %v697_v37 }
  0x23   :  { %405 = vmatmul.mubr.bf16.vlgmr.msra.gmra.mrb[0].mxu0 %v691_v33 }
  0x24   :  { %454 = vmatmul.mubr.bf16.vlgmr.msra.gmra.mrb[0].mxu1 %v694_v35  ;;  %646 = vmatpush3.bf16.msra.mxu0 %v697_v37 }
  0x25   :  { %647 = vmatprep.subr.bf16.mxu0 %v698_v38  ;;  %412 = vmatprep.mubr.bf16.mxu0 %v699_v39 }
  0x26   :  { %461 = vmatprep.mubr.bf16.mxu1 %v701_v40 }
  0x28   :  { %648 = vmatpush3.bf16.msra.mxu0 %v698_v38 }
  0x29   :  { %649 = vmatprep.subr.bf16.mxu0 %v705_v42 }
  0x2b   :  { %413 = vmatmul.mubr.bf16.gmra.mrb[4].mxu0 %v703_v41 }
  0x2c   :  { %462 = vmatmul.mubr.bf16.gmra.mrb[4].mxu1 %v704_v43  ;;  %653 = vmatprep.mubr.msk.bf16.mxu0 %vm365_vm0, %v707_v44 }
  0x2d   :  { %650 = vmatpush3.bf16.msra.mxu0 %v705_v42 }
  0x2e   :  { %651 = vmatprep.subr.bf16.mxu0 %v706_v45 }
  0x31   :  { %652 = vmatpush3.bf16.msra.mxu0 %v706_v45 }
  0x34   :  { %654 = vmatmul.mubr.msk.bf16.vlgmr.msra.gmra.mrb[8].mxu0 %vm365_vm0, %v708_v47 }
  0x8f   :  { %v526_v22 = vpop.permute.xlu0 %525 }
  0xf6   :  { %v599_v48 = vpop.f32.mrb[0].mxu0 }
  0xf7   :  { %v627_v49 = vpop.f32.mrb[0].mxu1  ;;  %v600_v50 = vpop.f32.mrb[1].mxu0 }
  0xf8   :  { %v601_v51 = vadd.f32 %v600_v50, %v599_v48  ;;  %v628_v52 = vpop.f32.mrb[1].mxu1  ;;  %v602_v53 = vpop.f32.mrb[2].mxu0 }
  0xf9   :  { %v629_v54 = vadd.f32 %v628_v52, %v627_v49  ;;  %v630_v55 = vpop.f32.mrb[2].mxu1  ;;  %v603_v56 = vpop.f32.mrb[3].mxu0 }
  0xfa   :  { %v604_v57 = vadd.f32 %v603_v56, %v602_v53  ;;  %v631_v58 = vpop.f32.mrb[3].mxu1 }
  0xfb   :  { %v632_v59 = vadd.f32 %v631_v58, %v630_v55  ;;  %v456_v60 = vadd.f32 %v629_v54, %v601_v51 }
  0xfd   :  { %v459_v61 = vadd.f32 %v632_v59, %v604_v57 }
  0xfe   :  { %v605_v62 = vpop.f32.mrb[4].mxu0 }
  0xff   :  { %v633_v63 = vpop.f32.mrb[4].mxu1  ;;  %v606_v0 = vpop.f32.mrb[5].mxu0 }
 0x100   :  { %v607_v1 = vadd.f32 %v606_v0, %v605_v62  ;;  %v634_v2 = vpop.f32.mrb[5].mxu1  ;;  %v608_v3 = vpop.f32.mrb[6].mxu0 }
 0x101   :  { %v635_v4 = vadd.f32 %v634_v2, %v633_v63  ;;  %v636_v5 = vpop.f32.mrb[6].mxu1  ;;  %v609_v6 = vpop.f32.mrb[7].mxu0 }
 0x102   :  { %v610_v7 = vadd.f32 %v609_v6, %v608_v3  ;;  %v637_v8 = vpop.f32.mrb[7].mxu1 }
 0x103   :  { %v638_v9 = vadd.f32 %v637_v8, %v636_v5  ;;  %v464_v10 = vadd.f32 %v635_v4, %v607_v1 }
 0x105   :  { %v467_v11 = vadd.f32 %v638_v9, %v610_v7 }
 0x107   :  { %v655_v12 = vpop.f32.mrb[8].mxu0 }
 0x108   :  { %v513_v13 = vadd.f32 %v655_v12, %v464_v10  ;;  %v504_v14 = vpop.f32.mrb[9].mxu0 }
 0x109   :  { %v505_v15 = vadd.f32 %v504_v14, %v456_v60  ;;  %v656_v16 = vpop.f32.mrb[10].mxu0 }
 0x10a   :  { %v516_v17 = vadd.f32 %v656_v16, %v467_v11  ;;  %v507_v18 = vpop.f32.mrb[11].mxu0 }
 0x10b   :  { %v508_v19 = vadd.f32 %v507_v18, %v459_v61 }
 0x10c   :  { %v520_v20 = vmax.f32 %v513_v13, %v516_v17 }
 0x10d   :  { %v519_v21 = vmax.f32 %v505_v15, %v508_v19 }
 0x10f   :  { %v521_v23 = vmax.f32 %v519_v21, %v520_v20 }
 0x111   :  { %v528_v24 = vadd.f32 %v526_v22, %v521_v23 }
 0x113   :  { %v529_v25 = vmax.f32 %v528_v24, 0.0 }
 0x115   :  { %530 = vst [vmem:[%s879_s3] sm:$0xff] %v529_v25 }

// kernel: tile.18
= control target key start
LH: loop header
LB: loop body
LE: loop exit
PB: predicated region body
PF: predicated region fallthrough
CT: control target
= control target key end

     0   :  { %s22_s0 = inlined_call_operand.vmem [shape: f32[8], index: 0, kind: input, shape index: {}]   ;;  %s23_s1 = inlined_call_operand.vmem [shape: f32[4,8], index: 1, kind: output, shape index: {}]  }
   0x1   :  { %v4_v0 = vld [vmem:[%s22_s0] ss:$0 sm:$0xff] }
   0x2   :  { %5 = vst [vmem:[%s23_s1] sm:$0xf] %v4_v0 }

// kernel: tile.2
= control target key start
LH: loop header
LB: loop body
LE: loop exit
PB: predicated region body
PF: predicated region fallthrough
CT: control target
= control target key end

     0   :  { %s66_s8 = smov 125   ;;  %vm7_vm0 = vcmask 7168   ;;  %s67_s11 = smov 126   ;;  %s117_s0 = inlined_call_operand.vmem [shape: f32[4,8], index: 0, kind: input, shape index: {}]   ;;  %s118_s1 = inlined_call_operand.vmem [shape: f32[32,1], index: 1, kind: output, shape index: {}]  }
   0x1   :  { %v4_v0 = vld [vmem:[%s117_s0] sm:$0xf]  ;;  %s65_s0 = smov 127   ;;  %s68_s12 = smov 124  }
   0x2   :  { %5 = vst [vmem:[#allocation0] sm:$0xf] %v4_v0  ;;  %s69_s13 = smov 123   ;;  %s70_s14 = smov 122  }
   0x3   :  { %s71_s15 = smov 121  }
   0x9   :  { %v9_v1 = vld [vmem:[#allocation0] sm:$0xf]  }
   0xa   :  { %v21_v2 = vld [vmem:[#allocation0] sm:$0xf]   ;;  %10 = vrot.lane.b32.xlu0 %v9_v1, %s65_s0 }
   0xb   :  { %22 = vrot.lane.b32.xlu1 %v21_v2, %s66_s8  ;;  %v15_v3 = vld [vmem:[#allocation0] sm:$0xf]  }
   0xc   :  { %v27_v4 = vld [vmem:[#allocation0] sm:$0xf]  }
   0xd   :  { %v6_v5 = vld [vmem:[#allocation0] sm:$0xf]  }
   0xe   :  { %8 = vst.msk [vmem:[%s118_s1] ss:$8 sm:$0xf] %vm7_vm0, %v6_v5   ;;  %16 = vrot.lane.b32.xlu0 %v15_v3, %s67_s11  ;;  %v33_v6 = vld [vmem:[#allocation0] sm:$0xf]  }
   0xf   :  { %28 = vrot.lane.b32.xlu1 %v27_v4, %s68_s12  ;;  %v39_v7 = vld [vmem:[#allocation0] sm:$0xf]  }
  0x10   :  { %v45_v8 = vld [vmem:[#allocation0] sm:$0xf]  }
  0x12   :  { %34 = vrot.lane.b32.xlu0 %v33_v6, %s69_s13 }
  0x13   :  { %40 = vrot.lane.b32.xlu1 %v39_v7, %s70_s14 }
  0x16   :  { %46 = vrot.lane.b32.xlu0 %v45_v8, %s71_s15 }
  0x7c   :  { %v11_v9 = vpop.permute.xlu0 %10  }
  0x7d   :  { %v23_v10 = vpop.permute.xlu1 %22   ;;  %51 = vst.msk [vmem:[%s118_s1 + $0x1] ss:$8 sm:$0xf] %vm7_vm0, %v11_v9  }
  0x7e   :  { %53 = vst.msk [vmem:[%s118_s1 + $0x3] ss:$8 sm:$0xf] %vm7_vm0, %v23_v10  }
  0x80   :  { %v17_v11 = vpop.permute.xlu0 %16  }
  0x81   :  { %v29_v12 = vpop.permute.xlu1 %28   ;;  %52 = vst.msk [vmem:[%s118_s1 + $0x2] ss:$8 sm:$0xf] %vm7_vm0, %v17_v11  }
  0x82   :  { %54 = vst.msk [vmem:[%s118_s1 + $0x4] ss:$8 sm:$0xf] %vm7_vm0, %v29_v12  }
  0x84   :  { %v35_v13 = vpop.permute.xlu0 %34  }
  0x85   :  { %v41_v14 = vpop.permute.xlu1 %40   ;;  %55 = vst.msk [vmem:[%s118_s1 + $0x5] ss:$8 sm:$0xf] %vm7_vm0, %v35_v13  }
  0x86   :  { %56 = vst.msk [vmem:[%s118_s1 + $0x6] ss:$8 sm:$0xf] %vm7_vm0, %v41_v14  }
  0x88   :  { %v47_v15 = vpop.permute.xlu0 %46  }
  0x89   :  { %57 = vst.msk [vmem:[%s118_s1 + $0x7] ss:$8 sm:$0xf] %vm7_vm0, %v47_v15  }

// kernel: post_print_denoiser_forward.9
= control target key start
LH: loop header
LB: loop body
LE: loop exit
PB: predicated region body
PF: predicated region fallthrough
CT: control target
= control target key end

     0   :  { %v162_v1 = vmov 0   ;;  %vm69_vm0 = vcmask 261120   ;;  %s221_s1 = inlined_call_operand.vmem [shape: bf16[32,128], index: 1, kind: input, shape index: {}]   ;;  %s222_s0 = inlined_call_operand.vmem [shape: bf16[32,32], index: 0, kind: input, shape index: {}]   ;;  %s223_s2 = inlined_call_operand.vmem [shape: f32[32,1], index: 2, kind: input, shape index: {}]   ;;  %s224_s3 = inlined_call_operand.vmem [shape: f32[32,128], index: 3, kind: output, shape index: {}]  }
   0x1   :  { %v158_v0 = vld [vmem:[%s221_s1] sm:$0xff]   ;;  %157 = vset.pattern.permute.xlu1 %v162_v1  ;;  %156 = vset.pattern.permute.xlu0 %v162_v1  ;;  %v159_v2 = vld [vmem:[%s221_s1 + $0x8] sm:$0xff]   ;;  %v25_v4 = vld [vmem:[%s223_s2 + $0x10] sm:$0xff] }
   0x2   :  { %147 = vmatprep.subr.bf16.mxu0 %v158_v0  ;;  %v160_v3 = vld [vmem:[%s222_s0] sm:$0xff]   ;;  %39 = vperm.xlu1 %157, %v25_v4   ;;  %v161_v6 = vld [vmem:[%s222_s0 + $0x8] sm:$0xff]   ;;  %v26_v7 = vld [vmem:[%s223_s2 + $0x18] sm:$0xff] }
   0x3   :  { %148 = vmatpush3.bf16.msra.mxu0 %v158_v0  ;;  %151 = vmatprep.mubr.msk.bf16.mxu0 %vm69_vm0, %v160_v3  ;;  %v23_v5 = vld [vmem:[%s223_s2] sm:$0xff]  ;;  %v24_v8 = vld [vmem:[%s223_s2 + $0x8] sm:$0xff] }
   0x4   :  { %149 = vmatprep.subr.bf16.mxu0 %v159_v2  ;;  %29 = vperm.xlu0 %156, %v23_v5  }
   0x6   :  { %44 = vperm.xlu1 %157, %v26_v7  }
   0x7   :  { %150 = vmatpush3.bf16.msra.mxu0 %v159_v2 }
   0x8   :  { %34 = vperm.xlu0 %156, %v24_v8  }
   0xa   :  { %152 = vmatmul.mubr.msk.bf16.vlgmr.msra.gmra.mrb[0].mxu0 %vm69_vm0, %v161_v6 }
  0x81   :  { %v40_v9 = vpop.permute.xlu1 %39 }
  0x83   :  { %v30_v10 = vpop.permute.xlu0 %29 }
  0x85   :  { %v45_v14 = vpop.permute.xlu1 %44 }
  0x87   :  { %v35_v17 = vpop.permute.xlu0 %34 }
  0xdd   :  { %v153_v11 = vpop.f32.mrb[0].mxu0 }
  0xde   :  { %v119_v12 = vadd.f32 %v153_v11, %v40_v9  ;;  %v110_v13 = vpop.f32.mrb[1].mxu0 }
  0xdf   :  { %v111_v15 = vadd.f32 %v110_v13, %v30_v10  ;;  %v154_v16 = vpop.f32.mrb[2].mxu0 }
  0xe0   :  { %v127_v18 = vmax.f32 %v119_v12, 0.0  ;;  %v122_v19 = vadd.f32 %v154_v16, %v45_v14  ;;  %v113_v20 = vpop.f32.mrb[3].mxu0 }
  0xe1   :  { %v125_v21 = vmax.f32 %v111_v15, 0.0  ;;  %v114_v22 = vadd.f32 %v113_v20, %v35_v17 }
  0xe2   :  { %131 = vst [vmem:[%s224_s3 + $0x10] sm:$0xff] %v127_v18  ;;  %v128_v23 = vmax.f32 %v122_v19, 0.0 }
  0xe3   :  { %129 = vst [vmem:[%s224_s3] sm:$0xff] %v125_v21  ;;  %v126_v24 = vmax.f32 %v114_v22, 0.0 }
  0xe4   :  { %132 = vst [vmem:[%s224_s3 + $0x18] sm:$0xff] %v128_v23 }
  0xe5   :  { %130 = vst [vmem:[%s224_s3 + $0x8] sm:$0xff] %v126_v24 }

// kernel: mul.4
= control target key start
LH: loop header
LB: loop body
LE: loop exit
PB: predicated region body
PF: predicated region fallthrough
CT: control target
= control target key end

     0   :  { %vm164_vm0 = vcmask 1043458   ;;  %vm168_vm1 = vcmask 1045508   ;;  %vm172_vm2 = vcmask 1047558   ;;  %s440_s24 = smov 3  ;;  %s442_s25 = smov 12  ;;  %vm174_vm3 = vcmask 261120   ;;  %s579_s0 = inlined_call_operand.vmem [shape: f32[2,2,32,16], index: 0, kind: input, shape index: {}]   ;;  %s580_s1 = inlined_call_operand.vmem [shape: f32[128,16], index: 1, kind: output, shape index: {}]  }
   0x1   :  { %v378_v0 = vld [vmem:[%s579_s0 + $0x1e] sm:$0x3]  ;;  %v380_v1 = vld [vmem:[%s579_s0 + $0x1a] sm:$0x3]  ;;  %v382_v2 = vld [vmem:[%s579_s0 + $0x16] sm:$0x3] }
   0x2   :  { %88 = vst [vmem:[#allocation0 + $0x78] sm:$0x3] %v378_v0  ;;  %98 = vst [vmem:[#allocation0 + $0x68] sm:$0x3] %v380_v1  ;;  %v384_v3 = vld [vmem:[%s579_s0 + $0x12] sm:$0x3] }
   0x3   :  { %108 = vst [vmem:[#allocation0 + $0x58] sm:$0x3] %v382_v2  ;;  %v386_v4 = vld [vmem:[%s579_s0 + $0xe] sm:$0x3]  ;;  %v388_v5 = vld [vmem:[%s579_s0 + $0xa] sm:$0x3] }
   0x4   :  { %118 = vst [vmem:[#allocation0 + $0x48] sm:$0x3] %v384_v3  ;;  %128 = vst [vmem:[#allocation0 + $0x38] sm:$0x3] %v386_v4  ;;  %v390_v6 = vld [vmem:[%s579_s0 + $0x6] sm:$0x3] }
   0x5   :  { %138 = vst [vmem:[#allocation0 + $0x28] sm:$0x3] %v388_v5  ;;  %v392_v7 = vld [vmem:[%s579_s0 + $0x2] sm:$0x3]  ;;  %148 = vst [vmem:[#allocation0 + $0x18] sm:$0x3] %v390_v6 }
   0x6   :  { %157 = vst [vmem:[#allocation0 + $0x8] sm:$0x3] %v392_v7  ;;  %v362_v8 = vld [vmem:[%s579_s0 + $0x3e] sm:$0x3]  ;;  %v364_v9 = vld [vmem:[%s579_s0 + $0x3a] sm:$0x3] }
   0x7   :  { %8 = vst [vmem:[#allocation0 + $0xf8] sm:$0x3] %v362_v8  ;;  %v366_v10 = vld [vmem:[%s579_s0 + $0x36] sm:$0x3]  ;;  %s450_s30 = smov 48  ;;  %s452_s2 = smov 192 }
   0x8   :  { %18 = vst [vmem:[#allocation0 + $0xe8] sm:$0x3] %v364_v9  ;;  %28 = vst [vmem:[#allocation0 + $0xd8] sm:$0x3] %v366_v10  ;;  %v368_v11 = vld [vmem:[%s579_s0 + $0x32] sm:$0x3] }
   0x9   :  { %v370_v12 = vld [vmem:[%s579_s0 + $0x2e] sm:$0x3]  ;;  %s198_s7 = smov 3  ;;  %38 = vst [vmem:[#allocation0 + $0xc8] sm:$0x3] %v368_v11  ;;  %s201_s12 = smov 12 }
   0xa   :  { %48 = vst [vmem:[#allocation0 + $0xb8] sm:$0x3] %v370_v12  ;;  %v372_v13 = vld [vmem:[%s579_s0 + $0x2a] sm:$0x3]  ;;  %v374_v14 = vld [vmem:[%s579_s0 + $0x26] sm:$0x3] }
   0xb   :  { %s206_s13 = smov 48  ;;  %58 = vst [vmem:[#allocation0 + $0xa8] sm:$0x3] %v372_v13  ;;  %68 = vst [vmem:[#allocation0 + $0x98] sm:$0x3] %v374_v14  ;;  %s211_s18 = smov 192 }
   0xc   :  { %v376_v15 = vld [vmem:[%s579_s0 + $0x22] sm:$0x3]  ;;  %v363_v16 = vld [vmem:[%s579_s0 + $0x3c] sm:$0x3]  ;;  %v365_v17 = vld [vmem:[%s579_s0 + $0x38] sm:$0x3] }
   0xd   :  { %78 = vst [vmem:[#allocation0 + $0x88] sm:$0x3] %v376_v15  ;;  %13 = vst [vmem:[#allocation0 + $0xf0] sm:$0x3] %v363_v16  ;;  %v367_v18 = vld [vmem:[%s579_s0 + $0x34] sm:$0x3] }
   0xe   :  { %s478_s23 = smov 3  ;;  %s480_s26 = smov 12  ;;  %23 = vst [vmem:[#allocation0 + $0xe0] sm:$0x3] %v365_v17  ;;  %33 = vst [vmem:[#allocation0 + $0xd0] sm:$0x3] %v367_v18 }
   0xf   :  { %v369_v19 = vld [vmem:[%s579_s0 + $0x30] sm:$0x3]  ;;  %v371_v20 = vld [vmem:[%s579_s0 + $0x2c] sm:$0x3]  ;;  %v244_v21 = vld [vmem:[#allocation0 + $0x8] ss:$16 sm:%s440_s24]  }
  0x10   :  { %v247_v22 = vld [vmem:[#allocation0 + $0x8] ss:$16 sm:%s442_s25]   ;;  %43 = vst [vmem:[#allocation0 + $0xc0] sm:$0x3] %v369_v19  ;;  %53 = vst [vmem:[#allocation0 + $0xb0] sm:$0x3] %v371_v20 }
  0x11   :  { %v252_v23 = vld [vmem:[#allocation0 + $0x8] ss:$16 sm:%s450_s30]   ;;  %v249_v24 = vsel %vm164_vm0, %v247_v22, %v244_v21  ;;  %v199_v26 = vld [vmem:[#allocation0 + $0x9] ss:$16 sm:%s198_s7]   ;;  %s273_s24 = smov 48  ;;  %s278_s25 = smov 192 }
  0x12   :  { %v257_v25 = vld [vmem:[#allocation0 + $0x8] ss:$16 sm:%s452_s2]   ;;  %v202_v27 = vld [vmem:[#allocation0 + $0x9] ss:$16 sm:%s201_s12]   ;;  %v254_v28 = vsel %vm168_vm1, %v252_v23, %v249_v24  ;;  %s220_s30 = smov 3  ;;  %s223_s2 = smov 12 }
  0x13   :  { %v204_v29 = vsel %vm164_vm0, %v202_v27, %v199_v26  ;;  %v207_v30 = vld [vmem:[#allocation0 + $0x9] ss:$16 sm:%s206_s13]   ;;  %v259_v32 = vsel %vm172_vm2, %v257_v25, %v254_v28  ;;  %v375_v35 = vld [vmem:[%s579_s0 + $0x24] sm:$0x3]  ;;  %s400_s8 = smov 64   ;;  %s228_s9 = smov 48 }
  0x14   :  { %v212_v31 = vld [vmem:[#allocation0 + $0x9] ss:$16 sm:%s211_s18]   ;;  %v209_v33 = vsel %vm168_vm1, %v207_v30, %v204_v29  ;;  %260 = vrot.lane.b32.xlu1 %v259_v32, %s400_s8  ;;  %s233_s10 = smov 192  ;;  %73 = vst [vmem:[#allocation0 + $0x90] sm:$0x3] %v375_v35  ;;  %s401_s15 = smov 96  }
  0x15   :  { %v373_v34 = vld [vmem:[%s579_s0 + $0x28] sm:$0x3]  ;;  %v214_v36 = vsel %vm172_vm2, %v212_v31, %v209_v33  ;;  %v377_v37 = vld [vmem:[%s579_s0 + $0x20] sm:$0x3]  ;;  %v379_v38 = vld [vmem:[%s579_s0 + $0x1c] sm:$0x3] }
  0x16   :  { %63 = vst [vmem:[#allocation0 + $0xa0] sm:$0x3] %v373_v34  ;;  %215 = vrot.lane.b32.xlu0 %v214_v36, %s401_s15  ;;  %v266_v39 = vld [vmem:[#allocation0 + $0x88] ss:$16 sm:%s478_s23]   ;;  %83 = vst [vmem:[#allocation0 + $0x80] sm:$0x3] %v377_v37 }
  0x17   :  { %v269_v40 = vld [vmem:[#allocation0 + $0x88] ss:$16 sm:%s480_s26]   ;;  %93 = vst [vmem:[#allocation0 + $0x70] sm:$0x3] %v379_v38  ;;  %v221_v44 = vld [vmem:[#allocation0 + $0x89] ss:$16 sm:%s220_s30]  }
  0x18   :  { %v274_v41 = vld [vmem:[#allocation0 + $0x88] ss:$16 sm:%s273_s24]   ;;  %v271_v42 = vsel %vm164_vm0, %v269_v40, %v266_v39  ;;  %v224_v45 = vld [vmem:[#allocation0 + $0x89] ss:$16 sm:%s223_s2]   ;;  %s310_s16 = smov 3  ;;  %s313_s17 = smov 12 }
  0x19   :  { %v279_v43 = vld [vmem:[#allocation0 + $0x88] ss:$16 sm:%s278_s25]   ;;  %v276_v46 = vsel %vm168_vm1, %v274_v41, %v271_v42  ;;  %v226_v47 = vsel %vm164_vm0, %v224_v45, %v221_v44  ;;  %v229_v48 = vld [vmem:[#allocation0 + $0x89] ss:$16 sm:%s228_s9]   ;;  %s318_s18 = smov 48  ;;  %s323_s24 = smov 192 }
  0x1a   :  { %v234_v49 = vld [vmem:[#allocation0 + $0x89] ss:$16 sm:%s233_s10]   ;;  %v281_v50 = vsel %vm172_vm2, %v279_v43, %v276_v46  ;;  %v231_v51 = vsel %vm168_vm1, %v229_v48, %v226_v47  ;;  %v383_v53 = vld [vmem:[%s579_s0 + $0x14] sm:$0x3]  ;;  %v385_v55 = vld [vmem:[%s579_s0 + $0x10] sm:$0x3] }
  0x1b   :  { %v381_v52 = vld [vmem:[%s579_s0 + $0x18] sm:$0x3]  ;;  %282 = vrot.lane.b32.xlu1 %v281_v50, %s400_s8  ;;  %v236_v54 = vsel %vm172_vm2, %v234_v49, %v231_v51  ;;  %113 = vst [vmem:[#allocation0 + $0x50] sm:$0x3] %v383_v53  ;;  %v387_v56 = vld [vmem:[%s579_s0 + $0xc] sm:$0x3] }
  0x1c   :  { %103 = vst [vmem:[#allocation0 + $0x60] sm:$0x3] %v381_v52  ;;  %v389_v57 = vld [vmem:[%s579_s0 + $0x8] sm:$0x3]  ;;  %237 = vrot.lane.b32.xlu0 %v236_v54, %s401_s15  ;;  %123 = vst [vmem:[#allocation0 + $0x40] sm:$0x3] %v385_v55 }
  0x1d   :  { %133 = vst [vmem:[#allocation0 + $0x30] sm:$0x3] %v387_v56  ;;  %143 = vst [vmem:[#allocation0 + $0x20] sm:$0x3] %v389_v57  ;;  %v391_v58 = vld [vmem:[%s579_s0 + $0x4] sm:$0x3] }
  0x1e   :  { %v158_v59 = vld [vmem:[%s579_s0] sm:$0x3]  ;;  %153 = vst [vmem:[#allocation0 + $0x10] sm:$0x3] %v391_v58  ;;  %s288_s0 = smov 3  ;;  %s291_s5 = smov 12 }
  0x1f   :  { %159 = vst [vmem:[#allocation0] sm:$0x3] %v158_v59  ;;  %v311_v60 = vld [vmem:[#allocation0 + $0x81] ss:$16 sm:%s310_s16]   ;;  %s296_s6 = smov 48  ;;  %s301_s7 = smov 192 }
  0x20   :  { %v314_v61 = vld [vmem:[#allocation0 + $0x81] ss:$16 sm:%s313_s17]   ;;  %s160_s8 = smov 3  ;;  %s177_s9 = smov 3  ;;  %vm217_vm4 = vcmask 1048320   ;;  %vm262_vm5 = vcmask 785920  }
  0x21   :  { %v319_v62 = vld [vmem:[#allocation0 + $0x81] ss:$16 sm:%s318_s18]   ;;  %v316_v63 = vsel %vm164_vm0, %v314_v61, %v311_v60  ;;  %v178_v3 = vld [vmem:[#allocation0 + $0x80] ss:$16 sm:%s177_s9]   ;;  %s180_s10 = smov 12  ;;  %s185_s11 = smov 48 }
  0x22   :  { %v324_v0 = vld [vmem:[#allocation0 + $0x81] ss:$16 sm:%s323_s24]   ;;  %v321_v1 = vsel %vm168_vm1, %v319_v62, %v316_v63  ;;  %s402_s12 = smov 32   ;;  %s162_s13 = smov 12  ;;  %v181_v4 = vld [vmem:[#allocation0 + $0x80] ss:$16 sm:%s180_s10]  }
  0x23   :  { %v326_v2 = vsel %vm172_vm2, %v324_v0, %v321_v1  ;;  %v186_v5 = vld [vmem:[#allocation0 + $0x80] ss:$16 sm:%s185_s11]   ;;  %s190_s14 = smov 192  ;;  %s166_s15 = smov 48  ;;  %v183_v6 = vsel %vm164_vm0, %v181_v4, %v178_v3  ;;  %vm307_vm6 = vcmask 523520  }
  0x24   :  { %327 = vrot.lane.b32.xlu1 %v326_v2, %s402_s12  ;;  %s170_s16 = smov 192  ;;  %v191_v7 = vld [vmem:[#allocation0 + $0x80] ss:$16 sm:%s190_s14]   ;;  %v188_v11 = vsel %vm168_vm1, %v186_v5, %v183_v6 }
  0x25   :  { %v193_v16 = vsel %vm172_vm2, %v191_v7, %v188_v11 }
  0x26   :  { %v289_v8 = vld [vmem:[#allocation0 + $0x1] ss:$16 sm:%s288_s0]   ;;  %v161_v14 = vld [vmem:[#allocation0] ss:$16 sm:%s160_s8]   ;;  %393 = vst.msk [vmem:[%s580_s1 + $0x8] sm:$0xff] %vm174_vm3, %v193_v16  }
  0x27   :  { %v292_v9 = vld [vmem:[#allocation0 + $0x1] ss:$16 sm:%s291_s5]   ;;  %v163_v15 = vld [vmem:[#allocation0] ss:$16 sm:%s162_s13]  }
  0x28   :  { %v297_v10 = vld [vmem:[#allocation0 + $0x1] ss:$16 sm:%s296_s6]   ;;  %v294_v12 = vsel %vm164_vm0, %v292_v9, %v289_v8  ;;  %v165_v18 = vsel %vm164_vm0, %v163_v15, %v161_v14  ;;  %v167_v19 = vld [vmem:[#allocation0] ss:$16 sm:%s166_s15]  }
  0x29   :  { %v302_v13 = vld [vmem:[#allocation0 + $0x1] ss:$16 sm:%s301_s7]   ;;  %v299_v17 = vsel %vm168_vm1, %v297_v10, %v294_v12  ;;  %v171_v20 = vld [vmem:[#allocation0] ss:$16 sm:%s170_s16]   ;;  %v169_v22 = vsel %vm168_vm1, %v167_v19, %v165_v18 }
  0x2a   :  { %v304_v21 = vsel %vm172_vm2, %v302_v13, %v299_v17  ;;  %v173_v23 = vsel %vm172_vm2, %v171_v20, %v169_v22 }
  0x2b   :  { %305 = vrot.lane.b32.xlu0 %v304_v21, %s402_s12  ;;  %175 = vst.msk [vmem:[%s580_s1] sm:$0xff] %vm174_vm3, %v173_v23  }
  0x86   :  { %v261_v24 = vpop.permute.xlu1 %260  }
  0x88   :  { %v216_v25 = vpop.permute.xlu0 %215  }
  0x89   :  { %218 = vst.msk [vmem:[%s580_s1] sm:$0xff] %vm217_vm4, %v216_v25  }
  0x8a   :  { %263 = vst.msk [vmem:[%s580_s1] sm:$0xff] %vm262_vm5, %v261_v24  }
  0x8d   :  { %v283_v26 = vpop.permute.xlu1 %282  }
  0x8e   :  { %v238_v27 = vpop.permute.xlu0 %237  }
  0x8f   :  { %394 = vst.msk [vmem:[%s580_s1 + $0x8] sm:$0xff] %vm217_vm4, %v238_v27  }
  0x90   :  { %395 = vst.msk [vmem:[%s580_s1 + $0x8] sm:$0xff] %vm262_vm5, %v283_v26  }
  0x96   :  { %v328_v28 = vpop.permute.xlu1 %327  }
  0x97   :  { %396 = vst.msk [vmem:[%s580_s1 + $0x8] sm:$0xff] %vm307_vm6, %v328_v28  }
  0x9d   :  { %v306_v29 = vpop.permute.xlu0 %305  }
  0x9e   :  { %308 = vst.msk [vmem:[%s580_s1] sm:$0xff] %vm307_vm6, %v306_v29  }

// kernel: tile.28
= control target key start
LH: loop header
LB: loop body
LE: loop exit
PB: predicated region body
PF: predicated region fallthrough
CT: control target
= control target key end

     0   :  { %s28_s0 = inlined_call_operand.vmem [shape: f32[32], index: 0, kind: input, shape index: {}]   ;;  %s29_s1 = inlined_call_operand.vmem [shape: f32[16,32], index: 1, kind: output, shape index: {}]  }
   0x1   :  { %v4_v0 = vld [vmem:[%s28_s0] ss:$0 sm:$0xff] }
   0x2   :  { %5 = vst [vmem:[%s29_s1] sm:$0xff] %v4_v0  ;;  %8 = vst [vmem:[%s29_s1 + $0x8] sm:$0xff] %v4_v0 }

// kernel: tile.1
= control target key start
LH: loop header
LB: loop body
LE: loop exit
PB: predicated region body
PF: predicated region fallthrough
CT: control target
= control target key end

     0   :  { %s1883_s8 = smov 126   ;;  %s1884_s9 = smov 127   ;;  %vm3_vm0 = vcmask 7168   ;;  %s4050_s0 = inlined_call_operand.vmem [shape: f32[16,32], index: 0, kind: input, shape index: {}]   ;;  %s4051_s1 = inlined_call_operand.vmem [shape: f32[512,1], index: 1, kind: output, shape index: {}]  }
   0x1   :  { %v1927_v0 = vld [vmem:[%s4050_s0] sm:$0xff]   ;;  %v1934_v1 = vld [vmem:[%s4050_s0 + $0x8] sm:$0xff]   ;;  %s1885_s12 = smov 125   ;;  %s1886_s13 = smov 124  }
   0x2   :  { %80 = vrot.lane.b32.xlu1 %v1927_v0, %s1883_s8  ;;  %39 = vrot.lane.b32.xlu0 %v1927_v0, %s1884_s9  ;;  %s1887_s14 = smov 123   ;;  %s1888_s15 = smov 122   ;;  %v2_v2 = vld [vmem:[%s4050_s0] sm:$0xff]   ;;  %v1316_v3 = vld [vmem:[%s4050_s0 + $0x8] sm:$0xff]  }
   0x3   :  { %s1889_s16 = smov 121   ;;  %s1890_s17 = smov 120   ;;  %4 = vst.msk [vmem:[%s4051_s1] sm:$0x1] %vm3_vm0, %v2_v2   ;;  %1309 = vst.msk [vmem:[%s4051_s1 + $0x1f] sm:$0x2] %vm3_vm0, %v2_v2  }
   0x4   :  { %s1891_s18 = smov 119   ;;  %s1892_s19 = smov 118   ;;  %1310 = vst.msk [vmem:[%s4051_s1 + $0x3e] sm:$0x4] %vm3_vm0, %v2_v2   ;;  %1311 = vst.msk [vmem:[%s4051_s1 + $0x5d] sm:$0x8] %vm3_vm0, %v2_v2  }
   0x5   :  { %s1893_s20 = smov 117   ;;  %s1894_s21 = smov 116   ;;  %1312 = vst.msk [vmem:[%s4051_s1 + $0x7c] sm:$0x10] %vm3_vm0, %v2_v2   ;;  %1313 = vst.msk [vmem:[%s4051_s1 + $0x9b] sm:$0x20] %vm3_vm0, %v2_v2  }
   0x6   :  { %101 = vrot.lane.b32.xlu1 %v1934_v1, %s1883_s8  ;;  %60 = vrot.lane.b32.xlu0 %v1934_v1, %s1884_s9  ;;  %s1895_s22 = smov 115   ;;  %s1896_s23 = smov 114   ;;  %1314 = vst.msk [vmem:[%s4051_s1 + $0xba] sm:$0x40] %vm3_vm0, %v2_v2   ;;  %1315 = vst.msk [vmem:[%s4051_s1 + $0xd9] sm:$0x80] %vm3_vm0, %v2_v2  }
   0x7   :  { %s1897_s24 = smov 113   ;;  %s1898_s25 = smov 112   ;;  %1317 = vst.msk [vmem:[%s4051_s1 + $0x100] sm:$0x1] %vm3_vm0, %v1316_v3   ;;  %1318 = vst.msk [vmem:[%s4051_s1 + $0x11f] sm:$0x2] %vm3_vm0, %v1316_v3  }
   0x8   :  { %s1899_s26 = smov 111   ;;  %s1900_s27 = smov 110   ;;  %1319 = vst.msk [vmem:[%s4051_s1 + $0x13e] sm:$0x4] %vm3_vm0, %v1316_v3   ;;  %1320 = vst.msk [vmem:[%s4051_s1 + $0x15d] sm:$0x8] %vm3_vm0, %v1316_v3  }
   0x9   :  { %s1901_s28 = smov 109   ;;  %s1902_s29 = smov 108   ;;  %1321 = vst.msk [vmem:[%s4051_s1 + $0x17c] sm:$0x10] %vm3_vm0, %v1316_v3   ;;  %1322 = vst.msk [vmem:[%s4051_s1 + $0x19b] sm:$0x20] %vm3_vm0, %v1316_v3  }
   0xa   :  { %142 = vrot.lane.b32.xlu1 %v1934_v1, %s1885_s12  ;;  %121 = vrot.lane.b32.xlu0 %v1927_v0, %s1885_s12  ;;  %s1903_s30 = smov 107   ;;  %s1904_s2 = smov 106   ;;  %1323 = vst.msk [vmem:[%s4051_s1 + $0x1ba] sm:$0x40] %vm3_vm0, %v1316_v3   ;;  %1324 = vst.msk [vmem:[%s4051_s1 + $0x1d9] sm:$0x80] %vm3_vm0, %v1316_v3  }
   0xb   :  { %s1905_s3 = smov 105   ;;  %s1906_s4 = smov 104  }
   0xc   :  { %s1907_s5 = smov 103   ;;  %s1908_s6 = smov 102  }
   0xd   :  { %s1909_s7 = smov 101  }
   0xe   :  { %183 = vrot.lane.b32.xlu1 %v1934_v1, %s1886_s13  ;;  %162 = vrot.lane.b32.xlu0 %v1927_v0, %s1886_s13  ;;  %s1910_s13 = smov 100  }
  0x12   :  { %224 = vrot.lane.b32.xlu1 %v1934_v1, %s1887_s14  ;;  %203 = vrot.lane.b32.xlu0 %v1927_v0, %s1887_s14  ;;  %s1911_s14 = smov 99  }
  0x16   :  { %265 = vrot.lane.b32.xlu1 %v1934_v1, %s1888_s15  ;;  %244 = vrot.lane.b32.xlu0 %v1927_v0, %s1888_s15 }
  0x1a   :  { %306 = vrot.lane.b32.xlu1 %v1934_v1, %s1889_s16  ;;  %285 = vrot.lane.b32.xlu0 %v1927_v0, %s1889_s16 }
  0x1e   :  { %347 = vrot.lane.b32.xlu1 %v1934_v1, %s1890_s17  ;;  %326 = vrot.lane.b32.xlu0 %v1927_v0, %s1890_s17  ;;  %s1912_s17 = smov 98  }
  0x22   :  { %388 = vrot.lane.b32.xlu1 %v1934_v1, %s1891_s18  ;;  %367 = vrot.lane.b32.xlu0 %v1927_v0, %s1891_s18 }
  0x26   :  { %429 = vrot.lane.b32.xlu1 %v1934_v1, %s1892_s19  ;;  %408 = vrot.lane.b32.xlu0 %v1927_v0, %s1892_s19 }
  0x2a   :  { %470 = vrot.lane.b32.xlu1 %v1934_v1, %s1893_s20  ;;  %449 = vrot.lane.b32.xlu0 %v1927_v0, %s1893_s20  ;;  %s1913_s20 = smov 97  }
  0x2e   :  { %511 = vrot.lane.b32.xlu1 %v1934_v1, %s1894_s21  ;;  %490 = vrot.lane.b32.xlu0 %v1927_v0, %s1894_s21 }
  0x32   :  { %552 = vrot.lane.b32.xlu1 %v1934_v1, %s1895_s22  ;;  %531 = vrot.lane.b32.xlu0 %v1927_v0, %s1895_s22 }
  0x36   :  { %593 = vrot.lane.b32.xlu1 %v1934_v1, %s1896_s23  ;;  %572 = vrot.lane.b32.xlu0 %v1927_v0, %s1896_s23 }
  0x3a   :  { %634 = vrot.lane.b32.xlu1 %v1934_v1, %s1897_s24  ;;  %613 = vrot.lane.b32.xlu0 %v1927_v0, %s1897_s24 }
  0x3e   :  { %675 = vrot.lane.b32.xlu1 %v1934_v1, %s1898_s25  ;;  %654 = vrot.lane.b32.xlu0 %v1927_v0, %s1898_s25 }
  0x42   :  { %716 = vrot.lane.b32.xlu1 %v1934_v1, %s1899_s26  ;;  %695 = vrot.lane.b32.xlu0 %v1927_v0, %s1899_s26 }
  0x46   :  { %757 = vrot.lane.b32.xlu1 %v1934_v1, %s1900_s27  ;;  %736 = vrot.lane.b32.xlu0 %v1927_v0, %s1900_s27 }
  0x4a   :  { %798 = vrot.lane.b32.xlu1 %v1934_v1, %s1901_s28  ;;  %777 = vrot.lane.b32.xlu0 %v1927_v0, %s1901_s28 }
  0x4e   :  { %839 = vrot.lane.b32.xlu1 %v1934_v1, %s1902_s29  ;;  %818 = vrot.lane.b32.xlu0 %v1927_v0, %s1902_s29 }
  0x52   :  { %880 = vrot.lane.b32.xlu1 %v1934_v1, %s1903_s30  ;;  %859 = vrot.lane.b32.xlu0 %v1927_v0, %s1903_s30 }
  0x56   :  { %921 = vrot.lane.b32.xlu1 %v1934_v1, %s1904_s2  ;;  %900 = vrot.lane.b32.xlu0 %v1927_v0, %s1904_s2 }
  0x5a   :  { %962 = vrot.lane.b32.xlu1 %v1934_v1, %s1905_s3  ;;  %941 = vrot.lane.b32.xlu0 %v1927_v0, %s1905_s3 }
  0x5e   :  { %1003 = vrot.lane.b32.xlu1 %v1934_v1, %s1906_s4  ;;  %982 = vrot.lane.b32.xlu0 %v1927_v0, %s1906_s4 }
  0x62   :  { %1044 = vrot.lane.b32.xlu1 %v1934_v1, %s1907_s5  ;;  %1023 = vrot.lane.b32.xlu0 %v1927_v0, %s1907_s5 }
  0x66   :  { %1085 = vrot.lane.b32.xlu1 %v1934_v1, %s1908_s6  ;;  %1064 = vrot.lane.b32.xlu0 %v1927_v0, %s1908_s6 }
  0x6a   :  { %1126 = vrot.lane.b32.xlu1 %v1934_v1, %s1909_s7  ;;  %1105 = vrot.lane.b32.xlu0 %v1927_v0, %s1909_s7 }
  0x6e   :  { %1167 = vrot.lane.b32.xlu1 %v1934_v1, %s1910_s13  ;;  %1146 = vrot.lane.b32.xlu0 %v1927_v0, %s1910_s13 }
  0x72   :  { %1208 = vrot.lane.b32.xlu1 %v1934_v1, %s1911_s14  ;;  %1187 = vrot.lane.b32.xlu0 %v1927_v0, %s1911_s14 }
  0x74   :  { %v81_v4 = vpop.permute.xlu1 %80   ;;  %v40_v5 = vpop.permute.xlu0 %39  }
  0x75   :  { %1342 = vst.msk [vmem:[%s4051_s1 + $0x2] sm:$0x1] %vm3_vm0, %v81_v4   ;;  %1343 = vst.msk [vmem:[%s4051_s1 + $0x21] sm:$0x2] %vm3_vm0, %v81_v4  }
  0x76   :  { %1344 = vst.msk [vmem:[%s4051_s1 + $0x40] sm:$0x4] %vm3_vm0, %v81_v4   ;;  %1345 = vst.msk [vmem:[%s4051_s1 + $0x5f] sm:$0x8] %vm3_vm0, %v81_v4   ;;  %1249 = vrot.lane.b32.xlu1 %v1934_v1, %s1912_s17  ;;  %1228 = vrot.lane.b32.xlu0 %v1927_v0, %s1912_s17 }
  0x77   :  { %1346 = vst.msk [vmem:[%s4051_s1 + $0x7e] sm:$0x10] %vm3_vm0, %v81_v4   ;;  %1347 = vst.msk [vmem:[%s4051_s1 + $0x9d] sm:$0x20] %vm3_vm0, %v81_v4  }
  0x78   :  { %1348 = vst.msk [vmem:[%s4051_s1 + $0xbc] sm:$0x40] %vm3_vm0, %v81_v4   ;;  %1349 = vst.msk [vmem:[%s4051_s1 + $0xdb] sm:$0x80] %vm3_vm0, %v81_v4   ;;  %v102_v6 = vpop.permute.xlu1 %101   ;;  %v61_v7 = vpop.permute.xlu0 %60  }
  0x79   :  { %1325 = vst.msk [vmem:[%s4051_s1 + $0x1] sm:$0x1] %vm3_vm0, %v40_v5   ;;  %1326 = vst.msk [vmem:[%s4051_s1 + $0x20] sm:$0x2] %vm3_vm0, %v40_v5  }
  0x7a   :  { %1327 = vst.msk [vmem:[%s4051_s1 + $0x3f] sm:$0x4] %vm3_vm0, %v40_v5   ;;  %1328 = vst.msk [vmem:[%s4051_s1 + $0x5e] sm:$0x8] %vm3_vm0, %v40_v5   ;;  %1290 = vrot.lane.b32.xlu1 %v1934_v1, %s1913_s20  ;;  %1269 = vrot.lane.b32.xlu0 %v1927_v0, %s1913_s20 }
  0x7b   :  { %1329 = vst.msk [vmem:[%s4051_s1 + $0x7d] sm:$0x10] %vm3_vm0, %v40_v5   ;;  %1330 = vst.msk [vmem:[%s4051_s1 + $0x9c] sm:$0x20] %vm3_vm0, %v40_v5  }
  0x7c   :  { %1331 = vst.msk [vmem:[%s4051_s1 + $0xbb] sm:$0x40] %vm3_vm0, %v40_v5   ;;  %1332 = vst.msk [vmem:[%s4051_s1 + $0xda] sm:$0x80] %vm3_vm0, %v40_v5   ;;  %v143_v8 = vpop.permute.xlu1 %142   ;;  %v122_v9 = vpop.permute.xlu0 %121  }
  0x7d   :  { %1351 = vst.msk [vmem:[%s4051_s1 + $0x102] sm:$0x1] %vm3_vm0, %v102_v6   ;;  %1352 = vst.msk [vmem:[%s4051_s1 + $0x121] sm:$0x2] %vm3_vm0, %v102_v6  }
  0x7e   :  { %1353 = vst.msk [vmem:[%s4051_s1 + $0x140] sm:$0x4] %vm3_vm0, %v102_v6   ;;  %1354 = vst.msk [vmem:[%s4051_s1 + $0x15f] sm:$0x8] %vm3_vm0, %v102_v6  }
  0x7f   :  { %1355 = vst.msk [vmem:[%s4051_s1 + $0x17e] sm:$0x10] %vm3_vm0, %v102_v6   ;;  %1356 = vst.msk [vmem:[%s4051_s1 + $0x19d] sm:$0x20] %vm3_vm0, %v102_v6  }
  0x80   :  { %1357 = vst.msk [vmem:[%s4051_s1 + $0x1bc] sm:$0x40] %vm3_vm0, %v102_v6   ;;  %1358 = vst.msk [vmem:[%s4051_s1 + $0x1db] sm:$0x80] %vm3_vm0, %v102_v6   ;;  %v184_v10 = vpop.permute.xlu1 %183   ;;  %v163_v11 = vpop.permute.xlu0 %162  }
  0x81   :  { %1334 = vst.msk [vmem:[%s4051_s1 + $0x101] sm:$0x1] %vm3_vm0, %v61_v7   ;;  %1335 = vst.msk [vmem:[%s4051_s1 + $0x120] sm:$0x2] %vm3_vm0, %v61_v7  }
  0x82   :  { %1336 = vst.msk [vmem:[%s4051_s1 + $0x13f] sm:$0x4] %vm3_vm0, %v61_v7   ;;  %1337 = vst.msk [vmem:[%s4051_s1 + $0x15e] sm:$0x8] %vm3_vm0, %v61_v7  }
  0x83   :  { %1338 = vst.msk [vmem:[%s4051_s1 + $0x17d] sm:$0x10] %vm3_vm0, %v61_v7   ;;  %1339 = vst.msk [vmem:[%s4051_s1 + $0x19c] sm:$0x20] %vm3_vm0, %v61_v7  }
  0x84   :  { %1340 = vst.msk [vmem:[%s4051_s1 + $0x1bb] sm:$0x40] %vm3_vm0, %v61_v7   ;;  %1341 = vst.msk [vmem:[%s4051_s1 + $0x1da] sm:$0x80] %vm3_vm0, %v61_v7   ;;  %v225_v12 = vpop.permute.xlu1 %224   ;;  %v204_v13 = vpop.permute.xlu0 %203  }
  0x85   :  { %1368 = vst.msk [vmem:[%s4051_s1 + $0x103] sm:$0x1] %vm3_vm0, %v143_v8   ;;  %1369 = vst.msk [vmem:[%s4051_s1 + $0x122] sm:$0x2] %vm3_vm0, %v143_v8  }
  0x86   :  { %1370 = vst.msk [vmem:[%s4051_s1 + $0x141] sm:$0x4] %vm3_vm0, %v143_v8   ;;  %1371 = vst.msk [vmem:[%s4051_s1 + $0x160] sm:$0x8] %vm3_vm0, %v143_v8  }
  0x87   :  { %1372 = vst.msk [vmem:[%s4051_s1 + $0x17f] sm:$0x10] %vm3_vm0, %v143_v8   ;;  %1373 = vst.msk [vmem:[%s4051_s1 + $0x19e] sm:$0x20] %vm3_vm0, %v143_v8  }
  0x88   :  { %1374 = vst.msk [vmem:[%s4051_s1 + $0x1bd] sm:$0x40] %vm3_vm0, %v143_v8   ;;  %1375 = vst.msk [vmem:[%s4051_s1 + $0x1dc] sm:$0x80] %vm3_vm0, %v143_v8   ;;  %v266_v14 = vpop.permute.xlu1 %265   ;;  %v245_v15 = vpop.permute.xlu0 %244  }
  0x89   :  { %1359 = vst.msk [vmem:[%s4051_s1 + $0x3] sm:$0x1] %vm3_vm0, %v122_v9   ;;  %1360 = vst.msk [vmem:[%s4051_s1 + $0x22] sm:$0x2] %vm3_vm0, %v122_v9  }
  0x8a   :  { %1361 = vst.msk [vmem:[%s4051_s1 + $0x41] sm:$0x4] %vm3_vm0, %v122_v9   ;;  %1362 = vst.msk [vmem:[%s4051_s1 + $0x60] sm:$0x8] %vm3_vm0, %v122_v9  }
  0x8b   :  { %1363 = vst.msk [vmem:[%s4051_s1 + $0x7f] sm:$0x10] %vm3_vm0, %v122_v9   ;;  %1364 = vst.msk [vmem:[%s4051_s1 + $0x9e] sm:$0x20] %vm3_vm0, %v122_v9  }
  0x8c   :  { %1365 = vst.msk [vmem:[%s4051_s1 + $0xbd] sm:$0x40] %vm3_vm0, %v122_v9   ;;  %1366 = vst.msk [vmem:[%s4051_s1 + $0xdc] sm:$0x80] %vm3_vm0, %v122_v9   ;;  %v307_v16 = vpop.permute.xlu1 %306   ;;  %v286_v17 = vpop.permute.xlu0 %285  }
  0x8d   :  { %1385 = vst.msk [vmem:[%s4051_s1 + $0x104] sm:$0x1] %vm3_vm0, %v184_v10   ;;  %1386 = vst.msk [vmem:[%s4051_s1 + $0x123] sm:$0x2] %vm3_vm0, %v184_v10  }
  0x8e   :  { %1387 = vst.msk [vmem:[%s4051_s1 + $0x142] sm:$0x4] %vm3_vm0, %v184_v10   ;;  %1388 = vst.msk [vmem:[%s4051_s1 + $0x161] sm:$0x8] %vm3_vm0, %v184_v10  }
  0x8f   :  { %1389 = vst.msk [vmem:[%s4051_s1 + $0x180] sm:$0x10] %vm3_vm0, %v184_v10   ;;  %1390 = vst.msk [vmem:[%s4051_s1 + $0x19f] sm:$0x20] %vm3_vm0, %v184_v10  }
  0x90   :  { %1391 = vst.msk [vmem:[%s4051_s1 + $0x1be] sm:$0x40] %vm3_vm0, %v184_v10   ;;  %1392 = vst.msk [vmem:[%s4051_s1 + $0x1dd] sm:$0x80] %vm3_vm0, %v184_v10   ;;  %v348_v18 = vpop.permute.xlu1 %347   ;;  %v327_v19 = vpop.permute.xlu0 %326  }
  0x91   :  { %1376 = vst.msk [vmem:[%s4051_s1 + $0x4] sm:$0x1] %vm3_vm0, %v163_v11   ;;  %1377 = vst.msk [vmem:[%s4051_s1 + $0x23] sm:$0x2] %vm3_vm0, %v163_v11  }
  0x92   :  { %1378 = vst.msk [vmem:[%s4051_s1 + $0x42] sm:$0x4] %vm3_vm0, %v163_v11   ;;  %1379 = vst.msk [vmem:[%s4051_s1 + $0x61] sm:$0x8] %vm3_vm0, %v163_v11  }
  0x93   :  { %1380 = vst.msk [vmem:[%s4051_s1 + $0x80] sm:$0x10] %vm3_vm0, %v163_v11   ;;  %1381 = vst.msk [vmem:[%s4051_s1 + $0x9f] sm:$0x20] %vm3_vm0, %v163_v11  }
  0x94   :  { %1382 = vst.msk [vmem:[%s4051_s1 + $0xbe] sm:$0x40] %vm3_vm0, %v163_v11   ;;  %1383 = vst.msk [vmem:[%s4051_s1 + $0xdd] sm:$0x80] %vm3_vm0, %v163_v11   ;;  %v389_v20 = vpop.permute.xlu1 %388   ;;  %v368_v21 = vpop.permute.xlu0 %367  }
  0x95   :  { %1402 = vst.msk [vmem:[%s4051_s1 + $0x105] sm:$0x1] %vm3_vm0, %v225_v12   ;;  %1403 = vst.msk [vmem:[%s4051_s1 + $0x124] sm:$0x2] %vm3_vm0, %v225_v12  }
  0x96   :  { %1404 = vst.msk [vmem:[%s4051_s1 + $0x143] sm:$0x4] %vm3_vm0, %v225_v12   ;;  %1405 = vst.msk [vmem:[%s4051_s1 + $0x162] sm:$0x8] %vm3_vm0, %v225_v12  }
  0x97   :  { %1406 = vst.msk [vmem:[%s4051_s1 + $0x181] sm:$0x10] %vm3_vm0, %v225_v12   ;;  %1407 = vst.msk [vmem:[%s4051_s1 + $0x1a0] sm:$0x20] %vm3_vm0, %v225_v12  }
  0x98   :  { %1408 = vst.msk [vmem:[%s4051_s1 + $0x1bf] sm:$0x40] %vm3_vm0, %v225_v12   ;;  %1409 = vst.msk [vmem:[%s4051_s1 + $0x1de] sm:$0x80] %vm3_vm0, %v225_v12   ;;  %v430_v22 = vpop.permute.xlu1 %429   ;;  %v409_v23 = vpop.permute.xlu0 %408  }
  0x99   :  { %1393 = vst.msk [vmem:[%s4051_s1 + $0x5] sm:$0x1] %vm3_vm0, %v204_v13   ;;  %1394 = vst.msk [vmem:[%s4051_s1 + $0x24] sm:$0x2] %vm3_vm0, %v204_v13  }
  0x9a   :  { %1395 = vst.msk [vmem:[%s4051_s1 + $0x43] sm:$0x4] %vm3_vm0, %v204_v13   ;;  %1396 = vst.msk [vmem:[%s4051_s1 + $0x62] sm:$0x8] %vm3_vm0, %v204_v13  }
  0x9b   :  { %1397 = vst.msk [vmem:[%s4051_s1 + $0x81] sm:$0x10] %vm3_vm0, %v204_v13   ;;  %1398 = vst.msk [vmem:[%s4051_s1 + $0xa0] sm:$0x20] %vm3_vm0, %v204_v13  }
  0x9c   :  { %1399 = vst.msk [vmem:[%s4051_s1 + $0xbf] sm:$0x40] %vm3_vm0, %v204_v13   ;;  %1400 = vst.msk [vmem:[%s4051_s1 + $0xde] sm:$0x80] %vm3_vm0, %v204_v13   ;;  %v471_v24 = vpop.permute.xlu1 %470   ;;  %v450_v25 = vpop.permute.xlu0 %449  }
  0x9d   :  { %1419 = vst.msk [vmem:[%s4051_s1 + $0x106] sm:$0x1] %vm3_vm0, %v266_v14   ;;  %1420 = vst.msk [vmem:[%s4051_s1 + $0x125] sm:$0x2] %vm3_vm0, %v266_v14  }
  0x9e   :  { %1421 = vst.msk [vmem:[%s4051_s1 + $0x144] sm:$0x4] %vm3_vm0, %v266_v14   ;;  %1422 = vst.msk [vmem:[%s4051_s1 + $0x163] sm:$0x8] %vm3_vm0, %v266_v14  }
  0x9f   :  { %1423 = vst.msk [vmem:[%s4051_s1 + $0x182] sm:$0x10] %vm3_vm0, %v266_v14   ;;  %1424 = vst.msk [vmem:[%s4051_s1 + $0x1a1] sm:$0x20] %vm3_vm0, %v266_v14  }
  0xa0   :  { %1425 = vst.msk [vmem:[%s4051_s1 + $0x1c0] sm:$0x40] %vm3_vm0, %v266_v14   ;;  %1426 = vst.msk [vmem:[%s4051_s1 + $0x1df] sm:$0x80] %vm3_vm0, %v266_v14   ;;  %v512_v26 = vpop.permute.xlu1 %511   ;;  %v491_v27 = vpop.permute.xlu0 %490  }
  0xa1   :  { %1410 = vst.msk [vmem:[%s4051_s1 + $0x6] sm:$0x1] %vm3_vm0, %v245_v15   ;;  %1411 = vst.msk [vmem:[%s4051_s1 + $0x25] sm:$0x2] %vm3_vm0, %v245_v15  }
  0xa2   :  { %1412 = vst.msk [vmem:[%s4051_s1 + $0x44] sm:$0x4] %vm3_vm0, %v245_v15   ;;  %1413 = vst.msk [vmem:[%s4051_s1 + $0x63] sm:$0x8] %vm3_vm0, %v245_v15  }
  0xa3   :  { %1414 = vst.msk [vmem:[%s4051_s1 + $0x82] sm:$0x10] %vm3_vm0, %v245_v15   ;;  %1415 = vst.msk [vmem:[%s4051_s1 + $0xa1] sm:$0x20] %vm3_vm0, %v245_v15  }
  0xa4   :  { %1416 = vst.msk [vmem:[%s4051_s1 + $0xc0] sm:$0x40] %vm3_vm0, %v245_v15   ;;  %1417 = vst.msk [vmem:[%s4051_s1 + $0xdf] sm:$0x80] %vm3_vm0, %v245_v15   ;;  %v553_v28 = vpop.permute.xlu1 %552   ;;  %v532_v29 = vpop.permute.xlu0 %531  }
  0xa5   :  { %1436 = vst.msk [vmem:[%s4051_s1 + $0x107] sm:$0x1] %vm3_vm0, %v307_v16   ;;  %1437 = vst.msk [vmem:[%s4051_s1 + $0x126] sm:$0x2] %vm3_vm0, %v307_v16  }
  0xa6   :  { %1438 = vst.msk [vmem:[%s4051_s1 + $0x145] sm:$0x4] %vm3_vm0, %v307_v16   ;;  %1439 = vst.msk [vmem:[%s4051_s1 + $0x164] sm:$0x8] %vm3_vm0, %v307_v16  }
  0xa7   :  { %1440 = vst.msk [vmem:[%s4051_s1 + $0x183] sm:$0x10] %vm3_vm0, %v307_v16   ;;  %1441 = vst.msk [vmem:[%s4051_s1 + $0x1a2] sm:$0x20] %vm3_vm0, %v307_v16  }
  0xa8   :  { %1442 = vst.msk [vmem:[%s4051_s1 + $0x1c1] sm:$0x40] %vm3_vm0, %v307_v16   ;;  %1443 = vst.msk [vmem:[%s4051_s1 + $0x1e0] sm:$0x80] %vm3_vm0, %v307_v16   ;;  %v594_v30 = vpop.permute.xlu1 %593   ;;  %v573_v31 = vpop.permute.xlu0 %572  }
  0xa9   :  { %1427 = vst.msk [vmem:[%s4051_s1 + $0x7] sm:$0x1] %vm3_vm0, %v286_v17   ;;  %1428 = vst.msk [vmem:[%s4051_s1 + $0x26] sm:$0x2] %vm3_vm0, %v286_v17  }
  0xaa   :  { %1429 = vst.msk [vmem:[%s4051_s1 + $0x45] sm:$0x4] %vm3_vm0, %v286_v17   ;;  %1430 = vst.msk [vmem:[%s4051_s1 + $0x64] sm:$0x8] %vm3_vm0, %v286_v17  }
  0xab   :  { %1431 = vst.msk [vmem:[%s4051_s1 + $0x83] sm:$0x10] %vm3_vm0, %v286_v17   ;;  %1432 = vst.msk [vmem:[%s4051_s1 + $0xa2] sm:$0x20] %vm3_vm0, %v286_v17  }
  0xac   :  { %1433 = vst.msk [vmem:[%s4051_s1 + $0xc1] sm:$0x40] %vm3_vm0, %v286_v17   ;;  %1434 = vst.msk [vmem:[%s4051_s1 + $0xe0] sm:$0x80] %vm3_vm0, %v286_v17   ;;  %v635_v32 = vpop.permute.xlu1 %634   ;;  %v614_v33 = vpop.permute.xlu0 %613  }
  0xad   :  { %1453 = vst.msk [vmem:[%s4051_s1 + $0x108] sm:$0x1] %vm3_vm0, %v348_v18   ;;  %1454 = vst.msk [vmem:[%s4051_s1 + $0x127] sm:$0x2] %vm3_vm0, %v348_v18  }
  0xae   :  { %1455 = vst.msk [vmem:[%s4051_s1 + $0x146] sm:$0x4] %vm3_vm0, %v348_v18   ;;  %1456 = vst.msk [vmem:[%s4051_s1 + $0x165] sm:$0x8] %vm3_vm0, %v348_v18  }
  0xaf   :  { %1457 = vst.msk [vmem:[%s4051_s1 + $0x184] sm:$0x10] %vm3_vm0, %v348_v18   ;;  %1458 = vst.msk [vmem:[%s4051_s1 + $0x1a3] sm:$0x20] %vm3_vm0, %v348_v18  }
  0xb0   :  { %1459 = vst.msk [vmem:[%s4051_s1 + $0x1c2] sm:$0x40] %vm3_vm0, %v348_v18   ;;  %1460 = vst.msk [vmem:[%s4051_s1 + $0x1e1] sm:$0x80] %vm3_vm0, %v348_v18   ;;  %v676_v34 = vpop.permute.xlu1 %675   ;;  %v655_v35 = vpop.permute.xlu0 %654  }
  0xb1   :  { %1444 = vst.msk [vmem:[%s4051_s1 + $0x8] sm:$0x1] %vm3_vm0, %v327_v19   ;;  %1445 = vst.msk [vmem:[%s4051_s1 + $0x27] sm:$0x2] %vm3_vm0, %v327_v19  }
  0xb2   :  { %1446 = vst.msk [vmem:[%s4051_s1 + $0x46] sm:$0x4] %vm3_vm0, %v327_v19   ;;  %1447 = vst.msk [vmem:[%s4051_s1 + $0x65] sm:$0x8] %vm3_vm0, %v327_v19  }
  0xb3   :  { %1448 = vst.msk [vmem:[%s4051_s1 + $0x84] sm:$0x10] %vm3_vm0, %v327_v19   ;;  %1449 = vst.msk [vmem:[%s4051_s1 + $0xa3] sm:$0x20] %vm3_vm0, %v327_v19  }
  0xb4   :  { %1450 = vst.msk [vmem:[%s4051_s1 + $0xc2] sm:$0x40] %vm3_vm0, %v327_v19   ;;  %1451 = vst.msk [vmem:[%s4051_s1 + $0xe1] sm:$0x80] %vm3_vm0, %v327_v19   ;;  %v717_v36 = vpop.permute.xlu1 %716   ;;  %v696_v37 = vpop.permute.xlu0 %695  }
  0xb5   :  { %1470 = vst.msk [vmem:[%s4051_s1 + $0x109] sm:$0x1] %vm3_vm0, %v389_v20   ;;  %1471 = vst.msk [vmem:[%s4051_s1 + $0x128] sm:$0x2] %vm3_vm0, %v389_v20  }
  0xb6   :  { %1472 = vst.msk [vmem:[%s4051_s1 + $0x147] sm:$0x4] %vm3_vm0, %v389_v20   ;;  %1473 = vst.msk [vmem:[%s4051_s1 + $0x166] sm:$0x8] %vm3_vm0, %v389_v20  }
  0xb7   :  { %1474 = vst.msk [vmem:[%s4051_s1 + $0x185] sm:$0x10] %vm3_vm0, %v389_v20   ;;  %1475 = vst.msk [vmem:[%s4051_s1 + $0x1a4] sm:$0x20] %vm3_vm0, %v389_v20  }
  0xb8   :  { %1476 = vst.msk [vmem:[%s4051_s1 + $0x1c3] sm:$0x40] %vm3_vm0, %v389_v20   ;;  %1477 = vst.msk [vmem:[%s4051_s1 + $0x1e2] sm:$0x80] %vm3_vm0, %v389_v20   ;;  %v758_v38 = vpop.permute.xlu1 %757   ;;  %v737_v39 = vpop.permute.xlu0 %736  }
  0xb9   :  { %1461 = vst.msk [vmem:[%s4051_s1 + $0x9] sm:$0x1] %vm3_vm0, %v368_v21   ;;  %1462 = vst.msk [vmem:[%s4051_s1 + $0x28] sm:$0x2] %vm3_vm0, %v368_v21  }
  0xba   :  { %1463 = vst.msk [vmem:[%s4051_s1 + $0x47] sm:$0x4] %vm3_vm0, %v368_v21   ;;  %1464 = vst.msk [vmem:[%s4051_s1 + $0x66] sm:$0x8] %vm3_vm0, %v368_v21  }
  0xbb   :  { %1465 = vst.msk [vmem:[%s4051_s1 + $0x85] sm:$0x10] %vm3_vm0, %v368_v21   ;;  %1466 = vst.msk [vmem:[%s4051_s1 + $0xa4] sm:$0x20] %vm3_vm0, %v368_v21  }
  0xbc   :  { %1467 = vst.msk [vmem:[%s4051_s1 + $0xc3] sm:$0x40] %vm3_vm0, %v368_v21   ;;  %1468 = vst.msk [vmem:[%s4051_s1 + $0xe2] sm:$0x80] %vm3_vm0, %v368_v21   ;;  %v799_v40 = vpop.permute.xlu1 %798   ;;  %v778_v41 = vpop.permute.xlu0 %777  }
  0xbd   :  { %1487 = vst.msk [vmem:[%s4051_s1 + $0x10a] sm:$0x1] %vm3_vm0, %v430_v22   ;;  %1488 = vst.msk [vmem:[%s4051_s1 + $0x129] sm:$0x2] %vm3_vm0, %v430_v22  }
  0xbe   :  { %1489 = vst.msk [vmem:[%s4051_s1 + $0x148] sm:$0x4] %vm3_vm0, %v430_v22   ;;  %1490 = vst.msk [vmem:[%s4051_s1 + $0x167] sm:$0x8] %vm3_vm0, %v430_v22  }
  0xbf   :  { %1491 = vst.msk [vmem:[%s4051_s1 + $0x186] sm:$0x10] %vm3_vm0, %v430_v22   ;;  %1492 = vst.msk [vmem:[%s4051_s1 + $0x1a5] sm:$0x20] %vm3_vm0, %v430_v22  }
  0xc0   :  { %1493 = vst.msk [vmem:[%s4051_s1 + $0x1c4] sm:$0x40] %vm3_vm0, %v430_v22   ;;  %1494 = vst.msk [vmem:[%s4051_s1 + $0x1e3] sm:$0x80] %vm3_vm0, %v430_v22   ;;  %v840_v42 = vpop.permute.xlu1 %839   ;;  %v819_v43 = vpop.permute.xlu0 %818  }
  0xc1   :  { %1478 = vst.msk [vmem:[%s4051_s1 + $0xa] sm:$0x1] %vm3_vm0, %v409_v23   ;;  %1479 = vst.msk [vmem:[%s4051_s1 + $0x29] sm:$0x2] %vm3_vm0, %v409_v23  }
  0xc2   :  { %1480 = vst.msk [vmem:[%s4051_s1 + $0x48] sm:$0x4] %vm3_vm0, %v409_v23   ;;  %1481 = vst.msk [vmem:[%s4051_s1 + $0x67] sm:$0x8] %vm3_vm0, %v409_v23  }
  0xc3   :  { %1482 = vst.msk [vmem:[%s4051_s1 + $0x86] sm:$0x10] %vm3_vm0, %v409_v23   ;;  %1483 = vst.msk [vmem:[%s4051_s1 + $0xa5] sm:$0x20] %vm3_vm0, %v409_v23  }
  0xc4   :  { %1484 = vst.msk [vmem:[%s4051_s1 + $0xc4] sm:$0x40] %vm3_vm0, %v409_v23   ;;  %1485 = vst.msk [vmem:[%s4051_s1 + $0xe3] sm:$0x80] %vm3_vm0, %v409_v23   ;;  %v881_v44 = vpop.permute.xlu1 %880   ;;  %v860_v45 = vpop.permute.xlu0 %859  }
  0xc5   :  { %1504 = vst.msk [vmem:[%s4051_s1 + $0x10b] sm:$0x1] %vm3_vm0, %v471_v24   ;;  %1505 = vst.msk [vmem:[%s4051_s1 + $0x12a] sm:$0x2] %vm3_vm0, %v471_v24  }
  0xc6   :  { %1506 = vst.msk [vmem:[%s4051_s1 + $0x149] sm:$0x4] %vm3_vm0, %v471_v24   ;;  %1507 = vst.msk [vmem:[%s4051_s1 + $0x168] sm:$0x8] %vm3_vm0, %v471_v24  }
  0xc7   :  { %1508 = vst.msk [vmem:[%s4051_s1 + $0x187] sm:$0x10] %vm3_vm0, %v471_v24   ;;  %1509 = vst.msk [vmem:[%s4051_s1 + $0x1a6] sm:$0x20] %vm3_vm0, %v471_v24  }
  0xc8   :  { %1510 = vst.msk [vmem:[%s4051_s1 + $0x1c5] sm:$0x40] %vm3_vm0, %v471_v24   ;;  %1511 = vst.msk [vmem:[%s4051_s1 + $0x1e4] sm:$0x80] %vm3_vm0, %v471_v24   ;;  %v922_v46 = vpop.permute.xlu1 %921   ;;  %v901_v47 = vpop.permute.xlu0 %900  }
  0xc9   :  { %1495 = vst.msk [vmem:[%s4051_s1 + $0xb] sm:$0x1] %vm3_vm0, %v450_v25   ;;  %1496 = vst.msk [vmem:[%s4051_s1 + $0x2a] sm:$0x2] %vm3_vm0, %v450_v25  }
  0xca   :  { %1497 = vst.msk [vmem:[%s4051_s1 + $0x49] sm:$0x4] %vm3_vm0, %v450_v25   ;;  %1498 = vst.msk [vmem:[%s4051_s1 + $0x68] sm:$0x8] %vm3_vm0, %v450_v25  }
  0xcb   :  { %1499 = vst.msk [vmem:[%s4051_s1 + $0x87] sm:$0x10] %vm3_vm0, %v450_v25   ;;  %1500 = vst.msk [vmem:[%s4051_s1 + $0xa6] sm:$0x20] %vm3_vm0, %v450_v25  }
  0xcc   :  { %1501 = vst.msk [vmem:[%s4051_s1 + $0xc5] sm:$0x40] %vm3_vm0, %v450_v25   ;;  %1502 = vst.msk [vmem:[%s4051_s1 + $0xe4] sm:$0x80] %vm3_vm0, %v450_v25   ;;  %v963_v48 = vpop.permute.xlu1 %962   ;;  %v942_v49 = vpop.permute.xlu0 %941  }
  0xcd   :  { %1521 = vst.msk [vmem:[%s4051_s1 + $0x10c] sm:$0x1] %vm3_vm0, %v512_v26   ;;  %1522 = vst.msk [vmem:[%s4051_s1 + $0x12b] sm:$0x2] %vm3_vm0, %v512_v26  }
  0xce   :  { %1523 = vst.msk [vmem:[%s4051_s1 + $0x14a] sm:$0x4] %vm3_vm0, %v512_v26   ;;  %1524 = vst.msk [vmem:[%s4051_s1 + $0x169] sm:$0x8] %vm3_vm0, %v512_v26  }
  0xcf   :  { %1525 = vst.msk [vmem:[%s4051_s1 + $0x188] sm:$0x10] %vm3_vm0, %v512_v26   ;;  %1526 = vst.msk [vmem:[%s4051_s1 + $0x1a7] sm:$0x20] %vm3_vm0, %v512_v26  }
  0xd0   :  { %1527 = vst.msk [vmem:[%s4051_s1 + $0x1c6] sm:$0x40] %vm3_vm0, %v512_v26   ;;  %1528 = vst.msk [vmem:[%s4051_s1 + $0x1e5] sm:$0x80] %vm3_vm0, %v512_v26   ;;  %v1004_v50 = vpop.permute.xlu1 %1003   ;;  %v983_v51 = vpop.permute.xlu0 %982  }
  0xd1   :  { %1512 = vst.msk [vmem:[%s4051_s1 + $0xc] sm:$0x1] %vm3_vm0, %v491_v27   ;;  %1513 = vst.msk [vmem:[%s4051_s1 + $0x2b] sm:$0x2] %vm3_vm0, %v491_v27  }
  0xd2   :  { %1514 = vst.msk [vmem:[%s4051_s1 + $0x4a] sm:$0x4] %vm3_vm0, %v491_v27   ;;  %1515 = vst.msk [vmem:[%s4051_s1 + $0x69] sm:$0x8] %vm3_vm0, %v491_v27  }
  0xd3   :  { %1516 = vst.msk [vmem:[%s4051_s1 + $0x88] sm:$0x10] %vm3_vm0, %v491_v27   ;;  %1517 = vst.msk [vmem:[%s4051_s1 + $0xa7] sm:$0x20] %vm3_vm0, %v491_v27  }
  0xd4   :  { %1518 = vst.msk [vmem:[%s4051_s1 + $0xc6] sm:$0x40] %vm3_vm0, %v491_v27   ;;  %1519 = vst.msk [vmem:[%s4051_s1 + $0xe5] sm:$0x80] %vm3_vm0, %v491_v27   ;;  %v1045_v52 = vpop.permute.xlu1 %1044   ;;  %v1024_v53 = vpop.permute.xlu0 %1023  }
  0xd5   :  { %1538 = vst.msk [vmem:[%s4051_s1 + $0x10d] sm:$0x1] %vm3_vm0, %v553_v28   ;;  %1539 = vst.msk [vmem:[%s4051_s1 + $0x12c] sm:$0x2] %vm3_vm0, %v553_v28  }
  0xd6   :  { %1540 = vst.msk [vmem:[%s4051_s1 + $0x14b] sm:$0x4] %vm3_vm0, %v553_v28   ;;  %1541 = vst.msk [vmem:[%s4051_s1 + $0x16a] sm:$0x8] %vm3_vm0, %v553_v28  }
  0xd7   :  { %1542 = vst.msk [vmem:[%s4051_s1 + $0x189] sm:$0x10] %vm3_vm0, %v553_v28   ;;  %1543 = vst.msk [vmem:[%s4051_s1 + $0x1a8] sm:$0x20] %vm3_vm0, %v553_v28  }
  0xd8   :  { %1544 = vst.msk [vmem:[%s4051_s1 + $0x1c7] sm:$0x40] %vm3_vm0, %v553_v28   ;;  %1545 = vst.msk [vmem:[%s4051_s1 + $0x1e6] sm:$0x80] %vm3_vm0, %v553_v28   ;;  %v1086_v54 = vpop.permute.xlu1 %1085   ;;  %v1065_v55 = vpop.permute.xlu0 %1064  }
  0xd9   :  { %1529 = vst.msk [vmem:[%s4051_s1 + $0xd] sm:$0x1] %vm3_vm0, %v532_v29   ;;  %1530 = vst.msk [vmem:[%s4051_s1 + $0x2c] sm:$0x2] %vm3_vm0, %v532_v29  }
  0xda   :  { %1531 = vst.msk [vmem:[%s4051_s1 + $0x4b] sm:$0x4] %vm3_vm0, %v532_v29   ;;  %1532 = vst.msk [vmem:[%s4051_s1 + $0x6a] sm:$0x8] %vm3_vm0, %v532_v29  }
  0xdb   :  { %1533 = vst.msk [vmem:[%s4051_s1 + $0x89] sm:$0x10] %vm3_vm0, %v532_v29   ;;  %1534 = vst.msk [vmem:[%s4051_s1 + $0xa8] sm:$0x20] %vm3_vm0, %v532_v29  }
  0xdc   :  { %1535 = vst.msk [vmem:[%s4051_s1 + $0xc7] sm:$0x40] %vm3_vm0, %v532_v29   ;;  %1536 = vst.msk [vmem:[%s4051_s1 + $0xe6] sm:$0x80] %vm3_vm0, %v532_v29   ;;  %v1127_v56 = vpop.permute.xlu1 %1126   ;;  %v1106_v57 = vpop.permute.xlu0 %1105  }
  0xdd   :  { %1555 = vst.msk [vmem:[%s4051_s1 + $0x10e] sm:$0x1] %vm3_vm0, %v594_v30   ;;  %1556 = vst.msk [vmem:[%s4051_s1 + $0x12d] sm:$0x2] %vm3_vm0, %v594_v30  }
  0xde   :  { %1557 = vst.msk [vmem:[%s4051_s1 + $0x14c] sm:$0x4] %vm3_vm0, %v594_v30   ;;  %1558 = vst.msk [vmem:[%s4051_s1 + $0x16b] sm:$0x8] %vm3_vm0, %v594_v30  }
  0xdf   :  { %1559 = vst.msk [vmem:[%s4051_s1 + $0x18a] sm:$0x10] %vm3_vm0, %v594_v30   ;;  %1560 = vst.msk [vmem:[%s4051_s1 + $0x1a9] sm:$0x20] %vm3_vm0, %v594_v30  }
  0xe0   :  { %1561 = vst.msk [vmem:[%s4051_s1 + $0x1c8] sm:$0x40] %vm3_vm0, %v594_v30   ;;  %1562 = vst.msk [vmem:[%s4051_s1 + $0x1e7] sm:$0x80] %vm3_vm0, %v594_v30   ;;  %v1168_v58 = vpop.permute.xlu1 %1167   ;;  %v1147_v59 = vpop.permute.xlu0 %1146  }
  0xe1   :  { %1546 = vst.msk [vmem:[%s4051_s1 + $0xe] sm:$0x1] %vm3_vm0, %v573_v31   ;;  %1547 = vst.msk [vmem:[%s4051_s1 + $0x2d] sm:$0x2] %vm3_vm0, %v573_v31  }
  0xe2   :  { %1548 = vst.msk [vmem:[%s4051_s1 + $0x4c] sm:$0x4] %vm3_vm0, %v573_v31   ;;  %1549 = vst.msk [vmem:[%s4051_s1 + $0x6b] sm:$0x8] %vm3_vm0, %v573_v31  }
  0xe3   :  { %1550 = vst.msk [vmem:[%s4051_s1 + $0x8a] sm:$0x10] %vm3_vm0, %v573_v31   ;;  %1551 = vst.msk [vmem:[%s4051_s1 + $0xa9] sm:$0x20] %vm3_vm0, %v573_v31  }
  0xe4   :  { %1552 = vst.msk [vmem:[%s4051_s1 + $0xc8] sm:$0x40] %vm3_vm0, %v573_v31   ;;  %1553 = vst.msk [vmem:[%s4051_s1 + $0xe7] sm:$0x80] %vm3_vm0, %v573_v31   ;;  %v1209_v60 = vpop.permute.xlu1 %1208   ;;  %v1188_v61 = vpop.permute.xlu0 %1187  }
  0xe5   :  { %1572 = vst.msk [vmem:[%s4051_s1 + $0x10f] sm:$0x1] %vm3_vm0, %v635_v32   ;;  %1573 = vst.msk [vmem:[%s4051_s1 + $0x12e] sm:$0x2] %vm3_vm0, %v635_v32  }
  0xe6   :  { %1574 = vst.msk [vmem:[%s4051_s1 + $0x14d] sm:$0x4] %vm3_vm0, %v635_v32   ;;  %1575 = vst.msk [vmem:[%s4051_s1 + $0x16c] sm:$0x8] %vm3_vm0, %v635_v32  }
  0xe7   :  { %1576 = vst.msk [vmem:[%s4051_s1 + $0x18b] sm:$0x10] %vm3_vm0, %v635_v32   ;;  %1577 = vst.msk [vmem:[%s4051_s1 + $0x1aa] sm:$0x20] %vm3_vm0, %v635_v32  }
  0xe8   :  { %1578 = vst.msk [vmem:[%s4051_s1 + $0x1c9] sm:$0x40] %vm3_vm0, %v635_v32   ;;  %1579 = vst.msk [vmem:[%s4051_s1 + $0x1e8] sm:$0x80] %vm3_vm0, %v635_v32   ;;  %v1250_v62 = vpop.permute.xlu1 %1249   ;;  %v1229_v63 = vpop.permute.xlu0 %1228  }
  0xe9   :  { %1563 = vst.msk [vmem:[%s4051_s1 + $0xf] sm:$0x1] %vm3_vm0, %v614_v33   ;;  %1564 = vst.msk [vmem:[%s4051_s1 + $0x2e] sm:$0x2] %vm3_vm0, %v614_v33  }
  0xea   :  { %1565 = vst.msk [vmem:[%s4051_s1 + $0x4d] sm:$0x4] %vm3_vm0, %v614_v33   ;;  %1566 = vst.msk [vmem:[%s4051_s1 + $0x6c] sm:$0x8] %vm3_vm0, %v614_v33  }
  0xeb   :  { %1567 = vst.msk [vmem:[%s4051_s1 + $0x8b] sm:$0x10] %vm3_vm0, %v614_v33   ;;  %1568 = vst.msk [vmem:[%s4051_s1 + $0xaa] sm:$0x20] %vm3_vm0, %v614_v33  }
  0xec   :  { %1569 = vst.msk [vmem:[%s4051_s1 + $0xc9] sm:$0x40] %vm3_vm0, %v614_v33   ;;  %1570 = vst.msk [vmem:[%s4051_s1 + $0xe8] sm:$0x80] %vm3_vm0, %v614_v33   ;;  %v1291_v0 = vpop.permute.xlu1 %1290   ;;  %v1270_v1 = vpop.permute.xlu0 %1269  }
  0xed   :  { %1589 = vst.msk [vmem:[%s4051_s1 + $0x110] sm:$0x1] %vm3_vm0, %v676_v34   ;;  %1590 = vst.msk [vmem:[%s4051_s1 + $0x12f] sm:$0x2] %vm3_vm0, %v676_v34  }
  0xee   :  { %1591 = vst.msk [vmem:[%s4051_s1 + $0x14e] sm:$0x4] %vm3_vm0, %v676_v34   ;;  %1592 = vst.msk [vmem:[%s4051_s1 + $0x16d] sm:$0x8] %vm3_vm0, %v676_v34  }
  0xef   :  { %1593 = vst.msk [vmem:[%s4051_s1 + $0x18c] sm:$0x10] %vm3_vm0, %v676_v34   ;;  %1594 = vst.msk [vmem:[%s4051_s1 + $0x1ab] sm:$0x20] %vm3_vm0, %v676_v34  }
  0xf0   :  { %1595 = vst.msk [vmem:[%s4051_s1 + $0x1ca] sm:$0x40] %vm3_vm0, %v676_v34   ;;  %1596 = vst.msk [vmem:[%s4051_s1 + $0x1e9] sm:$0x80] %vm3_vm0, %v676_v34  }
  0xf1   :  { %1580 = vst.msk [vmem:[%s4051_s1 + $0x10] sm:$0x1] %vm3_vm0, %v655_v35   ;;  %1581 = vst.msk [vmem:[%s4051_s1 + $0x2f] sm:$0x2] %vm3_vm0, %v655_v35  }
  0xf2   :  { %1582 = vst.msk [vmem:[%s4051_s1 + $0x4e] sm:$0x4] %vm3_vm0, %v655_v35   ;;  %1583 = vst.msk [vmem:[%s4051_s1 + $0x6d] sm:$0x8] %vm3_vm0, %v655_v35  }
  0xf3   :  { %1584 = vst.msk [vmem:[%s4051_s1 + $0x8c] sm:$0x10] %vm3_vm0, %v655_v35   ;;  %1585 = vst.msk [vmem:[%s4051_s1 + $0xab] sm:$0x20] %vm3_vm0, %v655_v35  }
  0xf4   :  { %1586 = vst.msk [vmem:[%s4051_s1 + $0xca] sm:$0x40] %vm3_vm0, %v655_v35   ;;  %1587 = vst.msk [vmem:[%s4051_s1 + $0xe9] sm:$0x80] %vm3_vm0, %v655_v35  }
  0xf5   :  { %1606 = vst.msk [vmem:[%s4051_s1 + $0x111] sm:$0x1] %vm3_vm0, %v717_v36   ;;  %1607 = vst.msk [vmem:[%s4051_s1 + $0x130] sm:$0x2] %vm3_vm0, %v717_v36  }
  0xf6   :  { %1608 = vst.msk [vmem:[%s4051_s1 + $0x14f] sm:$0x4] %vm3_vm0, %v717_v36   ;;  %1609 = vst.msk [vmem:[%s4051_s1 + $0x16e] sm:$0x8] %vm3_vm0, %v717_v36  }
  0xf7   :  { %1610 = vst.msk [vmem:[%s4051_s1 + $0x18d] sm:$0x10] %vm3_vm0, %v717_v36   ;;  %1611 = vst.msk [vmem:[%s4051_s1 + $0x1ac] sm:$0x20] %vm3_vm0, %v717_v36  }
  0xf8   :  { %1612 = vst.msk [vmem:[%s4051_s1 + $0x1cb] sm:$0x40] %vm3_vm0, %v717_v36   ;;  %1613 = vst.msk [vmem:[%s4051_s1 + $0x1ea] sm:$0x80] %vm3_vm0, %v717_v36  }
  0xf9   :  { %1597 = vst.msk [vmem:[%s4051_s1 + $0x11] sm:$0x1] %vm3_vm0, %v696_v37   ;;  %1598 = vst.msk [vmem:[%s4051_s1 + $0x30] sm:$0x2] %vm3_vm0, %v696_v37  }
  0xfa   :  { %1599 = vst.msk [vmem:[%s4051_s1 + $0x4f] sm:$0x4] %vm3_vm0, %v696_v37   ;;  %1600 = vst.msk [vmem:[%s4051_s1 + $0x6e] sm:$0x8] %vm3_vm0, %v696_v37  }
  0xfb   :  { %1601 = vst.msk [vmem:[%s4051_s1 + $0x8d] sm:$0x10] %vm3_vm0, %v696_v37   ;;  %1602 = vst.msk [vmem:[%s4051_s1 + $0xac] sm:$0x20] %vm3_vm0, %v696_v37  }
  0xfc   :  { %1603 = vst.msk [vmem:[%s4051_s1 + $0xcb] sm:$0x40] %vm3_vm0, %v696_v37   ;;  %1604 = vst.msk [vmem:[%s4051_s1 + $0xea] sm:$0x80] %vm3_vm0, %v696_v37  }
  0xfd   :  { %1623 = vst.msk [vmem:[%s4051_s1 + $0x112] sm:$0x1] %vm3_vm0, %v758_v38   ;;  %1624 = vst.msk [vmem:[%s4051_s1 + $0x131] sm:$0x2] %vm3_vm0, %v758_v38  }
  0xfe   :  { %1625 = vst.msk [vmem:[%s4051_s1 + $0x150] sm:$0x4] %vm3_vm0, %v758_v38   ;;  %1626 = vst.msk [vmem:[%s4051_s1 + $0x16f] sm:$0x8] %vm3_vm0, %v758_v38  }
  0xff   :  { %1627 = vst.msk [vmem:[%s4051_s1 + $0x18e] sm:$0x10] %vm3_vm0, %v758_v38   ;;  %1628 = vst.msk [vmem:[%s4051_s1 + $0x1ad] sm:$0x20] %vm3_vm0, %v758_v38  }
 0x100   :  { %1629 = vst.msk [vmem:[%s4051_s1 + $0x1cc] sm:$0x40] %vm3_vm0, %v758_v38   ;;  %1630 = vst.msk [vmem:[%s4051_s1 + $0x1eb] sm:$0x80] %vm3_vm0, %v758_v38  }
 0x101   :  { %1614 = vst.msk [vmem:[%s4051_s1 + $0x12] sm:$0x1] %vm3_vm0, %v737_v39   ;;  %1615 = vst.msk [vmem:[%s4051_s1 + $0x31] sm:$0x2] %vm3_vm0, %v737_v39  }
 0x102   :  { %1616 = vst.msk [vmem:[%s4051_s1 + $0x50] sm:$0x4] %vm3_vm0, %v737_v39   ;;  %1617 = vst.msk [vmem:[%s4051_s1 + $0x6f] sm:$0x8] %vm3_vm0, %v737_v39  }
 0x103   :  { %1618 = vst.msk [vmem:[%s4051_s1 + $0x8e] sm:$0x10] %vm3_vm0, %v737_v39   ;;  %1619 = vst.msk [vmem:[%s4051_s1 + $0xad] sm:$0x20] %vm3_vm0, %v737_v39  }
 0x104   :  { %1620 = vst.msk [vmem:[%s4051_s1 + $0xcc] sm:$0x40] %vm3_vm0, %v737_v39   ;;  %1621 = vst.msk [vmem:[%s4051_s1 + $0xeb] sm:$0x80] %vm3_vm0, %v737_v39  }
 0x105   :  { %1640 = vst.msk [vmem:[%s4051_s1 + $0x113] sm:$0x1] %vm3_vm0, %v799_v40   ;;  %1641 = vst.msk [vmem:[%s4051_s1 + $0x132] sm:$0x2] %vm3_vm0, %v799_v40  }
 0x106   :  { %1642 = vst.msk [vmem:[%s4051_s1 + $0x151] sm:$0x4] %vm3_vm0, %v799_v40   ;;  %1643 = vst.msk [vmem:[%s4051_s1 + $0x170] sm:$0x8] %vm3_vm0, %v799_v40  }
 0x107   :  { %1644 = vst.msk [vmem:[%s4051_s1 + $0x18f] sm:$0x10] %vm3_vm0, %v799_v40   ;;  %1645 = vst.msk [vmem:[%s4051_s1 + $0x1ae] sm:$0x20] %vm3_vm0, %v799_v40  }
 0x108   :  { %1646 = vst.msk [vmem:[%s4051_s1 + $0x1cd] sm:$0x40] %vm3_vm0, %v799_v40   ;;  %1647 = vst.msk [vmem:[%s4051_s1 + $0x1ec] sm:$0x80] %vm3_vm0, %v799_v40  }
 0x109   :  { %1631 = vst.msk [vmem:[%s4051_s1 + $0x13] sm:$0x1] %vm3_vm0, %v778_v41   ;;  %1632 = vst.msk [vmem:[%s4051_s1 + $0x32] sm:$0x2] %vm3_vm0, %v778_v41  }
 0x10a   :  { %1633 = vst.msk [vmem:[%s4051_s1 + $0x51] sm:$0x4] %vm3_vm0, %v778_v41   ;;  %1634 = vst.msk [vmem:[%s4051_s1 + $0x70] sm:$0x8] %vm3_vm0, %v778_v41  }
 0x10b   :  { %1635 = vst.msk [vmem:[%s4051_s1 + $0x8f] sm:$0x10] %vm3_vm0, %v778_v41   ;;  %1636 = vst.msk [vmem:[%s4051_s1 + $0xae] sm:$0x20] %vm3_vm0, %v778_v41  }
 0x10c   :  { %1637 = vst.msk [vmem:[%s4051_s1 + $0xcd] sm:$0x40] %vm3_vm0, %v778_v41   ;;  %1638 = vst.msk [vmem:[%s4051_s1 + $0xec] sm:$0x80] %vm3_vm0, %v778_v41  }
 0x10d   :  { %1657 = vst.msk [vmem:[%s4051_s1 + $0x114] sm:$0x1] %vm3_vm0, %v840_v42   ;;  %1658 = vst.msk [vmem:[%s4051_s1 + $0x133] sm:$0x2] %vm3_vm0, %v840_v42  }
 0x10e   :  { %1659 = vst.msk [vmem:[%s4051_s1 + $0x152] sm:$0x4] %vm3_vm0, %v840_v42   ;;  %1660 = vst.msk [vmem:[%s4051_s1 + $0x171] sm:$0x8] %vm3_vm0, %v840_v42  }
 0x10f   :  { %1661 = vst.msk [vmem:[%s4051_s1 + $0x190] sm:$0x10] %vm3_vm0, %v840_v42   ;;  %1662 = vst.msk [vmem:[%s4051_s1 + $0x1af] sm:$0x20] %vm3_vm0, %v840_v42  }
 0x110   :  { %1663 = vst.msk [vmem:[%s4051_s1 + $0x1ce] sm:$0x40] %vm3_vm0, %v840_v42   ;;  %1664 = vst.msk [vmem:[%s4051_s1 + $0x1ed] sm:$0x80] %vm3_vm0, %v840_v42  }
 0x111   :  { %1648 = vst.msk [vmem:[%s4051_s1 + $0x14] sm:$0x1] %vm3_vm0, %v819_v43   ;;  %1649 = vst.msk [vmem:[%s4051_s1 + $0x33] sm:$0x2] %vm3_vm0, %v819_v43  }
 0x112   :  { %1650 = vst.msk [vmem:[%s4051_s1 + $0x52] sm:$0x4] %vm3_vm0, %v819_v43   ;;  %1651 = vst.msk [vmem:[%s4051_s1 + $0x71] sm:$0x8] %vm3_vm0, %v819_v43  }
 0x113   :  { %1652 = vst.msk [vmem:[%s4051_s1 + $0x90] sm:$0x10] %vm3_vm0, %v819_v43   ;;  %1653 = vst.msk [vmem:[%s4051_s1 + $0xaf] sm:$0x20] %vm3_vm0, %v819_v43  }
 0x114   :  { %1654 = vst.msk [vmem:[%s4051_s1 + $0xce] sm:$0x40] %vm3_vm0, %v819_v43   ;;  %1655 = vst.msk [vmem:[%s4051_s1 + $0xed] sm:$0x80] %vm3_vm0, %v819_v43  }
 0x115   :  { %1674 = vst.msk [vmem:[%s4051_s1 + $0x115] sm:$0x1] %vm3_vm0, %v881_v44   ;;  %1675 = vst.msk [vmem:[%s4051_s1 + $0x134] sm:$0x2] %vm3_vm0, %v881_v44  }
 0x116   :  { %1676 = vst.msk [vmem:[%s4051_s1 + $0x153] sm:$0x4] %vm3_vm0, %v881_v44   ;;  %1677 = vst.msk [vmem:[%s4051_s1 + $0x172] sm:$0x8] %vm3_vm0, %v881_v44  }
 0x117   :  { %1678 = vst.msk [vmem:[%s4051_s1 + $0x191] sm:$0x10] %vm3_vm0, %v881_v44   ;;  %1679 = vst.msk [vmem:[%s4051_s1 + $0x1b0] sm:$0x20] %vm3_vm0, %v881_v44  }
 0x118   :  { %1680 = vst.msk [vmem:[%s4051_s1 + $0x1cf] sm:$0x40] %vm3_vm0, %v881_v44   ;;  %1681 = vst.msk [vmem:[%s4051_s1 + $0x1ee] sm:$0x80] %vm3_vm0, %v881_v44  }
 0x119   :  { %1665 = vst.msk [vmem:[%s4051_s1 + $0x15] sm:$0x1] %vm3_vm0, %v860_v45   ;;  %1666 = vst.msk [vmem:[%s4051_s1 + $0x34] sm:$0x2] %vm3_vm0, %v860_v45  }
 0x11a   :  { %1667 = vst.msk [vmem:[%s4051_s1 + $0x53] sm:$0x4] %vm3_vm0, %v860_v45   ;;  %1668 = vst.msk [vmem:[%s4051_s1 + $0x72] sm:$0x8] %vm3_vm0, %v860_v45  }
 0x11b   :  { %1669 = vst.msk [vmem:[%s4051_s1 + $0x91] sm:$0x10] %vm3_vm0, %v860_v45   ;;  %1670 = vst.msk [vmem:[%s4051_s1 + $0xb0] sm:$0x20] %vm3_vm0, %v860_v45  }
 0x11c   :  { %1671 = vst.msk [vmem:[%s4051_s1 + $0xcf] sm:$0x40] %vm3_vm0, %v860_v45   ;;  %1672 = vst.msk [vmem:[%s4051_s1 + $0xee] sm:$0x80] %vm3_vm0, %v860_v45  }
 0x11d   :  { %1691 = vst.msk [vmem:[%s4051_s1 + $0x116] sm:$0x1] %vm3_vm0, %v922_v46   ;;  %1692 = vst.msk [vmem:[%s4051_s1 + $0x135] sm:$0x2] %vm3_vm0, %v922_v46  }
 0x11e   :  { %1693 = vst.msk [vmem:[%s4051_s1 + $0x154] sm:$0x4] %vm3_vm0, %v922_v46   ;;  %1694 = vst.msk [vmem:[%s4051_s1 + $0x173] sm:$0x8] %vm3_vm0, %v922_v46  }
 0x11f   :  { %1695 = vst.msk [vmem:[%s4051_s1 + $0x192] sm:$0x10] %vm3_vm0, %v922_v46   ;;  %1696 = vst.msk [vmem:[%s4051_s1 + $0x1b1] sm:$0x20] %vm3_vm0, %v922_v46  }
 0x120   :  { %1697 = vst.msk [vmem:[%s4051_s1 + $0x1d0] sm:$0x40] %vm3_vm0, %v922_v46   ;;  %1698 = vst.msk [vmem:[%s4051_s1 + $0x1ef] sm:$0x80] %vm3_vm0, %v922_v46  }
 0x121   :  { %1682 = vst.msk [vmem:[%s4051_s1 + $0x16] sm:$0x1] %vm3_vm0, %v901_v47   ;;  %1683 = vst.msk [vmem:[%s4051_s1 + $0x35] sm:$0x2] %vm3_vm0, %v901_v47  }
 0x122   :  { %1684 = vst.msk [vmem:[%s4051_s1 + $0x54] sm:$0x4] %vm3_vm0, %v901_v47   ;;  %1685 = vst.msk [vmem:[%s4051_s1 + $0x73] sm:$0x8] %vm3_vm0, %v901_v47  }
 0x123   :  { %1686 = vst.msk [vmem:[%s4051_s1 + $0x92] sm:$0x10] %vm3_vm0, %v901_v47   ;;  %1687 = vst.msk [vmem:[%s4051_s1 + $0xb1] sm:$0x20] %vm3_vm0, %v901_v47  }
 0x124   :  { %1688 = vst.msk [vmem:[%s4051_s1 + $0xd0] sm:$0x40] %vm3_vm0, %v901_v47   ;;  %1689 = vst.msk [vmem:[%s4051_s1 + $0xef] sm:$0x80] %vm3_vm0, %v901_v47  }
 0x125   :  { %1708 = vst.msk [vmem:[%s4051_s1 + $0x117] sm:$0x1] %vm3_vm0, %v963_v48   ;;  %1709 = vst.msk [vmem:[%s4051_s1 + $0x136] sm:$0x2] %vm3_vm0, %v963_v48  }
 0x126   :  { %1710 = vst.msk [vmem:[%s4051_s1 + $0x155] sm:$0x4] %vm3_vm0, %v963_v48   ;;  %1711 = vst.msk [vmem:[%s4051_s1 + $0x174] sm:$0x8] %vm3_vm0, %v963_v48  }
 0x127   :  { %1712 = vst.msk [vmem:[%s4051_s1 + $0x193] sm:$0x10] %vm3_vm0, %v963_v48   ;;  %1713 = vst.msk [vmem:[%s4051_s1 + $0x1b2] sm:$0x20] %vm3_vm0, %v963_v48  }
 0x128   :  { %1714 = vst.msk [vmem:[%s4051_s1 + $0x1d1] sm:$0x40] %vm3_vm0, %v963_v48   ;;  %1715 = vst.msk [vmem:[%s4051_s1 + $0x1f0] sm:$0x80] %vm3_vm0, %v963_v48  }
 0x129   :  { %1699 = vst.msk [vmem:[%s4051_s1 + $0x17] sm:$0x1] %vm3_vm0, %v942_v49   ;;  %1700 = vst.msk [vmem:[%s4051_s1 + $0x36] sm:$0x2] %vm3_vm0, %v942_v49  }
 0x12a   :  { %1701 = vst.msk [vmem:[%s4051_s1 + $0x55] sm:$0x4] %vm3_vm0, %v942_v49   ;;  %1702 = vst.msk [vmem:[%s4051_s1 + $0x74] sm:$0x8] %vm3_vm0, %v942_v49  }
 0x12b   :  { %1703 = vst.msk [vmem:[%s4051_s1 + $0x93] sm:$0x10] %vm3_vm0, %v942_v49   ;;  %1704 = vst.msk [vmem:[%s4051_s1 + $0xb2] sm:$0x20] %vm3_vm0, %v942_v49  }
 0x12c   :  { %1705 = vst.msk [vmem:[%s4051_s1 + $0xd1] sm:$0x40] %vm3_vm0, %v942_v49   ;;  %1706 = vst.msk [vmem:[%s4051_s1 + $0xf0] sm:$0x80] %vm3_vm0, %v942_v49  }
 0x12d   :  { %1725 = vst.msk [vmem:[%s4051_s1 + $0x118] sm:$0x1] %vm3_vm0, %v1004_v50   ;;  %1726 = vst.msk [vmem:[%s4051_s1 + $0x137] sm:$0x2] %vm3_vm0, %v1004_v50  }
 0x12e   :  { %1727 = vst.msk [vmem:[%s4051_s1 + $0x156] sm:$0x4] %vm3_vm0, %v1004_v50   ;;  %1728 = vst.msk [vmem:[%s4051_s1 + $0x175] sm:$0x8] %vm3_vm0, %v1004_v50  }
 0x12f   :  { %1729 = vst.msk [vmem:[%s4051_s1 + $0x194] sm:$0x10] %vm3_vm0, %v1004_v50   ;;  %1730 = vst.msk [vmem:[%s4051_s1 + $0x1b3] sm:$0x20] %vm3_vm0, %v1004_v50  }
 0x130   :  { %1731 = vst.msk [vmem:[%s4051_s1 + $0x1d2] sm:$0x40] %vm3_vm0, %v1004_v50   ;;  %1732 = vst.msk [vmem:[%s4051_s1 + $0x1f1] sm:$0x80] %vm3_vm0, %v1004_v50  }
 0x131   :  { %1716 = vst.msk [vmem:[%s4051_s1 + $0x18] sm:$0x1] %vm3_vm0, %v983_v51   ;;  %1717 = vst.msk [vmem:[%s4051_s1 + $0x37] sm:$0x2] %vm3_vm0, %v983_v51  }
 0x132   :  { %1718 = vst.msk [vmem:[%s4051_s1 + $0x56] sm:$0x4] %vm3_vm0, %v983_v51   ;;  %1719 = vst.msk [vmem:[%s4051_s1 + $0x75] sm:$0x8] %vm3_vm0, %v983_v51  }
 0x133   :  { %1720 = vst.msk [vmem:[%s4051_s1 + $0x94] sm:$0x10] %vm3_vm0, %v983_v51   ;;  %1721 = vst.msk [vmem:[%s4051_s1 + $0xb3] sm:$0x20] %vm3_vm0, %v983_v51  }
 0x134   :  { %1722 = vst.msk [vmem:[%s4051_s1 + $0xd2] sm:$0x40] %vm3_vm0, %v983_v51   ;;  %1723 = vst.msk [vmem:[%s4051_s1 + $0xf1] sm:$0x80] %vm3_vm0, %v983_v51  }
 0x135   :  { %1742 = vst.msk [vmem:[%s4051_s1 + $0x119] sm:$0x1] %vm3_vm0, %v1045_v52   ;;  %1743 = vst.msk [vmem:[%s4051_s1 + $0x138] sm:$0x2] %vm3_vm0, %v1045_v52  }
 0x136   :  { %1744 = vst.msk [vmem:[%s4051_s1 + $0x157] sm:$0x4] %vm3_vm0, %v1045_v52   ;;  %1745 = vst.msk [vmem:[%s4051_s1 + $0x176] sm:$0x8] %vm3_vm0, %v1045_v52  }
 0x137   :  { %1746 = vst.msk [vmem:[%s4051_s1 + $0x195] sm:$0x10] %vm3_vm0, %v1045_v52   ;;  %1747 = vst.msk [vmem:[%s4051_s1 + $0x1b4] sm:$0x20] %vm3_vm0, %v1045_v52  }
 0x138   :  { %1748 = vst.msk [vmem:[%s4051_s1 + $0x1d3] sm:$0x40] %vm3_vm0, %v1045_v52   ;;  %1749 = vst.msk [vmem:[%s4051_s1 + $0x1f2] sm:$0x80] %vm3_vm0, %v1045_v52  }
 0x139   :  { %1733 = vst.msk [vmem:[%s4051_s1 + $0x19] sm:$0x1] %vm3_vm0, %v1024_v53   ;;  %1734 = vst.msk [vmem:[%s4051_s1 + $0x38] sm:$0x2] %vm3_vm0, %v1024_v53  }
 0x13a   :  { %1735 = vst.msk [vmem:[%s4051_s1 + $0x57] sm:$0x4] %vm3_vm0, %v1024_v53   ;;  %1736 = vst.msk [vmem:[%s4051_s1 + $0x76] sm:$0x8] %vm3_vm0, %v1024_v53  }
 0x13b   :  { %1737 = vst.msk [vmem:[%s4051_s1 + $0x95] sm:$0x10] %vm3_vm0, %v1024_v53   ;;  %1738 = vst.msk [vmem:[%s4051_s1 + $0xb4] sm:$0x20] %vm3_vm0, %v1024_v53  }
 0x13c   :  { %1739 = vst.msk [vmem:[%s4051_s1 + $0xd3] sm:$0x40] %vm3_vm0, %v1024_v53   ;;  %1740 = vst.msk [vmem:[%s4051_s1 + $0xf2] sm:$0x80] %vm3_vm0, %v1024_v53  }
 0x13d   :  { %1759 = vst.msk [vmem:[%s4051_s1 + $0x11a] sm:$0x1] %vm3_vm0, %v1086_v54   ;;  %1760 = vst.msk [vmem:[%s4051_s1 + $0x139] sm:$0x2] %vm3_vm0, %v1086_v54  }
 0x13e   :  { %1761 = vst.msk [vmem:[%s4051_s1 + $0x158] sm:$0x4] %vm3_vm0, %v1086_v54   ;;  %1762 = vst.msk [vmem:[%s4051_s1 + $0x177] sm:$0x8] %vm3_vm0, %v1086_v54  }
 0x13f   :  { %1763 = vst.msk [vmem:[%s4051_s1 + $0x196] sm:$0x10] %vm3_vm0, %v1086_v54   ;;  %1764 = vst.msk [vmem:[%s4051_s1 + $0x1b5] sm:$0x20] %vm3_vm0, %v1086_v54  }
 0x140   :  { %1765 = vst.msk [vmem:[%s4051_s1 + $0x1d4] sm:$0x40] %vm3_vm0, %v1086_v54   ;;  %1766 = vst.msk [vmem:[%s4051_s1 + $0x1f3] sm:$0x80] %vm3_vm0, %v1086_v54  }
 0x141   :  { %1750 = vst.msk [vmem:[%s4051_s1 + $0x1a] sm:$0x1] %vm3_vm0, %v1065_v55   ;;  %1751 = vst.msk [vmem:[%s4051_s1 + $0x39] sm:$0x2] %vm3_vm0, %v1065_v55  }
 0x142   :  { %1752 = vst.msk [vmem:[%s4051_s1 + $0x58] sm:$0x4] %vm3_vm0, %v1065_v55   ;;  %1753 = vst.msk [vmem:[%s4051_s1 + $0x77] sm:$0x8] %vm3_vm0, %v1065_v55  }
 0x143   :  { %1754 = vst.msk [vmem:[%s4051_s1 + $0x96] sm:$0x10] %vm3_vm0, %v1065_v55   ;;  %1755 = vst.msk [vmem:[%s4051_s1 + $0xb5] sm:$0x20] %vm3_vm0, %v1065_v55  }
 0x144   :  { %1756 = vst.msk [vmem:[%s4051_s1 + $0xd4] sm:$0x40] %vm3_vm0, %v1065_v55   ;;  %1757 = vst.msk [vmem:[%s4051_s1 + $0xf3] sm:$0x80] %vm3_vm0, %v1065_v55  }
 0x145   :  { %1776 = vst.msk [vmem:[%s4051_s1 + $0x11b] sm:$0x1] %vm3_vm0, %v1127_v56   ;;  %1777 = vst.msk [vmem:[%s4051_s1 + $0x13a] sm:$0x2] %vm3_vm0, %v1127_v56  }
 0x146   :  { %1778 = vst.msk [vmem:[%s4051_s1 + $0x159] sm:$0x4] %vm3_vm0, %v1127_v56   ;;  %1779 = vst.msk [vmem:[%s4051_s1 + $0x178] sm:$0x8] %vm3_vm0, %v1127_v56  }
 0x147   :  { %1780 = vst.msk [vmem:[%s4051_s1 + $0x197] sm:$0x10] %vm3_vm0, %v1127_v56   ;;  %1781 = vst.msk [vmem:[%s4051_s1 + $0x1b6] sm:$0x20] %vm3_vm0, %v1127_v56  }
 0x148   :  { %1782 = vst.msk [vmem:[%s4051_s1 + $0x1d5] sm:$0x40] %vm3_vm0, %v1127_v56   ;;  %1783 = vst.msk [vmem:[%s4051_s1 + $0x1f4] sm:$0x80] %vm3_vm0, %v1127_v56  }
 0x149   :  { %1767 = vst.msk [vmem:[%s4051_s1 + $0x1b] sm:$0x1] %vm3_vm0, %v1106_v57   ;;  %1768 = vst.msk [vmem:[%s4051_s1 + $0x3a] sm:$0x2] %vm3_vm0, %v1106_v57  }
 0x14a   :  { %1769 = vst.msk [vmem:[%s4051_s1 + $0x59] sm:$0x4] %vm3_vm0, %v1106_v57   ;;  %1770 = vst.msk [vmem:[%s4051_s1 + $0x78] sm:$0x8] %vm3_vm0, %v1106_v57  }
 0x14b   :  { %1771 = vst.msk [vmem:[%s4051_s1 + $0x97] sm:$0x10] %vm3_vm0, %v1106_v57   ;;  %1772 = vst.msk [vmem:[%s4051_s1 + $0xb6] sm:$0x20] %vm3_vm0, %v1106_v57  }
 0x14c   :  { %1773 = vst.msk [vmem:[%s4051_s1 + $0xd5] sm:$0x40] %vm3_vm0, %v1106_v57   ;;  %1774 = vst.msk [vmem:[%s4051_s1 + $0xf4] sm:$0x80] %vm3_vm0, %v1106_v57  }
 0x14d   :  { %1793 = vst.msk [vmem:[%s4051_s1 + $0x11c] sm:$0x1] %vm3_vm0, %v1168_v58   ;;  %1794 = vst.msk [vmem:[%s4051_s1 + $0x13b] sm:$0x2] %vm3_vm0, %v1168_v58  }
 0x14e   :  { %1795 = vst.msk [vmem:[%s4051_s1 + $0x15a] sm:$0x4] %vm3_vm0, %v1168_v58   ;;  %1796 = vst.msk [vmem:[%s4051_s1 + $0x179] sm:$0x8] %vm3_vm0, %v1168_v58  }
 0x14f   :  { %1797 = vst.msk [vmem:[%s4051_s1 + $0x198] sm:$0x10] %vm3_vm0, %v1168_v58   ;;  %1798 = vst.msk [vmem:[%s4051_s1 + $0x1b7] sm:$0x20] %vm3_vm0, %v1168_v58  }
 0x150   :  { %1799 = vst.msk [vmem:[%s4051_s1 + $0x1d6] sm:$0x40] %vm3_vm0, %v1168_v58   ;;  %1800 = vst.msk [vmem:[%s4051_s1 + $0x1f5] sm:$0x80] %vm3_vm0, %v1168_v58  }
 0x151   :  { %1784 = vst.msk [vmem:[%s4051_s1 + $0x1c] sm:$0x1] %vm3_vm0, %v1147_v59   ;;  %1785 = vst.msk [vmem:[%s4051_s1 + $0x3b] sm:$0x2] %vm3_vm0, %v1147_v59  }
 0x152   :  { %1786 = vst.msk [vmem:[%s4051_s1 + $0x5a] sm:$0x4] %vm3_vm0, %v1147_v59   ;;  %1787 = vst.msk [vmem:[%s4051_s1 + $0x79] sm:$0x8] %vm3_vm0, %v1147_v59  }
 0x153   :  { %1788 = vst.msk [vmem:[%s4051_s1 + $0x98] sm:$0x10] %vm3_vm0, %v1147_v59   ;;  %1789 = vst.msk [vmem:[%s4051_s1 + $0xb7] sm:$0x20] %vm3_vm0, %v1147_v59  }
 0x154   :  { %1790 = vst.msk [vmem:[%s4051_s1 + $0xd6] sm:$0x40] %vm3_vm0, %v1147_v59   ;;  %1791 = vst.msk [vmem:[%s4051_s1 + $0xf5] sm:$0x80] %vm3_vm0, %v1147_v59  }
 0x155   :  { %1810 = vst.msk [vmem:[%s4051_s1 + $0x11d] sm:$0x1] %vm3_vm0, %v1209_v60   ;;  %1811 = vst.msk [vmem:[%s4051_s1 + $0x13c] sm:$0x2] %vm3_vm0, %v1209_v60  }
 0x156   :  { %1812 = vst.msk [vmem:[%s4051_s1 + $0x15b] sm:$0x4] %vm3_vm0, %v1209_v60   ;;  %1813 = vst.msk [vmem:[%s4051_s1 + $0x17a] sm:$0x8] %vm3_vm0, %v1209_v60  }
 0x157   :  { %1814 = vst.msk [vmem:[%s4051_s1 + $0x199] sm:$0x10] %vm3_vm0, %v1209_v60   ;;  %1815 = vst.msk [vmem:[%s4051_s1 + $0x1b8] sm:$0x20] %vm3_vm0, %v1209_v60  }
 0x158   :  { %1816 = vst.msk [vmem:[%s4051_s1 + $0x1d7] sm:$0x40] %vm3_vm0, %v1209_v60   ;;  %1817 = vst.msk [vmem:[%s4051_s1 + $0x1f6] sm:$0x80] %vm3_vm0, %v1209_v60  }
 0x159   :  { %1801 = vst.msk [vmem:[%s4051_s1 + $0x1d] sm:$0x1] %vm3_vm0, %v1188_v61   ;;  %1802 = vst.msk [vmem:[%s4051_s1 + $0x3c] sm:$0x2] %vm3_vm0, %v1188_v61  }
 0x15a   :  { %1803 = vst.msk [vmem:[%s4051_s1 + $0x5b] sm:$0x4] %vm3_vm0, %v1188_v61   ;;  %1804 = vst.msk [vmem:[%s4051_s1 + $0x7a] sm:$0x8] %vm3_vm0, %v1188_v61  }
 0x15b   :  { %1805 = vst.msk [vmem:[%s4051_s1 + $0x99] sm:$0x10] %vm3_vm0, %v1188_v61   ;;  %1806 = vst.msk [vmem:[%s4051_s1 + $0xb8] sm:$0x20] %vm3_vm0, %v1188_v61  }
 0x15c   :  { %1807 = vst.msk [vmem:[%s4051_s1 + $0xd7] sm:$0x40] %vm3_vm0, %v1188_v61   ;;  %1808 = vst.msk [vmem:[%s4051_s1 + $0xf6] sm:$0x80] %vm3_vm0, %v1188_v61  }
 0x15d   :  { %1827 = vst.msk [vmem:[%s4051_s1 + $0x11e] sm:$0x1] %vm3_vm0, %v1250_v62   ;;  %1828 = vst.msk [vmem:[%s4051_s1 + $0x13d] sm:$0x2] %vm3_vm0, %v1250_v62  }
 0x15e   :  { %1829 = vst.msk [vmem:[%s4051_s1 + $0x15c] sm:$0x4] %vm3_vm0, %v1250_v62   ;;  %1830 = vst.msk [vmem:[%s4051_s1 + $0x17b] sm:$0x8] %vm3_vm0, %v1250_v62  }
 0x15f   :  { %1831 = vst.msk [vmem:[%s4051_s1 + $0x19a] sm:$0x10] %vm3_vm0, %v1250_v62   ;;  %1832 = vst.msk [vmem:[%s4051_s1 + $0x1b9] sm:$0x20] %vm3_vm0, %v1250_v62  }
 0x160   :  { %1833 = vst.msk [vmem:[%s4051_s1 + $0x1d8] sm:$0x40] %vm3_vm0, %v1250_v62   ;;  %1834 = vst.msk [vmem:[%s4051_s1 + $0x1f7] sm:$0x80] %vm3_vm0, %v1250_v62  }
 0x161   :  { %1818 = vst.msk [vmem:[%s4051_s1 + $0x1e] sm:$0x1] %vm3_vm0, %v1229_v63   ;;  %1819 = vst.msk [vmem:[%s4051_s1 + $0x3d] sm:$0x2] %vm3_vm0, %v1229_v63  }
 0x162   :  { %1820 = vst.msk [vmem:[%s4051_s1 + $0x5c] sm:$0x4] %vm3_vm0, %v1229_v63   ;;  %1821 = vst.msk [vmem:[%s4051_s1 + $0x7b] sm:$0x8] %vm3_vm0, %v1229_v63  }
 0x163   :  { %1822 = vst.msk [vmem:[%s4051_s1 + $0x9a] sm:$0x10] %vm3_vm0, %v1229_v63   ;;  %1823 = vst.msk [vmem:[%s4051_s1 + $0xb9] sm:$0x20] %vm3_vm0, %v1229_v63  }
 0x164   :  { %1824 = vst.msk [vmem:[%s4051_s1 + $0xd8] sm:$0x40] %vm3_vm0, %v1229_v63   ;;  %1825 = vst.msk [vmem:[%s4051_s1 + $0xf7] sm:$0x80] %vm3_vm0, %v1229_v63  }
 0x165   :  { %1844 = vst.msk [vmem:[%s4051_s1 + $0x11f] sm:$0x1] %vm3_vm0, %v1291_v0   ;;  %1845 = vst.msk [vmem:[%s4051_s1 + $0x13e] sm:$0x2] %vm3_vm0, %v1291_v0  }
 0x166   :  { %1846 = vst.msk [vmem:[%s4051_s1 + $0x15d] sm:$0x4] %vm3_vm0, %v1291_v0   ;;  %1847 = vst.msk [vmem:[%s4051_s1 + $0x17c] sm:$0x8] %vm3_vm0, %v1291_v0  }
 0x167   :  { %1848 = vst.msk [vmem:[%s4051_s1 + $0x19b] sm:$0x10] %vm3_vm0, %v1291_v0   ;;  %1849 = vst.msk [vmem:[%s4051_s1 + $0x1ba] sm:$0x20] %vm3_vm0, %v1291_v0  }
 0x168   :  { %1850 = vst.msk [vmem:[%s4051_s1 + $0x1d9] sm:$0x40] %vm3_vm0, %v1291_v0   ;;  %1851 = vst.msk [vmem:[%s4051_s1 + $0x1f8] sm:$0x80] %vm3_vm0, %v1291_v0  }
 0x169   :  { %1835 = vst.msk [vmem:[%s4051_s1 + $0x1f] sm:$0x1] %vm3_vm0, %v1270_v1   ;;  %1836 = vst.msk [vmem:[%s4051_s1 + $0x3e] sm:$0x2] %vm3_vm0, %v1270_v1  }
 0x16a   :  { %1837 = vst.msk [vmem:[%s4051_s1 + $0x5d] sm:$0x4] %vm3_vm0, %v1270_v1   ;;  %1838 = vst.msk [vmem:[%s4051_s1 + $0x7c] sm:$0x8] %vm3_vm0, %v1270_v1  }
 0x16b   :  { %1839 = vst.msk [vmem:[%s4051_s1 + $0x9b] sm:$0x10] %vm3_vm0, %v1270_v1   ;;  %1840 = vst.msk [vmem:[%s4051_s1 + $0xba] sm:$0x20] %vm3_vm0, %v1270_v1  }
 0x16c   :  { %1841 = vst.msk [vmem:[%s4051_s1 + $0xd9] sm:$0x40] %vm3_vm0, %v1270_v1   ;;  %1842 = vst.msk [vmem:[%s4051_s1 + $0xf8] sm:$0x80] %vm3_vm0, %v1270_v1  }

// kernel: tile.23
= control target key start
LH: loop header
LB: loop body
LE: loop exit
PB: predicated region body
PF: predicated region fallthrough
CT: control target
= control target key end

     0   :  { %s22_s0 = inlined_call_operand.vmem [shape: f32[16], index: 0, kind: input, shape index: {}]   ;;  %s23_s1 = inlined_call_operand.vmem [shape: f32[4,16], index: 1, kind: output, shape index: {}]  }
   0x1   :  { %v4_v0 = vld [vmem:[%s22_s0] ss:$0 sm:$0xff] }
   0x2   :  { %5 = vst [vmem:[%s23_s1] sm:$0xf] %v4_v0 }

// kernel: tile.0
= control target key start
LH: loop header
LB: loop body
LE: loop exit
PB: predicated region body
PF: predicated region fallthrough
CT: control target
= control target key end

     0   :  { %s176_s8 = smov 125   ;;  %s177_s9 = smov 126   ;;  %vm7_vm0 = vcmask 7168   ;;  %s331_s0 = inlined_call_operand.vmem [shape: f32[4,16], index: 0, kind: input, shape index: {}]   ;;  %s332_s1 = inlined_call_operand.vmem [shape: f32[64,1], index: 1, kind: output, shape index: {}]  }
   0x1   :  { %v4_v0 = vld [vmem:[%s331_s0] sm:$0xf]  ;;  %s175_s0 = smov 127   ;;  %s178_s10 = smov 124  }
   0x2   :  { %5 = vst [vmem:[#allocation0] sm:$0xf] %v4_v0  ;;  %s179_s11 = smov 123   ;;  %s180_s12 = smov 122  }
   0x3   :  { %s181_s13 = smov 121   ;;  %s182_s14 = smov 120  }
   0x4   :  { %s183_s19 = smov 119   ;;  %s184_s20 = smov 118  }
   0x5   :  { %s185_s21 = smov 117   ;;  %s186_s22 = smov 116  }
   0x6   :  { %s187_s23 = smov 115   ;;  %s188_s24 = smov 114  }
   0x7   :  { %s189_s25 = smov 113  }
   0x9   :  { %v10_v1 = vld [vmem:[#allocation0] sm:$0xf]  }
   0xa   :  { %v26_v2 = vld [vmem:[#allocation0] sm:$0xf]   ;;  %11 = vrot.lane.b32.xlu0 %v10_v1, %s175_s0 }
   0xb   :  { %27 = vrot.lane.b32.xlu1 %v26_v2, %s176_s8  ;;  %v18_v3 = vld [vmem:[#allocation0] sm:$0xf]  }
   0xc   :  { %v34_v4 = vld [vmem:[#allocation0] sm:$0xf]  }
   0xd   :  { %v42_v5 = vld [vmem:[#allocation0] sm:$0xf]  }
   0xe   :  { %19 = vrot.lane.b32.xlu0 %v18_v3, %s177_s9  ;;  %v50_v6 = vld [vmem:[#allocation0] sm:$0xf]  }
   0xf   :  { %35 = vrot.lane.b32.xlu1 %v34_v4, %s178_s10  ;;  %v58_v7 = vld [vmem:[#allocation0] sm:$0xf]  }
  0x10   :  { %v66_v8 = vld [vmem:[#allocation0] sm:$0xf]  }
  0x11   :  { %v74_v9 = vld [vmem:[#allocation0] sm:$0xf]  }
  0x12   :  { %43 = vrot.lane.b32.xlu0 %v42_v5, %s179_s11  ;;  %v82_v10 = vld [vmem:[#allocation0] sm:$0xf]  }
  0x13   :  { %51 = vrot.lane.b32.xlu1 %v50_v6, %s180_s12  ;;  %v6_v11 = vld [vmem:[#allocation0] sm:$0xf]  }
  0x14   :  { %8 = vst.msk [vmem:[%s332_s1] ss:$16 sm:$0x3] %vm7_vm0, %v6_v11   ;;  %9 = vst.msk [vmem:[%s332_s1] ss:$16 sm:$0xc] %vm7_vm0, %v6_v11  }
  0x15   :  { %v90_v12 = vld [vmem:[#allocation0] sm:$0xf]  }
  0x16   :  { %59 = vrot.lane.b32.xlu0 %v58_v7, %s181_s13  ;;  %v98_v13 = vld [vmem:[#allocation0] sm:$0xf]  }
  0x17   :  { %67 = vrot.lane.b32.xlu1 %v66_v8, %s182_s14  ;;  %v106_v14 = vld [vmem:[#allocation0] sm:$0xf]  }
  0x18   :  { %v114_v15 = vld [vmem:[#allocation0] sm:$0xf]  }
  0x19   :  { %v122_v16 = vld [vmem:[#allocation0] sm:$0xf]  }
  0x1a   :  { %75 = vrot.lane.b32.xlu0 %v74_v9, %s183_s19 }
  0x1b   :  { %83 = vrot.lane.b32.xlu1 %v82_v10, %s184_s20 }
  0x1e   :  { %91 = vrot.lane.b32.xlu0 %v90_v12, %s185_s21 }
  0x1f   :  { %99 = vrot.lane.b32.xlu1 %v98_v13, %s186_s22 }
  0x22   :  { %107 = vrot.lane.b32.xlu0 %v106_v14, %s187_s23 }
  0x23   :  { %115 = vrot.lane.b32.xlu1 %v114_v15, %s188_s24 }
  0x26   :  { %123 = vrot.lane.b32.xlu0 %v122_v16, %s189_s25 }
  0x7c   :  { %v12_v17 = vpop.permute.xlu0 %11  }
  0x7d   :  { %v28_v18 = vpop.permute.xlu1 %27   ;;  %130 = vst.msk [vmem:[%s332_s1 + $0x1] ss:$16 sm:$0x3] %vm7_vm0, %v12_v17   ;;  %131 = vst.msk [vmem:[%s332_s1 + $0x1] ss:$16 sm:$0xc] %vm7_vm0, %v12_v17  }
  0x7e   :  { %134 = vst.msk [vmem:[%s332_s1 + $0x3] ss:$16 sm:$0x3] %vm7_vm0, %v28_v18   ;;  %135 = vst.msk [vmem:[%s332_s1 + $0x3] ss:$16 sm:$0xc] %vm7_vm0, %v28_v18  }
  0x80   :  { %v20_v19 = vpop.permute.xlu0 %19  }
  0x81   :  { %v36_v20 = vpop.permute.xlu1 %35   ;;  %132 = vst.msk [vmem:[%s332_s1 + $0x2] ss:$16 sm:$0x3] %vm7_vm0, %v20_v19   ;;  %133 = vst.msk [vmem:[%s332_s1 + $0x2] ss:$16 sm:$0xc] %vm7_vm0, %v20_v19  }
  0x82   :  { %136 = vst.msk [vmem:[%s332_s1 + $0x4] ss:$16 sm:$0x3] %vm7_vm0, %v36_v20   ;;  %137 = vst.msk [vmem:[%s332_s1 + $0x4] ss:$16 sm:$0xc] %vm7_vm0, %v36_v20  }
  0x84   :  { %v44_v21 = vpop.permute.xlu0 %43  }
  0x85   :  { %v52_v22 = vpop.permute.xlu1 %51   ;;  %138 = vst.msk [vmem:[%s332_s1 + $0x5] ss:$16 sm:$0x3] %vm7_vm0, %v44_v21   ;;  %139 = vst.msk [vmem:[%s332_s1 + $0x5] ss:$16 sm:$0xc] %vm7_vm0, %v44_v21  }
  0x86   :  { %140 = vst.msk [vmem:[%s332_s1 + $0x6] ss:$16 sm:$0x3] %vm7_vm0, %v52_v22   ;;  %141 = vst.msk [vmem:[%s332_s1 + $0x6] ss:$16 sm:$0xc] %vm7_vm0, %v52_v22  }
  0x88   :  { %v60_v23 = vpop.permute.xlu0 %59  }
  0x89   :  { %v68_v24 = vpop.permute.xlu1 %67   ;;  %142 = vst.msk [vmem:[%s332_s1 + $0x7] ss:$16 sm:$0x3] %vm7_vm0, %v60_v23   ;;  %143 = vst.msk [vmem:[%s332_s1 + $0x7] ss:$16 sm:$0xc] %vm7_vm0, %v60_v23  }
  0x8a   :  { %144 = vst.msk [vmem:[%s332_s1 + $0x8] ss:$16 sm:$0x3] %vm7_vm0, %v68_v24   ;;  %145 = vst.msk [vmem:[%s332_s1 + $0x8] ss:$16 sm:$0xc] %vm7_vm0, %v68_v24  }
  0x8c   :  { %v76_v25 = vpop.permute.xlu0 %75  }
  0x8d   :  { %v84_v26 = vpop.permute.xlu1 %83   ;;  %146 = vst.msk [vmem:[%s332_s1 + $0x9] ss:$16 sm:$0x3] %vm7_vm0, %v76_v25   ;;  %147 = vst.msk [vmem:[%s332_s1 + $0x9] ss:$16 sm:$0xc] %vm7_vm0, %v76_v25  }
  0x8e   :  { %148 = vst.msk [vmem:[%s332_s1 + $0xa] ss:$16 sm:$0x3] %vm7_vm0, %v84_v26   ;;  %149 = vst.msk [vmem:[%s332_s1 + $0xa] ss:$16 sm:$0xc] %vm7_vm0, %v84_v26  }
  0x90   :  { %v92_v27 = vpop.permute.xlu0 %91  }
  0x91   :  { %v100_v28 = vpop.permute.xlu1 %99   ;;  %150 = vst.msk [vmem:[%s332_s1 + $0xb] ss:$16 sm:$0x3] %vm7_vm0, %v92_v27   ;;  %151 = vst.msk [vmem:[%s332_s1 + $0xb] ss:$16 sm:$0xc] %vm7_vm0, %v92_v27  }
  0x92   :  { %152 = vst.msk [vmem:[%s332_s1 + $0xc] ss:$16 sm:$0x3] %vm7_vm0, %v100_v28   ;;  %153 = vst.msk [vmem:[%s332_s1 + $0xc] ss:$16 sm:$0xc] %vm7_vm0, %v100_v28  }
  0x94   :  { %v108_v29 = vpop.permute.xlu0 %107  }
  0x95   :  { %v116_v30 = vpop.permute.xlu1 %115   ;;  %154 = vst.msk [vmem:[%s332_s1 + $0xd] ss:$16 sm:$0x3] %vm7_vm0, %v108_v29   ;;  %155 = vst.msk [vmem:[%s332_s1 + $0xd] ss:$16 sm:$0xc] %vm7_vm0, %v108_v29  }
  0x96   :  { %156 = vst.msk [vmem:[%s332_s1 + $0xe] ss:$16 sm:$0x3] %vm7_vm0, %v116_v30   ;;  %157 = vst.msk [vmem:[%s332_s1 + $0xe] ss:$16 sm:$0xc] %vm7_vm0, %v116_v30  }
  0x98   :  { %v124_v31 = vpop.permute.xlu0 %123  }
  0x99   :  { %158 = vst.msk [vmem:[%s332_s1 + $0xf] ss:$16 sm:$0x3] %vm7_vm0, %v124_v31   ;;  %159 = vst.msk [vmem:[%s332_s1 + $0xf] ss:$16 sm:$0xc] %vm7_vm0, %v124_v31  }

// kernel: post_print_denoiser_forward.10
= control target key start
LH: loop header
LB: loop body
LE: loop exit
PB: predicated region body
PF: predicated region fallthrough
CT: control target
= control target key end

     0   :  { %v2604_v0 = vmov 0   ;;  %vm79_vm0 = vcmask 64512   ;;  %v2605_v8 = vmov 0.0   ;;  %vm794_vm1 = vcmask 523264   ;;  %s4287_s4 = inlined_call_operand.vmem [shape: f32[8,384], index: 4, kind: input, shape index: {}]   ;;  %s4288_s1 = inlined_call_operand.vmem [shape: f32[64,1], index: 1, kind: input, shape index: {}]   ;;  %s4289_s0 = inlined_call_operand.vmem [shape: f32[64,8], index: 0, kind: input, shape index: {}]   ;;  %s4290_s3 = inlined_call_operand.vmem [shape: f32[512,1], index: 3, kind: input, shape index: {}]   ;;  %s4291_s2 = inlined_call_operand.vmem [shape: f32[512,64], index: 2, kind: input, shape index: {}]   ;;  %s4292_s5 = inlined_call_operand.vmem [shape: f32[512,384], index: 5, kind: output, shape index: {}]  }
   0x1   :  { %2603 = vset.pattern.permute.xlu1 %v2604_v0  ;;  %2602 = vset.pattern.permute.xlu0 %v2604_v0  ;;  %v29_v1 = vld [vmem:[%s4287_s4 + $0x8] sm:$0xff]  ;;  %v30_v2 = vld [vmem:[%s4287_s4 + $0x10] sm:$0xff]  ;;  %v31_v4 = vld [vmem:[%s4288_s1] sm:$0xff] }
   0x2   :  { %v33_v3 = vld [vmem:[%s4288_s1 + $0x10] sm:$0xff]  ;;  %104 = vmatprep.subr.mxu0 %v29_v1  ;;  %2434 = vmatprep.subr.mxu1 %v30_v2  ;;  %v28_v5 = vld [vmem:[%s4287_s4] sm:$0xff]  ;;  %v21_v7 = vld [vmem:[%s4289_s0 + $0x8] sm:$0xff] }
   0x3   :  { %v20_v6 = vld [vmem:[%s4289_s0] sm:$0xff]  ;;  %51 = vperm.xlu1 %2603, %v33_v3   ;;  %41 = vperm.xlu0 %2602, %v31_v4   ;;  %v34_v9 = vld [vmem:[%s4288_s1 + $0x18] sm:$0xff]  ;;  %v32_v10 = vld [vmem:[%s4288_s1 + $0x8] sm:$0xff] }
   0x4   :  { %105 = vmatpush1.msra.mxu0 %v28_v5  ;;  %168 = vmatprep.mubr.f32.mxu0 %v2605_v8  ;;  %v22_v11 = vld [vmem:[%s4289_s0 + $0x10] sm:$0xff]  ;;  %v23_v12 = vld [vmem:[%s4289_s0 + $0x18] sm:$0xff]  ;;  %v36_v13 = vld [vmem:[%s4288_s1 + $0x28] sm:$0xff] }
   0x5   :  { %2435 = vmatpush3.msra.mxu1 %v30_v2  ;;  %2436 = vmatprep.mubr.msk.f32.mxu1 %vm79_vm0, %v20_v6  ;;  %v35_v14 = vld [vmem:[%s4288_s1 + $0x20] sm:$0xff]  ;;  %v25_v16 = vld [vmem:[%s4289_s0 + $0x28] sm:$0xff]  ;;  %v38_v17 = vld [vmem:[%s4288_s1 + $0x38] sm:$0xff] }
   0x6   :  { %2209 = vmatmul.mubr.msk.f32.vlgmr.msra.gmra.mrb[0].mxu0 %vm79_vm0, %v20_v6  ;;  %2437 = vmatmul.mubr.msk.f32.vlgmr.msra.gmra.mrb[0].mxu1 %vm79_vm0, %v21_v7  ;;  %v24_v15 = vld [vmem:[%s4289_s0 + $0x20] sm:$0xff]  ;;  %v37_v18 = vld [vmem:[%s4288_s1 + $0x30] sm:$0xff]  ;;  %v27_v20 = vld [vmem:[%s4289_s0 + $0x38] sm:$0xff] }
   0x7   :  { %56 = vperm.xlu1 %2603, %v34_v9   ;;  %46 = vperm.xlu0 %2602, %v32_v10   ;;  %v26_v19 = vld [vmem:[%s4289_s0 + $0x30] sm:$0xff]  ;;  %v411_v21 = vld [vmem:[%s4290_s3 + $0x8] sm:$0xff]  ;;  %v410_v22 = vld [vmem:[%s4290_s3] sm:$0xff] }
   0x8   :  { %174 = vmatprep.mubr.f32.mxu0 %v2605_v8  ;;  %2439 = vmatprep.mubr.msk.f32.mxu1 %vm79_vm0, %v22_v11  ;;  %v413_v23 = vld [vmem:[%s4290_s3 + $0x18] sm:$0xff]  ;;  %v412_v24 = vld [vmem:[%s4290_s3 + $0x10] sm:$0xff]  ;;  %v415_v25 = vld [vmem:[%s4290_s3 + $0x28] sm:$0xff] }
   0x9   :  { %v414_v26 = vld [vmem:[%s4290_s3 + $0x20] sm:$0xff]  ;;  %v417_v27 = vld [vmem:[%s4290_s3 + $0x38] sm:$0xff]  ;;  %v416_v28 = vld [vmem:[%s4290_s3 + $0x30] sm:$0xff] }
   0xa   :  { %2210 = vmatmul.mubr.msk.f32.gmra.mrb[2].mxu0 %vm79_vm0, %v21_v7  ;;  %2440 = vmatmul.mubr.msk.f32.gmra.mrb[2].mxu1 %vm79_vm0, %v23_v12  ;;  %v419_v29 = vld [vmem:[%s4290_s3 + $0x48] sm:$0xff]  ;;  %v418_v30 = vld [vmem:[%s4290_s3 + $0x40] sm:$0xff]  ;;  %v421_v31 = vld [vmem:[%s4290_s3 + $0x58] sm:$0xff] }
   0xb   :  { %66 = vperm.xlu1 %2603, %v36_v13   ;;  %61 = vperm.xlu0 %2602, %v35_v14   ;;  %v420_v32 = vld [vmem:[%s4290_s3 + $0x50] sm:$0xff]  ;;  %v423_v33 = vld [vmem:[%s4290_s3 + $0x68] sm:$0xff]  ;;  %v422_v34 = vld [vmem:[%s4290_s3 + $0x60] sm:$0xff] }
   0xc   :  { %180 = vmatprep.mubr.f32.mxu0 %v2605_v8  ;;  %2442 = vmatprep.mubr.msk.f32.mxu1 %vm79_vm0, %v24_v15  ;;  %v425_v35 = vld [vmem:[%s4290_s3 + $0x78] sm:$0xff]  ;;  %v424_v36 = vld [vmem:[%s4290_s3 + $0x70] sm:$0xff]  ;;  %v427_v37 = vld [vmem:[%s4290_s3 + $0x88] sm:$0xff] }
   0xd   :  { %v426_v38 = vld [vmem:[%s4290_s3 + $0x80] sm:$0xff]  ;;  %v429_v39 = vld [vmem:[%s4290_s3 + $0x98] sm:$0xff]  ;;  %v428_v40 = vld [vmem:[%s4290_s3 + $0x90] sm:$0xff] }
   0xe   :  { %2211 = vmatmul.mubr.msk.f32.gmra.mrb[4].mxu0 %vm79_vm0, %v22_v11  ;;  %2443 = vmatmul.mubr.msk.f32.gmra.mrb[4].mxu1 %vm79_vm0, %v25_v16  ;;  %v431_v41 = vld [vmem:[%s4290_s3 + $0xa8] sm:$0xff]  ;;  %v430_v42 = vld [vmem:[%s4290_s3 + $0xa0] sm:$0xff]  ;;  %v433_v43 = vld [vmem:[%s4290_s3 + $0xb8] sm:$0xff] }
   0xf   :  { %76 = vperm.xlu1 %2603, %v38_v17   ;;  %71 = vperm.xlu0 %2602, %v37_v18   ;;  %v432_v44 = vld [vmem:[%s4290_s3 + $0xb0] sm:$0xff]  ;;  %v435_v45 = vld [vmem:[%s4290_s3 + $0xc8] sm:$0xff]  ;;  %v434_v46 = vld [vmem:[%s4290_s3 + $0xc0] sm:$0xff] }
  0x10   :  { %186 = vmatprep.mubr.f32.mxu0 %v2605_v8  ;;  %2445 = vmatprep.mubr.msk.f32.mxu1 %vm79_vm0, %v26_v19  ;;  %v437_v47 = vld [vmem:[%s4290_s3 + $0xd8] sm:$0xff]  ;;  %v436_v48 = vld [vmem:[%s4290_s3 + $0xd0] sm:$0xff]  ;;  %v439_v49 = vld [vmem:[%s4290_s3 + $0xe8] sm:$0xff] }
  0x11   :  { %v438_v50 = vld [vmem:[%s4290_s3 + $0xe0] sm:$0xff]  ;;  %v441_v51 = vld [vmem:[%s4290_s3 + $0xf8] sm:$0xff]  ;;  %v440_v52 = vld [vmem:[%s4290_s3 + $0xf0] sm:$0xff] }
  0x12   :  { %2212 = vmatmul.mubr.msk.f32.gmra.mrb[6].mxu0 %vm79_vm0, %v23_v12  ;;  %2446 = vmatmul.mubr.msk.f32.gmra.mrb[6].mxu1 %vm79_vm0, %v27_v20  ;;  %v443_v53 = vld [vmem:[%s4290_s3 + $0x108] sm:$0xff]  ;;  %v442_v54 = vld [vmem:[%s4290_s3 + $0x100] sm:$0xff]  ;;  %v445_v55 = vld [vmem:[%s4290_s3 + $0x118] sm:$0xff] }
  0x13   :  { %481 = vperm.xlu1 %2603, %v411_v21   ;;  %476 = vperm.xlu0 %2602, %v410_v22   ;;  %v444_v56 = vld [vmem:[%s4290_s3 + $0x110] sm:$0xff]  ;;  %v447_v57 = vld [vmem:[%s4290_s3 + $0x128] sm:$0xff]  ;;  %v446_v58 = vld [vmem:[%s4290_s3 + $0x120] sm:$0xff] }
  0x14   :  { %192 = vmatprep.mubr.f32.mxu0 %v2605_v8  ;;  %1135 = vmatprep.mubr.f32.mxu1 %v2605_v8  ;;  %v449_v59 = vld [vmem:[%s4290_s3 + $0x138] sm:$0xff]  ;;  %v448_v60 = vld [vmem:[%s4290_s3 + $0x130] sm:$0xff]  ;;  %v451_v61 = vld [vmem:[%s4290_s3 + $0x148] sm:$0xff] }
  0x15   :  { %v450_v62 = vld [vmem:[%s4290_s3 + $0x140] sm:$0xff]  ;;  %v453_v63 = vld [vmem:[%s4290_s3 + $0x158] sm:$0xff]  ;;  %v452_v0 = vld [vmem:[%s4290_s3 + $0x150] sm:$0xff] }
  0x16   :  { %2213 = vmatmul.mubr.msk.f32.gmra.mrb[8].mxu0 %vm79_vm0, %v24_v15  ;;  %v455_v1 = vld [vmem:[%s4290_s3 + $0x168] sm:$0xff]  ;;  %v454_v2 = vld [vmem:[%s4290_s3 + $0x160] sm:$0xff]  ;;  %v457_v3 = vld [vmem:[%s4290_s3 + $0x178] sm:$0xff] }
  0x17   :  { %491 = vperm.xlu1 %2603, %v413_v23   ;;  %486 = vperm.xlu0 %2602, %v412_v24   ;;  %v456_v4 = vld [vmem:[%s4290_s3 + $0x170] sm:$0xff]  ;;  %v459_v5 = vld [vmem:[%s4290_s3 + $0x188] sm:$0xff]  ;;  %v458_v6 = vld [vmem:[%s4290_s3 + $0x180] sm:$0xff] }
  0x18   :  { %198 = vmatprep.mubr.f32.mxu0 %v2605_v8  ;;  %v461_v7 = vld [vmem:[%s4290_s3 + $0x198] sm:$0xff]  ;;  %v460_v9 = vld [vmem:[%s4290_s3 + $0x190] sm:$0xff]  ;;  %v463_v10 = vld [vmem:[%s4290_s3 + $0x1a8] sm:$0xff] }
  0x19   :  { %v462_v11 = vld [vmem:[%s4290_s3 + $0x1a0] sm:$0xff]  ;;  %v465_v12 = vld [vmem:[%s4290_s3 + $0x1b8] sm:$0xff]  ;;  %v464_v13 = vld [vmem:[%s4290_s3 + $0x1b0] sm:$0xff] }
  0x1a   :  { %2214 = vmatmul.mubr.msk.f32.gmra.mrb[10].mxu0 %vm79_vm0, %v25_v16  ;;  %v467_v14 = vld [vmem:[%s4290_s3 + $0x1c8] sm:$0xff]  ;;  %v466_v15 = vld [vmem:[%s4290_s3 + $0x1c0] sm:$0xff]  ;;  %v469_v16 = vld [vmem:[%s4290_s3 + $0x1d8] sm:$0xff] }
  0x1b   :  { %501 = vperm.xlu1 %2603, %v415_v25   ;;  %496 = vperm.xlu0 %2602, %v414_v26   ;;  %v468_v17 = vld [vmem:[%s4290_s3 + $0x1d0] sm:$0xff]  ;;  %v471_v18 = vld [vmem:[%s4290_s3 + $0x1e8] sm:$0xff] }
  0x1c   :  { %204 = vmatprep.mubr.f32.mxu0 %v2605_v8  ;;  %v472_v21 = vld [vmem:[%s4290_s3 + $0x1f0] sm:$0xff] }
  0x1e   :  { %2215 = vmatmul.mubr.msk.f32.gmra.mrb[12].mxu0 %vm79_vm0, %v26_v19  ;;  %v470_v19 = vld [vmem:[%s4290_s3 + $0x1e0] sm:$0xff] }
  0x1f   :  { %511 = vperm.xlu1 %2603, %v417_v27   ;;  %506 = vperm.xlu0 %2602, %v416_v28  }
  0x20   :  { %210 = vmatprep.mubr.f32.mxu0 %v2605_v8 }
  0x22   :  { %2216 = vmatmul.mubr.msk.f32.gmra.mrb[14].mxu0 %vm79_vm0, %v27_v20  ;;  %v473_v20 = vld [vmem:[%s4290_s3 + $0x1f8] sm:$0xff] }
  0x23   :  { %521 = vperm.xlu1 %2603, %v419_v29   ;;  %516 = vperm.xlu0 %2602, %v418_v30  }
  0x24   :  { %1051 = vmatprep.mubr.f32.mxu0 %v2605_v8 }
  0x27   :  { %531 = vperm.xlu1 %2603, %v421_v31   ;;  %526 = vperm.xlu0 %2602, %v420_v32  }
  0x2b   :  { %541 = vperm.xlu1 %2603, %v423_v33   ;;  %536 = vperm.xlu0 %2602, %v422_v34  }
  0x2f   :  { %551 = vperm.xlu1 %2603, %v425_v35   ;;  %546 = vperm.xlu0 %2602, %v424_v36  }
  0x33   :  { %561 = vperm.xlu1 %2603, %v427_v37   ;;  %556 = vperm.xlu0 %2602, %v426_v38  }
  0x37   :  { %571 = vperm.xlu1 %2603, %v429_v39   ;;  %566 = vperm.xlu0 %2602, %v428_v40  }
  0x3b   :  { %581 = vperm.xlu1 %2603, %v431_v41   ;;  %576 = vperm.xlu0 %2602, %v430_v42  }
  0x3f   :  { %591 = vperm.xlu1 %2603, %v433_v43   ;;  %586 = vperm.xlu0 %2602, %v432_v44  }
  0x43   :  { %601 = vperm.xlu1 %2603, %v435_v45   ;;  %596 = vperm.xlu0 %2602, %v434_v46  }
  0x47   :  { %611 = vperm.xlu1 %2603, %v437_v47   ;;  %606 = vperm.xlu0 %2602, %v436_v48  }
  0x4b   :  { %621 = vperm.xlu1 %2603, %v439_v49   ;;  %616 = vperm.xlu0 %2602, %v438_v50  }
  0x4f   :  { %631 = vperm.xlu1 %2603, %v441_v51   ;;  %626 = vperm.xlu0 %2602, %v440_v52  }
  0x53   :  { %641 = vperm.xlu1 %2603, %v443_v53   ;;  %636 = vperm.xlu0 %2602, %v442_v54  }
  0x57   :  { %651 = vperm.xlu1 %2603, %v445_v55   ;;  %646 = vperm.xlu0 %2602, %v444_v56  }
  0x5b   :  { %661 = vperm.xlu1 %2603, %v447_v57   ;;  %656 = vperm.xlu0 %2602, %v446_v58  }
  0x5f   :  { %671 = vperm.xlu1 %2603, %v449_v59   ;;  %666 = vperm.xlu0 %2602, %v448_v60  }
  0x63   :  { %681 = vperm.xlu1 %2603, %v451_v61   ;;  %676 = vperm.xlu0 %2602, %v450_v62  }
  0x67   :  { %691 = vperm.xlu1 %2603, %v453_v63   ;;  %686 = vperm.xlu0 %2602, %v452_v0  }
  0x6b   :  { %701 = vperm.xlu1 %2603, %v455_v1   ;;  %696 = vperm.xlu0 %2602, %v454_v2  }
  0x6f   :  { %711 = vperm.xlu1 %2603, %v457_v3   ;;  %706 = vperm.xlu0 %2602, %v456_v4  }
  0x73   :  { %721 = vperm.xlu1 %2603, %v459_v5   ;;  %716 = vperm.xlu0 %2602, %v458_v6  }
  0x77   :  { %731 = vperm.xlu1 %2603, %v461_v7   ;;  %726 = vperm.xlu0 %2602, %v460_v9  }
  0x7b   :  { %741 = vperm.xlu1 %2603, %v463_v10   ;;  %736 = vperm.xlu0 %2602, %v462_v11  }
  0x7f   :  { %751 = vperm.xlu1 %2603, %v465_v12   ;;  %746 = vperm.xlu0 %2602, %v464_v13  }
  0x82   :  { %v52_v22 = vpop.permute.xlu1 %51  ;;  %v42_v23 = vpop.permute.xlu0 %41 }
  0x83   :  { %761 = vperm.xlu1 %2603, %v467_v14   ;;  %756 = vperm.xlu0 %2602, %v466_v15  }
  0x86   :  { %v57_v24 = vpop.permute.xlu1 %56  ;;  %v47_v25 = vpop.permute.xlu0 %46 }
  0x87   :  { %771 = vperm.xlu1 %2603, %v469_v16   ;;  %766 = vperm.xlu0 %2602, %v468_v17  }
  0x8a   :  { %v2911_v32 = vpop.permute.xlu1 %66  ;;  %v62_v38 = vpop.permute.xlu0 %61 }
  0x8b   :  { %781 = vperm.xlu1 %2603, %v471_v18   ;;  %776 = vperm.xlu0 %2602, %v470_v19  }
  0x8e   :  { %v77_v60 = vpop.permute.xlu1 %76  ;;  %v72_v61 = vpop.permute.xlu0 %71 }
  0x8f   :  { %791 = vperm.xlu1 %2603, %v473_v20   ;;  %786 = vperm.xlu0 %2602, %v472_v21  }
  0xd9   :  { %v170_v26 = vpop.f32.mrb[0].mxu0  ;;  %v2438_v27 = vpop.f32.mrb[0].mxu1 }
  0xda   :  { %v172_v28 = vpop.f32.mrb[1].mxu0  ;;  %v289_v29 = vadd.f32 %v2438_v27, %v47_v25  ;;  %v171_v30 = vadd.f32 %v170_v26, %v42_v23  ;;  %v283_v31 = vpop.f32.mrb[1].mxu1 }
  0xdb   :  { %v284_v34 = vadd.f32 %v283_v31, %v42_v23  ;;  %v173_v35 = vadd.f32 %v172_v28, %v42_v23 }
  0xdc   :  { %v327_v33 = vmax.f32 %v289_v29, 0.0  ;;  %v322_v43 = vmax.f32 %v171_v30, 0.0 }
  0xdd   :  { %v176_v36 = vpop.f32.mrb[2].mxu0  ;;  %v2441_v37 = vpop.f32.mrb[2].mxu1  ;;  %v324_v41 = vmax.f32 %v284_v34, 0.0  ;;  %v323_v50 = vmax.f32 %v173_v35, 0.0 }
  0xde   :  { %v177_v39 = vadd.f32 %v176_v36, %v47_v25  ;;  %v178_v40 = vpop.f32.mrb[3].mxu0  ;;  %v299_v42 = vadd.f32 %v2441_v37, %v57_v24  ;;  %v293_v45 = vpop.f32.mrb[3].mxu1 }
  0xdf   :  { %v179_v44 = vadd.f32 %v178_v40, %v47_v25  ;;  %v2913_v47 = vpack.c.bf16 %v327_v33, %v324_v41  ;;  %v294_v49 = vadd.f32 %v293_v45, %v52_v22 }
  0xe0   :  { %v325_v46 = vmax.f32 %v177_v39, 0.0  ;;  %v333_v48 = vmax.f32 %v299_v42, 0.0 }
  0xe1   :  { %v326_v51 = vmax.f32 %v179_v44, 0.0  ;;  %v182_v52 = vpop.f32.mrb[4].mxu0  ;;  %v2444_v53 = vpop.f32.mrb[4].mxu1  ;;  %v330_v56 = vmax.f32 %v294_v49, 0.0 }
  0xe2   :  { %v2562_v54 = vpack.c.bf16 %v325_v46, %v322_v43  ;;  %v184_v55 = vpop.f32.mrb[5].mxu0  ;;  %v309_v57 = vadd.f32 %v2444_v53, %v2911_v32  ;;  %v303_v59 = vpop.f32.mrb[5].mxu1  ;;  %v183_v62 = vadd.f32 %v182_v52, %v52_v22  ;;  %v2927_v52 = vld [vmem:[%s4291_s2] sm:$0xff]  ;;  %v2932_v53 = vld [vmem:[%s4291_s2 + $0x70] sm:$0xff] }
  0xe3   :  { %v2560_v58 = vpack.c.bf16 %v326_v51, %v323_v50  ;;  %v2916_v63 = vpack.c.bf16 %v333_v48, %v330_v56  ;;  %v304_v1 = vadd.f32 %v303_v59, %v62_v38  ;;  %v185_v2 = vadd.f32 %v184_v55, %v52_v22  ;;  %v2949_v55 = vld [vmem:[%s4291_s2 + $0x78] sm:$0xff]  ;;  %v2967_v56 = vld [vmem:[%s4291_s2 + $0x80] sm:$0xff] }
  0xe4   :  { %v339_v0 = vmax.f32 %v309_v57, 0.0  ;;  %v328_v13 = vmax.f32 %v183_v62, 0.0  ;;  %v2980_v57 = vld [vmem:[%s4291_s2 + $0x18] sm:$0xff]  ;;  %v2998_v59 = vld [vmem:[%s4291_s2 + $0x20] sm:$0xff] }
  0xe5   :  { %v188_v3 = vpop.f32.mrb[6].mxu0  ;;  %v2447_v4 = vpop.f32.mrb[6].mxu1  ;;  %2561 = vmatprep.subr.bf16.mxu0 %v2560_v58  ;;  %2592 = vmatprep.subr.bf16.mxu1 %v2560_v58  ;;  %v336_v5 = vmax.f32 %v304_v1, 0.0  ;;  %v329_v17 = vmax.f32 %v185_v2, 0.0  ;;  %v2985_v58 = vld [vmem:[%s4291_s2 + $0x88] sm:$0xff]  ;;  %v3020_v62 = vld [vmem:[%s4291_s2 + $0x98] sm:$0xff] }
  0xe6   :  { %v189_v6 = vadd.f32 %v188_v3, %v57_v24  ;;  %v319_v7 = vadd.f32 %v2447_v4, %v77_v60  ;;  %v190_v9 = vpop.f32.mrb[7].mxu0  ;;  %v313_v10 = vpop.f32.mrb[7].mxu1  ;;  %2563 = vmatpush1.bf16.msra.mxu0 %v2562_v54  ;;  %2596 = vmatpush1.bf16.msra.mxu1 %v2562_v54  ;;  %v2944_v54 = vld [vmem:[%s4291_s2 + $0x8] sm:$0xff]  ;;  %v353_v1 = vld [vmem:[%s4291_s2 + $0x38] sm:$0xff]  ;;  %v354_v3 = vld [vmem:[%s4291_s2 + $0x40] sm:$0xff] }
  0xe7   :  { %v191_v11 = vadd.f32 %v190_v9, %v57_v24  ;;  %v314_v12 = vadd.f32 %v313_v10, %v72_v61  ;;  %v2918_v14 = vpack.c.bf16 %v339_v0, %v336_v5  ;;  %v3034_v0 = vld [vmem:[%s4291_s2 + $0xa0] sm:$0xff]  ;;  %v3047_v2 = vld [vmem:[%s4291_s2 + $0xa8] sm:$0xff]  ;;  %v3060_v4 = vld [vmem:[%s4291_s2 + $0xb0] sm:$0xff] }
  0xe8   :  { %v331_v15 = vmax.f32 %v189_v6, 0.0  ;;  %v345_v16 = vmax.f32 %v319_v7, 0.0  ;;  %v355_v5 = vld [vmem:[%s4291_s2 + $0x48] sm:$0xff]  ;;  %v3073_v6 = vld [vmem:[%s4291_s2 + $0xb8] sm:$0xff]  ;;  %v356_v7 = vld [vmem:[%s4291_s2 + $0x50] sm:$0xff] }
  0xe9   :  { %v332_v18 = vmax.f32 %v191_v11, 0.0  ;;  %v342_v19 = vmax.f32 %v314_v12, 0.0  ;;  %v194_v20 = vpop.f32.mrb[8].mxu0  ;;  %v3086_v9 = vld [vmem:[%s4291_s2 + $0xc0] sm:$0xff]  ;;  %v357_v10 = vld [vmem:[%s4291_s2 + $0x58] sm:$0xff]  ;;  %v3099_v11 = vld [vmem:[%s4291_s2 + $0xc8] sm:$0xff] }
  0xea   :  { %v2566_v21 = vpack.c.bf16 %v331_v15, %v328_v13  ;;  %v196_v22 = vpop.f32.mrb[9].mxu0  ;;  %v195_v26 = vadd.f32 %v194_v20, %v62_v38  ;;  %v358_v12 = vld [vmem:[%s4291_s2 + $0x60] sm:$0xff]  ;;  %v3112_v13 = vld [vmem:[%s4291_s2 + $0xd0] sm:$0xff]  ;;  %v3125_v15 = vld [vmem:[%s4291_s2 + $0xd8] sm:$0xff] }
  0xeb   :  { %v2564_v23 = vpack.c.bf16 %v332_v18, %v329_v17  ;;  %v2920_v25 = vpack.c.bf16 %v345_v16, %v342_v19  ;;  %v197_v27 = vadd.f32 %v196_v22, %v62_v38  ;;  %v3136_v16 = vld [vmem:[%s4291_s2 + $0xe0] sm:$0xff]  ;;  %v3148_v17 = vld [vmem:[%s4291_s2 + $0xe8] sm:$0xff]  ;;  %v3160_v18 = vld [vmem:[%s4291_s2 + $0xf0] sm:$0xff] }
  0xec   :  { %v334_v31 = vmax.f32 %v195_v26, 0.0  ;;  %v377_v19 = vld [vmem:[%s4291_s2 + $0xf8] sm:$0xff]  ;;  %v378_v20 = vld [vmem:[%s4291_s2 + $0x100] sm:$0xff]  ;;  %v380_v22 = vld [vmem:[%s4291_s2 + $0x110] sm:$0xff] }
  0xed   :  { %v200_v28 = vpop.f32.mrb[10].mxu0  ;;  %2565 = vmatprep.subr.bf16.mxu0 %v2564_v23  ;;  %2593 = vmatprep.subr.bf16.mxu1 %v2564_v23  ;;  %v335_v34 = vmax.f32 %v197_v27, 0.0  ;;  %v381_v23 = vld [vmem:[%s4291_s2 + $0x118] sm:$0xff]  ;;  %v383_v26 = vld [vmem:[%s4291_s2 + $0x128] sm:$0xff]  ;;  %v384_v27 = vld [vmem:[%s4291_s2 + $0x130] sm:$0xff] }
  0xee   :  { %v201_v24 = vadd.f32 %v200_v28, %v2911_v32  ;;  %v202_v29 = vpop.f32.mrb[11].mxu0  ;;  %2567 = vmatpush1.bf16.msra.mxu0 %v2566_v21  ;;  %2597 = vmatpush1.bf16.msra.mxu1 %v2566_v21  ;;  %v379_v21 = vld [vmem:[%s4291_s2 + $0x108] sm:$0xff]  ;;  %v385_v28 = vld [vmem:[%s4291_s2 + $0x138] sm:$0xff] }
  0xef   :  { %v203_v30 = vadd.f32 %v202_v29, %v2911_v32  ;;  %v387_v29 = vld [vmem:[%s4291_s2 + $0x148] sm:$0xff] }
  0xf0   :  { %v337_v33 = vmax.f32 %v201_v24, 0.0  ;;  %v386_v24 = vld [vmem:[%s4291_s2 + $0x140] sm:$0xff] }
  0xf1   :  { %v338_v35 = vmax.f32 %v203_v30, 0.0  ;;  %v206_v36 = vpop.f32.mrb[12].mxu0  ;;  %v388_v30 = vld [vmem:[%s4291_s2 + $0x150] sm:$0xff] }
  0xf2   :  { %v2570_v37 = vpack.c.bf16 %v337_v33, %v334_v31  ;;  %v208_v39 = vpop.f32.mrb[13].mxu0  ;;  %v207_v41 = vadd.f32 %v206_v36, %v72_v61  ;;  %v389_v31 = vld [vmem:[%s4291_s2 + $0x158] sm:$0xff]  ;;  %v390_v33 = vld [vmem:[%s4291_s2 + $0x160] sm:$0xff] }
  0xf3   :  { %v2568_v40 = vpack.c.bf16 %v338_v35, %v335_v34  ;;  %v209_v38 = vadd.f32 %v208_v39, %v72_v61  ;;  %v3015_v61 = vld [vmem:[%s4291_s2 + $0x28] sm:$0xff]  ;;  %v392_v35 = vld [vmem:[%s4291_s2 + $0x170] sm:$0xff]  ;;  %v393_v36 = vld [vmem:[%s4291_s2 + $0x178] sm:$0xff] }
  0xf4   :  { %v340_v46 = vmax.f32 %v207_v41, 0.0  ;;  %v391_v34 = vld [vmem:[%s4291_s2 + $0x168] sm:$0xff]  ;;  %v397_v41 = vld [vmem:[%s4291_s2 + $0x198] sm:$0xff] }
  0xf5   :  { %v212_v42 = vpop.f32.mrb[14].mxu0  ;;  %2569 = vmatprep.subr.bf16.mxu0 %v2568_v40  ;;  %2594 = vmatprep.subr.bf16.mxu1 %v2568_v40  ;;  %v341_v48 = vmax.f32 %v209_v38, 0.0  ;;  %v395_v39 = vld [vmem:[%s4291_s2 + $0x188] sm:$0xff]  ;;  %v396_v40 = vld [vmem:[%s4291_s2 + $0x190] sm:$0xff]  ;;  %v398_v38 = vld [vmem:[%s4291_s2 + $0x1a0] sm:$0xff] }
  0xf6   :  { %v213_v43 = vadd.f32 %v212_v42, %v77_v60  ;;  %v214_v44 = vpop.f32.mrb[15].mxu0  ;;  %2571 = vmatpush1.bf16.msra.mxu0 %v2570_v37  ;;  %2598 = vmatpush1.bf16.msra.mxu1 %v2570_v37  ;;  %v394_v37 = vld [vmem:[%s4291_s2 + $0x180] sm:$0xff]  ;;  %v399_v42 = vld [vmem:[%s4291_s2 + $0x1a8] sm:$0xff] }
  0xf7   :  { %v215_v45 = vadd.f32 %v214_v44, %v77_v60  ;;  %v3003_v60 = vld [vmem:[%s4291_s2 + $0x90] sm:$0xff]  ;;  %v3349_v44 = vpop.permute.xlu1 %481 }
  0xf8   :  { %v343_v32 = vmax.f32 %v213_v43, 0.0  ;;  %v400_v43 = vld [vmem:[%s4291_s2 + $0x1b0] sm:$0xff] }
  0xf9   :  { %v344_v49 = vmax.f32 %v215_v45, 0.0  ;;  %v3351_v45 = vpop.permute.xlu0 %476 }
  0xfa   :  { %v2574_v50 = vpack.c.bf16 %v343_v32, %v340_v46  ;;  %v401_v46 = vld [vmem:[%s4291_s2 + $0x1b8] sm:$0xff]  ;;  %v402_v32 = vld [vmem:[%s4291_s2 + $0x1c0] sm:$0xff] }
  0xfb   :  { %v2572_v51 = vpack.c.bf16 %v344_v49, %v341_v48  ;;  %v403_v48 = vld [vmem:[%s4291_s2 + $0x1c8] sm:$0xff]  ;;  %v3370_v49 = vpop.permute.xlu1 %491 }
  0xfd   :  { %2573 = vmatprep.subr.bf16.mxu0 %v2572_v51  ;;  %2595 = vmatprep.subr.bf16.mxu1 %v2572_v51  ;;  %v404_v51 = vld [vmem:[%s4291_s2 + $0x1d0] sm:$0xff] }
  0xfe   :  { %2575 = vmatpush1.bf16.msra.mxu0 %v2574_v50  ;;  %2599 = vmatpush1.bf16.msra.mxu1 %v2574_v50  ;;  %v3372_v50 = vpop.permute.xlu0 %486 }
  0xff   :  { %2577 = vmatprep.subr.bf16.mxu0 %v2913_v47 }
 0x101   :  { %2225 = vmatmul.mubr.msk.f32.vlgmr.msra.gmra.mrb[16].mxu0 %vm794_vm1, %v2927_v52  ;;  %2239 = vmatmul.mubr.msk.f32.vlgmr.msra.gmra.mrb[8].mxu1 %vm794_vm1, %v2932_v53 }
 0x102   :  { %2579 = vmatpush3.bf16.msra.mxu0 %v2913_v47  ;;  %1057 = vmatprep.mubr.f32.mxu0 %v2605_v8  ;;  %v2962_v47 = vld [vmem:[%s4291_s2 + $0x10] sm:$0xff] }
 0x103   :  { %2581 = vmatprep.subr.bf16.mxu0 %v2916_v63  ;;  %1141 = vmatprep.mubr.f32.mxu1 %v2605_v8 }
 0x105   :  { %2226 = vmatmul.mubr.msk.f32.gmra.mrb[18].mxu0 %vm794_vm1, %v2944_v54  ;;  %2240 = vmatmul.mubr.msk.f32.gmra.mrb[10].mxu1 %vm794_vm1, %v2949_v55 }
 0x106   :  { %2583 = vmatpush3.bf16.msra.mxu0 %v2916_v63  ;;  %1063 = vmatprep.mubr.f32.mxu0 %v2605_v8  ;;  %v352_v63 = vld [vmem:[%s4291_s2 + $0x30] sm:$0xff] }
 0x107   :  { %2585 = vmatprep.subr.bf16.mxu0 %v2918_v14  ;;  %1147 = vmatprep.mubr.f32.mxu1 %v2605_v8 }
 0x109   :  { %2227 = vmatmul.mubr.msk.f32.gmra.mrb[20].mxu0 %vm794_vm1, %v2962_v47  ;;  %2241 = vmatmul.mubr.msk.f32.gmra.mrb[12].mxu1 %vm794_vm1, %v2967_v56 }
 0x10a   :  { %2587 = vmatpush3.bf16.msra.mxu0 %v2918_v14  ;;  %1069 = vmatprep.mubr.f32.mxu0 %v2605_v8  ;;  %v359_v14 = vld [vmem:[%s4291_s2 + $0x68] sm:$0xff] }
 0x10b   :  { %2589 = vmatprep.subr.bf16.mxu0 %v2920_v25  ;;  %1153 = vmatprep.mubr.f32.mxu1 %v2605_v8 }
 0x10d   :  { %2228 = vmatmul.mubr.msk.f32.gmra.mrb[22].mxu0 %vm794_vm1, %v2980_v57  ;;  %2242 = vmatmul.mubr.msk.f32.gmra.mrb[14].mxu1 %vm794_vm1, %v2985_v58 }
 0x10e   :  { %2591 = vmatpush3.bf16.msra.mxu0 %v2920_v25  ;;  %1075 = vmatprep.mubr.f32.mxu0 %v2605_v8  ;;  %v382_v25 = vld [vmem:[%s4291_s2 + $0x120] sm:$0xff] }
 0x10f   :  { %1159 = vmatprep.mubr.f32.mxu1 %v2605_v8 }
 0x111   :  { %2229 = vmatmul.mubr.msk.f32.gmra.mrb[24].mxu0 %vm794_vm1, %v2998_v59  ;;  %2243 = vmatmul.mubr.msk.f32.gmra.mrb[16].mxu1 %vm794_vm1, %v3003_v60 }
 0x112   :  { %1081 = vmatprep.mubr.f32.mxu0 %v2605_v8  ;;  %1165 = vmatprep.mubr.f32.mxu1 %v2605_v8 }
 0x115   :  { %2230 = vmatmul.mubr.msk.f32.gmra.mrb[26].mxu0 %vm794_vm1, %v3015_v61  ;;  %2244 = vmatmul.mubr.msk.f32.gmra.mrb[18].mxu1 %vm794_vm1, %v3020_v62 }
 0x116   :  { %1087 = vmatprep.mubr.f32.mxu0 %v2605_v8  ;;  %1171 = vmatprep.mubr.f32.mxu1 %v2605_v8 }
 0x119   :  { %2231 = vmatmul.mubr.msk.f32.gmra.mrb[28].mxu0 %vm794_vm1, %v352_v63  ;;  %2245 = vmatmul.mubr.msk.f32.gmra.mrb[20].mxu1 %vm794_vm1, %v3034_v0 }
 0x11a   :  { %1093 = vmatprep.mubr.f32.mxu0 %v2605_v8  ;;  %1177 = vmatprep.mubr.f32.mxu1 %v2605_v8 }
 0x11d   :  { %2232 = vmatmul.mubr.msk.f32.gmra.mrb[30].mxu0 %vm794_vm1, %v353_v1  ;;  %2246 = vmatmul.mubr.msk.f32.gmra.mrb[22].mxu1 %vm794_vm1, %v3047_v2 }
 0x11e   :  { %1099 = vmatprep.mubr.f32.mxu0 %v2605_v8  ;;  %1183 = vmatprep.mubr.f32.mxu1 %v2605_v8 }
 0x121   :  { %2233 = vmatmul.mubr.msk.f32.gmra.mrb[32].mxu0 %vm794_vm1, %v354_v3  ;;  %2247 = vmatmul.mubr.msk.f32.gmra.mrb[24].mxu1 %vm794_vm1, %v3060_v4 }
 0x122   :  { %1105 = vmatprep.mubr.f32.mxu0 %v2605_v8  ;;  %1189 = vmatprep.mubr.f32.mxu1 %v2605_v8 }
 0x125   :  { %2234 = vmatmul.mubr.msk.f32.gmra.mrb[34].mxu0 %vm794_vm1, %v355_v5  ;;  %2248 = vmatmul.mubr.msk.f32.gmra.mrb[26].mxu1 %vm794_vm1, %v3073_v6 }
 0x126   :  { %1111 = vmatprep.mubr.f32.mxu0 %v2605_v8  ;;  %1195 = vmatprep.mubr.f32.mxu1 %v2605_v8 }
 0x129   :  { %2235 = vmatmul.mubr.msk.f32.gmra.mrb[36].mxu0 %vm794_vm1, %v356_v7  ;;  %2249 = vmatmul.mubr.msk.f32.gmra.mrb[28].mxu1 %vm794_vm1, %v3086_v9 }
 0x12a   :  { %1117 = vmatprep.mubr.f32.mxu0 %v2605_v8  ;;  %1201 = vmatprep.mubr.f32.mxu1 %v2605_v8 }
 0x12d   :  { %2236 = vmatmul.mubr.msk.f32.gmra.mrb[38].mxu0 %vm794_vm1, %v357_v10  ;;  %2250 = vmatmul.mubr.msk.f32.gmra.mrb[30].mxu1 %vm794_vm1, %v3099_v11 }
 0x12e   :  { %1123 = vmatprep.mubr.f32.mxu0 %v2605_v8  ;;  %1207 = vmatprep.mubr.f32.mxu1 %v2605_v8 }
 0x131   :  { %2237 = vmatmul.mubr.msk.f32.gmra.mrb[40].mxu0 %vm794_vm1, %v358_v12  ;;  %2251 = vmatmul.mubr.msk.f32.gmra.mrb[32].mxu1 %vm794_vm1, %v3112_v13 }
 0x132   :  { %1129 = vmatprep.mubr.f32.mxu0 %v2605_v8  ;;  %1213 = vmatprep.mubr.f32.mxu1 %v2605_v8 }
 0x135   :  { %2238 = vmatmul.mubr.msk.f32.gmra.mrb[42].mxu0 %vm794_vm1, %v359_v14  ;;  %2252 = vmatmul.mubr.msk.f32.gmra.mrb[34].mxu1 %vm794_vm1, %v3125_v15 }
 0x136   :  { %1219 = vmatprep.mubr.f32.mxu1 %v2605_v8  ;;  %2464 = vmatprep.mubr.msk.f32.mxu0 %vm794_vm1, %v2927_v52  ;;  %v405_v52 = vld [vmem:[%s4291_s2 + $0x1d8] sm:$0xff] }
 0x139   :  { %2253 = vmatmul.mubr.msk.f32.gmra.mrb[36].mxu1 %vm794_vm1, %v3136_v16  ;;  %2465 = vmatmul.mubr.msk.f32.vlgmr.msra.gmra.mrb[44].mxu0 %vm794_vm1, %v2944_v54  ;;  %v3387_v54 = vpop.permute.xlu1 %501 }
 0x13a   :  { %1225 = vmatprep.mubr.f32.mxu1 %v2605_v8  ;;  %2467 = vmatprep.mubr.msk.f32.mxu0 %vm794_vm1, %v2962_v47  ;;  %v407_v47 = vld [vmem:[%s4291_s2 + $0x1e8] sm:$0xff] }
 0x13d   :  { %2254 = vmatmul.mubr.msk.f32.gmra.mrb[38].mxu1 %vm794_vm1, %v3148_v17  ;;  %2468 = vmatmul.mubr.msk.f32.gmra.mrb[46].mxu0 %vm794_vm1, %v2980_v57  ;;  %v409_v57 = vld [vmem:[%s4291_s2 + $0x1f8] sm:$0xff] }
 0x13e   :  { %1231 = vmatprep.mubr.f32.mxu1 %v2605_v8  ;;  %2470 = vmatprep.mubr.msk.f32.mxu0 %vm794_vm1, %v2998_v59 }
 0x141   :  { %2255 = vmatmul.mubr.msk.f32.gmra.mrb[40].mxu1 %vm794_vm1, %v3160_v18  ;;  %2471 = vmatmul.mubr.msk.f32.gmra.mrb[48].mxu0 %vm794_vm1, %v3015_v61 }
 0x142   :  { %1237 = vmatprep.mubr.f32.mxu1 %v2605_v8  ;;  %2473 = vmatprep.mubr.msk.f32.mxu0 %vm794_vm1, %v352_v63 }
 0x145   :  { %2256 = vmatmul.mubr.msk.f32.gmra.mrb[42].mxu1 %vm794_vm1, %v377_v19  ;;  %2474 = vmatmul.mubr.msk.f32.gmra.mrb[50].mxu0 %vm794_vm1, %v353_v1 }
 0x146   :  { %1243 = vmatprep.mubr.f32.mxu1 %v2605_v8  ;;  %2476 = vmatprep.mubr.msk.f32.mxu0 %vm794_vm1, %v354_v3 }
 0x149   :  { %2257 = vmatmul.mubr.msk.f32.gmra.mrb[44].mxu1 %vm794_vm1, %v378_v20  ;;  %2477 = vmatmul.mubr.msk.f32.gmra.mrb[52].mxu0 %vm794_vm1, %v355_v5 }
 0x14a   :  { %1249 = vmatprep.mubr.f32.mxu1 %v2605_v8  ;;  %2479 = vmatprep.mubr.msk.f32.mxu0 %vm794_vm1, %v356_v7 }
 0x14d   :  { %2258 = vmatmul.mubr.msk.f32.gmra.mrb[46].mxu1 %vm794_vm1, %v379_v21  ;;  %2480 = vmatmul.mubr.msk.f32.gmra.mrb[54].mxu0 %vm794_vm1, %v357_v10 }
 0x14e   :  { %1255 = vmatprep.mubr.f32.mxu1 %v2605_v8  ;;  %2482 = vmatprep.mubr.msk.f32.mxu0 %vm794_vm1, %v358_v12 }
 0x151   :  { %2259 = vmatmul.mubr.msk.f32.gmra.mrb[48].mxu1 %vm794_vm1, %v380_v22  ;;  %2483 = vmatmul.mubr.msk.f32.gmra.mrb[56].mxu0 %vm794_vm1, %v359_v14 }
 0x152   :  { %1261 = vmatprep.mubr.f32.mxu1 %v2605_v8  ;;  %2485 = vmatprep.mubr.msk.f32.mxu0 %vm794_vm1, %v2932_v53  ;;  %v406_v53 = vld [vmem:[%s4291_s2 + $0x1e0] sm:$0xff] }
 0x155   :  { %2260 = vmatmul.mubr.msk.f32.gmra.mrb[50].mxu1 %vm794_vm1, %v381_v23  ;;  %2486 = vmatmul.mubr.msk.f32.gmra.mrb[58].mxu0 %vm794_vm1, %v2949_v55  ;;  %v3389_v55 = vpop.permute.xlu0 %496 }
 0x156   :  { %1267 = vmatprep.mubr.f32.mxu1 %v2605_v8  ;;  %2488 = vmatprep.mubr.msk.f32.mxu0 %vm794_vm1, %v2967_v56  ;;  %v408_v56 = vld [vmem:[%s4291_s2 + $0x1f0] sm:$0xff] }
 0x159   :  { %2261 = vmatmul.mubr.msk.f32.gmra.mrb[52].mxu1 %vm794_vm1, %v382_v25  ;;  %2489 = vmatmul.mubr.msk.f32.gmra.mrb[60].mxu0 %vm794_vm1, %v2985_v58  ;;  %v3408_v58 = vpop.permute.xlu1 %511  ;;  %v3410_v59 = vpop.permute.xlu0 %506 }
 0x15a   :  { %1273 = vmatprep.mubr.f32.mxu1 %v2605_v8  ;;  %2491 = vmatprep.mubr.msk.f32.mxu0 %vm794_vm1, %v3003_v60 }
 0x15d   :  { %2262 = vmatmul.mubr.msk.f32.gmra.mrb[54].mxu1 %vm794_vm1, %v383_v26  ;;  %2492 = vmatmul.mubr.msk.f32.gmra.mrb[62].mxu0 %vm794_vm1, %v3020_v62  ;;  %v3415_v60 = vpop.permute.xlu1 %521  ;;  %v3417_v61 = vpop.permute.xlu0 %516 }
 0x15e   :  { %1279 = vmatprep.mubr.f32.mxu1 %v2605_v8  ;;  %2494 = vmatprep.mubr.msk.f32.mxu0 %vm794_vm1, %v3034_v0 }
 0x161   :  { %2263 = vmatmul.mubr.msk.f32.gmra.mrb[56].mxu1 %vm794_vm1, %v384_v27  ;;  %2495 = vmatmul.mubr.msk.f32.gmra.mrb[64].mxu0 %vm794_vm1, %v3047_v2  ;;  %v3423_v62 = vpop.permute.xlu1 %531  ;;  %v3425_v63 = vpop.permute.xlu0 %526 }
 0x162   :  { %1285 = vmatprep.mubr.f32.mxu1 %v2605_v8  ;;  %2497 = vmatprep.mubr.msk.f32.mxu0 %vm794_vm1, %v3060_v4 }
 0x165   :  { %2264 = vmatmul.mubr.msk.f32.gmra.mrb[58].mxu1 %vm794_vm1, %v385_v28  ;;  %2498 = vmatmul.mubr.msk.f32.gmra.mrb[66].mxu0 %vm794_vm1, %v3073_v6  ;;  %v3429_v0 = vpop.permute.xlu1 %541  ;;  %v3431_v1 = vpop.permute.xlu0 %536 }
 0x166   :  { %1291 = vmatprep.mubr.f32.mxu1 %v2605_v8  ;;  %2500 = vmatprep.mubr.msk.f32.mxu0 %vm794_vm1, %v3086_v9 }
 0x169   :  { %2265 = vmatmul.mubr.msk.f32.gmra.mrb[60].mxu1 %vm794_vm1, %v386_v24  ;;  %2501 = vmatmul.mubr.msk.f32.gmra.mrb[68].mxu0 %vm794_vm1, %v3099_v11  ;;  %v3434_v2 = vpop.permute.xlu1 %551  ;;  %v3436_v3 = vpop.permute.xlu0 %546 }
 0x16a   :  { %1297 = vmatprep.mubr.f32.mxu1 %v2605_v8  ;;  %2503 = vmatprep.mubr.msk.f32.mxu0 %vm794_vm1, %v3112_v13 }
 0x16d   :  { %2266 = vmatmul.mubr.msk.f32.gmra.mrb[62].mxu1 %vm794_vm1, %v387_v29  ;;  %2504 = vmatmul.mubr.msk.f32.gmra.mrb[70].mxu0 %vm794_vm1, %v3125_v15  ;;  %v3438_v4 = vpop.permute.xlu1 %561  ;;  %v3440_v5 = vpop.permute.xlu0 %556 }
 0x16e   :  { %1303 = vmatprep.mubr.f32.mxu1 %v2605_v8  ;;  %2506 = vmatprep.mubr.msk.f32.mxu0 %vm794_vm1, %v3136_v16 }
 0x171   :  { %2267 = vmatmul.mubr.msk.f32.gmra.mrb[64].mxu1 %vm794_vm1, %v388_v30  ;;  %2507 = vmatmul.mubr.msk.f32.gmra.mrb[72].mxu0 %vm794_vm1, %v3148_v17  ;;  %v3446_v14 = vpop.permute.xlu1 %571  ;;  %v3448_v15 = vpop.permute.xlu0 %566 }
 0x172   :  { %1309 = vmatprep.mubr.f32.mxu1 %v2605_v8  ;;  %2509 = vmatprep.mubr.msk.f32.mxu0 %vm794_vm1, %v3160_v18 }
 0x175   :  { %2268 = vmatmul.mubr.msk.f32.gmra.mrb[66].mxu1 %vm794_vm1, %v389_v31  ;;  %2510 = vmatmul.mubr.msk.f32.gmra.mrb[74].mxu0 %vm794_vm1, %v377_v19 }
 0x176   :  { %1315 = vmatprep.mubr.f32.mxu1 %v2605_v8  ;;  %2512 = vmatprep.mubr.msk.f32.mxu0 %vm794_vm1, %v378_v20 }
 0x179   :  { %2269 = vmatmul.mubr.msk.f32.gmra.mrb[68].mxu1 %vm794_vm1, %v390_v33  ;;  %2513 = vmatmul.mubr.msk.f32.gmra.mrb[76].mxu0 %vm794_vm1, %v379_v21 }
 0x17a   :  { %1321 = vmatprep.mubr.f32.mxu1 %v2605_v8  ;;  %2515 = vmatprep.mubr.msk.f32.mxu0 %vm794_vm1, %v380_v22 }
 0x17d   :  { %2270 = vmatmul.mubr.msk.f32.gmra.mrb[70].mxu1 %vm794_vm1, %v391_v34  ;;  %2516 = vmatmul.mubr.msk.f32.gmra.mrb[78].mxu0 %vm794_vm1, %v381_v23 }
 0x17e   :  { %1327 = vmatprep.mubr.f32.mxu1 %v2605_v8  ;;  %2518 = vmatprep.mubr.msk.f32.mxu0 %vm794_vm1, %v382_v25 }
 0x181   :  { %2271 = vmatmul.mubr.msk.f32.gmra.mrb[72].mxu1 %vm794_vm1, %v392_v35  ;;  %2519 = vmatmul.mubr.msk.f32.gmra.mrb[80].mxu0 %vm794_vm1, %v383_v26 }
 0x182   :  { %1333 = vmatprep.mubr.f32.mxu1 %v2605_v8  ;;  %2521 = vmatprep.mubr.msk.f32.mxu0 %vm794_vm1, %v384_v27 }
 0x185   :  { %2272 = vmatmul.mubr.msk.f32.gmra.mrb[74].mxu1 %vm794_vm1, %v393_v36  ;;  %2522 = vmatmul.mubr.msk.f32.gmra.mrb[82].mxu0 %vm794_vm1, %v385_v28 }
 0x186   :  { %1339 = vmatprep.mubr.f32.mxu1 %v2605_v8  ;;  %2524 = vmatprep.mubr.msk.f32.mxu0 %vm794_vm1, %v386_v24 }
 0x189   :  { %2273 = vmatmul.mubr.msk.f32.gmra.mrb[76].mxu1 %vm794_vm1, %v394_v37  ;;  %2525 = vmatmul.mubr.msk.f32.gmra.mrb[84].mxu0 %vm794_vm1, %v387_v29 }
 0x18a   :  { %1345 = vmatprep.mubr.f32.mxu1 %v2605_v8  ;;  %2527 = vmatprep.mubr.msk.f32.mxu0 %vm794_vm1, %v388_v30 }
 0x18d   :  { %2274 = vmatmul.mubr.msk.f32.gmra.mrb[78].mxu1 %vm794_vm1, %v395_v39  ;;  %2528 = vmatmul.mubr.msk.f32.gmra.mrb[86].mxu0 %vm794_vm1, %v389_v31 }
 0x18e   :  { %1351 = vmatprep.mubr.f32.mxu1 %v2605_v8  ;;  %2530 = vmatprep.mubr.msk.f32.mxu0 %vm794_vm1, %v390_v33 }
 0x191   :  { %2275 = vmatmul.mubr.msk.f32.gmra.mrb[80].mxu1 %vm794_vm1, %v396_v40  ;;  %2531 = vmatmul.mubr.msk.f32.gmra.mrb[88].mxu0 %vm794_vm1, %v391_v34 }
 0x192   :  { %1357 = vmatprep.mubr.f32.mxu1 %v2605_v8  ;;  %2533 = vmatprep.mubr.msk.f32.mxu0 %vm794_vm1, %v392_v35 }
 0x195   :  { %2276 = vmatmul.mubr.msk.f32.gmra.mrb[82].mxu1 %vm794_vm1, %v397_v41  ;;  %2534 = vmatmul.mubr.msk.f32.gmra.mrb[90].mxu0 %vm794_vm1, %v393_v36 }
 0x196   :  { %1363 = vmatprep.mubr.f32.mxu1 %v2605_v8  ;;  %2536 = vmatprep.mubr.msk.f32.mxu0 %vm794_vm1, %v394_v37 }
 0x199   :  { %2277 = vmatmul.mubr.msk.f32.gmra.mrb[84].mxu1 %vm794_vm1, %v398_v38  ;;  %2537 = vmatmul.mubr.msk.f32.gmra.mrb[92].mxu0 %vm794_vm1, %v395_v39 }
 0x19a   :  { %1369 = vmatprep.mubr.f32.mxu1 %v2605_v8  ;;  %2539 = vmatprep.mubr.msk.f32.mxu0 %vm794_vm1, %v396_v40 }
 0x19d   :  { %2278 = vmatmul.mubr.msk.f32.gmra.mrb[86].mxu1 %vm794_vm1, %v399_v42  ;;  %2540 = vmatmul.mubr.msk.f32.gmra.mrb[94].mxu0 %vm794_vm1, %v397_v41 }
 0x19e   :  { %1375 = vmatprep.mubr.f32.mxu1 %v2605_v8  ;;  %2542 = vmatprep.mubr.msk.f32.mxu0 %vm794_vm1, %v398_v38  ;;  %v3482_v38 = vpop.permute.xlu1 %581 }
 0x1a1   :  { %2279 = vmatmul.mubr.msk.f32.gmra.mrb[88].mxu1 %vm794_vm1, %v400_v43  ;;  %2543 = vmatmul.mubr.msk.f32.gmra.mrb[96].mxu0 %vm794_vm1, %v399_v42  ;;  %v3484_v42 = vpop.permute.xlu0 %576 }
 0x1a2   :  { %1381 = vmatprep.mubr.f32.mxu1 %v2605_v8  ;;  %2545 = vmatprep.mubr.msk.f32.mxu0 %vm794_vm1, %v400_v43 }
 0x1a5   :  { %2280 = vmatmul.mubr.msk.f32.gmra.mrb[90].mxu1 %vm794_vm1, %v401_v46  ;;  %2546 = vmatmul.mubr.msk.f32.gmra.mrb[98].mxu0 %vm794_vm1, %v401_v46 }
 0x1a6   :  { %1387 = vmatprep.mubr.f32.mxu1 %v2605_v8  ;;  %2548 = vmatprep.mubr.msk.f32.mxu0 %vm794_vm1, %v402_v32 }
 0x1a9   :  { %2281 = vmatmul.mubr.msk.f32.gmra.mrb[92].mxu1 %vm794_vm1, %v402_v32  ;;  %2549 = vmatmul.mubr.msk.f32.gmra.mrb[100].mxu0 %vm794_vm1, %v403_v48 }
 0x1aa   :  { %1393 = vmatprep.mubr.f32.mxu1 %v2605_v8  ;;  %2551 = vmatprep.mubr.msk.f32.mxu0 %vm794_vm1, %v404_v51 }
 0x1ad   :  { %2282 = vmatmul.mubr.msk.f32.gmra.mrb[94].mxu1 %vm794_vm1, %v403_v48  ;;  %2552 = vmatmul.mubr.msk.f32.gmra.mrb[102].mxu0 %vm794_vm1, %v405_v52 }
 0x1ae   :  { %1399 = vmatprep.mubr.f32.mxu1 %v2605_v8  ;;  %2554 = vmatprep.mubr.msk.f32.mxu0 %vm794_vm1, %v406_v53 }
 0x1b1   :  { %2283 = vmatmul.mubr.msk.f32.gmra.mrb[96].mxu1 %vm794_vm1, %v404_v51  ;;  %2555 = vmatmul.mubr.msk.f32.gmra.mrb[104].mxu0 %vm794_vm1, %v407_v47 }
 0x1b2   :  { %1405 = vmatprep.mubr.f32.mxu1 %v2605_v8  ;;  %2557 = vmatprep.mubr.msk.f32.mxu0 %vm794_vm1, %v408_v56 }
 0x1b5   :  { %2284 = vmatmul.mubr.msk.f32.gmra.mrb[98].mxu1 %vm794_vm1, %v405_v52  ;;  %2558 = vmatmul.mubr.msk.f32.gmra.mrb[106].mxu0 %vm794_vm1, %v409_v57 }
 0x1b6   :  { %1411 = vmatprep.mubr.f32.mxu1 %v2605_v8 }
 0x1b9   :  { %2285 = vmatmul.mubr.msk.f32.gmra.mrb[100].mxu1 %vm794_vm1, %v406_v53 }
 0x1ba   :  { %1417 = vmatprep.mubr.f32.mxu1 %v2605_v8 }
 0x1bd   :  { %2286 = vmatmul.mubr.msk.f32.gmra.mrb[102].mxu1 %vm794_vm1, %v407_v47 }
 0x1be   :  { %1423 = vmatprep.mubr.f32.mxu1 %v2605_v8 }
 0x1c1   :  { %2287 = vmatmul.mubr.msk.f32.gmra.mrb[104].mxu1 %vm794_vm1, %v408_v56 }
 0x1c2   :  { %1429 = vmatprep.mubr.f32.mxu1 %v2605_v8 }
 0x1c5   :  { %2288 = vmatmul.mubr.msk.f32.gmra.mrb[106].mxu1 %vm794_vm1, %v409_v57 }
 0x1d4   :  { %v1053_v6 = vpop.f32.mrb[16].mxu0  ;;  %v1137_v7 = vpop.f32.mrb[8].mxu1 }
 0x1d5   :  { %v1054_v9 = vadd.f32 %v1053_v6, %v3351_v45  ;;  %v1138_v8 = vadd.f32 %v1137_v7, %v3436_v3  ;;  %v1055_v10 = vpop.f32.mrb[17].mxu0  ;;  %v1139_v11 = vpop.f32.mrb[9].mxu1 }
 0x1d6   :  { %v1056_v12 = vadd.f32 %v1055_v10, %v3351_v45  ;;  %v1140_v13 = vadd.f32 %v1139_v11, %v3436_v3 }
 0x1d7   :  { %v1821_v16 = vmax.f32 %v1054_v9, 0.0  ;;  %v1863_v17 = vmax.f32 %v1138_v8, 0.0 }
 0x1d8   :  { %v1822_v18 = vmax.f32 %v1056_v12, 0.0  ;;  %v1864_v19 = vmax.f32 %v1140_v13, 0.0  ;;  %v1059_v20 = vpop.f32.mrb[18].mxu0  ;;  %v1143_v21 = vpop.f32.mrb[10].mxu1 }
 0x1d9   :  { %2013 = vst [vmem:[%s4292_s5] sm:$0xff] %v1821_v16  ;;  %2055 = vst [vmem:[%s4292_s5 + $0x150] sm:$0xff] %v1863_v17  ;;  %v1060_v22 = vadd.f32 %v1059_v20, %v3349_v44  ;;  %v1144_v23 = vadd.f32 %v1143_v21, %v3434_v2  ;;  %v1061_v25 = vpop.f32.mrb[19].mxu0  ;;  %v1145_v26 = vpop.f32.mrb[11].mxu1 }
 0x1da   :  { %2014 = vst [vmem:[%s4292_s5 + $0x8] sm:$0xff] %v1822_v18  ;;  %2056 = vst [vmem:[%s4292_s5 + $0x158] sm:$0xff] %v1864_v19  ;;  %v1062_v27 = vadd.f32 %v1061_v25, %v3349_v44  ;;  %v1146_v28 = vadd.f32 %v1145_v26, %v3434_v2 }
 0x1db   :  { %v1824_v24 = vmax.f32 %v1060_v22, 0.0  ;;  %v1866_v29 = vmax.f32 %v1144_v23, 0.0  ;;  %v3518_v22 = vpop.permute.xlu1 %591  ;;  %v3520_v23 = vpop.permute.xlu0 %586 }
 0x1dc   :  { %v1825_v30 = vmax.f32 %v1062_v27, 0.0  ;;  %v1867_v31 = vmax.f32 %v1146_v28, 0.0  ;;  %v1065_v33 = vpop.f32.mrb[20].mxu0  ;;  %v1149_v34 = vpop.f32.mrb[12].mxu1 }
 0x1dd   :  { %2016 = vst [vmem:[%s4292_s5 + $0x18] sm:$0xff] %v1824_v24  ;;  %2058 = vst [vmem:[%s4292_s5 + $0x168] sm:$0xff] %v1866_v29  ;;  %v1066_v35 = vadd.f32 %v1065_v33, %v3372_v50  ;;  %v1150_v36 = vadd.f32 %v1149_v34, %v3440_v5  ;;  %v1067_v37 = vpop.f32.mrb[21].mxu0  ;;  %v1151_v39 = vpop.f32.mrb[13].mxu1 }
 0x1de   :  { %2017 = vst [vmem:[%s4292_s5 + $0x20] sm:$0xff] %v1825_v30  ;;  %2059 = vst [vmem:[%s4292_s5 + $0x170] sm:$0xff] %v1867_v31  ;;  %v1068_v40 = vadd.f32 %v1067_v37, %v3372_v50  ;;  %v1152_v41 = vadd.f32 %v1151_v39, %v3440_v5 }
 0x1df   :  { %v1827_v43 = vmax.f32 %v1066_v35, 0.0  ;;  %v1869_v46 = vmax.f32 %v1150_v36, 0.0 }
 0x1e0   :  { %v1828_v32 = vmax.f32 %v1068_v40, 0.0  ;;  %v1870_v48 = vmax.f32 %v1152_v41, 0.0  ;;  %v1071_v51 = vpop.f32.mrb[22].mxu0  ;;  %v1155_v52 = vpop.f32.mrb[14].mxu1 }
 0x1e1   :  { %2019 = vst [vmem:[%s4292_s5 + $0x30] sm:$0xff] %v1827_v43  ;;  %2061 = vst [vmem:[%s4292_s5 + $0x180] sm:$0xff] %v1869_v46  ;;  %v1072_v53 = vadd.f32 %v1071_v51, %v3370_v49  ;;  %v1156_v47 = vadd.f32 %v1155_v52, %v3438_v4  ;;  %v1073_v56 = vpop.f32.mrb[23].mxu0  ;;  %v1157_v57 = vpop.f32.mrb[15].mxu1 }
 0x1e2   :  { %2020 = vst [vmem:[%s4292_s5 + $0x38] sm:$0xff] %v1828_v32  ;;  %2062 = vst [vmem:[%s4292_s5 + $0x188] sm:$0xff] %v1870_v48  ;;  %v1074_v6 = vadd.f32 %v1073_v56, %v3370_v49  ;;  %v1158_v7 = vadd.f32 %v1157_v57, %v3438_v4  ;;  %v3554_v56 = vpop.permute.xlu1 %601  ;;  %v3556_v57 = vpop.permute.xlu0 %596 }
 0x1e3   :  { %v1830_v9 = vmax.f32 %v1072_v53, 0.0  ;;  %v1872_v8 = vmax.f32 %v1156_v47, 0.0 }
 0x1e4   :  { %v1831_v10 = vmax.f32 %v1074_v6, 0.0  ;;  %v1873_v11 = vmax.f32 %v1158_v7, 0.0  ;;  %v1077_v12 = vpop.f32.mrb[24].mxu0  ;;  %v1161_v13 = vpop.f32.mrb[16].mxu1 }
 0x1e5   :  { %2022 = vst [vmem:[%s4292_s5 + $0x48] sm:$0xff] %v1830_v9  ;;  %2064 = vst [vmem:[%s4292_s5 + $0x198] sm:$0xff] %v1872_v8  ;;  %v1078_v16 = vadd.f32 %v1077_v12, %v3389_v55  ;;  %v1162_v17 = vadd.f32 %v1161_v13, %v3448_v15  ;;  %v1079_v18 = vpop.f32.mrb[25].mxu0  ;;  %v1163_v19 = vpop.f32.mrb[17].mxu1 }
 0x1e6   :  { %2023 = vst [vmem:[%s4292_s5 + $0x50] sm:$0xff] %v1831_v10  ;;  %2065 = vst [vmem:[%s4292_s5 + $0x1a0] sm:$0xff] %v1873_v11  ;;  %v1080_v20 = vadd.f32 %v1079_v18, %v3389_v55  ;;  %v1164_v21 = vadd.f32 %v1163_v19, %v3448_v15 }
 0x1e7   :  { %v1833_v25 = vmax.f32 %v1078_v16, 0.0  ;;  %v1875_v26 = vmax.f32 %v1162_v17, 0.0 }
 0x1e8   :  { %v1834_v27 = vmax.f32 %v1080_v20, 0.0  ;;  %v1876_v28 = vmax.f32 %v1164_v21, 0.0  ;;  %v1083_v24 = vpop.f32.mrb[26].mxu0  ;;  %v1167_v29 = vpop.f32.mrb[18].mxu1 }
 0x1e9   :  { %2025 = vst [vmem:[%s4292_s5 + $0x60] sm:$0xff] %v1833_v25  ;;  %2067 = vst [vmem:[%s4292_s5 + $0x1b0] sm:$0xff] %v1875_v26  ;;  %v1084_v30 = vadd.f32 %v1083_v24, %v3387_v54  ;;  %v1168_v31 = vadd.f32 %v1167_v29, %v3446_v14  ;;  %v1085_v33 = vpop.f32.mrb[27].mxu0  ;;  %v1169_v34 = vpop.f32.mrb[19].mxu1 }
 0x1ea   :  { %2026 = vst [vmem:[%s4292_s5 + $0x68] sm:$0xff] %v1834_v27  ;;  %2068 = vst [vmem:[%s4292_s5 + $0x1b8] sm:$0xff] %v1876_v28  ;;  %v1086_v35 = vadd.f32 %v1085_v33, %v3387_v54  ;;  %v1170_v36 = vadd.f32 %v1169_v34, %v3446_v14 }
 0x1eb   :  { %v1836_v37 = vmax.f32 %v1084_v30, 0.0  ;;  %v1878_v39 = vmax.f32 %v1168_v31, 0.0 }
 0x1ec   :  { %v1837_v40 = vmax.f32 %v1086_v35, 0.0  ;;  %v1879_v41 = vmax.f32 %v1170_v36, 0.0  ;;  %v1089_v43 = vpop.f32.mrb[28].mxu0  ;;  %v1173_v46 = vpop.f32.mrb[20].mxu1 }
 0x1ed   :  { %2028 = vst [vmem:[%s4292_s5 + $0x78] sm:$0xff] %v1836_v37  ;;  %2070 = vst [vmem:[%s4292_s5 + $0x1c8] sm:$0xff] %v1878_v39  ;;  %v1090_v32 = vadd.f32 %v1089_v43, %v3410_v59  ;;  %v1174_v48 = vadd.f32 %v1173_v46, %v3484_v42  ;;  %v1091_v51 = vpop.f32.mrb[29].mxu0  ;;  %v1175_v52 = vpop.f32.mrb[21].mxu1 }
 0x1ee   :  { %2029 = vst [vmem:[%s4292_s5 + $0x80] sm:$0xff] %v1837_v40  ;;  %2071 = vst [vmem:[%s4292_s5 + $0x1d0] sm:$0xff] %v1879_v41  ;;  %v1092_v53 = vadd.f32 %v1091_v51, %v3410_v59  ;;  %v1176_v47 = vadd.f32 %v1175_v52, %v3484_v42  ;;  %v3590_v35 = vpop.permute.xlu1 %611  ;;  %v3592_v36 = vpop.permute.xlu0 %606 }
 0x1ef   :  { %v1839_v6 = vmax.f32 %v1090_v32, 0.0  ;;  %v1881_v7 = vmax.f32 %v1174_v48, 0.0 }
 0x1f0   :  { %v1840_v9 = vmax.f32 %v1092_v53, 0.0  ;;  %v1882_v8 = vmax.f32 %v1176_v47, 0.0  ;;  %v1095_v10 = vpop.f32.mrb[30].mxu0  ;;  %v1179_v11 = vpop.f32.mrb[22].mxu1 }
 0x1f1   :  { %2031 = vst [vmem:[%s4292_s5 + $0x90] sm:$0xff] %v1839_v6  ;;  %2073 = vst [vmem:[%s4292_s5 + $0x1e0] sm:$0xff] %v1881_v7  ;;  %v1096_v12 = vadd.f32 %v1095_v10, %v3408_v58  ;;  %v1180_v13 = vadd.f32 %v1179_v11, %v3482_v38  ;;  %v1097_v16 = vpop.f32.mrb[31].mxu0  ;;  %v1181_v17 = vpop.f32.mrb[23].mxu1 }
 0x1f2   :  { %2032 = vst [vmem:[%s4292_s5 + $0x98] sm:$0xff] %v1840_v9  ;;  %2074 = vst [vmem:[%s4292_s5 + $0x1e8] sm:$0xff] %v1882_v8  ;;  %v1098_v18 = vadd.f32 %v1097_v16, %v3408_v58  ;;  %v1182_v19 = vadd.f32 %v1181_v17, %v3482_v38 }
 0x1f3   :  { %v1842_v20 = vmax.f32 %v1096_v12, 0.0  ;;  %v1884_v21 = vmax.f32 %v1180_v13, 0.0 }
 0x1f4   :  { %v1843_v25 = vmax.f32 %v1098_v18, 0.0  ;;  %v1885_v26 = vmax.f32 %v1182_v19, 0.0  ;;  %v1101_v27 = vpop.f32.mrb[32].mxu0  ;;  %v1185_v28 = vpop.f32.mrb[24].mxu1 }
 0x1f5   :  { %2034 = vst [vmem:[%s4292_s5 + $0xa8] sm:$0xff] %v1842_v20  ;;  %2076 = vst [vmem:[%s4292_s5 + $0x1f8] sm:$0xff] %v1884_v21  ;;  %v1102_v24 = vadd.f32 %v1101_v27, %v3417_v61  ;;  %v1186_v29 = vadd.f32 %v1185_v28, %v3520_v23  ;;  %v1103_v30 = vpop.f32.mrb[33].mxu0  ;;  %v1187_v31 = vpop.f32.mrb[25].mxu1 }
 0x1f6   :  { %2035 = vst [vmem:[%s4292_s5 + $0xb0] sm:$0xff] %v1843_v25  ;;  %2077 = vst [vmem:[%s4292_s5 + $0x200] sm:$0xff] %v1885_v26  ;;  %v1104_v33 = vadd.f32 %v1103_v30, %v3417_v61  ;;  %v1188_v34 = vadd.f32 %v1187_v31, %v3520_v23  ;;  %v3626_v20 = vpop.permute.xlu1 %621  ;;  %v3628_v21 = vpop.permute.xlu0 %616 }
 0x1f7   :  { %v1845_v37 = vmax.f32 %v1102_v24, 0.0  ;;  %v1887_v39 = vmax.f32 %v1186_v29, 0.0 }
 0x1f8   :  { %v1846_v40 = vmax.f32 %v1104_v33, 0.0  ;;  %v1888_v41 = vmax.f32 %v1188_v34, 0.0  ;;  %v1107_v43 = vpop.f32.mrb[34].mxu0  ;;  %v1191_v46 = vpop.f32.mrb[26].mxu1 }
 0x1f9   :  { %2037 = vst [vmem:[%s4292_s5 + $0xc0] sm:$0xff] %v1845_v37  ;;  %2079 = vst [vmem:[%s4292_s5 + $0x210] sm:$0xff] %v1887_v39  ;;  %v1108_v32 = vadd.f32 %v1107_v43, %v3415_v60  ;;  %v1192_v48 = vadd.f32 %v1191_v46, %v3518_v22  ;;  %v1109_v51 = vpop.f32.mrb[35].mxu0  ;;  %v1193_v52 = vpop.f32.mrb[27].mxu1 }
 0x1fa   :  { %2038 = vst [vmem:[%s4292_s5 + $0xc8] sm:$0xff] %v1846_v40  ;;  %2080 = vst [vmem:[%s4292_s5 + $0x218] sm:$0xff] %v1888_v41  ;;  %v1110_v53 = vadd.f32 %v1109_v51, %v3415_v60  ;;  %v1194_v47 = vadd.f32 %v1193_v52, %v3518_v22 }
 0x1fb   :  { %v1848_v6 = vmax.f32 %v1108_v32, 0.0  ;;  %v1890_v7 = vmax.f32 %v1192_v48, 0.0 }
 0x1fc   :  { %v1849_v9 = vmax.f32 %v1110_v53, 0.0  ;;  %v1891_v8 = vmax.f32 %v1194_v47, 0.0  ;;  %v1113_v10 = vpop.f32.mrb[36].mxu0  ;;  %v1197_v11 = vpop.f32.mrb[28].mxu1 }
 0x1fd   :  { %2040 = vst [vmem:[%s4292_s5 + $0xd8] sm:$0xff] %v1848_v6  ;;  %2082 = vst [vmem:[%s4292_s5 + $0x228] sm:$0xff] %v1890_v7  ;;  %v1114_v12 = vadd.f32 %v1113_v10, %v3425_v63  ;;  %v1198_v13 = vadd.f32 %v1197_v11, %v3556_v57  ;;  %v1115_v16 = vpop.f32.mrb[37].mxu0  ;;  %v1199_v17 = vpop.f32.mrb[29].mxu1 }
 0x1fe   :  { %2041 = vst [vmem:[%s4292_s5 + $0xe0] sm:$0xff] %v1849_v9  ;;  %2083 = vst [vmem:[%s4292_s5 + $0x230] sm:$0xff] %v1891_v8  ;;  %v1116_v18 = vadd.f32 %v1115_v16, %v3425_v63  ;;  %v1200_v19 = vadd.f32 %v1199_v17, %v3556_v57  ;;  %v3662_v9 = vpop.permute.xlu1 %631  ;;  %v3664_v8 = vpop.permute.xlu0 %626 }
 0x1ff   :  { %v1851_v25 = vmax.f32 %v1114_v12, 0.0  ;;  %v1893_v26 = vmax.f32 %v1198_v13, 0.0 }
 0x200   :  { %v1852_v27 = vmax.f32 %v1116_v18, 0.0  ;;  %v1894_v28 = vmax.f32 %v1200_v19, 0.0  ;;  %v1119_v24 = vpop.f32.mrb[38].mxu0  ;;  %v1203_v29 = vpop.f32.mrb[30].mxu1 }
 0x201   :  { %2043 = vst [vmem:[%s4292_s5 + $0xf0] sm:$0xff] %v1851_v25  ;;  %2085 = vst [vmem:[%s4292_s5 + $0x240] sm:$0xff] %v1893_v26  ;;  %v1120_v30 = vadd.f32 %v1119_v24, %v3423_v62  ;;  %v1204_v31 = vadd.f32 %v1203_v29, %v3554_v56  ;;  %v1121_v33 = vpop.f32.mrb[39].mxu0  ;;  %v1205_v34 = vpop.f32.mrb[31].mxu1 }
 0x202   :  { %2044 = vst [vmem:[%s4292_s5 + $0xf8] sm:$0xff] %v1852_v27  ;;  %2086 = vst [vmem:[%s4292_s5 + $0x248] sm:$0xff] %v1894_v28  ;;  %v1122_v37 = vadd.f32 %v1121_v33, %v3423_v62  ;;  %v1206_v39 = vadd.f32 %v1205_v34, %v3554_v56 }
 0x203   :  { %v1854_v40 = vmax.f32 %v1120_v30, 0.0  ;;  %v1896_v41 = vmax.f32 %v1204_v31, 0.0 }
 0x204   :  { %v1855_v43 = vmax.f32 %v1122_v37, 0.0  ;;  %v1897_v46 = vmax.f32 %v1206_v39, 0.0  ;;  %v1125_v32 = vpop.f32.mrb[40].mxu0  ;;  %v1209_v48 = vpop.f32.mrb[32].mxu1 }
 0x205   :  { %2046 = vst [vmem:[%s4292_s5 + $0x108] sm:$0xff] %v1854_v40  ;;  %2088 = vst [vmem:[%s4292_s5 + $0x258] sm:$0xff] %v1896_v41  ;;  %v1126_v51 = vadd.f32 %v1125_v32, %v3431_v1  ;;  %v1210_v52 = vadd.f32 %v1209_v48, %v3592_v36  ;;  %v1127_v53 = vpop.f32.mrb[41].mxu0  ;;  %v1211_v47 = vpop.f32.mrb[33].mxu1 }
 0x206   :  { %2047 = vst [vmem:[%s4292_s5 + $0x110] sm:$0xff] %v1855_v43  ;;  %2089 = vst [vmem:[%s4292_s5 + $0x260] sm:$0xff] %v1897_v46  ;;  %v1128_v6 = vadd.f32 %v1127_v53, %v3431_v1  ;;  %v1212_v7 = vadd.f32 %v1211_v47, %v3592_v36  ;;  %v3698_v32 = vpop.permute.xlu1 %641  ;;  %v3700_v48 = vpop.permute.xlu0 %636 }
 0x207   :  { %v1857_v10 = vmax.f32 %v1126_v51, 0.0  ;;  %v1899_v11 = vmax.f32 %v1210_v52, 0.0 }
 0x208   :  { %v1858_v12 = vmax.f32 %v1128_v6, 0.0  ;;  %v1900_v13 = vmax.f32 %v1212_v7, 0.0  ;;  %v1131_v16 = vpop.f32.mrb[42].mxu0  ;;  %v1215_v17 = vpop.f32.mrb[34].mxu1 }
 0x209   :  { %2049 = vst [vmem:[%s4292_s5 + $0x120] sm:$0xff] %v1857_v10  ;;  %2091 = vst [vmem:[%s4292_s5 + $0x270] sm:$0xff] %v1899_v11  ;;  %v1132_v18 = vadd.f32 %v1131_v16, %v3429_v0  ;;  %v1216_v19 = vadd.f32 %v1215_v17, %v3590_v35  ;;  %v1133_v25 = vpop.f32.mrb[43].mxu0  ;;  %v1217_v26 = vpop.f32.mrb[35].mxu1 }
 0x20a   :  { %2050 = vst [vmem:[%s4292_s5 + $0x128] sm:$0xff] %v1858_v12  ;;  %2092 = vst [vmem:[%s4292_s5 + $0x278] sm:$0xff] %v1900_v13  ;;  %v1134_v27 = vadd.f32 %v1133_v25, %v3429_v0  ;;  %v1218_v28 = vadd.f32 %v1217_v26, %v3590_v35 }
 0x20b   :  { %v1860_v24 = vmax.f32 %v1132_v18, 0.0  ;;  %v1902_v29 = vmax.f32 %v1216_v19, 0.0 }
 0x20c   :  { %v1861_v30 = vmax.f32 %v1134_v27, 0.0  ;;  %v1903_v31 = vmax.f32 %v1218_v28, 0.0  ;;  %v1221_v33 = vpop.f32.mrb[36].mxu1  ;;  %v2466_v34 = vpop.f32.mrb[44].mxu0 }
 0x20d   :  { %2052 = vst [vmem:[%s4292_s5 + $0x138] sm:$0xff] %v1860_v24  ;;  %2094 = vst [vmem:[%s4292_s5 + $0x288] sm:$0xff] %v1902_v29  ;;  %v1222_v37 = vadd.f32 %v1221_v33, %v3628_v21  ;;  %v1508_v39 = vadd.f32 %v2466_v34, %v3349_v44  ;;  %v1223_v40 = vpop.f32.mrb[37].mxu1  ;;  %v1502_v41 = vpop.f32.mrb[45].mxu0 }
 0x20e   :  { %2053 = vst [vmem:[%s4292_s5 + $0x140] sm:$0xff] %v1861_v30  ;;  %2095 = vst [vmem:[%s4292_s5 + $0x290] sm:$0xff] %v1903_v31  ;;  %v1224_v43 = vadd.f32 %v1223_v40, %v3628_v21  ;;  %v1503_v46 = vadd.f32 %v1502_v41, %v3351_v45  ;;  %v3734_v30 = vpop.permute.xlu1 %651  ;;  %v3736_v31 = vpop.permute.xlu0 %646 }
 0x20f   :  { %v1905_v51 = vmax.f32 %v1222_v37, 0.0  ;;  %v1826_v44 = vmax.f32 %v1508_v39, 0.0 }
 0x210   :  { %v1906_v52 = vmax.f32 %v1224_v43, 0.0  ;;  %v1823_v53 = vmax.f32 %v1503_v46, 0.0  ;;  %v1227_v47 = vpop.f32.mrb[38].mxu1  ;;  %v2469_v6 = vpop.f32.mrb[46].mxu0 }
 0x211   :  { %2097 = vst [vmem:[%s4292_s5 + $0x2a0] sm:$0xff] %v1905_v51  ;;  %2018 = vst [vmem:[%s4292_s5 + $0x28] sm:$0xff] %v1826_v44  ;;  %v1228_v45 = vadd.f32 %v1227_v47, %v3626_v20  ;;  %v1518_v7 = vadd.f32 %v2469_v6, %v3370_v49  ;;  %v1229_v10 = vpop.f32.mrb[39].mxu1  ;;  %v1512_v11 = vpop.f32.mrb[47].mxu0 }
 0x212   :  { %2098 = vst [vmem:[%s4292_s5 + $0x2a8] sm:$0xff] %v1906_v52  ;;  %2015 = vst [vmem:[%s4292_s5 + $0x10] sm:$0xff] %v1823_v53  ;;  %v1230_v12 = vadd.f32 %v1229_v10, %v3626_v20  ;;  %v1513_v13 = vadd.f32 %v1512_v11, %v3372_v50 }
 0x213   :  { %v1908_v16 = vmax.f32 %v1228_v45, 0.0  ;;  %v1832_v17 = vmax.f32 %v1518_v7, 0.0 }
 0x214   :  { %v1909_v18 = vmax.f32 %v1230_v12, 0.0  ;;  %v1829_v19 = vmax.f32 %v1513_v13, 0.0  ;;  %v1233_v25 = vpop.f32.mrb[40].mxu1  ;;  %v2472_v49 = vpop.f32.mrb[48].mxu0 }
 0x215   :  { %2100 = vst [vmem:[%s4292_s5 + $0x2b8] sm:$0xff] %v1908_v16  ;;  %2024 = vst [vmem:[%s4292_s5 + $0x58] sm:$0xff] %v1832_v17  ;;  %v1234_v26 = vadd.f32 %v1233_v25, %v3664_v8  ;;  %v1528_v27 = vadd.f32 %v2472_v49, %v3387_v54  ;;  %v1235_v28 = vpop.f32.mrb[41].mxu1  ;;  %v1522_v50 = vpop.f32.mrb[49].mxu0 }
 0x216   :  { %2101 = vst [vmem:[%s4292_s5 + $0x2c0] sm:$0xff] %v1909_v18  ;;  %2021 = vst [vmem:[%s4292_s5 + $0x40] sm:$0xff] %v1829_v19  ;;  %v1236_v24 = vadd.f32 %v1235_v28, %v3664_v8  ;;  %v1523_v29 = vadd.f32 %v1522_v50, %v3389_v55  ;;  %v3770_v16 = vpop.permute.xlu1 %661  ;;  %v3772_v17 = vpop.permute.xlu0 %656 }
 0x217   :  { %v1911_v33 = vmax.f32 %v1234_v26, 0.0  ;;  %v1838_v54 = vmax.f32 %v1528_v27, 0.0 }
 0x218   :  { %v1912_v34 = vmax.f32 %v1236_v24, 0.0  ;;  %v1835_v37 = vmax.f32 %v1523_v29, 0.0  ;;  %v1239_v39 = vpop.f32.mrb[42].mxu1  ;;  %v2475_v40 = vpop.f32.mrb[50].mxu0 }
 0x219   :  { %2103 = vst [vmem:[%s4292_s5 + $0x2d0] sm:$0xff] %v1911_v33  ;;  %2030 = vst [vmem:[%s4292_s5 + $0x88] sm:$0xff] %v1838_v54  ;;  %v1240_v55 = vadd.f32 %v1239_v39, %v3662_v9  ;;  %v1538_v41 = vadd.f32 %v2475_v40, %v3408_v58  ;;  %v1241_v43 = vpop.f32.mrb[43].mxu1  ;;  %v1532_v46 = vpop.f32.mrb[51].mxu0 }
 0x21a   :  { %2104 = vst [vmem:[%s4292_s5 + $0x2d8] sm:$0xff] %v1912_v34  ;;  %2027 = vst [vmem:[%s4292_s5 + $0x70] sm:$0xff] %v1835_v37  ;;  %v1242_v51 = vadd.f32 %v1241_v43, %v3662_v9  ;;  %v1533_v44 = vadd.f32 %v1532_v46, %v3410_v59 }
 0x21b   :  { %v1914_v52 = vmax.f32 %v1240_v55, 0.0  ;;  %v1844_v53 = vmax.f32 %v1538_v41, 0.0 }
 0x21c   :  { %v1915_v47 = vmax.f32 %v1242_v51, 0.0  ;;  %v1841_v6 = vmax.f32 %v1533_v44, 0.0  ;;  %v1245_v45 = vpop.f32.mrb[44].mxu1  ;;  %v2478_v58 = vpop.f32.mrb[52].mxu0 }
 0x21d   :  { %2106 = vst [vmem:[%s4292_s5 + $0x2e8] sm:$0xff] %v1914_v52  ;;  %2036 = vst [vmem:[%s4292_s5 + $0xb8] sm:$0xff] %v1844_v53  ;;  %v1246_v7 = vadd.f32 %v1245_v45, %v3700_v48  ;;  %v1548_v10 = vadd.f32 %v2478_v58, %v3415_v60  ;;  %v1247_v11 = vpop.f32.mrb[45].mxu1  ;;  %v1542_v59 = vpop.f32.mrb[53].mxu0 }
 0x21e   :  { %2107 = vst [vmem:[%s4292_s5 + $0x2f0] sm:$0xff] %v1915_v47  ;;  %2033 = vst [vmem:[%s4292_s5 + $0xa0] sm:$0xff] %v1841_v6  ;;  %v1248_v12 = vadd.f32 %v1247_v11, %v3700_v48  ;;  %v1543_v13 = vadd.f32 %v1542_v59, %v3417_v61  ;;  %v3806_v51 = vpop.permute.xlu1 %671  ;;  %v3808_v44 = vpop.permute.xlu0 %666 }
 0x21f   :  { %v1917_v18 = vmax.f32 %v1246_v7, 0.0  ;;  %v1850_v60 = vmax.f32 %v1548_v10, 0.0 }
 0x220   :  { %v1918_v19 = vmax.f32 %v1248_v12, 0.0  ;;  %v1847_v25 = vmax.f32 %v1543_v13, 0.0  ;;  %v1251_v49 = vpop.f32.mrb[46].mxu1  ;;  %v2481_v26 = vpop.f32.mrb[54].mxu0 }
 0x221   :  { %2109 = vst [vmem:[%s4292_s5 + $0x300] sm:$0xff] %v1917_v18  ;;  %2042 = vst [vmem:[%s4292_s5 + $0xe8] sm:$0xff] %v1850_v60  ;;  %v1252_v61 = vadd.f32 %v1251_v49, %v3698_v32  ;;  %v1558_v27 = vadd.f32 %v2481_v26, %v3423_v62  ;;  %v1253_v28 = vpop.f32.mrb[47].mxu1  ;;  %v1552_v50 = vpop.f32.mrb[55].mxu0 }
 0x222   :  { %2110 = vst [vmem:[%s4292_s5 + $0x308] sm:$0xff] %v1918_v19  ;;  %2039 = vst [vmem:[%s4292_s5 + $0xd0] sm:$0xff] %v1847_v25  ;;  %v1254_v24 = vadd.f32 %v1253_v28, %v3698_v32  ;;  %v1553_v29 = vadd.f32 %v1552_v50, %v3425_v63  ;;  %v3842_v28 = vpop.permute.xlu1 %681  ;;  %v3844_v50 = vpop.permute.xlu0 %676 }
 0x223   :  { %v1920_v33 = vmax.f32 %v1252_v61, 0.0  ;;  %v1856_v54 = vmax.f32 %v1558_v27, 0.0 }
 0x224   :  { %v1921_v34 = vmax.f32 %v1254_v24, 0.0  ;;  %v1853_v37 = vmax.f32 %v1553_v29, 0.0  ;;  %v1257_v39 = vpop.f32.mrb[48].mxu1  ;;  %v2484_v62 = vpop.f32.mrb[56].mxu0 }
 0x225   :  { %2112 = vst [vmem:[%s4292_s5 + $0x318] sm:$0xff] %v1920_v33  ;;  %2048 = vst [vmem:[%s4292_s5 + $0x118] sm:$0xff] %v1856_v54  ;;  %v1258_v40 = vadd.f32 %v1257_v39, %v3736_v31  ;;  %v1568_v55 = vadd.f32 %v2484_v62, %v3429_v0  ;;  %v1259_v41 = vpop.f32.mrb[49].mxu1  ;;  %v1562_v63 = vpop.f32.mrb[57].mxu0 }
 0x226   :  { %2113 = vst [vmem:[%s4292_s5 + $0x320] sm:$0xff] %v1921_v34  ;;  %2045 = vst [vmem:[%s4292_s5 + $0x100] sm:$0xff] %v1853_v37  ;;  %v1260_v43 = vadd.f32 %v1259_v41, %v3736_v31  ;;  %v1563_v46 = vadd.f32 %v1562_v63, %v3431_v1 }
 0x227   :  { %v1923_v52 = vmax.f32 %v1258_v40, 0.0  ;;  %v1862_v0 = vmax.f32 %v1568_v55, 0.0 }
 0x228   :  { %v1924_v53 = vmax.f32 %v1260_v43, 0.0  ;;  %v1859_v47 = vmax.f32 %v1563_v46, 0.0  ;;  %v1263_v6 = vpop.f32.mrb[50].mxu1  ;;  %v2487_v45 = vpop.f32.mrb[58].mxu0 }
 0x229   :  { %2115 = vst [vmem:[%s4292_s5 + $0x330] sm:$0xff] %v1923_v52  ;;  %2054 = vst [vmem:[%s4292_s5 + $0x148] sm:$0xff] %v1862_v0  ;;  %v1264_v1 = vadd.f32 %v1263_v6, %v3734_v30  ;;  %v1578_v58 = vadd.f32 %v2487_v45, %v3434_v2  ;;  %v1265_v7 = vpop.f32.mrb[51].mxu1  ;;  %v1572_v10 = vpop.f32.mrb[59].mxu0 }
 0x22a   :  { %2116 = vst [vmem:[%s4292_s5 + $0x338] sm:$0xff] %v1924_v53  ;;  %2051 = vst [vmem:[%s4292_s5 + $0x130] sm:$0xff] %v1859_v47  ;;  %v1266_v11 = vadd.f32 %v1265_v7, %v3734_v30  ;;  %v1573_v59 = vadd.f32 %v1572_v10, %v3436_v3 }
 0x22b   :  { %v1926_v12 = vmax.f32 %v1264_v1, 0.0  ;;  %v1868_v13 = vmax.f32 %v1578_v58, 0.0  ;;  %v3878_v1 = vpop.permute.xlu1 %691  ;;  %v3880_v58 = vpop.permute.xlu0 %686 }
 0x22c   :  { %v1927_v18 = vmax.f32 %v1266_v11, 0.0  ;;  %v1865_v60 = vmax.f32 %v1573_v59, 0.0  ;;  %v1269_v19 = vpop.f32.mrb[52].mxu1  ;;  %v2490_v2 = vpop.f32.mrb[60].mxu0 }
 0x22d   :  { %2118 = vst [vmem:[%s4292_s5 + $0x348] sm:$0xff] %v1926_v12  ;;  %2060 = vst [vmem:[%s4292_s5 + $0x178] sm:$0xff] %v1868_v13  ;;  %v1270_v25 = vadd.f32 %v1269_v19, %v3772_v17  ;;  %v1588_v49 = vadd.f32 %v2490_v2, %v3438_v4  ;;  %v1271_v26 = vpop.f32.mrb[53].mxu1  ;;  %v1582_v3 = vpop.f32.mrb[61].mxu0 }
 0x22e   :  { %2119 = vst [vmem:[%s4292_s5 + $0x350] sm:$0xff] %v1927_v18  ;;  %2057 = vst [vmem:[%s4292_s5 + $0x160] sm:$0xff] %v1865_v60  ;;  %v1272_v61 = vadd.f32 %v1271_v26, %v3772_v17  ;;  %v1583_v27 = vadd.f32 %v1582_v3, %v3440_v5 }
 0x22f   :  { %v1929_v24 = vmax.f32 %v1270_v25, 0.0  ;;  %v1874_v4 = vmax.f32 %v1588_v49, 0.0 }
 0x230   :  { %v1930_v29 = vmax.f32 %v1272_v61, 0.0  ;;  %v1871_v33 = vmax.f32 %v1583_v27, 0.0  ;;  %v1275_v54 = vpop.f32.mrb[54].mxu1  ;;  %v2493_v34 = vpop.f32.mrb[62].mxu0 }
 0x231   :  { %2121 = vst [vmem:[%s4292_s5 + $0x360] sm:$0xff] %v1929_v24  ;;  %2066 = vst [vmem:[%s4292_s5 + $0x1a8] sm:$0xff] %v1874_v4  ;;  %v1276_v5 = vadd.f32 %v1275_v54, %v3770_v16  ;;  %v1598_v37 = vadd.f32 %v2493_v34, %v3446_v14  ;;  %v1277_v39 = vpop.f32.mrb[55].mxu1  ;;  %v1592_v62 = vpop.f32.mrb[63].mxu0 }
 0x232   :  { %2122 = vst [vmem:[%s4292_s5 + $0x368] sm:$0xff] %v1930_v29  ;;  %2063 = vst [vmem:[%s4292_s5 + $0x190] sm:$0xff] %v1871_v33  ;;  %v1278_v40 = vadd.f32 %v1277_v39, %v3770_v16  ;;  %v1593_v55 = vadd.f32 %v1592_v62, %v3448_v15  ;;  %v3914_v54 = vpop.permute.xlu1 %701  ;;  %v3916_v34 = vpop.permute.xlu0 %696 }
 0x233   :  { %v1932_v41 = vmax.f32 %v1276_v5, 0.0  ;;  %v1880_v63 = vmax.f32 %v1598_v37, 0.0 }
 0x234   :  { %v1933_v43 = vmax.f32 %v1278_v40, 0.0  ;;  %v1877_v46 = vmax.f32 %v1593_v55, 0.0  ;;  %v1281_v52 = vpop.f32.mrb[56].mxu1  ;;  %v2496_v14 = vpop.f32.mrb[64].mxu0 }
 0x235   :  { %2124 = vst [vmem:[%s4292_s5 + $0x378] sm:$0xff] %v1932_v41  ;;  %2072 = vst [vmem:[%s4292_s5 + $0x1d8] sm:$0xff] %v1880_v63  ;;  %v1282_v0 = vadd.f32 %v1281_v52, %v3808_v44  ;;  %v1608_v53 = vadd.f32 %v2496_v14, %v3482_v38  ;;  %v1283_v47 = vpop.f32.mrb[57].mxu1  ;;  %v1602_v15 = vpop.f32.mrb[65].mxu0 }
 0x236   :  { %2125 = vst [vmem:[%s4292_s5 + $0x380] sm:$0xff] %v1933_v43  ;;  %2069 = vst [vmem:[%s4292_s5 + $0x1c0] sm:$0xff] %v1877_v46  ;;  %v1284_v6 = vadd.f32 %v1283_v47, %v3808_v44  ;;  %v1603_v45 = vadd.f32 %v1602_v15, %v3484_v42 }
 0x237   :  { %v1935_v7 = vmax.f32 %v1282_v0, 0.0  ;;  %v1886_v38 = vmax.f32 %v1608_v53, 0.0 }
 0x238   :  { %v1936_v10 = vmax.f32 %v1284_v6, 0.0  ;;  %v1883_v11 = vmax.f32 %v1603_v45, 0.0  ;;  %v1287_v59 = vpop.f32.mrb[58].mxu1  ;;  %v2499_v12 = vpop.f32.mrb[66].mxu0 }
 0x239   :  { %2127 = vst [vmem:[%s4292_s5 + $0x390] sm:$0xff] %v1935_v7  ;;  %2078 = vst [vmem:[%s4292_s5 + $0x208] sm:$0xff] %v1886_v38  ;;  %v1288_v42 = vadd.f32 %v1287_v59, %v3806_v51  ;;  %v1618_v13 = vadd.f32 %v2499_v12, %v3518_v22  ;;  %v1289_v18 = vpop.f32.mrb[59].mxu1  ;;  %v1612_v60 = vpop.f32.mrb[67].mxu0 }
 0x23a   :  { %2128 = vst [vmem:[%s4292_s5 + $0x398] sm:$0xff] %v1936_v10  ;;  %2075 = vst [vmem:[%s4292_s5 + $0x1f0] sm:$0xff] %v1883_v11  ;;  %v1290_v19 = vadd.f32 %v1289_v18, %v3806_v51  ;;  %v1613_v2 = vadd.f32 %v1612_v60, %v3520_v23  ;;  %v3950_v10 = vpop.permute.xlu1 %711  ;;  %v3952_v11 = vpop.permute.xlu0 %706 }
 0x23b   :  { %v1938_v25 = vmax.f32 %v1288_v42, 0.0  ;;  %v1892_v49 = vmax.f32 %v1618_v13, 0.0 }
 0x23c   :  { %v1939_v26 = vmax.f32 %v1290_v19, 0.0  ;;  %v1889_v3 = vmax.f32 %v1613_v2, 0.0  ;;  %v1293_v61 = vpop.f32.mrb[60].mxu1  ;;  %v2502_v22 = vpop.f32.mrb[68].mxu0 }
 0x23d   :  { %2130 = vst [vmem:[%s4292_s5 + $0x3a8] sm:$0xff] %v1938_v25  ;;  %2084 = vst [vmem:[%s4292_s5 + $0x238] sm:$0xff] %v1892_v49  ;;  %v1294_v27 = vadd.f32 %v1293_v61, %v3844_v50  ;;  %v1628_v24 = vadd.f32 %v2502_v22, %v3554_v56  ;;  %v1295_v4 = vpop.f32.mrb[61].mxu1  ;;  %v1622_v23 = vpop.f32.mrb[69].mxu0 }
 0x23e   :  { %2131 = vst [vmem:[%s4292_s5 + $0x3b0] sm:$0xff] %v1939_v26  ;;  %2081 = vst [vmem:[%s4292_s5 + $0x220] sm:$0xff] %v1889_v3  ;;  %v1296_v29 = vadd.f32 %v1295_v4, %v3844_v50  ;;  %v1623_v33 = vadd.f32 %v1622_v23, %v3556_v57 }
 0x23f   :  { %v1941_v5 = vmax.f32 %v1294_v27, 0.0  ;;  %v1898_v56 = vmax.f32 %v1628_v24, 0.0 }
 0x240   :  { %v1942_v37 = vmax.f32 %v1296_v29, 0.0  ;;  %v1895_v39 = vmax.f32 %v1623_v33, 0.0  ;;  %v1299_v62 = vpop.f32.mrb[62].mxu1  ;;  %v2505_v40 = vpop.f32.mrb[70].mxu0 }
 0x241   :  { %2133 = vst [vmem:[%s4292_s5 + $0x3c0] sm:$0xff] %v1941_v5  ;;  %2090 = vst [vmem:[%s4292_s5 + $0x268] sm:$0xff] %v1898_v56  ;;  %v1300_v57 = vadd.f32 %v1299_v62, %v3842_v28  ;;  %v1638_v55 = vadd.f32 %v2505_v40, %v3590_v35  ;;  %v1301_v41 = vpop.f32.mrb[63].mxu1  ;;  %v1632_v63 = vpop.f32.mrb[71].mxu0 }
 0x242   :  { %2134 = vst [vmem:[%s4292_s5 + $0x3c8] sm:$0xff] %v1942_v37  ;;  %2087 = vst [vmem:[%s4292_s5 + $0x250] sm:$0xff] %v1895_v39  ;;  %v1302_v43 = vadd.f32 %v1301_v41, %v3842_v28  ;;  %v1633_v46 = vadd.f32 %v1632_v63, %v3592_v36  ;;  %v3986_v5 = vpop.permute.xlu1 %721  ;;  %v3988_v56 = vpop.permute.xlu0 %716 }
 0x243   :  { %v1944_v52 = vmax.f32 %v1300_v57, 0.0  ;;  %v1904_v14 = vmax.f32 %v1638_v55, 0.0 }
 0x244   :  { %v1945_v0 = vmax.f32 %v1302_v43, 0.0  ;;  %v1901_v53 = vmax.f32 %v1633_v46, 0.0  ;;  %v1305_v47 = vpop.f32.mrb[64].mxu1  ;;  %v2508_v35 = vpop.f32.mrb[72].mxu0 }
 0x245   :  { %2136 = vst [vmem:[%s4292_s5 + $0x3d8] sm:$0xff] %v1944_v52  ;;  %2096 = vst [vmem:[%s4292_s5 + $0x298] sm:$0xff] %v1904_v14  ;;  %v1306_v15 = vadd.f32 %v1305_v47, %v3880_v58  ;;  %v1648_v6 = vadd.f32 %v2508_v35, %v3626_v20  ;;  %v1307_v45 = vpop.f32.mrb[65].mxu1  ;;  %v1642_v36 = vpop.f32.mrb[73].mxu0 }
 0x246   :  { %2137 = vst [vmem:[%s4292_s5 + $0x3e0] sm:$0xff] %v1945_v0  ;;  %2093 = vst [vmem:[%s4292_s5 + $0x280] sm:$0xff] %v1901_v53  ;;  %v1308_v7 = vadd.f32 %v1307_v45, %v3880_v58  ;;  %v1643_v38 = vadd.f32 %v1642_v36, %v3628_v21 }
 0x247   :  { %v1947_v59 = vmax.f32 %v1306_v15, 0.0  ;;  %v1910_v20 = vmax.f32 %v1648_v6, 0.0 }
 0x248   :  { %v1948_v12 = vmax.f32 %v1308_v7, 0.0  ;;  %v1907_v42 = vmax.f32 %v1643_v38, 0.0  ;;  %v1311_v13 = vpop.f32.mrb[66].mxu1  ;;  %v2511_v18 = vpop.f32.mrb[74].mxu0 }
 0x249   :  { %2139 = vst [vmem:[%s4292_s5 + $0x3f0] sm:$0xff] %v1947_v59  ;;  %2102 = vst [vmem:[%s4292_s5 + $0x2c8] sm:$0xff] %v1910_v20  ;;  %v1312_v21 = vadd.f32 %v1311_v13, %v3878_v1  ;;  %v1658_v60 = vadd.f32 %v2511_v18, %v3662_v9  ;;  %v1313_v19 = vpop.f32.mrb[67].mxu1  ;;  %v1652_v2 = vpop.f32.mrb[75].mxu0 }
 0x24a   :  { %2140 = vst [vmem:[%s4292_s5 + $0x3f8] sm:$0xff] %v1948_v12  ;;  %2099 = vst [vmem:[%s4292_s5 + $0x2b0] sm:$0xff] %v1907_v42  ;;  %v1314_v25 = vadd.f32 %v1313_v19, %v3878_v1  ;;  %v1653_v49 = vadd.f32 %v1652_v2, %v3664_v8  ;;  %v4022_v7 = vpop.permute.xlu1 %731  ;;  %v4024_v38 = vpop.permute.xlu0 %726 }
 0x24b   :  { %v1950_v26 = vmax.f32 %v1312_v21, 0.0  ;;  %v1916_v3 = vmax.f32 %v1658_v60, 0.0 }
 0x24c   :  { %v1951_v61 = vmax.f32 %v1314_v25, 0.0  ;;  %v1913_v22 = vmax.f32 %v1653_v49, 0.0  ;;  %v1317_v27 = vpop.f32.mrb[68].mxu1  ;;  %v2514_v9 = vpop.f32.mrb[76].mxu0 }
 0x24d   :  { %2142 = vst [vmem:[%s4292_s5 + $0x408] sm:$0xff] %v1950_v26  ;;  %2108 = vst [vmem:[%s4292_s5 + $0x2f8] sm:$0xff] %v1916_v3  ;;  %v1318_v24 = vadd.f32 %v1317_v27, %v3916_v34  ;;  %v1668_v4 = vadd.f32 %v2514_v9, %v3698_v32  ;;  %v1319_v23 = vpop.f32.mrb[69].mxu1  ;;  %v1662_v8 = vpop.f32.mrb[77].mxu0 }
 0x24e   :  { %2143 = vst [vmem:[%s4292_s5 + $0x410] sm:$0xff] %v1951_v61  ;;  %2105 = vst [vmem:[%s4292_s5 + $0x2e0] sm:$0xff] %v1913_v22  ;;  %v1320_v29 = vadd.f32 %v1319_v23, %v3916_v34  ;;  %v1663_v33 = vadd.f32 %v1662_v8, %v3700_v48  ;;  %v4058_v23 = vpop.permute.xlu1 %741  ;;  %v4060_v8 = vpop.permute.xlu0 %736 }
 0x24f   :  { %v1953_v37 = vmax.f32 %v1318_v24, 0.0  ;;  %v1922_v32 = vmax.f32 %v1668_v4, 0.0 }
 0x250   :  { %v1954_v39 = vmax.f32 %v1320_v29, 0.0  ;;  %v1919_v62 = vmax.f32 %v1663_v33, 0.0  ;;  %v1323_v40 = vpop.f32.mrb[70].mxu1  ;;  %v2517_v57 = vpop.f32.mrb[78].mxu0 }
 0x251   :  { %2145 = vst [vmem:[%s4292_s5 + $0x420] sm:$0xff] %v1953_v37  ;;  %2114 = vst [vmem:[%s4292_s5 + $0x328] sm:$0xff] %v1922_v32  ;;  %v1324_v48 = vadd.f32 %v1323_v40, %v3914_v54  ;;  %v1678_v55 = vadd.f32 %v2517_v57, %v3734_v30  ;;  %v1325_v41 = vpop.f32.mrb[71].mxu1  ;;  %v1672_v63 = vpop.f32.mrb[79].mxu0 }
 0x252   :  { %2146 = vst [vmem:[%s4292_s5 + $0x428] sm:$0xff] %v1954_v39  ;;  %2111 = vst [vmem:[%s4292_s5 + $0x310] sm:$0xff] %v1919_v62  ;;  %v1326_v43 = vadd.f32 %v1325_v41, %v3914_v54  ;;  %v1673_v46 = vadd.f32 %v1672_v63, %v3736_v31 }
 0x253   :  { %v1956_v52 = vmax.f32 %v1324_v48, 0.0  ;;  %v1928_v14 = vmax.f32 %v1678_v55, 0.0 }
 0x254   :  { %v1957_v0 = vmax.f32 %v1326_v43, 0.0  ;;  %v1925_v53 = vmax.f32 %v1673_v46, 0.0  ;;  %v1329_v47 = vpop.f32.mrb[72].mxu1  ;;  %v2520_v30 = vpop.f32.mrb[80].mxu0 }
 0x255   :  { %2148 = vst [vmem:[%s4292_s5 + $0x438] sm:$0xff] %v1956_v52  ;;  %2120 = vst [vmem:[%s4292_s5 + $0x358] sm:$0xff] %v1928_v14  ;;  %v1330_v35 = vadd.f32 %v1329_v47, %v3952_v11  ;;  %v1688_v15 = vadd.f32 %v2520_v30, %v3770_v16  ;;  %v1331_v6 = vpop.f32.mrb[73].mxu1  ;;  %v1682_v31 = vpop.f32.mrb[81].mxu0 }
 0x256   :  { %2149 = vst [vmem:[%s4292_s5 + $0x440] sm:$0xff] %v1957_v0  ;;  %2117 = vst [vmem:[%s4292_s5 + $0x340] sm:$0xff] %v1925_v53  ;;  %v1332_v45 = vadd.f32 %v1331_v6, %v3952_v11  ;;  %v1683_v36 = vadd.f32 %v1682_v31, %v3772_v17 }
 0x257   :  { %v1959_v59 = vmax.f32 %v1330_v35, 0.0  ;;  %v1934_v16 = vmax.f32 %v1688_v15, 0.0  ;;  %v4094_v35 = vpop.permute.xlu1 %751  ;;  %v4096_v15 = vpop.permute.xlu0 %746 }
 0x258   :  { %v1960_v20 = vmax.f32 %v1332_v45, 0.0  ;;  %v1931_v12 = vmax.f32 %v1683_v36, 0.0  ;;  %v1335_v42 = vpop.f32.mrb[74].mxu1  ;;  %v2523_v13 = vpop.f32.mrb[82].mxu0 }
 0x259   :  { %2151 = vst [vmem:[%s4292_s5 + $0x450] sm:$0xff] %v1959_v59  ;;  %2126 = vst [vmem:[%s4292_s5 + $0x388] sm:$0xff] %v1934_v16  ;;  %v1336_v17 = vadd.f32 %v1335_v42, %v3950_v10  ;;  %v1698_v18 = vadd.f32 %v2523_v13, %v3806_v51  ;;  %v1337_v21 = vpop.f32.mrb[75].mxu1  ;;  %v1692_v60 = vpop.f32.mrb[83].mxu0 }
 0x25a   :  { %2152 = vst [vmem:[%s4292_s5 + $0x458] sm:$0xff] %v1960_v20  ;;  %2123 = vst [vmem:[%s4292_s5 + $0x370] sm:$0xff] %v1931_v12  ;;  %v1338_v19 = vadd.f32 %v1337_v21, %v3950_v10  ;;  %v1693_v2 = vadd.f32 %v1692_v60, %v3808_v44 }
 0x25b   :  { %v1962_v25 = vmax.f32 %v1336_v17, 0.0  ;;  %v1940_v49 = vmax.f32 %v1698_v18, 0.0 }
 0x25c   :  { %v1963_v26 = vmax.f32 %v1338_v19, 0.0  ;;  %v1937_v3 = vmax.f32 %v1693_v2, 0.0  ;;  %v1341_v61 = vpop.f32.mrb[76].mxu1  ;;  %v2526_v51 = vpop.f32.mrb[84].mxu0 }
 0x25d   :  { %2154 = vst [vmem:[%s4292_s5 + $0x468] sm:$0xff] %v1962_v25  ;;  %2132 = vst [vmem:[%s4292_s5 + $0x3b8] sm:$0xff] %v1940_v49  ;;  %v1342_v22 = vadd.f32 %v1341_v61, %v3988_v56  ;;  %v1708_v27 = vadd.f32 %v2526_v51, %v3842_v28  ;;  %v1343_v9 = vpop.f32.mrb[77].mxu1  ;;  %v1702_v44 = vpop.f32.mrb[85].mxu0 }
 0x25e   :  { %2155 = vst [vmem:[%s4292_s5 + $0x470] sm:$0xff] %v1963_v26  ;;  %2129 = vst [vmem:[%s4292_s5 + $0x3a0] sm:$0xff] %v1937_v3  ;;  %v1344_v24 = vadd.f32 %v1343_v9, %v3988_v56  ;;  %v1703_v4 = vadd.f32 %v1702_v44, %v3844_v50  ;;  %v4130_v61 = vpop.permute.xlu1 %761  ;;  %v4132_v51 = vpop.permute.xlu0 %756 }
 0x25f   :  { %v1965_v29 = vmax.f32 %v1342_v22, 0.0  ;;  %v1946_v28 = vmax.f32 %v1708_v27, 0.0 }
 0x260   :  { %v1966_v33 = vmax.f32 %v1344_v24, 0.0  ;;  %v1943_v37 = vmax.f32 %v1703_v4, 0.0  ;;  %v1347_v32 = vpop.f32.mrb[78].mxu1  ;;  %v2529_v39 = vpop.f32.mrb[86].mxu0 }
 0x261   :  { %2157 = vst [vmem:[%s4292_s5 + $0x480] sm:$0xff] %v1965_v29  ;;  %2138 = vst [vmem:[%s4292_s5 + $0x3e8] sm:$0xff] %v1946_v28  ;;  %v1348_v50 = vadd.f32 %v1347_v32, %v3986_v5  ;;  %v1718_v62 = vadd.f32 %v2529_v39, %v3878_v1  ;;  %v1349_v40 = vpop.f32.mrb[79].mxu1  ;;  %v1712_v57 = vpop.f32.mrb[87].mxu0 }
 0x262   :  { %2158 = vst [vmem:[%s4292_s5 + $0x488] sm:$0xff] %v1966_v33  ;;  %2135 = vst [vmem:[%s4292_s5 + $0x3d0] sm:$0xff] %v1943_v37  ;;  %v1350_v48 = vadd.f32 %v1349_v40, %v3986_v5  ;;  %v1713_v55 = vadd.f32 %v1712_v57, %v3880_v58 }
 0x263   :  { %v1968_v41 = vmax.f32 %v1348_v50, 0.0  ;;  %v1952_v63 = vmax.f32 %v1718_v62, 0.0 }
 0x264   :  { %v1969_v43 = vmax.f32 %v1350_v48, 0.0  ;;  %v1949_v46 = vmax.f32 %v1713_v55, 0.0  ;;  %v1353_v52 = vpop.f32.mrb[80].mxu1  ;;  %v2532_v1 = vpop.f32.mrb[88].mxu0 }
 0x265   :  { %2160 = vst [vmem:[%s4292_s5 + $0x498] sm:$0xff] %v1968_v41  ;;  %2144 = vst [vmem:[%s4292_s5 + $0x418] sm:$0xff] %v1952_v63  ;;  %v1354_v14 = vadd.f32 %v1353_v52, %v4024_v38  ;;  %v1728_v0 = vadd.f32 %v2532_v1, %v3914_v54  ;;  %v1355_v53 = vpop.f32.mrb[81].mxu1  ;;  %v1722_v58 = vpop.f32.mrb[89].mxu0 }
 0x266   :  { %2161 = vst [vmem:[%s4292_s5 + $0x4a0] sm:$0xff] %v1969_v43  ;;  %2141 = vst [vmem:[%s4292_s5 + $0x400] sm:$0xff] %v1949_v46  ;;  %v1356_v47 = vadd.f32 %v1355_v53, %v4024_v38  ;;  %v1723_v30 = vadd.f32 %v1722_v58, %v3916_v34  ;;  %v4166_v43 = vpop.permute.xlu1 %771  ;;  %v4168_v46 = vpop.permute.xlu0 %766 }
 0x267   :  { %v1971_v6 = vmax.f32 %v1354_v14, 0.0  ;;  %v1958_v54 = vmax.f32 %v1728_v0, 0.0 }
 0x268   :  { %v1972_v31 = vmax.f32 %v1356_v47, 0.0  ;;  %v1955_v45 = vmax.f32 %v1723_v30, 0.0  ;;  %v1359_v36 = vpop.f32.mrb[82].mxu1  ;;  %v2535_v59 = vpop.f32.mrb[90].mxu0 }
 0x269   :  { %2163 = vst [vmem:[%s4292_s5 + $0x4b0] sm:$0xff] %v1971_v6  ;;  %2150 = vst [vmem:[%s4292_s5 + $0x448] sm:$0xff] %v1958_v54  ;;  %v1360_v34 = vadd.f32 %v1359_v36, %v4022_v7  ;;  %v1738_v16 = vadd.f32 %v2535_v59, %v3950_v10  ;;  %v1361_v20 = vpop.f32.mrb[83].mxu1  ;;  %v1732_v12 = vpop.f32.mrb[91].mxu0 }
 0x26a   :  { %2164 = vst [vmem:[%s4292_s5 + $0x4b8] sm:$0xff] %v1972_v31  ;;  %2147 = vst [vmem:[%s4292_s5 + $0x430] sm:$0xff] %v1955_v45  ;;  %v1362_v42 = vadd.f32 %v1361_v20, %v4022_v7  ;;  %v1733_v13 = vadd.f32 %v1732_v12, %v3952_v11 }
 0x26b   :  { %v1974_v17 = vmax.f32 %v1360_v34, 0.0  ;;  %v1964_v18 = vmax.f32 %v1738_v16, 0.0 }
 0x26c   :  { %v1975_v21 = vmax.f32 %v1362_v42, 0.0  ;;  %v1961_v60 = vmax.f32 %v1733_v13, 0.0  ;;  %v1365_v19 = vpop.f32.mrb[84].mxu1  ;;  %v2538_v10 = vpop.f32.mrb[92].mxu0 }
 0x26d   :  { %2166 = vst [vmem:[%s4292_s5 + $0x4c8] sm:$0xff] %v1974_v17  ;;  %2156 = vst [vmem:[%s4292_s5 + $0x478] sm:$0xff] %v1964_v18  ;;  %v1366_v2 = vadd.f32 %v1365_v19, %v4060_v8  ;;  %v1748_v25 = vadd.f32 %v2538_v10, %v3986_v5  ;;  %v1367_v49 = vpop.f32.mrb[85].mxu1  ;;  %v1742_v11 = vpop.f32.mrb[93].mxu0 }
 0x26e   :  { %2167 = vst [vmem:[%s4292_s5 + $0x4d0] sm:$0xff] %v1975_v21  ;;  %2153 = vst [vmem:[%s4292_s5 + $0x460] sm:$0xff] %v1961_v60  ;;  %v1368_v26 = vadd.f32 %v1367_v49, %v4060_v8  ;;  %v1743_v3 = vadd.f32 %v1742_v11, %v3988_v56  ;;  %v4202_v17 = vpop.permute.xlu1 %781  ;;  %v777_v18 = vpop.permute.xlu0 %776 }
 0x26f   :  { %v1977_v22 = vmax.f32 %v1366_v2, 0.0  ;;  %v1970_v5 = vmax.f32 %v1748_v25, 0.0 }
 0x270   :  { %v1978_v27 = vmax.f32 %v1368_v26, 0.0  ;;  %v1967_v9 = vmax.f32 %v1743_v3, 0.0  ;;  %v1371_v44 = vpop.f32.mrb[86].mxu1  ;;  %v2541_v24 = vpop.f32.mrb[94].mxu0 }
 0x271   :  { %2169 = vst [vmem:[%s4292_s5 + $0x4e0] sm:$0xff] %v1977_v22  ;;  %2162 = vst [vmem:[%s4292_s5 + $0x4a8] sm:$0xff] %v1970_v5  ;;  %v1372_v56 = vadd.f32 %v1371_v44, %v4058_v23  ;;  %v1758_v4 = vadd.f32 %v2541_v24, %v4022_v7  ;;  %v1373_v29 = vpop.f32.mrb[87].mxu1  ;;  %v1752_v28 = vpop.f32.mrb[95].mxu0 }
 0x272   :  { %2170 = vst [vmem:[%s4292_s5 + $0x4e8] sm:$0xff] %v1978_v27  ;;  %2159 = vst [vmem:[%s4292_s5 + $0x490] sm:$0xff] %v1967_v9  ;;  %v1374_v33 = vadd.f32 %v1373_v29, %v4058_v23  ;;  %v1753_v37 = vadd.f32 %v1752_v28, %v4024_v38 }
 0x273   :  { %v1980_v32 = vmax.f32 %v1372_v56, 0.0  ;;  %v1976_v39 = vmax.f32 %v1758_v4, 0.0 }
 0x274   :  { %v1981_v50 = vmax.f32 %v1374_v33, 0.0  ;;  %v1973_v62 = vmax.f32 %v1753_v37, 0.0  ;;  %v1377_v40 = vpop.f32.mrb[88].mxu1  ;;  %v2544_v7 = vpop.f32.mrb[96].mxu0 }
 0x275   :  { %2172 = vst [vmem:[%s4292_s5 + $0x4f8] sm:$0xff] %v1980_v32  ;;  %2168 = vst [vmem:[%s4292_s5 + $0x4d8] sm:$0xff] %v1976_v39  ;;  %v1378_v57 = vadd.f32 %v1377_v40, %v4096_v15  ;;  %v1768_v48 = vadd.f32 %v2544_v7, %v4058_v23  ;;  %v1379_v55 = vpop.f32.mrb[89].mxu1  ;;  %v1762_v38 = vpop.f32.mrb[97].mxu0 }
 0x276   :  { %2173 = vst [vmem:[%s4292_s5 + $0x500] sm:$0xff] %v1981_v50  ;;  %2165 = vst [vmem:[%s4292_s5 + $0x4c0] sm:$0xff] %v1973_v62  ;;  %v1380_v41 = vadd.f32 %v1379_v55, %v4096_v15  ;;  %v1763_v63 = vadd.f32 %v1762_v38, %v4060_v8  ;;  %v792_v32 = vpop.permute.xlu1 %791  ;;  %v787_v39 = vpop.permute.xlu0 %786 }
 0x277   :  { %v1983_v52 = vmax.f32 %v1378_v57, 0.0  ;;  %v1982_v23 = vmax.f32 %v1768_v48, 0.0 }
 0x278   :  { %v1984_v1 = vmax.f32 %v1380_v41, 0.0  ;;  %v1979_v14 = vmax.f32 %v1763_v63, 0.0  ;;  %v1383_v0 = vpop.f32.mrb[90].mxu1  ;;  %v2547_v53 = vpop.f32.mrb[98].mxu0 }
 0x279   :  { %2175 = vst [vmem:[%s4292_s5 + $0x510] sm:$0xff] %v1983_v52  ;;  %2174 = vst [vmem:[%s4292_s5 + $0x508] sm:$0xff] %v1982_v23  ;;  %v1384_v8 = vadd.f32 %v1383_v0, %v4094_v35  ;;  %v1778_v58 = vadd.f32 %v2547_v53, %v4094_v35  ;;  %v1385_v47 = vpop.f32.mrb[91].mxu1  ;;  %v1772_v30 = vpop.f32.mrb[99].mxu0 }
 0x27a   :  { %2176 = vst [vmem:[%s4292_s5 + $0x518] sm:$0xff] %v1984_v1  ;;  %2171 = vst [vmem:[%s4292_s5 + $0x4f0] sm:$0xff] %v1979_v14  ;;  %v1386_v6 = vadd.f32 %v1385_v47, %v4094_v35  ;;  %v1773_v54 = vadd.f32 %v1772_v30, %v4096_v15 }
 0x27b   :  { %v1986_v31 = vmax.f32 %v1384_v8, 0.0  ;;  %v1988_v45 = vmax.f32 %v1778_v58, 0.0 }
 0x27c   :  { %v1987_v36 = vmax.f32 %v1386_v6, 0.0  ;;  %v1985_v59 = vmax.f32 %v1773_v54, 0.0  ;;  %v1389_v34 = vpop.f32.mrb[92].mxu1  ;;  %v2550_v16 = vpop.f32.mrb[100].mxu0 }
 0x27d   :  { %2178 = vst [vmem:[%s4292_s5 + $0x528] sm:$0xff] %v1986_v31  ;;  %2180 = vst [vmem:[%s4292_s5 + $0x538] sm:$0xff] %v1988_v45  ;;  %v1390_v20 = vadd.f32 %v1389_v34, %v4132_v51  ;;  %v1788_v35 = vadd.f32 %v2550_v16, %v4130_v61  ;;  %v1391_v12 = vpop.f32.mrb[93].mxu1  ;;  %v1782_v15 = vpop.f32.mrb[101].mxu0 }
 0x27e   :  { %2179 = vst [vmem:[%s4292_s5 + $0x530] sm:$0xff] %v1987_v36  ;;  %2177 = vst [vmem:[%s4292_s5 + $0x520] sm:$0xff] %v1985_v59  ;;  %v1392_v42 = vadd.f32 %v1391_v12, %v4132_v51  ;;  %v1783_v13 = vadd.f32 %v1782_v15, %v4132_v51 }
 0x27f   :  { %v1989_v21 = vmax.f32 %v1390_v20, 0.0  ;;  %v1994_v60 = vmax.f32 %v1788_v35, 0.0 }
 0x280   :  { %v1990_v19 = vmax.f32 %v1392_v42, 0.0  ;;  %v1991_v10 = vmax.f32 %v1783_v13, 0.0  ;;  %v1395_v2 = vpop.f32.mrb[94].mxu1  ;;  %v2553_v25 = vpop.f32.mrb[102].mxu0 }
 0x281   :  { %2181 = vst [vmem:[%s4292_s5 + $0x540] sm:$0xff] %v1989_v21  ;;  %2186 = vst [vmem:[%s4292_s5 + $0x568] sm:$0xff] %v1994_v60  ;;  %v1396_v49 = vadd.f32 %v1395_v2, %v4130_v61  ;;  %v1798_v11 = vadd.f32 %v2553_v25, %v4166_v43  ;;  %v1397_v26 = vpop.f32.mrb[95].mxu1  ;;  %v1792_v3 = vpop.f32.mrb[103].mxu0 }
 0x282   :  { %2182 = vst [vmem:[%s4292_s5 + $0x548] sm:$0xff] %v1990_v19  ;;  %2183 = vst [vmem:[%s4292_s5 + $0x550] sm:$0xff] %v1991_v10  ;;  %v1398_v51 = vadd.f32 %v1397_v26, %v4130_v61  ;;  %v1793_v22 = vadd.f32 %v1792_v3, %v4168_v46 }
 0x283   :  { %v1992_v5 = vmax.f32 %v1396_v49, 0.0  ;;  %v2000_v27 = vmax.f32 %v1798_v11, 0.0 }
 0x284   :  { %v1993_v9 = vmax.f32 %v1398_v51, 0.0  ;;  %v1997_v44 = vmax.f32 %v1793_v22, 0.0  ;;  %v1401_v24 = vpop.f32.mrb[96].mxu1  ;;  %v2556_v56 = vpop.f32.mrb[104].mxu0 }
 0x285   :  { %2184 = vst [vmem:[%s4292_s5 + $0x558] sm:$0xff] %v1992_v5  ;;  %2192 = vst [vmem:[%s4292_s5 + $0x598] sm:$0xff] %v2000_v27  ;;  %v1402_v4 = vadd.f32 %v1401_v24, %v4168_v46  ;;  %v1808_v61 = vadd.f32 %v2556_v56, %v4202_v17  ;;  %v1403_v29 = vpop.f32.mrb[97].mxu1  ;;  %v1802_v28 = vpop.f32.mrb[105].mxu0 }
 0x286   :  { %2185 = vst [vmem:[%s4292_s5 + $0x560] sm:$0xff] %v1993_v9  ;;  %2189 = vst [vmem:[%s4292_s5 + $0x580] sm:$0xff] %v1997_v44  ;;  %v1404_v33 = vadd.f32 %v1403_v29, %v4168_v46  ;;  %v1803_v37 = vadd.f32 %v1802_v28, %v777_v18 }
 0x287   :  { %v1995_v50 = vmax.f32 %v1402_v4, 0.0  ;;  %v2006_v62 = vmax.f32 %v1808_v61, 0.0 }
 0x288   :  { %v1996_v40 = vmax.f32 %v1404_v33, 0.0  ;;  %v2003_v7 = vmax.f32 %v1803_v37, 0.0  ;;  %v1407_v57 = vpop.f32.mrb[98].mxu1  ;;  %v2559_v48 = vpop.f32.mrb[106].mxu0 }
 0x289   :  { %2187 = vst [vmem:[%s4292_s5 + $0x570] sm:$0xff] %v1995_v50  ;;  %2198 = vst [vmem:[%s4292_s5 + $0x5c8] sm:$0xff] %v2006_v62  ;;  %v1408_v55 = vadd.f32 %v1407_v57, %v4166_v43  ;;  %v1818_v38 = vadd.f32 %v2559_v48, %v792_v32  ;;  %v1409_v41 = vpop.f32.mrb[99].mxu1  ;;  %v1812_v63 = vpop.f32.mrb[107].mxu0 }
 0x28a   :  { %2188 = vst [vmem:[%s4292_s5 + $0x578] sm:$0xff] %v1996_v40  ;;  %2195 = vst [vmem:[%s4292_s5 + $0x5b0] sm:$0xff] %v2003_v7  ;;  %v1410_v46 = vadd.f32 %v1409_v41, %v4166_v43  ;;  %v1813_v52 = vadd.f32 %v1812_v63, %v787_v39 }
 0x28b   :  { %v1998_v23 = vmax.f32 %v1408_v55, 0.0  ;;  %v2012_v1 = vmax.f32 %v1818_v38, 0.0 }
 0x28c   :  { %v1999_v14 = vmax.f32 %v1410_v46, 0.0  ;;  %v2009_v0 = vmax.f32 %v1813_v52, 0.0  ;;  %v1413_v53 = vpop.f32.mrb[100].mxu1 }
 0x28d   :  { %2190 = vst [vmem:[%s4292_s5 + $0x588] sm:$0xff] %v1998_v23  ;;  %2204 = vst [vmem:[%s4292_s5 + $0x5f8] sm:$0xff] %v2012_v1  ;;  %v1414_v8 = vadd.f32 %v1413_v53, %v777_v18  ;;  %v1415_v58 = vpop.f32.mrb[101].mxu1 }
 0x28e   :  { %2191 = vst [vmem:[%s4292_s5 + $0x590] sm:$0xff] %v1999_v14  ;;  %2201 = vst [vmem:[%s4292_s5 + $0x5e0] sm:$0xff] %v2009_v0  ;;  %v1416_v43 = vadd.f32 %v1415_v58, %v777_v18 }
 0x28f   :  { %v2001_v47 = vmax.f32 %v1414_v8, 0.0 }
 0x290   :  { %v2002_v30 = vmax.f32 %v1416_v43, 0.0  ;;  %v1419_v6 = vpop.f32.mrb[102].mxu1 }
 0x291   :  { %2193 = vst [vmem:[%s4292_s5 + $0x5a0] sm:$0xff] %v2001_v47  ;;  %v1420_v54 = vadd.f32 %v1419_v6, %v4202_v17  ;;  %v1421_v31 = vpop.f32.mrb[103].mxu1 }
 0x292   :  { %2194 = vst [vmem:[%s4292_s5 + $0x5a8] sm:$0xff] %v2002_v30  ;;  %v1422_v45 = vadd.f32 %v1421_v31, %v4202_v17 }
 0x293   :  { %v2004_v36 = vmax.f32 %v1420_v54, 0.0 }
 0x294   :  { %v2005_v59 = vmax.f32 %v1422_v45, 0.0  ;;  %v1425_v34 = vpop.f32.mrb[104].mxu1 }
 0x295   :  { %2196 = vst [vmem:[%s4292_s5 + $0x5b8] sm:$0xff] %v2004_v36  ;;  %v1426_v16 = vadd.f32 %v1425_v34, %v787_v39  ;;  %v1427_v20 = vpop.f32.mrb[105].mxu1 }
 0x296   :  { %2197 = vst [vmem:[%s4292_s5 + $0x5c0] sm:$0xff] %v2005_v59  ;;  %v1428_v35 = vadd.f32 %v1427_v20, %v787_v39 }
 0x297   :  { %v2007_v12 = vmax.f32 %v1426_v16, 0.0 }
 0x298   :  { %v2008_v15 = vmax.f32 %v1428_v35, 0.0  ;;  %v1431_v42 = vpop.f32.mrb[106].mxu1 }
 0x299   :  { %2199 = vst [vmem:[%s4292_s5 + $0x5d0] sm:$0xff] %v2007_v12  ;;  %v1432_v13 = vadd.f32 %v1431_v42, %v792_v32  ;;  %v1433_v17 = vpop.f32.mrb[107].mxu1 }
 0x29a   :  { %2200 = vst [vmem:[%s4292_s5 + $0x5d8] sm:$0xff] %v2008_v15  ;;  %v1434_v18 = vadd.f32 %v1433_v17, %v792_v32 }
 0x29b   :  { %v2010_v21 = vmax.f32 %v1432_v13, 0.0 }
 0x29c   :  { %v2011_v60 = vmax.f32 %v1434_v18, 0.0 }
 0x29d   :  { %2202 = vst [vmem:[%s4292_s5 + $0x5e8] sm:$0xff] %v2010_v21 }
 0x29e   :  { %2203 = vst [vmem:[%s4292_s5 + $0x5f0] sm:$0xff] %v2011_v60 }

// kernel: post_print_denoiser_forward.11
= control target key start
LH: loop header
LB: loop body
LE: loop exit
PB: predicated region body
PF: predicated region fallthrough
CT: control target
= control target key end

     0   :  { %v5956_v3 = vmov 0   ;;  %vm3489_vm0 = vcmask 261120   ;;  %s8032_s1 = inlined_call_operand.vmem [shape: bf16[288,4096], index: 1, kind: input, shape index: {}]   ;;  %s8033_s0 = inlined_call_operand.vmem [shape: bf16[8,288], index: 0, kind: input, shape index: {}]   ;;  %s8034_s2 = inlined_call_operand.vmem [shape: f32[8,1], index: 2, kind: input, shape index: {}]   ;;  %s8035_s3 = inlined_call_operand.vmem [shape: f32[8,4096], index: 3, kind: output, shape index: {}]  }
   0x1   :  { %v17_v0 = vld [vmem:[%s8032_s1] sm:$0xff]  ;;  %v18_v2 = vld [vmem:[%s8032_s1 + $0x8] sm:$0xff]  ;;  %5821 = vset.pattern.permute.xlu0 %v5956_v3 }
   0x2   :  { %v33_v1 = vld [vmem:[%s8032_s1 + $0x80] sm:$0xff]  ;;  %v34_v5 = vld [vmem:[%s8032_s1 + $0x88] sm:$0xff] }
   0x3   :  { %v5133_v4 = vcombine.high %v17_v0, %v33_v1  ;;  %v5132_v6 = vcombine.low %v17_v0, %v33_v1  ;;  %v49_v7 = vld [vmem:[%s8032_s1 + $0x100] sm:$0xff]  ;;  %v5135_v9 = vcombine.high %v18_v2, %v34_v5  ;;  %v5134_v10 = vcombine.low %v18_v2, %v34_v5  ;;  %v50_v12 = vld [vmem:[%s8032_s1 + $0x108] sm:$0xff] }
   0x4   :  { %v65_v8 = vld [vmem:[%s8032_s1 + $0x180] sm:$0xff]  ;;  %v66_v13 = vld [vmem:[%s8032_s1 + $0x188] sm:$0xff] }
   0x5   :  { %v5165_v11 = vcombine.high %v49_v7, %v65_v8  ;;  %v81_v14 = vld [vmem:[%s8032_s1 + $0x200] sm:$0xff]  ;;  %3493 = vmatprep.subr.bf16.mxu0 %v5133_v4  ;;  %v5167_v15 = vcombine.high %v50_v12, %v66_v13  ;;  %v82_v17 = vld [vmem:[%s8032_s1 + $0x208] sm:$0xff]  ;;  %3575 = vmatprep.subr.bf16.mxu1 %v5135_v9  ;;  %v5164_v19 = vcombine.low %v49_v7, %v65_v8 }
   0x6   :  { %v97_v16 = vld [vmem:[%s8032_s1 + $0x280] sm:$0xff]  ;;  %v98_v18 = vld [vmem:[%s8032_s1 + $0x288] sm:$0xff]  ;;  %3494 = vmatpush1.bf16.msra.mxu0 %v5132_v6  ;;  %3576 = vmatpush1.bf16.msra.mxu1 %v5134_v10  ;;  %v5166_v20 = vcombine.low %v50_v12, %v66_v13 }
   0x7   :  { %3495 = vmatprep.subr.bf16.mxu0 %v5165_v11  ;;  %v5197_v21 = vcombine.high %v81_v14, %v97_v16  ;;  %3577 = vmatprep.subr.bf16.mxu1 %v5167_v15  ;;  %v5199_v22 = vcombine.high %v82_v17, %v98_v18  ;;  %v113_v23 = vld [vmem:[%s8032_s1 + $0x300] sm:$0xff]  ;;  %v114_v25 = vld [vmem:[%s8032_s1 + $0x308] sm:$0xff]  ;;  %v5196_v27 = vcombine.low %v81_v14, %v97_v16 }
   0x8   :  { %v129_v24 = vld [vmem:[%s8032_s1 + $0x380] sm:$0xff]  ;;  %v130_v26 = vld [vmem:[%s8032_s1 + $0x388] sm:$0xff]  ;;  %v5198_v28 = vcombine.low %v82_v17, %v98_v18 }
   0x9   :  { %v5229_v29 = vcombine.high %v113_v23, %v129_v24  ;;  %v5231_v30 = vcombine.high %v114_v25, %v130_v26  ;;  %v145_v31 = vld [vmem:[%s8032_s1 + $0x400] sm:$0xff]  ;;  %v146_v33 = vld [vmem:[%s8032_s1 + $0x408] sm:$0xff]  ;;  %v5228_v35 = vcombine.low %v113_v23, %v129_v24  ;;  %v5230_v36 = vcombine.low %v114_v25, %v130_v26 }
   0xa   :  { %3496 = vmatpush1.bf16.msra.mxu0 %v5164_v19  ;;  %3578 = vmatpush1.bf16.msra.mxu1 %v5166_v20  ;;  %v161_v32 = vld [vmem:[%s8032_s1 + $0x480] sm:$0xff]  ;;  %v162_v34 = vld [vmem:[%s8032_s1 + $0x488] sm:$0xff] }
   0xb   :  { %3497 = vmatprep.subr.bf16.mxu0 %v5197_v21  ;;  %3579 = vmatprep.subr.bf16.mxu1 %v5199_v22  ;;  %v5261_v37 = vcombine.high %v145_v31, %v161_v32  ;;  %v5263_v38 = vcombine.high %v146_v33, %v162_v34  ;;  %v177_v39 = vld [vmem:[%s8032_s1 + $0x500] sm:$0xff]  ;;  %v178_v41 = vld [vmem:[%s8032_s1 + $0x508] sm:$0xff]  ;;  %v5260_v43 = vcombine.low %v145_v31, %v161_v32 }
   0xc   :  { %v193_v40 = vld [vmem:[%s8032_s1 + $0x580] sm:$0xff]  ;;  %v194_v42 = vld [vmem:[%s8032_s1 + $0x588] sm:$0xff]  ;;  %v5262_v44 = vcombine.low %v146_v33, %v162_v34 }
   0xd   :  { %v5293_v45 = vcombine.high %v177_v39, %v193_v40  ;;  %v5295_v46 = vcombine.high %v178_v41, %v194_v42  ;;  %v209_v47 = vld [vmem:[%s8032_s1 + $0x600] sm:$0xff]  ;;  %v210_v49 = vld [vmem:[%s8032_s1 + $0x608] sm:$0xff]  ;;  %v5292_v51 = vcombine.low %v177_v39, %v193_v40  ;;  %v5294_v52 = vcombine.low %v178_v41, %v194_v42 }
   0xe   :  { %3498 = vmatpush1.bf16.msra.mxu0 %v5196_v27  ;;  %3580 = vmatpush1.bf16.msra.mxu1 %v5198_v28  ;;  %v225_v48 = vld [vmem:[%s8032_s1 + $0x680] sm:$0xff]  ;;  %v226_v50 = vld [vmem:[%s8032_s1 + $0x688] sm:$0xff] }
   0xf   :  { %3499 = vmatprep.subr.bf16.mxu0 %v5229_v29  ;;  %3581 = vmatprep.subr.bf16.mxu1 %v5231_v30  ;;  %v5325_v53 = vcombine.high %v209_v47, %v225_v48  ;;  %v6065_v54 = vld [vmem:[%s8033_s0] sm:$0xff]  ;;  %v5327_v55 = vcombine.high %v210_v49, %v226_v50  ;;  %v242_v59 = vld [vmem:[%s8032_s1 + $0x708] sm:$0xff]  ;;  %v5324_v61 = vcombine.low %v209_v47, %v225_v48 }
  0x10   :  { %v241_v56 = vld [vmem:[%s8032_s1 + $0x700] sm:$0xff]  ;;  %v6075_v58 = vcombine.high %v6065_v54, %v6065_v54  ;;  %v258_v60 = vld [vmem:[%s8032_s1 + $0x788] sm:$0xff]  ;;  %v5326_v62 = vcombine.low %v210_v49, %v226_v50 }
  0x11   :  { %v257_v57 = vld [vmem:[%s8032_s1 + $0x780] sm:$0xff]  ;;  %v5359_v0 = vcombine.high %v242_v59, %v258_v60  ;;  %v274_v4 = vld [vmem:[%s8032_s1 + $0x808] sm:$0xff]  ;;  %v5358_v7 = vcombine.low %v242_v59, %v258_v60 }
  0x12   :  { %3500 = vmatpush1.bf16.msra.mxu0 %v5228_v35  ;;  %3582 = vmatpush1.bf16.msra.mxu1 %v5230_v36  ;;  %v5357_v63 = vcombine.high %v241_v56, %v257_v57  ;;  %v273_v1 = vld [vmem:[%s8032_s1 + $0x800] sm:$0xff]  ;;  %v290_v5 = vld [vmem:[%s8032_s1 + $0x888] sm:$0xff]  ;;  %v5356_v6 = vcombine.low %v241_v56, %v257_v57 }
  0x13   :  { %3501 = vmatprep.subr.bf16.mxu0 %v5261_v37  ;;  %3583 = vmatprep.subr.bf16.mxu1 %v5263_v38  ;;  %v289_v2 = vld [vmem:[%s8032_s1 + $0x880] sm:$0xff]  ;;  %v5391_v9 = vcombine.high %v274_v4, %v290_v5  ;;  %v306_v12 = vld [vmem:[%s8032_s1 + $0x908] sm:$0xff]  ;;  %v5390_v15 = vcombine.low %v274_v4, %v290_v5 }
  0x14   :  { %3525 = vmatprep.mubr.bf16.mxu0 %v6075_v58  ;;  %3607 = vmatprep.mubr.bf16.mxu1 %v6075_v58  ;;  %v5389_v8 = vcombine.high %v273_v1, %v289_v2  ;;  %v305_v10 = vld [vmem:[%s8032_s1 + $0x900] sm:$0xff]  ;;  %v322_v13 = vld [vmem:[%s8032_s1 + $0x988] sm:$0xff]  ;;  %v5388_v14 = vcombine.low %v273_v1, %v289_v2 }
  0x15   :  { %v321_v11 = vld [vmem:[%s8032_s1 + $0x980] sm:$0xff]  ;;  %v5423_v17 = vcombine.high %v306_v12, %v322_v13  ;;  %v338_v20 = vld [vmem:[%s8032_s1 + $0xa08] sm:$0xff]  ;;  %v5422_v23 = vcombine.low %v306_v12, %v322_v13 }
  0x16   :  { %3502 = vmatpush1.bf16.msra.mxu0 %v5260_v43  ;;  %3584 = vmatpush1.bf16.msra.mxu1 %v5262_v44  ;;  %v5421_v16 = vcombine.high %v305_v10, %v321_v11  ;;  %v337_v18 = vld [vmem:[%s8032_s1 + $0xa00] sm:$0xff]  ;;  %v354_v21 = vld [vmem:[%s8032_s1 + $0xa88] sm:$0xff]  ;;  %v5420_v22 = vcombine.low %v305_v10, %v321_v11 }
  0x17   :  { %3503 = vmatprep.subr.bf16.mxu0 %v5293_v45  ;;  %3585 = vmatprep.subr.bf16.mxu1 %v5295_v46  ;;  %v353_v19 = vld [vmem:[%s8032_s1 + $0xa80] sm:$0xff]  ;;  %v5455_v25 = vcombine.high %v338_v20, %v354_v21  ;;  %v370_v28 = vld [vmem:[%s8032_s1 + $0xb08] sm:$0xff]  ;;  %v5454_v31 = vcombine.low %v338_v20, %v354_v21 }
  0x18   :  { %v5453_v24 = vcombine.high %v337_v18, %v353_v19  ;;  %v369_v26 = vld [vmem:[%s8032_s1 + $0xb00] sm:$0xff]  ;;  %v386_v29 = vld [vmem:[%s8032_s1 + $0xb88] sm:$0xff]  ;;  %v5452_v30 = vcombine.low %v337_v18, %v353_v19 }
  0x19   :  { %v385_v27 = vld [vmem:[%s8032_s1 + $0xb80] sm:$0xff]  ;;  %v5487_v33 = vcombine.high %v370_v28, %v386_v29  ;;  %v402_v36 = vld [vmem:[%s8032_s1 + $0xc08] sm:$0xff]  ;;  %v5486_v39 = vcombine.low %v370_v28, %v386_v29 }
  0x1a   :  { %3504 = vmatpush1.bf16.msra.mxu0 %v5292_v51  ;;  %3586 = vmatpush1.bf16.msra.mxu1 %v5294_v52  ;;  %v5485_v32 = vcombine.high %v369_v26, %v385_v27  ;;  %v401_v34 = vld [vmem:[%s8032_s1 + $0xc00] sm:$0xff]  ;;  %v418_v37 = vld [vmem:[%s8032_s1 + $0xc88] sm:$0xff]  ;;  %v5484_v38 = vcombine.low %v369_v26, %v385_v27 }
  0x1b   :  { %3505 = vmatprep.subr.bf16.mxu0 %v5325_v53  ;;  %3587 = vmatprep.subr.bf16.mxu1 %v5327_v55  ;;  %v417_v35 = vld [vmem:[%s8032_s1 + $0xc80] sm:$0xff]  ;;  %v5519_v41 = vcombine.high %v402_v36, %v418_v37  ;;  %v434_v44 = vld [vmem:[%s8032_s1 + $0xd08] sm:$0xff]  ;;  %v5518_v47 = vcombine.low %v402_v36, %v418_v37 }
  0x1c   :  { %v5517_v40 = vcombine.high %v401_v34, %v417_v35  ;;  %v433_v42 = vld [vmem:[%s8032_s1 + $0xd00] sm:$0xff]  ;;  %v450_v45 = vld [vmem:[%s8032_s1 + $0xd88] sm:$0xff]  ;;  %v5516_v46 = vcombine.low %v401_v34, %v417_v35  ;;  %v68_v34 = vld [vmem:[%s8032_s1 + $0x198] sm:$0xff] }
  0x1d   :  { %v449_v43 = vld [vmem:[%s8032_s1 + $0xd80] sm:$0xff]  ;;  %v5551_v49 = vcombine.high %v434_v44, %v450_v45  ;;  %v466_v52 = vld [vmem:[%s8032_s1 + $0xe08] sm:$0xff]  ;;  %v5550_v56 = vcombine.low %v434_v44, %v450_v45 }
  0x1e   :  { %3506 = vmatpush1.bf16.msra.mxu0 %v5324_v61  ;;  %3588 = vmatpush1.bf16.msra.mxu1 %v5326_v62  ;;  %v5549_v48 = vcombine.high %v433_v42, %v449_v43  ;;  %v465_v50 = vld [vmem:[%s8032_s1 + $0xe00] sm:$0xff]  ;;  %v482_v53 = vld [vmem:[%s8032_s1 + $0xe88] sm:$0xff]  ;;  %v5548_v55 = vcombine.low %v433_v42, %v449_v43  ;;  %v100_v42 = vld [vmem:[%s8032_s1 + $0x298] sm:$0xff] }
  0x1f   :  { %3507 = vmatprep.subr.bf16.mxu0 %v5357_v63  ;;  %3589 = vmatprep.subr.bf16.mxu1 %v5359_v0  ;;  %v481_v51 = vld [vmem:[%s8032_s1 + $0xe80] sm:$0xff]  ;;  %v5583_v60 = vcombine.high %v466_v52, %v482_v53  ;;  %v498_v63 = vld [vmem:[%s8032_s1 + $0xf08] sm:$0xff]  ;;  %v5582_v2 = vcombine.low %v466_v52, %v482_v53 }
  0x20   :  { %v5581_v57 = vcombine.high %v465_v50, %v481_v51  ;;  %v593_v59 = vld [vmem:[%s8034_s2] sm:$0xff]  ;;  %v514_v0 = vld [vmem:[%s8032_s1 + $0xf88] sm:$0xff]  ;;  %v5580_v1 = vcombine.low %v465_v50, %v481_v51  ;;  %v132_v50 = vld [vmem:[%s8032_s1 + $0x398] sm:$0xff] }
  0x21   :  { %v497_v61 = vld [vmem:[%s8032_s1 + $0xf00] sm:$0xff]  ;;  %596 = vperm.xlu0 %5821, %v593_v59   ;;  %v5615_v5 = vcombine.high %v498_v63, %v514_v0  ;;  %v5614_v11 = vcombine.low %v498_v63, %v514_v0  ;;  %v578_v18 = vld [vmem:[%s8032_s1 + $0x1188] sm:$0xff]  ;;  %v148_v59 = vld [vmem:[%s8032_s1 + $0x418] sm:$0xff] }
  0x22   :  { %3508 = vmatpush1.bf16.msra.mxu0 %v5356_v6  ;;  %3590 = vmatpush1.bf16.msra.mxu1 %v5358_v7  ;;  %v513_v62 = vld [vmem:[%s8032_s1 + $0xf80] sm:$0xff] }
  0x23   :  { %3509 = vmatprep.subr.bf16.mxu0 %v5389_v8  ;;  %3591 = vmatprep.subr.bf16.mxu1 %v5391_v9  ;;  %v5613_v4 = vcombine.high %v497_v61, %v513_v62  ;;  %v529_v6 = vld [vmem:[%s8032_s1 + $0x1000] sm:$0xff]  ;;  %v530_v8 = vld [vmem:[%s8032_s1 + $0x1008] sm:$0xff]  ;;  %v5612_v10 = vcombine.low %v497_v61, %v513_v62 }
  0x24   :  { %v545_v7 = vld [vmem:[%s8032_s1 + $0x1080] sm:$0xff]  ;;  %v546_v9 = vld [vmem:[%s8032_s1 + $0x1088] sm:$0xff] }
  0x25   :  { %v5645_v12 = vcombine.high %v529_v6, %v545_v7  ;;  %v5647_v13 = vcombine.high %v530_v8, %v546_v9  ;;  %v5644_v19 = vcombine.low %v529_v6, %v545_v7  ;;  %v5646_v20 = vcombine.low %v530_v8, %v546_v9 }
  0x26   :  { %3510 = vmatpush1.bf16.msra.mxu0 %v5388_v14  ;;  %3592 = vmatpush1.bf16.msra.mxu1 %v5390_v15  ;;  %v561_v14 = vld [vmem:[%s8032_s1 + $0x1100] sm:$0xff] }
  0x27   :  { %3511 = vmatprep.subr.bf16.mxu0 %v5421_v16  ;;  %3593 = vmatprep.subr.bf16.mxu1 %v5423_v17  ;;  %v577_v15 = vld [vmem:[%s8032_s1 + $0x1180] sm:$0xff]  ;;  %v6204_v16 = vcombine.low %v6065_v54, %v6065_v54  ;;  %v562_v17 = vld [vmem:[%s8032_s1 + $0x1108] sm:$0xff]  ;;  %v19_v54 = vld [vmem:[%s8032_s1 + $0x10] sm:$0xff] }
  0x28   :  { %v5677_v21 = vcombine.high %v561_v14, %v577_v15  ;;  %v5676_v26 = vcombine.low %v561_v14, %v577_v15  ;;  %v5678_v27 = vcombine.low %v562_v17, %v578_v18 }
  0x2a   :  { %3512 = vmatpush1.bf16.msra.mxu0 %v5420_v22  ;;  %3594 = vmatpush1.bf16.msra.mxu1 %v5422_v23  ;;  %v5679_v22 = vcombine.high %v562_v17, %v578_v18  ;;  %v35_v23 = vld [vmem:[%s8032_s1 + $0x90] sm:$0xff] }
  0x2b   :  { %3513 = vmatprep.subr.bf16.mxu0 %v5453_v24  ;;  %3595 = vmatprep.subr.bf16.mxu1 %v5455_v25  ;;  %v20_v24 = vld [vmem:[%s8032_s1 + $0x18] sm:$0xff]  ;;  %v5137_v28 = vcombine.high %v19_v54, %v35_v23  ;;  %v5136_v35 = vcombine.low %v19_v54, %v35_v23 }
  0x2c   :  { %v36_v25 = vld [vmem:[%s8032_s1 + $0x98] sm:$0xff] }
  0x2d   :  { %v5139_v29 = vcombine.high %v20_v24, %v36_v25  ;;  %v5138_v36 = vcombine.low %v20_v24, %v36_v25 }
  0x2e   :  { %3514 = vmatpush1.bf16.msra.mxu0 %v5452_v30  ;;  %3596 = vmatpush1.bf16.msra.mxu1 %v5454_v31  ;;  %v51_v30 = vld [vmem:[%s8032_s1 + $0x110] sm:$0xff] }
  0x2f   :  { %3515 = vmatprep.subr.bf16.mxu0 %v5485_v32  ;;  %3597 = vmatprep.subr.bf16.mxu1 %v5487_v33  ;;  %v67_v31 = vld [vmem:[%s8032_s1 + $0x190] sm:$0xff]  ;;  %v6237_v32 = vld [vmem:[%s8033_s0 + $0x8] ss:$0 sps:$4 sm:$0xff]   ;;  %v52_v33 = vld [vmem:[%s8032_s1 + $0x118] sm:$0xff] }
  0x30   :  { %v5169_v37 = vcombine.high %v51_v30, %v67_v31  ;;  %v5168_v43 = vcombine.low %v51_v30, %v67_v31  ;;  %v5170_v44 = vcombine.low %v52_v33, %v68_v34 }
  0x32   :  { %3516 = vmatpush1.bf16.msra.mxu0 %v5484_v38  ;;  %3598 = vmatpush1.bf16.msra.mxu1 %v5486_v39  ;;  %v5171_v38 = vcombine.high %v52_v33, %v68_v34  ;;  %v83_v39 = vld [vmem:[%s8032_s1 + $0x210] sm:$0xff] }
  0x33   :  { %3517 = vmatprep.subr.bf16.mxu0 %v5517_v40  ;;  %3599 = vmatprep.subr.bf16.mxu1 %v5519_v41  ;;  %v99_v40 = vld [vmem:[%s8032_s1 + $0x290] sm:$0xff]  ;;  %v84_v41 = vld [vmem:[%s8032_s1 + $0x218] sm:$0xff] }
  0x34   :  { %v5201_v45 = vcombine.high %v83_v39, %v99_v40  ;;  %v5200_v51 = vcombine.low %v83_v39, %v99_v40  ;;  %v5202_v52 = vcombine.low %v84_v41, %v100_v42 }
  0x36   :  { %3518 = vmatpush1.bf16.msra.mxu0 %v5516_v46  ;;  %3600 = vmatpush1.bf16.msra.mxu1 %v5518_v47  ;;  %v5203_v46 = vcombine.high %v84_v41, %v100_v42  ;;  %v115_v47 = vld [vmem:[%s8032_s1 + $0x310] sm:$0xff] }
  0x37   :  { %3519 = vmatprep.subr.bf16.mxu0 %v5549_v48  ;;  %3601 = vmatprep.subr.bf16.mxu1 %v5551_v49  ;;  %v131_v48 = vld [vmem:[%s8032_s1 + $0x390] sm:$0xff]  ;;  %v116_v49 = vld [vmem:[%s8032_s1 + $0x318] sm:$0xff] }
  0x38   :  { %v5233_v53 = vcombine.high %v115_v47, %v131_v48  ;;  %v5232_v61 = vcombine.low %v115_v47, %v131_v48  ;;  %v5234_v62 = vcombine.low %v116_v49, %v132_v50 }
  0x3a   :  { %3520 = vmatpush1.bf16.msra.mxu0 %v5548_v55  ;;  %3602 = vmatpush1.bf16.msra.mxu1 %v5550_v56  ;;  %v5235_v55 = vcombine.high %v116_v49, %v132_v50  ;;  %v147_v56 = vld [vmem:[%s8032_s1 + $0x410] sm:$0xff] }
  0x3b   :  { %3521 = vmatprep.subr.bf16.mxu0 %v5581_v57  ;;  %3603 = vmatprep.subr.bf16.mxu1 %v5583_v60  ;;  %v163_v57 = vld [vmem:[%s8032_s1 + $0x490] sm:$0xff]  ;;  %v164_v60 = vld [vmem:[%s8032_s1 + $0x498] sm:$0xff] }
  0x3c   :  { %v5265_v63 = vcombine.high %v147_v56, %v163_v57  ;;  %v5267_v0 = vcombine.high %v148_v59, %v164_v60  ;;  %v5264_v6 = vcombine.low %v147_v56, %v163_v57  ;;  %v5266_v7 = vcombine.low %v148_v59, %v164_v60 }
  0x3e   :  { %3522 = vmatpush1.bf16.msra.mxu0 %v5580_v1  ;;  %3604 = vmatpush1.bf16.msra.mxu1 %v5582_v2  ;;  %v179_v1 = vld [vmem:[%s8032_s1 + $0x510] sm:$0xff] }
  0x3f   :  { %3523 = vmatprep.subr.bf16.mxu0 %v5613_v4  ;;  %3605 = vmatprep.subr.bf16.mxu1 %v5615_v5  ;;  %v195_v2 = vld [vmem:[%s8032_s1 + $0x590] sm:$0xff]  ;;  %v180_v4 = vld [vmem:[%s8032_s1 + $0x518] sm:$0xff] }
  0x40   :  { %v196_v5 = vld [vmem:[%s8032_s1 + $0x598] sm:$0xff]  ;;  %v5297_v8 = vcombine.high %v179_v1, %v195_v2  ;;  %v5296_v14 = vcombine.low %v179_v1, %v195_v2 }
  0x41   :  { %v5299_v9 = vcombine.high %v180_v4, %v196_v5  ;;  %v5298_v15 = vcombine.low %v180_v4, %v196_v5 }
  0x42   :  { %3524 = vmatpush1.bf16.msra.mxu0 %v5612_v10  ;;  %3606 = vmatpush1.bf16.msra.mxu1 %v5614_v11  ;;  %v211_v10 = vld [vmem:[%s8032_s1 + $0x610] sm:$0xff] }
  0x43   :  { %3534 = vmatprep.subr.bf16.mxu0 %v5645_v12  ;;  %3616 = vmatprep.subr.bf16.mxu1 %v5647_v13  ;;  %v227_v11 = vld [vmem:[%s8032_s1 + $0x690] sm:$0xff]  ;;  %v212_v12 = vld [vmem:[%s8032_s1 + $0x618] sm:$0xff] }
  0x44   :  { %v228_v13 = vld [vmem:[%s8032_s1 + $0x698] sm:$0xff]  ;;  %v5329_v17 = vcombine.high %v211_v10, %v227_v11  ;;  %v5328_v54 = vcombine.low %v211_v10, %v227_v11 }
  0x45   :  { %3526 = vmatmul.mubr.bf16.vlgmr.msra.gmra.mrb[0].mxu0 %v6204_v16  ;;  %3608 = vmatmul.mubr.bf16.vlgmr.msra.gmra.mrb[0].mxu1 %v6204_v16  ;;  %v5331_v18 = vcombine.high %v212_v12, %v228_v13  ;;  %v5330_v23 = vcombine.low %v212_v12, %v228_v13 }
  0x46   :  { %3535 = vmatpush1.bf16.msra.mxu0 %v5644_v19  ;;  %3617 = vmatpush1.bf16.msra.mxu1 %v5646_v20  ;;  %v243_v19 = vld [vmem:[%s8032_s1 + $0x710] sm:$0xff] }
  0x47   :  { %3536 = vmatprep.subr.bf16.mxu0 %v5677_v21  ;;  %3618 = vmatprep.subr.bf16.mxu1 %v5679_v22  ;;  %v259_v20 = vld [vmem:[%s8032_s1 + $0x790] sm:$0xff]  ;;  %v244_v21 = vld [vmem:[%s8032_s1 + $0x718] sm:$0xff] }
  0x48   :  { %3566 = vmatprep.mubr.bf16.mxu0 %v5956_v3  ;;  %3648 = vmatprep.mubr.bf16.mxu1 %v5956_v3  ;;  %v260_v22 = vld [vmem:[%s8032_s1 + $0x798] sm:$0xff]  ;;  %v5361_v24 = vcombine.high %v243_v19, %v259_v20  ;;  %v5360_v30 = vcombine.low %v243_v19, %v259_v20 }
  0x49   :  { %v5363_v25 = vcombine.high %v244_v21, %v260_v22  ;;  %v5362_v31 = vcombine.low %v244_v21, %v260_v22 }
  0x4a   :  { %3537 = vmatpush1.bf16.msra.mxu0 %v5676_v26  ;;  %3619 = vmatpush1.bf16.msra.mxu1 %v5678_v27  ;;  %v275_v26 = vld [vmem:[%s8032_s1 + $0x810] sm:$0xff] }
  0x4b   :  { %3657 = vmatprep.subr.bf16.mxu0 %v5137_v28  ;;  %3739 = vmatprep.subr.bf16.mxu1 %v5139_v29  ;;  %v291_v27 = vld [vmem:[%s8032_s1 + $0x890] sm:$0xff]  ;;  %v276_v28 = vld [vmem:[%s8032_s1 + $0x818] sm:$0xff] }
  0x4c   :  { %v292_v29 = vld [vmem:[%s8032_s1 + $0x898] sm:$0xff]  ;;  %v5393_v33 = vcombine.high %v275_v26, %v291_v27  ;;  %v5392_v39 = vcombine.low %v275_v26, %v291_v27 }
  0x4d   :  { %v5395_v34 = vcombine.high %v276_v28, %v292_v29  ;;  %v5394_v40 = vcombine.low %v276_v28, %v292_v29 }
  0x51   :  { %5708 = vmatmul.mubr.msk.bf16.vlgmr.msra.gmra.mrb[0].mxu0 %vm3489_vm0, %v6237_v32  ;;  %5709 = vmatmul.mubr.msk.bf16.vlgmr.msra.gmra.mrb[0].mxu1 %vm3489_vm0, %v6237_v32 }
  0x52   :  { %3658 = vmatpush1.bf16.msra.mxu0 %v5136_v35  ;;  %3740 = vmatpush1.bf16.msra.mxu1 %v5138_v36  ;;  %v307_v35 = vld [vmem:[%s8032_s1 + $0x910] sm:$0xff] }
  0x53   :  { %3659 = vmatprep.subr.bf16.mxu0 %v5169_v37  ;;  %3741 = vmatprep.subr.bf16.mxu1 %v5171_v38  ;;  %v323_v36 = vld [vmem:[%s8032_s1 + $0x990] sm:$0xff]  ;;  %v308_v37 = vld [vmem:[%s8032_s1 + $0x918] sm:$0xff] }
  0x54   :  { %3689 = vmatprep.mubr.bf16.mxu0 %v6075_v58  ;;  %3771 = vmatprep.mubr.bf16.mxu1 %v6075_v58  ;;  %v324_v38 = vld [vmem:[%s8032_s1 + $0x998] sm:$0xff]  ;;  %v5425_v41 = vcombine.high %v307_v35, %v323_v36  ;;  %v5424_v47 = vcombine.low %v307_v35, %v323_v36 }
  0x55   :  { %v5427_v42 = vcombine.high %v308_v37, %v324_v38  ;;  %v5426_v48 = vcombine.low %v308_v37, %v324_v38 }
  0x56   :  { %3660 = vmatpush1.bf16.msra.mxu0 %v5168_v43  ;;  %3742 = vmatpush1.bf16.msra.mxu1 %v5170_v44  ;;  %v339_v43 = vld [vmem:[%s8032_s1 + $0xa10] sm:$0xff] }
  0x57   :  { %3661 = vmatprep.subr.bf16.mxu0 %v5201_v45  ;;  %3743 = vmatprep.subr.bf16.mxu1 %v5203_v46  ;;  %v355_v44 = vld [vmem:[%s8032_s1 + $0xa90] sm:$0xff]  ;;  %v340_v45 = vld [vmem:[%s8032_s1 + $0xa18] sm:$0xff] }
  0x58   :  { %v356_v46 = vld [vmem:[%s8032_s1 + $0xa98] sm:$0xff]  ;;  %v5457_v49 = vcombine.high %v339_v43, %v355_v44  ;;  %v5456_v56 = vcombine.low %v339_v43, %v355_v44 }
  0x59   :  { %v5459_v50 = vcombine.high %v340_v45, %v356_v46  ;;  %v5458_v57 = vcombine.low %v340_v45, %v356_v46 }
  0x5a   :  { %3662 = vmatpush1.bf16.msra.mxu0 %v5200_v51  ;;  %3744 = vmatpush1.bf16.msra.mxu1 %v5202_v52  ;;  %v371_v51 = vld [vmem:[%s8032_s1 + $0xb10] sm:$0xff] }
  0x5b   :  { %3663 = vmatprep.subr.bf16.mxu0 %v5233_v53  ;;  %3745 = vmatprep.subr.bf16.mxu1 %v5235_v55  ;;  %v387_v52 = vld [vmem:[%s8032_s1 + $0xb90] sm:$0xff]  ;;  %v372_v53 = vld [vmem:[%s8032_s1 + $0xb18] sm:$0xff] }
  0x5c   :  { %v388_v55 = vld [vmem:[%s8032_s1 + $0xb98] sm:$0xff]  ;;  %v5489_v59 = vcombine.high %v371_v51, %v387_v52  ;;  %v5488_v1 = vcombine.low %v371_v51, %v387_v52 }
  0x5d   :  { %v5491_v60 = vcombine.high %v372_v53, %v388_v55  ;;  %v5490_v2 = vcombine.low %v372_v53, %v388_v55 }
  0x5e   :  { %3664 = vmatpush1.bf16.msra.mxu0 %v5232_v61  ;;  %3746 = vmatpush1.bf16.msra.mxu1 %v5234_v62  ;;  %v403_v61 = vld [vmem:[%s8032_s1 + $0xc10] sm:$0xff] }
  0x5f   :  { %3665 = vmatprep.subr.bf16.mxu0 %v5265_v63  ;;  %3747 = vmatprep.subr.bf16.mxu1 %v5267_v0  ;;  %v419_v62 = vld [vmem:[%s8032_s1 + $0xc90] sm:$0xff]  ;;  %v404_v63 = vld [vmem:[%s8032_s1 + $0xc18] sm:$0xff] }
  0x60   :  { %v420_v0 = vld [vmem:[%s8032_s1 + $0xc98] sm:$0xff]  ;;  %v5521_v4 = vcombine.high %v403_v61, %v419_v62  ;;  %v5520_v10 = vcombine.low %v403_v61, %v419_v62 }
  0x61   :  { %v5523_v5 = vcombine.high %v404_v63, %v420_v0  ;;  %v5522_v11 = vcombine.low %v404_v63, %v420_v0 }
  0x62   :  { %3666 = vmatpush1.bf16.msra.mxu0 %v5264_v6  ;;  %3748 = vmatpush1.bf16.msra.mxu1 %v5266_v7  ;;  %v435_v6 = vld [vmem:[%s8032_s1 + $0xd10] sm:$0xff] }
  0x63   :  { %3667 = vmatprep.subr.bf16.mxu0 %v5297_v8  ;;  %3749 = vmatprep.subr.bf16.mxu1 %v5299_v9  ;;  %v451_v7 = vld [vmem:[%s8032_s1 + $0xd90] sm:$0xff]  ;;  %v436_v8 = vld [vmem:[%s8032_s1 + $0xd18] sm:$0xff] }
  0x64   :  { %v452_v9 = vld [vmem:[%s8032_s1 + $0xd98] sm:$0xff]  ;;  %v5553_v12 = vcombine.high %v435_v6, %v451_v7  ;;  %v5552_v19 = vcombine.low %v435_v6, %v451_v7 }
  0x65   :  { %v5555_v13 = vcombine.high %v436_v8, %v452_v9  ;;  %v5554_v20 = vcombine.low %v436_v8, %v452_v9 }
  0x66   :  { %3668 = vmatpush1.bf16.msra.mxu0 %v5296_v14  ;;  %3750 = vmatpush1.bf16.msra.mxu1 %v5298_v15  ;;  %v467_v14 = vld [vmem:[%s8032_s1 + $0xe10] sm:$0xff] }
  0x67   :  { %3669 = vmatprep.subr.bf16.mxu0 %v5329_v17  ;;  %3751 = vmatprep.subr.bf16.mxu1 %v5331_v18  ;;  %v483_v15 = vld [vmem:[%s8032_s1 + $0xe90] sm:$0xff]  ;;  %v468_v17 = vld [vmem:[%s8032_s1 + $0xe18] sm:$0xff] }
  0x68   :  { %v484_v18 = vld [vmem:[%s8032_s1 + $0xe98] sm:$0xff]  ;;  %v5585_v21 = vcombine.high %v467_v14, %v483_v15  ;;  %v5584_v26 = vcombine.low %v467_v14, %v483_v15 }
  0x69   :  { %v5587_v22 = vcombine.high %v468_v17, %v484_v18  ;;  %v5586_v27 = vcombine.low %v468_v17, %v484_v18 }
  0x6a   :  { %3670 = vmatpush1.bf16.msra.mxu0 %v5328_v54  ;;  %3752 = vmatpush1.bf16.msra.mxu1 %v5330_v23  ;;  %v499_v54 = vld [vmem:[%s8032_s1 + $0xf10] sm:$0xff] }
  0x6b   :  { %3671 = vmatprep.subr.bf16.mxu0 %v5361_v24  ;;  %3753 = vmatprep.subr.bf16.mxu1 %v5363_v25  ;;  %v515_v23 = vld [vmem:[%s8032_s1 + $0xf90] sm:$0xff]  ;;  %v500_v24 = vld [vmem:[%s8032_s1 + $0xf18] sm:$0xff] }
  0x6c   :  { %v516_v25 = vld [vmem:[%s8032_s1 + $0xf98] sm:$0xff]  ;;  %v5617_v28 = vcombine.high %v499_v54, %v515_v23  ;;  %v5616_v35 = vcombine.low %v499_v54, %v515_v23 }
  0x6d   :  { %v5619_v29 = vcombine.high %v500_v24, %v516_v25  ;;  %v5618_v36 = vcombine.low %v500_v24, %v516_v25 }
  0x6e   :  { %3672 = vmatpush1.bf16.msra.mxu0 %v5360_v30  ;;  %3754 = vmatpush1.bf16.msra.mxu1 %v5362_v31  ;;  %v531_v30 = vld [vmem:[%s8032_s1 + $0x1010] sm:$0xff] }
  0x6f   :  { %3673 = vmatprep.subr.bf16.mxu0 %v5393_v33  ;;  %3755 = vmatprep.subr.bf16.mxu1 %v5395_v34  ;;  %v547_v31 = vld [vmem:[%s8032_s1 + $0x1090] sm:$0xff]  ;;  %v532_v33 = vld [vmem:[%s8032_s1 + $0x1018] sm:$0xff] }
  0x70   :  { %v548_v34 = vld [vmem:[%s8032_s1 + $0x1098] sm:$0xff]  ;;  %v5649_v37 = vcombine.high %v531_v30, %v547_v31  ;;  %v5648_v43 = vcombine.low %v531_v30, %v547_v31 }
  0x71   :  { %v5651_v38 = vcombine.high %v532_v33, %v548_v34  ;;  %v5650_v44 = vcombine.low %v532_v33, %v548_v34 }
  0x72   :  { %3674 = vmatpush1.bf16.msra.mxu0 %v5392_v39  ;;  %3756 = vmatpush1.bf16.msra.mxu1 %v5394_v40  ;;  %v563_v39 = vld [vmem:[%s8032_s1 + $0x1110] sm:$0xff] }
  0x73   :  { %3675 = vmatprep.subr.bf16.mxu0 %v5425_v41  ;;  %3757 = vmatprep.subr.bf16.mxu1 %v5427_v42  ;;  %v579_v40 = vld [vmem:[%s8032_s1 + $0x1190] sm:$0xff]  ;;  %v564_v41 = vld [vmem:[%s8032_s1 + $0x1118] sm:$0xff] }
  0x74   :  { %v580_v42 = vld [vmem:[%s8032_s1 + $0x1198] sm:$0xff]  ;;  %v5681_v45 = vcombine.high %v563_v39, %v579_v40  ;;  %v5680_v51 = vcombine.low %v563_v39, %v579_v40 }
  0x75   :  { %v5683_v46 = vcombine.high %v564_v41, %v580_v42  ;;  %v5682_v52 = vcombine.low %v564_v41, %v580_v42 }
  0x76   :  { %3676 = vmatpush1.bf16.msra.mxu0 %v5424_v47  ;;  %3758 = vmatpush1.bf16.msra.mxu1 %v5426_v48  ;;  %v21_v47 = vld [vmem:[%s8032_s1 + $0x20] sm:$0xff] }
  0x77   :  { %3677 = vmatprep.subr.bf16.mxu0 %v5457_v49  ;;  %3759 = vmatprep.subr.bf16.mxu1 %v5459_v50  ;;  %v37_v48 = vld [vmem:[%s8032_s1 + $0xa0] sm:$0xff]  ;;  %v22_v49 = vld [vmem:[%s8032_s1 + $0x28] sm:$0xff] }
  0x78   :  { %v38_v50 = vld [vmem:[%s8032_s1 + $0xa8] sm:$0xff]  ;;  %v5141_v53 = vcombine.high %v21_v47, %v37_v48  ;;  %v5140_v61 = vcombine.low %v21_v47, %v37_v48 }
  0x79   :  { %v5143_v55 = vcombine.high %v22_v49, %v38_v50  ;;  %v5142_v62 = vcombine.low %v22_v49, %v38_v50 }
  0x7a   :  { %3678 = vmatpush1.bf16.msra.mxu0 %v5456_v56  ;;  %3760 = vmatpush1.bf16.msra.mxu1 %v5458_v57  ;;  %v53_v56 = vld [vmem:[%s8032_s1 + $0x120] sm:$0xff] }
  0x7b   :  { %3679 = vmatprep.subr.bf16.mxu0 %v5489_v59  ;;  %3761 = vmatprep.subr.bf16.mxu1 %v5491_v60  ;;  %v69_v57 = vld [vmem:[%s8032_s1 + $0x1a0] sm:$0xff]  ;;  %v54_v59 = vld [vmem:[%s8032_s1 + $0x128] sm:$0xff] }
  0x7c   :  { %v70_v60 = vld [vmem:[%s8032_s1 + $0x1a8] sm:$0xff]  ;;  %v5173_v63 = vcombine.high %v53_v56, %v69_v57  ;;  %v5172_v6 = vcombine.low %v53_v56, %v69_v57 }
  0x7d   :  { %v5175_v0 = vcombine.high %v54_v59, %v70_v60  ;;  %v5174_v7 = vcombine.low %v54_v59, %v70_v60 }
  0x7e   :  { %3680 = vmatpush1.bf16.msra.mxu0 %v5488_v1  ;;  %3762 = vmatpush1.bf16.msra.mxu1 %v5490_v2  ;;  %v85_v1 = vld [vmem:[%s8032_s1 + $0x220] sm:$0xff] }
  0x7f   :  { %3681 = vmatprep.subr.bf16.mxu0 %v5521_v4  ;;  %3763 = vmatprep.subr.bf16.mxu1 %v5523_v5  ;;  %v101_v2 = vld [vmem:[%s8032_s1 + $0x2a0] sm:$0xff]  ;;  %v86_v4 = vld [vmem:[%s8032_s1 + $0x228] sm:$0xff] }
  0x80   :  { %v102_v5 = vld [vmem:[%s8032_s1 + $0x2a8] sm:$0xff]  ;;  %v5205_v8 = vcombine.high %v85_v1, %v101_v2  ;;  %v5204_v14 = vcombine.low %v85_v1, %v101_v2 }
  0x81   :  { %v5207_v9 = vcombine.high %v86_v4, %v102_v5  ;;  %v5206_v15 = vcombine.low %v86_v4, %v102_v5 }
  0x82   :  { %3682 = vmatpush1.bf16.msra.mxu0 %v5520_v10  ;;  %3764 = vmatpush1.bf16.msra.mxu1 %v5522_v11  ;;  %v117_v10 = vld [vmem:[%s8032_s1 + $0x320] sm:$0xff] }
  0x83   :  { %3683 = vmatprep.subr.bf16.mxu0 %v5553_v12  ;;  %3765 = vmatprep.subr.bf16.mxu1 %v5555_v13  ;;  %v133_v11 = vld [vmem:[%s8032_s1 + $0x3a0] sm:$0xff]  ;;  %v118_v12 = vld [vmem:[%s8032_s1 + $0x328] sm:$0xff] }
  0x84   :  { %v134_v13 = vld [vmem:[%s8032_s1 + $0x3a8] sm:$0xff]  ;;  %v5237_v17 = vcombine.high %v117_v10, %v133_v11  ;;  %v5236_v54 = vcombine.low %v117_v10, %v133_v11 }
  0x85   :  { %v5239_v18 = vcombine.high %v118_v12, %v134_v13  ;;  %v5238_v23 = vcombine.low %v118_v12, %v134_v13 }
  0x86   :  { %3684 = vmatpush1.bf16.msra.mxu0 %v5552_v19  ;;  %3766 = vmatpush1.bf16.msra.mxu1 %v5554_v20  ;;  %v149_v19 = vld [vmem:[%s8032_s1 + $0x420] sm:$0xff] }
  0x87   :  { %3685 = vmatprep.subr.bf16.mxu0 %v5585_v21  ;;  %3767 = vmatprep.subr.bf16.mxu1 %v5587_v22  ;;  %v165_v20 = vld [vmem:[%s8032_s1 + $0x4a0] sm:$0xff]  ;;  %v150_v21 = vld [vmem:[%s8032_s1 + $0x428] sm:$0xff] }
  0x88   :  { %v166_v22 = vld [vmem:[%s8032_s1 + $0x4a8] sm:$0xff]  ;;  %v5269_v24 = vcombine.high %v149_v19, %v165_v20  ;;  %v5268_v30 = vcombine.low %v149_v19, %v165_v20 }
  0x89   :  { %v5271_v25 = vcombine.high %v150_v21, %v166_v22  ;;  %v5270_v31 = vcombine.low %v150_v21, %v166_v22 }
  0x8a   :  { %3686 = vmatpush1.bf16.msra.mxu0 %v5584_v26  ;;  %3768 = vmatpush1.bf16.msra.mxu1 %v5586_v27  ;;  %v181_v26 = vld [vmem:[%s8032_s1 + $0x520] sm:$0xff] }
  0x8b   :  { %3687 = vmatprep.subr.bf16.mxu0 %v5617_v28  ;;  %3769 = vmatprep.subr.bf16.mxu1 %v5619_v29  ;;  %v197_v27 = vld [vmem:[%s8032_s1 + $0x5a0] sm:$0xff]  ;;  %v182_v28 = vld [vmem:[%s8032_s1 + $0x528] sm:$0xff] }
  0x8c   :  { %v198_v29 = vld [vmem:[%s8032_s1 + $0x5a8] sm:$0xff]  ;;  %v5301_v33 = vcombine.high %v181_v26, %v197_v27  ;;  %v5300_v39 = vcombine.low %v181_v26, %v197_v27 }
  0x8d   :  { %v5303_v34 = vcombine.high %v182_v28, %v198_v29  ;;  %v5302_v40 = vcombine.low %v182_v28, %v198_v29 }
  0x8e   :  { %3688 = vmatpush1.bf16.msra.mxu0 %v5616_v35  ;;  %3770 = vmatpush1.bf16.msra.mxu1 %v5618_v36  ;;  %v213_v35 = vld [vmem:[%s8032_s1 + $0x620] sm:$0xff] }
  0x8f   :  { %3698 = vmatprep.subr.bf16.mxu0 %v5649_v37  ;;  %3780 = vmatprep.subr.bf16.mxu1 %v5651_v38  ;;  %v229_v36 = vld [vmem:[%s8032_s1 + $0x6a0] sm:$0xff]  ;;  %v214_v37 = vld [vmem:[%s8032_s1 + $0x628] sm:$0xff] }
  0x90   :  { %v230_v38 = vld [vmem:[%s8032_s1 + $0x6a8] sm:$0xff]  ;;  %v5333_v41 = vcombine.high %v213_v35, %v229_v36  ;;  %v5332_v47 = vcombine.low %v213_v35, %v229_v36 }
  0x91   :  { %3690 = vmatmul.mubr.bf16.vlgmr.msra.gmra.mrb[4].mxu0 %v6204_v16  ;;  %3772 = vmatmul.mubr.bf16.vlgmr.msra.gmra.mrb[4].mxu1 %v6204_v16  ;;  %v5335_v42 = vcombine.high %v214_v37, %v230_v38  ;;  %v5334_v48 = vcombine.low %v214_v37, %v230_v38 }
  0x92   :  { %3699 = vmatpush1.bf16.msra.mxu0 %v5648_v43  ;;  %3781 = vmatpush1.bf16.msra.mxu1 %v5650_v44  ;;  %v245_v43 = vld [vmem:[%s8032_s1 + $0x720] sm:$0xff] }
  0x93   :  { %3700 = vmatprep.subr.bf16.mxu0 %v5681_v45  ;;  %3782 = vmatprep.subr.bf16.mxu1 %v5683_v46  ;;  %v261_v44 = vld [vmem:[%s8032_s1 + $0x7a0] sm:$0xff]  ;;  %v246_v45 = vld [vmem:[%s8032_s1 + $0x728] sm:$0xff] }
  0x94   :  { %3730 = vmatprep.mubr.bf16.mxu0 %v5956_v3  ;;  %3812 = vmatprep.mubr.bf16.mxu1 %v5956_v3  ;;  %v262_v46 = vld [vmem:[%s8032_s1 + $0x7a8] sm:$0xff]  ;;  %v5365_v49 = vcombine.high %v245_v43, %v261_v44  ;;  %v5364_v56 = vcombine.low %v245_v43, %v261_v44 }
  0x95   :  { %v5367_v50 = vcombine.high %v246_v45, %v262_v46  ;;  %v5366_v57 = vcombine.low %v246_v45, %v262_v46 }
  0x96   :  { %3701 = vmatpush1.bf16.msra.mxu0 %v5680_v51  ;;  %3783 = vmatpush1.bf16.msra.mxu1 %v5682_v52  ;;  %v277_v51 = vld [vmem:[%s8032_s1 + $0x820] sm:$0xff] }
  0x97   :  { %3821 = vmatprep.subr.bf16.mxu0 %v5141_v53  ;;  %3903 = vmatprep.subr.bf16.mxu1 %v5143_v55  ;;  %v293_v52 = vld [vmem:[%s8032_s1 + $0x8a0] sm:$0xff]  ;;  %v278_v53 = vld [vmem:[%s8032_s1 + $0x828] sm:$0xff] }
  0x98   :  { %v294_v55 = vld [vmem:[%s8032_s1 + $0x8a8] sm:$0xff]  ;;  %v5397_v59 = vcombine.high %v277_v51, %v293_v52  ;;  %v5396_v1 = vcombine.low %v277_v51, %v293_v52 }
  0x99   :  { %v5399_v60 = vcombine.high %v278_v53, %v294_v55  ;;  %v5398_v2 = vcombine.low %v278_v53, %v294_v55 }
  0x9d   :  { %5710 = vmatmul.mubr.msk.bf16.vlgmr.msra.gmra.mrb[4].mxu0 %vm3489_vm0, %v6237_v32  ;;  %5711 = vmatmul.mubr.msk.bf16.vlgmr.msra.gmra.mrb[4].mxu1 %vm3489_vm0, %v6237_v32 }
  0x9e   :  { %3822 = vmatpush1.bf16.msra.mxu0 %v5140_v61  ;;  %3904 = vmatpush1.bf16.msra.mxu1 %v5142_v62  ;;  %v309_v61 = vld [vmem:[%s8032_s1 + $0x920] sm:$0xff] }
  0x9f   :  { %3823 = vmatprep.subr.bf16.mxu0 %v5173_v63  ;;  %3905 = vmatprep.subr.bf16.mxu1 %v5175_v0  ;;  %v325_v62 = vld [vmem:[%s8032_s1 + $0x9a0] sm:$0xff]  ;;  %v310_v63 = vld [vmem:[%s8032_s1 + $0x928] sm:$0xff] }
  0xa0   :  { %3853 = vmatprep.mubr.bf16.mxu0 %v6075_v58  ;;  %3935 = vmatprep.mubr.bf16.mxu1 %v6075_v58  ;;  %v326_v0 = vld [vmem:[%s8032_s1 + $0x9a8] sm:$0xff]  ;;  %v5429_v4 = vcombine.high %v309_v61, %v325_v62  ;;  %v5428_v10 = vcombine.low %v309_v61, %v325_v62 }
  0xa1   :  { %v5431_v5 = vcombine.high %v310_v63, %v326_v0  ;;  %v5430_v11 = vcombine.low %v310_v63, %v326_v0 }
  0xa2   :  { %3824 = vmatpush1.bf16.msra.mxu0 %v5172_v6  ;;  %3906 = vmatpush1.bf16.msra.mxu1 %v5174_v7  ;;  %v341_v6 = vld [vmem:[%s8032_s1 + $0xa20] sm:$0xff] }
  0xa3   :  { %3825 = vmatprep.subr.bf16.mxu0 %v5205_v8  ;;  %3907 = vmatprep.subr.bf16.mxu1 %v5207_v9  ;;  %v357_v7 = vld [vmem:[%s8032_s1 + $0xaa0] sm:$0xff]  ;;  %v342_v8 = vld [vmem:[%s8032_s1 + $0xa28] sm:$0xff] }
  0xa4   :  { %v358_v9 = vld [vmem:[%s8032_s1 + $0xaa8] sm:$0xff]  ;;  %v5461_v12 = vcombine.high %v341_v6, %v357_v7  ;;  %v5460_v19 = vcombine.low %v341_v6, %v357_v7 }
  0xa5   :  { %v5463_v13 = vcombine.high %v342_v8, %v358_v9  ;;  %v5462_v20 = vcombine.low %v342_v8, %v358_v9 }
  0xa6   :  { %3826 = vmatpush1.bf16.msra.mxu0 %v5204_v14  ;;  %3908 = vmatpush1.bf16.msra.mxu1 %v5206_v15  ;;  %v373_v14 = vld [vmem:[%s8032_s1 + $0xb20] sm:$0xff] }
  0xa7   :  { %3827 = vmatprep.subr.bf16.mxu0 %v5237_v17  ;;  %3909 = vmatprep.subr.bf16.mxu1 %v5239_v18  ;;  %v389_v15 = vld [vmem:[%s8032_s1 + $0xba0] sm:$0xff]  ;;  %v374_v17 = vld [vmem:[%s8032_s1 + $0xb28] sm:$0xff] }
  0xa8   :  { %v390_v18 = vld [vmem:[%s8032_s1 + $0xba8] sm:$0xff]  ;;  %v5493_v21 = vcombine.high %v373_v14, %v389_v15  ;;  %v5492_v26 = vcombine.low %v373_v14, %v389_v15 }
  0xa9   :  { %v5495_v22 = vcombine.high %v374_v17, %v390_v18  ;;  %v5494_v27 = vcombine.low %v374_v17, %v390_v18 }
  0xaa   :  { %3828 = vmatpush1.bf16.msra.mxu0 %v5236_v54  ;;  %3910 = vmatpush1.bf16.msra.mxu1 %v5238_v23  ;;  %v405_v54 = vld [vmem:[%s8032_s1 + $0xc20] sm:$0xff] }
  0xab   :  { %3829 = vmatprep.subr.bf16.mxu0 %v5269_v24  ;;  %3911 = vmatprep.subr.bf16.mxu1 %v5271_v25  ;;  %v421_v23 = vld [vmem:[%s8032_s1 + $0xca0] sm:$0xff]  ;;  %v406_v24 = vld [vmem:[%s8032_s1 + $0xc28] sm:$0xff] }
  0xac   :  { %v422_v25 = vld [vmem:[%s8032_s1 + $0xca8] sm:$0xff]  ;;  %v5525_v28 = vcombine.high %v405_v54, %v421_v23  ;;  %v5524_v35 = vcombine.low %v405_v54, %v421_v23 }
  0xad   :  { %v5527_v29 = vcombine.high %v406_v24, %v422_v25  ;;  %v5526_v36 = vcombine.low %v406_v24, %v422_v25 }
  0xae   :  { %3830 = vmatpush1.bf16.msra.mxu0 %v5268_v30  ;;  %3912 = vmatpush1.bf16.msra.mxu1 %v5270_v31  ;;  %v437_v30 = vld [vmem:[%s8032_s1 + $0xd20] sm:$0xff] }
  0xaf   :  { %3831 = vmatprep.subr.bf16.mxu0 %v5301_v33  ;;  %3913 = vmatprep.subr.bf16.mxu1 %v5303_v34  ;;  %v453_v31 = vld [vmem:[%s8032_s1 + $0xda0] sm:$0xff]  ;;  %v438_v33 = vld [vmem:[%s8032_s1 + $0xd28] sm:$0xff] }
  0xb0   :  { %v454_v34 = vld [vmem:[%s8032_s1 + $0xda8] sm:$0xff]  ;;  %v5557_v37 = vcombine.high %v437_v30, %v453_v31  ;;  %v5556_v43 = vcombine.low %v437_v30, %v453_v31 }
  0xb1   :  { %v5559_v38 = vcombine.high %v438_v33, %v454_v34  ;;  %v5558_v44 = vcombine.low %v438_v33, %v454_v34 }
  0xb2   :  { %3832 = vmatpush1.bf16.msra.mxu0 %v5300_v39  ;;  %3914 = vmatpush1.bf16.msra.mxu1 %v5302_v40  ;;  %v469_v39 = vld [vmem:[%s8032_s1 + $0xe20] sm:$0xff] }
  0xb3   :  { %3833 = vmatprep.subr.bf16.mxu0 %v5333_v41  ;;  %3915 = vmatprep.subr.bf16.mxu1 %v5335_v42  ;;  %v485_v40 = vld [vmem:[%s8032_s1 + $0xea0] sm:$0xff]  ;;  %v470_v41 = vld [vmem:[%s8032_s1 + $0xe28] sm:$0xff] }
  0xb4   :  { %v486_v42 = vld [vmem:[%s8032_s1 + $0xea8] sm:$0xff]  ;;  %v5589_v45 = vcombine.high %v469_v39, %v485_v40  ;;  %v5588_v51 = vcombine.low %v469_v39, %v485_v40 }
  0xb5   :  { %v5591_v46 = vcombine.high %v470_v41, %v486_v42  ;;  %v5590_v52 = vcombine.low %v470_v41, %v486_v42  ;;  %v151_v42 = vld [vmem:[%s8032_s1 + $0x430] sm:$0xff] }
  0xb6   :  { %3834 = vmatpush1.bf16.msra.mxu0 %v5332_v47  ;;  %3916 = vmatpush1.bf16.msra.mxu1 %v5334_v48  ;;  %v501_v47 = vld [vmem:[%s8032_s1 + $0xf20] sm:$0xff] }
  0xb7   :  { %3835 = vmatprep.subr.bf16.mxu0 %v5365_v49  ;;  %3917 = vmatprep.subr.bf16.mxu1 %v5367_v50  ;;  %v517_v48 = vld [vmem:[%s8032_s1 + $0xfa0] sm:$0xff]  ;;  %v502_v49 = vld [vmem:[%s8032_s1 + $0xf28] sm:$0xff] }
  0xb8   :  { %v518_v50 = vld [vmem:[%s8032_s1 + $0xfa8] sm:$0xff]  ;;  %v5621_v53 = vcombine.high %v501_v47, %v517_v48  ;;  %v5620_v61 = vcombine.low %v501_v47, %v517_v48 }
  0xb9   :  { %v5623_v55 = vcombine.high %v502_v49, %v518_v50  ;;  %v5622_v62 = vcombine.low %v502_v49, %v518_v50  ;;  %v183_v50 = vld [vmem:[%s8032_s1 + $0x530] sm:$0xff] }
  0xba   :  { %3836 = vmatpush1.bf16.msra.mxu0 %v5364_v56  ;;  %3918 = vmatpush1.bf16.msra.mxu1 %v5366_v57  ;;  %v533_v56 = vld [vmem:[%s8032_s1 + $0x1020] sm:$0xff] }
  0xbb   :  { %3837 = vmatprep.subr.bf16.mxu0 %v5397_v59  ;;  %3919 = vmatprep.subr.bf16.mxu1 %v5399_v60  ;;  %v549_v57 = vld [vmem:[%s8032_s1 + $0x10a0] sm:$0xff]  ;;  %v534_v59 = vld [vmem:[%s8032_s1 + $0x1028] sm:$0xff] }
  0xbc   :  { %v550_v60 = vld [vmem:[%s8032_s1 + $0x10a8] sm:$0xff]  ;;  %v5653_v63 = vcombine.high %v533_v56, %v549_v57  ;;  %v5652_v6 = vcombine.low %v533_v56, %v549_v57 }
  0xbd   :  { %v5655_v0 = vcombine.high %v534_v59, %v550_v60  ;;  %v5654_v7 = vcombine.low %v534_v59, %v550_v60  ;;  %v215_v60 = vld [vmem:[%s8032_s1 + $0x630] sm:$0xff] }
  0xbe   :  { %3838 = vmatpush1.bf16.msra.mxu0 %v5396_v1  ;;  %3920 = vmatpush1.bf16.msra.mxu1 %v5398_v2  ;;  %v565_v1 = vld [vmem:[%s8032_s1 + $0x1120] sm:$0xff] }
  0xbf   :  { %3839 = vmatprep.subr.bf16.mxu0 %v5429_v4  ;;  %3921 = vmatprep.subr.bf16.mxu1 %v5431_v5  ;;  %v581_v2 = vld [vmem:[%s8032_s1 + $0x11a0] sm:$0xff]  ;;  %v566_v4 = vld [vmem:[%s8032_s1 + $0x1128] sm:$0xff] }
  0xc0   :  { %v582_v5 = vld [vmem:[%s8032_s1 + $0x11a8] sm:$0xff]  ;;  %v5685_v8 = vcombine.high %v565_v1, %v581_v2  ;;  %v5684_v14 = vcombine.low %v565_v1, %v581_v2 }
  0xc1   :  { %v5687_v9 = vcombine.high %v566_v4, %v582_v5  ;;  %v5686_v15 = vcombine.low %v566_v4, %v582_v5  ;;  %v247_v5 = vld [vmem:[%s8032_s1 + $0x730] sm:$0xff] }
  0xc2   :  { %3840 = vmatpush1.bf16.msra.mxu0 %v5428_v10  ;;  %3922 = vmatpush1.bf16.msra.mxu1 %v5430_v11  ;;  %v23_v10 = vld [vmem:[%s8032_s1 + $0x30] sm:$0xff] }
  0xc3   :  { %3841 = vmatprep.subr.bf16.mxu0 %v5461_v12  ;;  %3923 = vmatprep.subr.bf16.mxu1 %v5463_v13  ;;  %v39_v11 = vld [vmem:[%s8032_s1 + $0xb0] sm:$0xff]  ;;  %v24_v12 = vld [vmem:[%s8032_s1 + $0x38] sm:$0xff] }
  0xc4   :  { %v40_v13 = vld [vmem:[%s8032_s1 + $0xb8] sm:$0xff]  ;;  %v5145_v17 = vcombine.high %v23_v10, %v39_v11  ;;  %v5144_v54 = vcombine.low %v23_v10, %v39_v11 }
  0xc5   :  { %v5147_v18 = vcombine.high %v24_v12, %v40_v13  ;;  %v5146_v23 = vcombine.low %v24_v12, %v40_v13  ;;  %v279_v13 = vld [vmem:[%s8032_s1 + $0x830] sm:$0xff] }
  0xc6   :  { %3842 = vmatpush1.bf16.msra.mxu0 %v5460_v19  ;;  %3924 = vmatpush1.bf16.msra.mxu1 %v5462_v20  ;;  %v55_v19 = vld [vmem:[%s8032_s1 + $0x130] sm:$0xff] }
  0xc7   :  { %3843 = vmatprep.subr.bf16.mxu0 %v5493_v21  ;;  %3925 = vmatprep.subr.bf16.mxu1 %v5495_v22  ;;  %v71_v20 = vld [vmem:[%s8032_s1 + $0x1b0] sm:$0xff]  ;;  %v56_v21 = vld [vmem:[%s8032_s1 + $0x138] sm:$0xff] }
  0xc8   :  { %v72_v22 = vld [vmem:[%s8032_s1 + $0x1b8] sm:$0xff]  ;;  %v5177_v24 = vcombine.high %v55_v19, %v71_v20  ;;  %v5176_v30 = vcombine.low %v55_v19, %v71_v20 }
  0xc9   :  { %v5179_v25 = vcombine.high %v56_v21, %v72_v22  ;;  %v5178_v31 = vcombine.low %v56_v21, %v72_v22  ;;  %v311_v22 = vld [vmem:[%s8032_s1 + $0x930] sm:$0xff] }
  0xca   :  { %3844 = vmatpush1.bf16.msra.mxu0 %v5492_v26  ;;  %3926 = vmatpush1.bf16.msra.mxu1 %v5494_v27  ;;  %v87_v26 = vld [vmem:[%s8032_s1 + $0x230] sm:$0xff] }
  0xcb   :  { %3845 = vmatprep.subr.bf16.mxu0 %v5525_v28  ;;  %3927 = vmatprep.subr.bf16.mxu1 %v5527_v29  ;;  %v103_v27 = vld [vmem:[%s8032_s1 + $0x2b0] sm:$0xff]  ;;  %v88_v28 = vld [vmem:[%s8032_s1 + $0x238] sm:$0xff] }
  0xcc   :  { %v104_v29 = vld [vmem:[%s8032_s1 + $0x2b8] sm:$0xff]  ;;  %v5209_v33 = vcombine.high %v87_v26, %v103_v27 }
  0xcd   :  { %v5211_v34 = vcombine.high %v88_v28, %v104_v29  ;;  %v5210_v39 = vcombine.low %v88_v28, %v104_v29  ;;  %v343_v29 = vld [vmem:[%s8032_s1 + $0xa30] sm:$0xff] }
  0xce   :  { %3846 = vmatpush1.bf16.msra.mxu0 %v5524_v35  ;;  %3928 = vmatpush1.bf16.msra.mxu1 %v5526_v36  ;;  %v119_v35 = vld [vmem:[%s8032_s1 + $0x330] sm:$0xff] }
  0xcf   :  { %3847 = vmatprep.subr.bf16.mxu0 %v5557_v37  ;;  %3929 = vmatprep.subr.bf16.mxu1 %v5559_v38  ;;  %v135_v36 = vld [vmem:[%s8032_s1 + $0x3b0] sm:$0xff]  ;;  %v136_v37 = vld [vmem:[%s8032_s1 + $0x3b8] sm:$0xff]  ;;  %v5208_v38 = vcombine.low %v87_v26, %v103_v27 }
  0xd0   :  { %v5241_v40 = vcombine.high %v119_v35, %v135_v36 }
  0xd2   :  { %3848 = vmatpush1.bf16.msra.mxu0 %v5556_v43  ;;  %3930 = vmatpush1.bf16.msra.mxu1 %v5558_v44  ;;  %v167_v43 = vld [vmem:[%s8032_s1 + $0x4b0] sm:$0xff]  ;;  %v152_v44 = vld [vmem:[%s8032_s1 + $0x438] sm:$0xff] }
  0xd3   :  { %3849 = vmatprep.subr.bf16.mxu0 %v5589_v45  ;;  %3931 = vmatprep.subr.bf16.mxu1 %v5591_v46  ;;  %v168_v45 = vld [vmem:[%s8032_s1 + $0x4b8] sm:$0xff]  ;;  %v5240_v46 = vcombine.low %v119_v35, %v135_v36  ;;  %v5273_v48 = vcombine.high %v151_v42, %v167_v43 }
  0xd4   :  { %v5275_v49 = vcombine.high %v152_v44, %v168_v45  ;;  %v5274_v56 = vcombine.low %v152_v44, %v168_v45  ;;  %v407_v45 = vld [vmem:[%s8032_s1 + $0xc30] sm:$0xff] }
  0xd6   :  { %3850 = vmatpush1.bf16.msra.mxu0 %v5588_v51  ;;  %3932 = vmatpush1.bf16.msra.mxu1 %v5590_v52  ;;  %v199_v51 = vld [vmem:[%s8032_s1 + $0x5b0] sm:$0xff]  ;;  %v184_v52 = vld [vmem:[%s8032_s1 + $0x538] sm:$0xff] }
  0xd7   :  { %3851 = vmatprep.subr.bf16.mxu0 %v5621_v53  ;;  %3933 = vmatprep.subr.bf16.mxu1 %v5623_v55  ;;  %v200_v53 = vld [vmem:[%s8032_s1 + $0x5b8] sm:$0xff]  ;;  %v5272_v55 = vcombine.low %v151_v42, %v167_v43  ;;  %v5305_v57 = vcombine.high %v183_v50, %v199_v51 }
  0xd8   :  { %v5307_v59 = vcombine.high %v184_v52, %v200_v53  ;;  %v5306_v1 = vcombine.low %v184_v52, %v200_v53  ;;  %v439_v53 = vld [vmem:[%s8032_s1 + $0xd30] sm:$0xff] }
  0xda   :  { %3852 = vmatpush1.bf16.msra.mxu0 %v5620_v61  ;;  %3934 = vmatpush1.bf16.msra.mxu1 %v5622_v62  ;;  %v231_v61 = vld [vmem:[%s8032_s1 + $0x6b0] sm:$0xff]  ;;  %v216_v62 = vld [vmem:[%s8032_s1 + $0x638] sm:$0xff] }
  0xdb   :  { %3862 = vmatprep.subr.bf16.mxu0 %v5653_v63  ;;  %3944 = vmatprep.subr.bf16.mxu1 %v5655_v0  ;;  %v232_v63 = vld [vmem:[%s8032_s1 + $0x6b8] sm:$0xff]  ;;  %v5304_v0 = vcombine.low %v183_v50, %v199_v51  ;;  %v5337_v2 = vcombine.high %v215_v60, %v231_v61 }
  0xdc   :  { %v5339_v4 = vcombine.high %v216_v62, %v232_v63  ;;  %v5338_v10 = vcombine.low %v216_v62, %v232_v63  ;;  %v471_v63 = vld [vmem:[%s8032_s1 + $0xe30] sm:$0xff] }
  0xdd   :  { %3854 = vmatmul.mubr.bf16.vlgmr.msra.gmra.mrb[8].mxu0 %v6204_v16  ;;  %3936 = vmatmul.mubr.bf16.vlgmr.msra.gmra.mrb[8].mxu1 %v6204_v16 }
  0xde   :  { %3863 = vmatpush1.bf16.msra.mxu0 %v5652_v6  ;;  %3945 = vmatpush1.bf16.msra.mxu1 %v5654_v7  ;;  %v263_v6 = vld [vmem:[%s8032_s1 + $0x7b0] sm:$0xff]  ;;  %v248_v7 = vld [vmem:[%s8032_s1 + $0x738] sm:$0xff] }
  0xdf   :  { %3864 = vmatprep.subr.bf16.mxu0 %v5685_v8  ;;  %3946 = vmatprep.subr.bf16.mxu1 %v5687_v9  ;;  %v264_v8 = vld [vmem:[%s8032_s1 + $0x7b8] sm:$0xff]  ;;  %v5336_v9 = vcombine.low %v215_v60, %v231_v61  ;;  %v5369_v11 = vcombine.high %v247_v5, %v263_v6 }
  0xe0   :  { %3894 = vmatprep.mubr.bf16.mxu0 %v5956_v3  ;;  %3976 = vmatprep.mubr.bf16.mxu1 %v5956_v3  ;;  %v5371_v12 = vcombine.high %v248_v7, %v264_v8  ;;  %v5370_v19 = vcombine.low %v248_v7, %v264_v8  ;;  %v503_v8 = vld [vmem:[%s8032_s1 + $0xf30] sm:$0xff] }
  0xe2   :  { %3865 = vmatpush1.bf16.msra.mxu0 %v5684_v14  ;;  %3947 = vmatpush1.bf16.msra.mxu1 %v5686_v15  ;;  %v295_v14 = vld [vmem:[%s8032_s1 + $0x8b0] sm:$0xff]  ;;  %v280_v15 = vld [vmem:[%s8032_s1 + $0x838] sm:$0xff] }
  0xe3   :  { %3985 = vmatprep.subr.bf16.mxu0 %v5145_v17  ;;  %4067 = vmatprep.subr.bf16.mxu1 %v5147_v18  ;;  %v296_v17 = vld [vmem:[%s8032_s1 + $0x8b8] sm:$0xff]  ;;  %v5368_v18 = vcombine.low %v247_v5, %v263_v6  ;;  %v5401_v20 = vcombine.high %v279_v13, %v295_v14 }
  0xe4   :  { %v5403_v21 = vcombine.high %v280_v15, %v296_v17  ;;  %v5402_v26 = vcombine.low %v280_v15, %v296_v17  ;;  %v535_v17 = vld [vmem:[%s8032_s1 + $0x1030] sm:$0xff] }
  0xe9   :  { %5712 = vmatmul.mubr.msk.bf16.vlgmr.msra.gmra.mrb[8].mxu0 %vm3489_vm0, %v6237_v32  ;;  %5713 = vmatmul.mubr.msk.bf16.vlgmr.msra.gmra.mrb[8].mxu1 %vm3489_vm0, %v6237_v32  ;;  %v120_v32 = vld [vmem:[%s8032_s1 + $0x338] sm:$0xff] }
  0xea   :  { %3986 = vmatpush1.bf16.msra.mxu0 %v5144_v54  ;;  %4068 = vmatpush1.bf16.msra.mxu1 %v5146_v23  ;;  %v5243_v41 = vcombine.high %v120_v32, %v136_v37  ;;  %v5242_v47 = vcombine.low %v120_v32, %v136_v37  ;;  %v327_v54 = vld [vmem:[%s8032_s1 + $0x9b0] sm:$0xff]  ;;  %v312_v23 = vld [vmem:[%s8032_s1 + $0x938] sm:$0xff] }
  0xeb   :  { %3987 = vmatprep.subr.bf16.mxu0 %v5177_v24  ;;  %4069 = vmatprep.subr.bf16.mxu1 %v5179_v25  ;;  %v328_v24 = vld [vmem:[%s8032_s1 + $0x9b8] sm:$0xff]  ;;  %v5400_v25 = vcombine.low %v279_v13, %v295_v14  ;;  %v5433_v27 = vcombine.high %v311_v22, %v327_v54  ;;  %v375_v37 = vld [vmem:[%s8032_s1 + $0xb30] sm:$0xff] }
  0xec   :  { %4017 = vmatprep.mubr.bf16.mxu0 %v6075_v58  ;;  %4099 = vmatprep.mubr.bf16.mxu1 %v6075_v58  ;;  %v5435_v28 = vcombine.high %v312_v23, %v328_v24  ;;  %v5434_v35 = vcombine.low %v312_v23, %v328_v24 }
  0xee   :  { %3988 = vmatpush1.bf16.msra.mxu0 %v5176_v30  ;;  %4070 = vmatpush1.bf16.msra.mxu1 %v5178_v31  ;;  %v359_v30 = vld [vmem:[%s8032_s1 + $0xab0] sm:$0xff]  ;;  %v344_v31 = vld [vmem:[%s8032_s1 + $0xa38] sm:$0xff] }
  0xef   :  { %3989 = vmatprep.subr.bf16.mxu0 %v5209_v33  ;;  %4071 = vmatprep.subr.bf16.mxu1 %v5211_v34  ;;  %v360_v33 = vld [vmem:[%s8032_s1 + $0xab8] sm:$0xff]  ;;  %v5432_v34 = vcombine.low %v311_v22, %v327_v54  ;;  %v5465_v36 = vcombine.high %v343_v29, %v359_v30  ;;  %v6883_v22 = vpop.permute.xlu0 %596 }
  0xf0   :  { %v5467_v32 = vcombine.high %v344_v31, %v360_v33  ;;  %v5466_v42 = vcombine.low %v344_v31, %v360_v33  ;;  %v568_v31 = vld [vmem:[%s8032_s1 + $0x1138] sm:$0xff] }
  0xf1   :  { %v584_v33 = vld [vmem:[%s8032_s1 + $0x11b8] sm:$0xff] }
  0xf2   :  { %3990 = vmatpush1.bf16.msra.mxu0 %v5208_v38  ;;  %4072 = vmatpush1.bf16.msra.mxu1 %v5210_v39  ;;  %v391_v38 = vld [vmem:[%s8032_s1 + $0xbb0] sm:$0xff]  ;;  %v376_v39 = vld [vmem:[%s8032_s1 + $0xb38] sm:$0xff] }
  0xf3   :  { %3991 = vmatprep.subr.bf16.mxu0 %v5241_v40  ;;  %4073 = vmatprep.subr.bf16.mxu1 %v5243_v41  ;;  %v392_v40 = vld [vmem:[%s8032_s1 + $0xbb8] sm:$0xff]  ;;  %v5464_v41 = vcombine.low %v343_v29, %v359_v30  ;;  %v5497_v43 = vcombine.high %v375_v37, %v391_v38 }
  0xf4   :  { %v5499_v44 = vcombine.high %v376_v39, %v392_v40  ;;  %v5498_v50 = vcombine.low %v376_v39, %v392_v40 }
  0xf6   :  { %3992 = vmatpush1.bf16.msra.mxu0 %v5240_v46  ;;  %4074 = vmatpush1.bf16.msra.mxu1 %v5242_v47  ;;  %v423_v46 = vld [vmem:[%s8032_s1 + $0xcb0] sm:$0xff]  ;;  %v408_v47 = vld [vmem:[%s8032_s1 + $0xc38] sm:$0xff] }
  0xf7   :  { %3993 = vmatprep.subr.bf16.mxu0 %v5273_v48  ;;  %4075 = vmatprep.subr.bf16.mxu1 %v5275_v49  ;;  %v424_v48 = vld [vmem:[%s8032_s1 + $0xcb8] sm:$0xff]  ;;  %v5496_v49 = vcombine.low %v375_v37, %v391_v38  ;;  %v5529_v51 = vcombine.high %v407_v45, %v423_v46 }
  0xf8   :  { %v5531_v52 = vcombine.high %v408_v47, %v424_v48  ;;  %v5530_v60 = vcombine.low %v408_v47, %v424_v48  ;;  %v25_v47 = vld [vmem:[%s8032_s1 + $0x40] sm:$0xff] }
  0xf9   :  { %v41_v48 = vld [vmem:[%s8032_s1 + $0xc0] sm:$0xff] }
  0xfa   :  { %3994 = vmatpush1.bf16.msra.mxu0 %v5272_v55  ;;  %4076 = vmatpush1.bf16.msra.mxu1 %v5274_v56  ;;  %v455_v55 = vld [vmem:[%s8032_s1 + $0xdb0] sm:$0xff]  ;;  %v440_v56 = vld [vmem:[%s8032_s1 + $0xd38] sm:$0xff] }
  0xfb   :  { %3995 = vmatprep.subr.bf16.mxu0 %v5305_v57  ;;  %4077 = vmatprep.subr.bf16.mxu1 %v5307_v59  ;;  %v456_v57 = vld [vmem:[%s8032_s1 + $0xdb8] sm:$0xff]  ;;  %v5528_v59 = vcombine.low %v407_v45, %v423_v46  ;;  %v5561_v61 = vcombine.high %v439_v53, %v455_v55  ;;  %v5691_v46 = vcombine.high %v568_v31, %v584_v33 }
  0xfc   :  { %v5563_v62 = vcombine.high %v440_v56, %v456_v57  ;;  %v5562_v5 = vcombine.low %v440_v56, %v456_v57 }
  0xfe   :  { %3996 = vmatpush1.bf16.msra.mxu0 %v5304_v0  ;;  %4078 = vmatpush1.bf16.msra.mxu1 %v5306_v1  ;;  %v487_v0 = vld [vmem:[%s8032_s1 + $0xeb0] sm:$0xff]  ;;  %v472_v1 = vld [vmem:[%s8032_s1 + $0xe38] sm:$0xff] }
  0xff   :  { %3997 = vmatprep.subr.bf16.mxu0 %v5337_v2  ;;  %4079 = vmatprep.subr.bf16.mxu1 %v5339_v4  ;;  %v488_v2 = vld [vmem:[%s8032_s1 + $0xeb8] sm:$0xff]  ;;  %v5560_v4 = vcombine.low %v439_v53, %v455_v55  ;;  %v5593_v6 = vcombine.high %v471_v63, %v487_v0  ;;  %v42_v53 = vld [vmem:[%s8032_s1 + $0xc8] sm:$0xff] }
 0x100   :  { %v5595_v7 = vcombine.high %v472_v1, %v488_v2  ;;  %v5594_v13 = vcombine.low %v472_v1, %v488_v2 }
 0x102   :  { %3998 = vmatpush1.bf16.msra.mxu0 %v5336_v9  ;;  %4080 = vmatpush1.bf16.msra.mxu1 %v5338_v10  ;;  %v519_v9 = vld [vmem:[%s8032_s1 + $0xfb0] sm:$0xff]  ;;  %v504_v10 = vld [vmem:[%s8032_s1 + $0xf38] sm:$0xff] }
 0x103   :  { %3999 = vmatprep.subr.bf16.mxu0 %v5369_v11  ;;  %4081 = vmatprep.subr.bf16.mxu1 %v5371_v12  ;;  %v520_v11 = vld [vmem:[%s8032_s1 + $0xfb8] sm:$0xff]  ;;  %v5592_v12 = vcombine.low %v471_v63, %v487_v0  ;;  %v5625_v14 = vcombine.high %v503_v8, %v519_v9 }
 0x104   :  { %v5627_v15 = vcombine.high %v504_v10, %v520_v11  ;;  %v5626_v54 = vcombine.low %v504_v10, %v520_v11 }
 0x106   :  { %4000 = vmatpush1.bf16.msra.mxu0 %v5368_v18  ;;  %4082 = vmatpush1.bf16.msra.mxu1 %v5370_v19  ;;  %v551_v18 = vld [vmem:[%s8032_s1 + $0x10b0] sm:$0xff]  ;;  %v536_v19 = vld [vmem:[%s8032_s1 + $0x1038] sm:$0xff] }
 0x107   :  { %4001 = vmatprep.subr.bf16.mxu0 %v5401_v20  ;;  %4083 = vmatprep.subr.bf16.mxu1 %v5403_v21  ;;  %v552_v20 = vld [vmem:[%s8032_s1 + $0x10b8] sm:$0xff]  ;;  %v5624_v21 = vcombine.low %v503_v8, %v519_v9  ;;  %v5657_v23 = vcombine.high %v535_v17, %v551_v18  ;;  %v5656_v37 = vcombine.low %v535_v17, %v551_v18  ;;  %v106_v17 = vld [vmem:[%s8032_s1 + $0x2c8] sm:$0xff] }
 0x108   :  { %v5148_v8 = vcombine.low %v25_v47, %v41_v48 }
 0x10a   :  { %4002 = vmatpush1.bf16.msra.mxu0 %v5400_v25  ;;  %4084 = vmatpush1.bf16.msra.mxu1 %v5402_v26  ;;  %v5659_v25 = vcombine.high %v536_v19, %v552_v20  ;;  %v567_v26 = vld [vmem:[%s8032_s1 + $0x1130] sm:$0xff] }
 0x10b   :  { %4003 = vmatprep.subr.bf16.mxu0 %v5433_v27  ;;  %4085 = vmatprep.subr.bf16.mxu1 %v5435_v28  ;;  %v583_v27 = vld [vmem:[%s8032_s1 + $0x11b0] sm:$0xff] }
 0x10c   :  { %v5688_v57 = vcombine.low %v567_v26, %v583_v27 }
 0x10e   :  { %4004 = vmatpush1.bf16.msra.mxu0 %v5432_v34  ;;  %4086 = vmatpush1.bf16.msra.mxu1 %v5434_v35 }
 0x10f   :  { %4005 = vmatprep.subr.bf16.mxu0 %v5465_v36  ;;  %4087 = vmatprep.subr.bf16.mxu1 %v5467_v32 }
 0x112   :  { %4006 = vmatpush1.bf16.msra.mxu0 %v5464_v41  ;;  %4088 = vmatpush1.bf16.msra.mxu1 %v5466_v42  ;;  %v5658_v41 = vcombine.low %v536_v19, %v552_v20 }
 0x113   :  { %4007 = vmatprep.subr.bf16.mxu0 %v5497_v43  ;;  %4089 = vmatprep.subr.bf16.mxu1 %v5499_v44  ;;  %v5689_v43 = vcombine.high %v567_v26, %v583_v27  ;;  %v137_v26 = vld [vmem:[%s8032_s1 + $0x3c0] sm:$0xff] }
 0x116   :  { %4008 = vmatpush1.bf16.msra.mxu0 %v5496_v49  ;;  %4090 = vmatpush1.bf16.msra.mxu1 %v5498_v50 }
 0x117   :  { %4009 = vmatprep.subr.bf16.mxu0 %v5529_v51  ;;  %4091 = vmatprep.subr.bf16.mxu1 %v5531_v52  ;;  %v26_v52 = vld [vmem:[%s8032_s1 + $0x48] sm:$0xff] }
 0x118   :  { %v5151_v1 = vcombine.high %v26_v52, %v42_v53  ;;  %v5150_v9 = vcombine.low %v26_v52, %v42_v53  ;;  %v186_v52 = vld [vmem:[%s8032_s1 + $0x548] sm:$0xff] }
 0x119   :  { %v202_v53 = vld [vmem:[%s8032_s1 + $0x5c8] sm:$0xff] }
 0x11a   :  { %4010 = vmatpush1.bf16.msra.mxu0 %v5528_v59  ;;  %4092 = vmatpush1.bf16.msra.mxu1 %v5530_v60 }
 0x11b   :  { %4011 = vmatprep.subr.bf16.mxu0 %v5561_v61  ;;  %4093 = vmatprep.subr.bf16.mxu1 %v5563_v62  ;;  %v5690_v61 = vcombine.low %v568_v31, %v584_v33  ;;  %v5149_v62 = vcombine.high %v25_v47, %v41_v48  ;;  %v138_v31 = vld [vmem:[%s8032_s1 + $0x3c8] sm:$0xff] }
 0x11e   :  { %4012 = vmatpush1.bf16.msra.mxu0 %v5560_v4  ;;  %4094 = vmatpush1.bf16.msra.mxu1 %v5562_v5  ;;  %v57_v4 = vld [vmem:[%s8032_s1 + $0x140] sm:$0xff] }
 0x11f   :  { %4013 = vmatprep.subr.bf16.mxu0 %v5593_v6  ;;  %4095 = vmatprep.subr.bf16.mxu1 %v5595_v7  ;;  %v73_v5 = vld [vmem:[%s8032_s1 + $0x1c0] sm:$0xff]  ;;  %v58_v6 = vld [vmem:[%s8032_s1 + $0x148] sm:$0xff] }
 0x120   :  { %v74_v7 = vld [vmem:[%s8032_s1 + $0x1c8] sm:$0xff]  ;;  %v5181_v10 = vcombine.high %v57_v4, %v73_v5  ;;  %v5180_v18 = vcombine.low %v57_v4, %v73_v5 }
 0x121   :  { %v5183_v11 = vcombine.high %v58_v6, %v74_v7  ;;  %v5182_v20 = vcombine.low %v58_v6, %v74_v7  ;;  %v5310_v7 = vcombine.low %v186_v52, %v202_v53 }
 0x122   :  { %4014 = vmatpush1.bf16.msra.mxu0 %v5592_v12  ;;  %4096 = vmatpush1.bf16.msra.mxu1 %v5594_v13  ;;  %v89_v12 = vld [vmem:[%s8032_s1 + $0x240] sm:$0xff] }
 0x123   :  { %4015 = vmatprep.subr.bf16.mxu0 %v5625_v14  ;;  %4097 = vmatprep.subr.bf16.mxu1 %v5627_v15  ;;  %v105_v13 = vld [vmem:[%s8032_s1 + $0x2c0] sm:$0xff]  ;;  %v6950_v14 = vld [vmem:[%s8033_s0 + $0x8] ss:$0 sps:$4 sm:$0xff]  }
 0x124   :  { %v3568_v24 = vpop.f32.mrb[0].mxu0  ;;  %v3650_v29 = vpop.f32.mrb[0].mxu1  ;;  %v90_v15 = vld [vmem:[%s8032_s1 + $0x248] sm:$0xff] }
 0x125   :  { %v6892_v28 = vadd.f32 %v3568_v24, %v6883_v22  ;;  %v3570_v30 = vpop.f32.mrb[1].mxu0  ;;  %v6901_v34 = vadd.f32 %v3650_v29, %v6883_v22  ;;  %v3652_v36 = vpop.f32.mrb[1].mxu1  ;;  %v5215_v24 = vcombine.high %v90_v15, %v106_v17 }
 0x126   :  { %4016 = vmatpush1.bf16.msra.mxu0 %v5624_v21  ;;  %v6904_v35 = vadd.f32 %v3570_v30, %v6883_v22  ;;  %v3572_v32 = vpop.f32.mrb[2].mxu0  ;;  %4098 = vmatpush1.bf16.msra.mxu1 %v5626_v54  ;;  %v6908_v39 = vadd.f32 %v3652_v36, %v6883_v22  ;;  %v3654_v40 = vpop.f32.mrb[2].mxu1  ;;  %v5213_v21 = vcombine.high %v89_v12, %v105_v13  ;;  %v122_v30 = vld [vmem:[%s8032_s1 + $0x348] sm:$0xff] }
 0x127   :  { %v4805_v38 = vand.u32 2147483647, %v6892_v28  ;;  %4026 = vmatprep.subr.bf16.mxu0 %v5657_v23  ;;  %v3573_v42 = vpop.f32.mrb[3].mxu0  ;;  %v4807_v44 = vand.u32 2147483647, %v6901_v34  ;;  %4108 = vmatprep.subr.bf16.mxu1 %v5659_v25  ;;  %v3655_v51 = vpop.f32.mrb[3].mxu1  ;;  %v5212_v32 = vcombine.low %v89_v12, %v105_v13  ;;  %v5246_v47 = vcombine.low %v122_v30, %v138_v31 }
 0x128   :  { %v4806_v45 = vand.u32 2147483647, %v6904_v35  ;;  %v4808_v50 = vand.u32 2147483647, %v6908_v39  ;;  %v121_v25 = vld [vmem:[%s8032_s1 + $0x340] sm:$0xff]  ;;  %vm4997_vm1 = vcmp.ge.f32.partialorder %v6892_v28, 0.0 }
 0x129   :  { %v4837_v49 = vsub.f32 0.0, %v4805_v38  ;;  %4018 = vmatmul.mubr.bf16.vlgmr.msra.gmra.mrb[12].mxu0 %v6204_v16  ;;  %v4839_v55 = vsub.f32 0.0, %v4807_v44  ;;  %4100 = vmatmul.mubr.bf16.vlgmr.msra.gmra.mrb[12].mxu1 %v6204_v16  ;;  %v5214_v38 = vcombine.low %v90_v15, %v106_v17  ;;  %v5245_v40 = vcombine.high %v121_v25, %v137_v26  ;;  %v153_v42 = vld [vmem:[%s8032_s1 + $0x440] sm:$0xff]  ;;  %v154_v44 = vld [vmem:[%s8032_s1 + $0x448] sm:$0xff] }
 0x12a   :  { %v4838_v56 = vsub.f32 0.0, %v4806_v45  ;;  %4027 = vmatpush1.bf16.msra.mxu0 %v5656_v37  ;;  %v4840_v60 = vsub.f32 0.0, %v4808_v50  ;;  %4109 = vmatpush1.bf16.msra.mxu1 %v5658_v41  ;;  %v5247_v41 = vcombine.high %v122_v30, %v138_v31  ;;  %v170_v45 = vld [vmem:[%s8032_s1 + $0x4c8] sm:$0xff]  ;;  %v185_v50 = vld [vmem:[%s8032_s1 + $0x540] sm:$0xff]  ;;  %vm4999_vm2 = vcmp.ge.f32.partialorder %v6901_v34, 0.0 }
 0x12b   :  { %v4869_v59 = vmul.f32 1.442695, %v4837_v49  ;;  %4028 = vmatprep.subr.bf16.mxu0 %v5689_v43  ;;  %v4873_v63 = vmul.f32 1.442695, %v4839_v55  ;;  %4110 = vmatprep.subr.bf16.mxu1 %v5691_v46  ;;  %v169_v43 = vld [vmem:[%s8032_s1 + $0x4c0] sm:$0xff]  ;;  %v5244_v46 = vcombine.low %v121_v25, %v137_v26  ;;  %v5279_v49 = vcombine.high %v154_v44, %v170_v45  ;;  %v282_v25 = vld [vmem:[%s8032_s1 + $0x848] sm:$0xff] }
 0x12c   :  { %v4871_v0 = vmul.f32 1.442695, %v4838_v56  ;;  %4058 = vmatprep.mubr.bf16.mxu0 %v5956_v3  ;;  %v4875_v2 = vmul.f32 1.442695, %v4840_v60  ;;  %4140 = vmatprep.mubr.bf16.mxu1 %v5956_v3  ;;  %v5277_v48 = vcombine.high %v153_v42, %v169_v43  ;;  %v201_v51 = vld [vmem:[%s8032_s1 + $0x5c0] sm:$0xff]  ;;  %v5276_v55 = vcombine.low %v153_v42, %v169_v43  ;;  %v298_v26 = vld [vmem:[%s8032_s1 + $0x8c8] sm:$0xff] }
 0x12d   :  { %5825 = vpow2.f32 %v4869_v59  ;;  %v5278_v56 = vcombine.low %v154_v44, %v170_v45  ;;  %v5311_v60 = vcombine.high %v186_v52, %v202_v53  ;;  %v5308_v6 = vcombine.low %v185_v50, %v201_v51  ;;  %v249_v15 = vld [vmem:[%s8032_s1 + $0x740] sm:$0xff]  ;;  %v346_v45 = vld [vmem:[%s8032_s1 + $0xa48] sm:$0xff] }
 0x12e   :  { %5827 = vpow2.f32 %v4873_v63  ;;  %4029 = vmatpush1.bf16.msra.mxu0 %v5688_v57  ;;  %4111 = vmatpush1.bf16.msra.mxu1 %v5690_v61  ;;  %v5309_v57 = vcombine.high %v185_v50, %v201_v51  ;;  %v217_v61 = vld [vmem:[%s8032_s1 + $0x640] sm:$0xff]  ;;  %vm4998_vm3 = vcmp.ge.f32.partialorder %v6904_v35, 0.0  ;;  %vm5000_vm4 = vcmp.ge.f32.partialorder %v6908_v39, 0.0  ;;  %v250_v35 = vld [vmem:[%s8032_s1 + $0x748] sm:$0xff] }
 0x12f   :  { %5829 = vpow2.f32 %v4871_v0  ;;  %4149 = vmatprep.subr.bf16.mxu0 %v5149_v62  ;;  %4231 = vmatprep.subr.bf16.mxu1 %v5151_v1  ;;  %v233_v62 = vld [vmem:[%s8032_s1 + $0x6c0] sm:$0xff]  ;;  %v218_v1 = vld [vmem:[%s8032_s1 + $0x648] sm:$0xff]  ;;  %v5407_v31 = vcombine.high %v282_v25, %v298_v26 }
 0x130   :  { %5831 = vpow2.f32 %v4875_v2  ;;  %v234_v2 = vld [vmem:[%s8032_s1 + $0x6c8] sm:$0xff]  ;;  %v265_v34 = vld [vmem:[%s8032_s1 + $0x7c0] sm:$0xff] }
 0x131   :  { %v5343_v13 = vcombine.high %v218_v1, %v234_v2  ;;  %v5342_v39 = vcombine.low %v218_v1, %v234_v2  ;;  %v345_v43 = vld [vmem:[%s8032_s1 + $0xa40] sm:$0xff]  ;;  %v378_v53 = vld [vmem:[%s8032_s1 + $0xb48] sm:$0xff] }
 0x132   :  { %v361_v44 = vld [vmem:[%s8032_s1 + $0xac0] sm:$0xff] }
 0x133   :  { %v377_v51 = vld [vmem:[%s8032_s1 + $0xb40] sm:$0xff] }
 0x134   :  { %v393_v52 = vld [vmem:[%s8032_s1 + $0xbc0] sm:$0xff] }
 0x135   :  { %5714 = vmatmul.mubr.msk.bf16.vlgmr.msra.gmra.mrb[12].mxu0 %vm3489_vm0, %v6950_v14  ;;  %5715 = vmatmul.mubr.msk.bf16.vlgmr.msra.gmra.mrb[12].mxu1 %vm3489_vm0, %v6950_v14  ;;  %v5500_v1 = vcombine.low %v377_v51, %v393_v52 }
 0x136   :  { %4150 = vmatpush1.bf16.msra.mxu0 %v5148_v8  ;;  %4232 = vmatpush1.bf16.msra.mxu1 %v5150_v9 }
 0x137   :  { %v5826_v19 = vpop.eup %5825  ;;  %4151 = vmatprep.subr.bf16.mxu0 %v5181_v10  ;;  %4233 = vmatprep.subr.bf16.mxu1 %v5183_v11  ;;  %v5341_v11 = vcombine.high %v217_v61, %v233_v62 }
 0x138   :  { %v5828_v54 = vpop.eup %5827  ;;  %v4933_v23 = vadd.f32 1.0, %v5826_v19  ;;  %4181 = vmatprep.mubr.bf16.mxu0 %v6075_v58  ;;  %4263 = vmatprep.mubr.bf16.mxu1 %v6075_v58 }
 0x139   :  { %v5830_v27 = vpop.eup %5829  ;;  %v4935_v29 = vadd.f32 1.0, %v5828_v54 }
 0x13a   :  { %v6976_v33 = vpop.eup %5831  ;;  %5833 = vrcp.f32 %v4933_v23  ;;  %v4934_v36 = vadd.f32 1.0, %v5830_v27  ;;  %4152 = vmatpush1.bf16.msra.mxu0 %v5180_v18  ;;  %4234 = vmatpush1.bf16.msra.mxu1 %v5182_v20  ;;  %v266_v18 = vld [vmem:[%s8032_s1 + $0x7c8] sm:$0xff]  ;;  %v5340_v20 = vcombine.low %v217_v61, %v233_v62  ;;  %v281_v23 = vld [vmem:[%s8032_s1 + $0x840] sm:$0xff] }
 0x13b   :  { %5835 = vrcp.f32 %v4935_v29  ;;  %v4936_v37 = vadd.f32 1.0, %v6976_v33  ;;  %4153 = vmatprep.subr.bf16.mxu0 %v5213_v21  ;;  %4235 = vmatprep.subr.bf16.mxu1 %v5215_v24  ;;  %v5373_v21 = vcombine.high %v249_v15, %v265_v34  ;;  %v297_v24 = vld [vmem:[%s8032_s1 + $0x8c0] sm:$0xff]  ;;  %v5374_v29 = vcombine.low %v250_v35, %v266_v18 }
 0x13c   :  { %5837 = vrcp.f32 %v4934_v36  ;;  %v5405_v30 = vcombine.high %v281_v23, %v297_v24  ;;  %v329_v36 = vld [vmem:[%s8032_s1 + $0x9c0] sm:$0xff] }
 0x13d   :  { %5839 = vrcp.f32 %v4936_v37  ;;  %v330_v37 = vld [vmem:[%s8032_s1 + $0x9c8] sm:$0xff]  ;;  %v409_v61 = vld [vmem:[%s8032_s1 + $0xc40] sm:$0xff] }
 0x13e   :  { %4154 = vmatpush1.bf16.msra.mxu0 %v5212_v32  ;;  %4236 = vmatpush1.bf16.msra.mxu1 %v5214_v38  ;;  %v314_v32 = vld [vmem:[%s8032_s1 + $0x948] sm:$0xff]  ;;  %v5404_v38 = vcombine.low %v281_v23, %v297_v24  ;;  %v425_v62 = vld [vmem:[%s8032_s1 + $0xcc0] sm:$0xff] }
 0x13f   :  { %4155 = vmatprep.subr.bf16.mxu0 %v5245_v40  ;;  %4237 = vmatprep.subr.bf16.mxu1 %v5247_v41  ;;  %v5406_v40 = vcombine.low %v282_v25, %v298_v26  ;;  %v5439_v42 = vcombine.high %v314_v32, %v330_v37  ;;  %v522_v23 = vld [vmem:[%s8032_s1 + $0xfc8] sm:$0xff] }
 0x142   :  { %4156 = vmatpush1.bf16.msra.mxu0 %v5244_v46  ;;  %4238 = vmatpush1.bf16.msra.mxu1 %v5246_v47  ;;  %v362_v46 = vld [vmem:[%s8032_s1 + $0xac8] sm:$0xff] }
 0x143   :  { %4157 = vmatprep.subr.bf16.mxu0 %v5277_v48  ;;  %4239 = vmatprep.subr.bf16.mxu1 %v5279_v49  ;;  %v5438_v48 = vcombine.low %v314_v32, %v330_v37  ;;  %v5469_v49 = vcombine.high %v345_v43, %v361_v44  ;;  %v5471_v50 = vcombine.high %v346_v45, %v362_v46 }
 0x144   :  { %v5834_v59 = vpop.eup %5833 }
 0x145   :  { %v5836_v63 = vpop.eup %5835  ;;  %v5029_v0 = vmul.f32 %v5834_v59, %v5826_v19 }
 0x146   :  { %v5838_v4 = vpop.eup %5837  ;;  %v5031_v5 = vmul.f32 %v5836_v63, %v5828_v54  ;;  %4158 = vmatpush1.bf16.msra.mxu0 %v5276_v55  ;;  %4240 = vmatpush1.bf16.msra.mxu1 %v5278_v56  ;;  %v5375_v54 = vcombine.high %v250_v35, %v266_v18  ;;  %v394_v55 = vld [vmem:[%s8032_s1 + $0xbc8] sm:$0xff]  ;;  %v5468_v56 = vcombine.low %v345_v43, %v361_v44 }
 0x147   :  { %v5840_v8 = vpop.eup %5839  ;;  %v5061_v9 = vsel %vm4997_vm1, %v5834_v59, %v5029_v0  ;;  %v5030_v10 = vmul.f32 %v5838_v4, %v5830_v27  ;;  %4159 = vmatprep.subr.bf16.mxu0 %v5309_v57  ;;  %4241 = vmatprep.subr.bf16.mxu1 %v5311_v60  ;;  %v5372_v27 = vcombine.low %v249_v15, %v265_v34  ;;  %v426_v0 = vld [vmem:[%s8032_s1 + $0xcc8] sm:$0xff]  ;;  %v489_v15 = vld [vmem:[%s8032_s1 + $0xec0] sm:$0xff] }
 0x148   :  { %5093 = vst [vmem:[%s8035_s3] sm:$0xff] %v5061_v9  ;;  %v5063_v12 = vsel %vm4999_vm2, %v5836_v63, %v5031_v5  ;;  %v5032_v28 = vmul.f32 %v5840_v8, %v6976_v33  ;;  %v313_v33 = vld [vmem:[%s8032_s1 + $0x940] sm:$0xff]  ;;  %v5470_v57 = vcombine.low %v346_v45, %v362_v46  ;;  %v5501_v59 = vcombine.high %v377_v51, %v393_v52  ;;  %v410_v63 = vld [vmem:[%s8032_s1 + $0xc48] sm:$0xff] }
 0x149   :  { %5095 = vst [vmem:[%s8035_s3 + $0x10] sm:$0xff] %v5063_v12  ;;  %v5062_v17 = vsel %vm4998_vm3, %v5838_v4, %v5030_v10  ;;  %v5437_v41 = vcombine.high %v313_v33, %v329_v36  ;;  %v5436_v47 = vcombine.low %v313_v33, %v329_v36  ;;  %v5503_v60 = vcombine.high %v378_v53, %v394_v55  ;;  %v458_v9 = vld [vmem:[%s8032_s1 + $0xdc8] sm:$0xff] }
 0x14a   :  { %5094 = vst [vmem:[%s8035_s3 + $0x8] sm:$0xff] %v5062_v17  ;;  %v5064_v19 = vsel %vm5000_vm4, %v5840_v8, %v5032_v28  ;;  %4160 = vmatpush1.bf16.msra.mxu0 %v5308_v6  ;;  %4242 = vmatpush1.bf16.msra.mxu1 %v5310_v7  ;;  %v5502_v2 = vcombine.low %v378_v53, %v394_v55  ;;  %v441_v6 = vld [vmem:[%s8032_s1 + $0xd40] sm:$0xff]  ;;  %v442_v8 = vld [vmem:[%s8032_s1 + $0xd48] sm:$0xff] }
 0x14b   :  { %5096 = vst [vmem:[%s8035_s3 + $0x18] sm:$0xff] %v5064_v19  ;;  %4161 = vmatprep.subr.bf16.mxu0 %v5341_v11  ;;  %4243 = vmatprep.subr.bf16.mxu1 %v5343_v13  ;;  %v5533_v4 = vcombine.high %v409_v61, %v425_v62  ;;  %v5535_v5 = vcombine.high %v410_v63, %v426_v0  ;;  %v457_v7 = vld [vmem:[%s8032_s1 + $0xdc0] sm:$0xff]  ;;  %v474_v34 = vld [vmem:[%s8032_s1 + $0xe48] sm:$0xff] }
 0x14c   :  { %v5532_v10 = vcombine.low %v409_v61, %v425_v62  ;;  %v5534_v11 = vcombine.low %v410_v63, %v426_v0  ;;  %v5565_v12 = vcombine.high %v441_v6, %v457_v7  ;;  %v5567_v28 = vcombine.high %v442_v8, %v458_v9  ;;  %v473_v13 = vld [vmem:[%s8032_s1 + $0xe40] sm:$0xff]  ;;  %v490_v17 = vld [vmem:[%s8032_s1 + $0xec8] sm:$0xff]  ;;  %v27_v0 = vld [vmem:[%s8032_s1 + $0x50] sm:$0xff] }
 0x14d   :  { %v5564_v35 = vcombine.low %v441_v6, %v457_v7  ;;  %v5566_v18 = vcombine.low %v442_v8, %v458_v9  ;;  %v5597_v19 = vcombine.high %v473_v13, %v489_v15  ;;  %v5596_v24 = vcombine.low %v473_v13, %v489_v15  ;;  %v554_v33 = vld [vmem:[%s8032_s1 + $0x10c8] sm:$0xff]  ;;  %v28_v6 = vld [vmem:[%s8032_s1 + $0x58] sm:$0xff] }
 0x14e   :  { %4162 = vmatpush1.bf16.msra.mxu0 %v5340_v20  ;;  %4244 = vmatpush1.bf16.msra.mxu1 %v5342_v39  ;;  %v5599_v20 = vcombine.high %v474_v34, %v490_v17  ;;  %v505_v39 = vld [vmem:[%s8032_s1 + $0xf40] sm:$0xff]  ;;  %v5598_v25 = vcombine.low %v474_v34, %v490_v17  ;;  %v570_v46 = vld [vmem:[%s8032_s1 + $0x1148] sm:$0xff]  ;;  %v44_v7 = vld [vmem:[%s8032_s1 + $0xd8] sm:$0xff] }
 0x14f   :  { %4163 = vmatprep.subr.bf16.mxu0 %v5373_v21  ;;  %4245 = vmatprep.subr.bf16.mxu1 %v5375_v54  ;;  %v521_v21 = vld [vmem:[%s8032_s1 + $0xfc0] sm:$0xff]  ;;  %v506_v54 = vld [vmem:[%s8032_s1 + $0xf48] sm:$0xff]  ;;  %v5155_v17 = vcombine.high %v28_v6, %v44_v7 }
 0x150   :  { %v5629_v26 = vcombine.high %v505_v39, %v521_v21  ;;  %v5628_v36 = vcombine.low %v505_v39, %v521_v21  ;;  %v5630_v32 = vcombine.low %v506_v54, %v522_v23  ;;  %v76_v39 = vld [vmem:[%s8032_s1 + $0x1d8] sm:$0xff] }
 0x152   :  { %4164 = vmatpush1.bf16.msra.mxu0 %v5372_v27  ;;  %4246 = vmatpush1.bf16.msra.mxu1 %v5374_v29  ;;  %v5631_v27 = vcombine.high %v506_v54, %v522_v23  ;;  %v537_v29 = vld [vmem:[%s8032_s1 + $0x1040] sm:$0xff]  ;;  %v5154_v54 = vcombine.low %v28_v6, %v44_v7  ;;  %v204_v6 = vld [vmem:[%s8032_s1 + $0x5d8] sm:$0xff] }
 0x153   :  { %4165 = vmatprep.subr.bf16.mxu0 %v5405_v30  ;;  %4247 = vmatprep.subr.bf16.mxu1 %v5407_v31  ;;  %v553_v30 = vld [vmem:[%s8032_s1 + $0x10c0] sm:$0xff]  ;;  %v538_v31 = vld [vmem:[%s8032_s1 + $0x1048] sm:$0xff] }
 0x154   :  { %v5661_v37 = vcombine.high %v537_v29, %v553_v30  ;;  %v5660_v52 = vcombine.low %v537_v29, %v553_v30  ;;  %v108_v29 = vld [vmem:[%s8032_s1 + $0x2d8] sm:$0xff] }
 0x156   :  { %4166 = vmatpush1.bf16.msra.mxu0 %v5404_v38  ;;  %4248 = vmatpush1.bf16.msra.mxu1 %v5406_v40  ;;  %v5663_v40 = vcombine.high %v538_v31, %v554_v33 }
 0x157   :  { %4167 = vmatprep.subr.bf16.mxu0 %v5437_v41  ;;  %4249 = vmatprep.subr.bf16.mxu1 %v5439_v42  ;;  %v569_v41 = vld [vmem:[%s8032_s1 + $0x1140] sm:$0xff] }
 0x158   :  { %v585_v42 = vld [vmem:[%s8032_s1 + $0x11c0] sm:$0xff] }
 0x15a   :  { %4168 = vmatpush1.bf16.msra.mxu0 %v5436_v47  ;;  %4250 = vmatpush1.bf16.msra.mxu1 %v5438_v48  ;;  %v586_v47 = vld [vmem:[%s8032_s1 + $0x11c8] sm:$0xff] }
 0x15b   :  { %4169 = vmatprep.subr.bf16.mxu0 %v5469_v49  ;;  %4251 = vmatprep.subr.bf16.mxu1 %v5471_v50  ;;  %v5695_v63 = vcombine.high %v570_v46, %v586_v47 }
 0x15e   :  { %4170 = vmatpush1.bf16.msra.mxu0 %v5468_v56  ;;  %4252 = vmatpush1.bf16.msra.mxu1 %v5470_v57  ;;  %v5662_v57 = vcombine.low %v538_v31, %v554_v33 }
 0x15f   :  { %4171 = vmatprep.subr.bf16.mxu0 %v5501_v59  ;;  %4253 = vmatprep.subr.bf16.mxu1 %v5503_v60  ;;  %v5693_v60 = vcombine.high %v569_v41, %v585_v42 }
 0x162   :  { %4172 = vmatpush1.bf16.msra.mxu0 %v5500_v1  ;;  %4254 = vmatpush1.bf16.msra.mxu1 %v5502_v2  ;;  %v43_v1 = vld [vmem:[%s8032_s1 + $0xd0] sm:$0xff] }
 0x163   :  { %4173 = vmatprep.subr.bf16.mxu0 %v5533_v4  ;;  %4255 = vmatprep.subr.bf16.mxu1 %v5535_v5  ;;  %v5153_v13 = vcombine.high %v27_v0, %v43_v1  ;;  %v5152_v21 = vcombine.low %v27_v0, %v43_v1 }
 0x166   :  { %4174 = vmatpush1.bf16.msra.mxu0 %v5532_v10  ;;  %4256 = vmatpush1.bf16.msra.mxu1 %v5534_v11  ;;  %v5692_v10 = vcombine.low %v569_v41, %v585_v42  ;;  %v139_v41 = vld [vmem:[%s8032_s1 + $0x3d0] sm:$0xff] }
 0x167   :  { %4175 = vmatprep.subr.bf16.mxu0 %v5565_v12  ;;  %4257 = vmatprep.subr.bf16.mxu1 %v5567_v28  ;;  %v5694_v28 = vcombine.low %v570_v46, %v586_v47 }
 0x16a   :  { %4176 = vmatpush1.bf16.msra.mxu0 %v5564_v35  ;;  %4258 = vmatpush1.bf16.msra.mxu1 %v5566_v18  ;;  %v59_v18 = vld [vmem:[%s8032_s1 + $0x150] sm:$0xff] }
 0x16b   :  { %4177 = vmatprep.subr.bf16.mxu0 %v5597_v19  ;;  %4259 = vmatprep.subr.bf16.mxu1 %v5599_v20  ;;  %v75_v19 = vld [vmem:[%s8032_s1 + $0x1d0] sm:$0xff]  ;;  %v60_v20 = vld [vmem:[%s8032_s1 + $0x158] sm:$0xff] }
 0x16c   :  { %v5185_v23 = vcombine.high %v59_v18, %v75_v19  ;;  %v5184_v30 = vcombine.low %v59_v18, %v75_v19  ;;  %v5186_v33 = vcombine.low %v60_v20, %v76_v39 }
 0x16e   :  { %4178 = vmatpush1.bf16.msra.mxu0 %v5596_v24  ;;  %4260 = vmatpush1.bf16.msra.mxu1 %v5598_v25  ;;  %v5187_v24 = vcombine.high %v60_v20, %v76_v39  ;;  %v91_v25 = vld [vmem:[%s8032_s1 + $0x250] sm:$0xff] }
 0x16f   :  { %4179 = vmatprep.subr.bf16.mxu0 %v5629_v26  ;;  %4261 = vmatprep.subr.bf16.mxu1 %v5631_v27  ;;  %v107_v26 = vld [vmem:[%s8032_s1 + $0x2d0] sm:$0xff]  ;;  %v92_v27 = vld [vmem:[%s8032_s1 + $0x258] sm:$0xff] }
 0x170   :  { %v3732_v38 = vpop.f32.mrb[4].mxu0  ;;  %v3814_v44 = vpop.f32.mrb[4].mxu1 }
 0x171   :  { %v7159_v43 = vadd.f32 %v3732_v38, %v6883_v22  ;;  %v3734_v45 = vpop.f32.mrb[5].mxu0  ;;  %v7168_v48 = vadd.f32 %v3814_v44, %v6883_v22  ;;  %v3816_v50 = vpop.f32.mrb[5].mxu1  ;;  %v5219_v38 = vcombine.high %v92_v27, %v108_v29  ;;  %v124_v44 = vld [vmem:[%s8032_s1 + $0x358] sm:$0xff] }
 0x172   :  { %4180 = vmatpush1.bf16.msra.mxu0 %v5628_v36  ;;  %v7171_v49 = vadd.f32 %v3734_v45, %v6883_v22  ;;  %v3736_v51 = vpop.f32.mrb[6].mxu0  ;;  %4262 = vmatpush1.bf16.msra.mxu1 %v5630_v32  ;;  %v7175_v55 = vadd.f32 %v3816_v50, %v6883_v22  ;;  %v3818_v56 = vpop.f32.mrb[6].mxu1  ;;  %v5217_v36 = vcombine.high %v91_v25, %v107_v26  ;;  %v140_v45 = vld [vmem:[%s8032_s1 + $0x3d8] sm:$0xff] }
 0x173   :  { %v4809_v53 = vand.u32 2147483647, %v7159_v43  ;;  %4190 = vmatprep.subr.bf16.mxu0 %v5661_v37  ;;  %v3737_v59 = vpop.f32.mrb[7].mxu0  ;;  %v4811_v61 = vand.u32 2147483647, %v7168_v48  ;;  %4272 = vmatprep.subr.bf16.mxu1 %v5663_v40  ;;  %v3819_v5 = vpop.f32.mrb[7].mxu1  ;;  %v5216_v50 = vcombine.low %v91_v25, %v107_v26  ;;  %v5251_v56 = vcombine.high %v124_v44, %v140_v45 }
 0x174   :  { %v4810_v62 = vand.u32 2147483647, %v7171_v49  ;;  %v4812_v4 = vand.u32 2147483647, %v7175_v55  ;;  %v123_v40 = vld [vmem:[%s8032_s1 + $0x350] sm:$0xff]  ;;  %v188_v5 = vld [vmem:[%s8032_s1 + $0x558] sm:$0xff] }
 0x175   :  { %v4841_v2 = vsub.f32 0.0, %v4809_v53  ;;  %4182 = vmatmul.mubr.bf16.vlgmr.msra.gmra.mrb[16].mxu0 %v6204_v16  ;;  %v4843_v8 = vsub.f32 0.0, %v4811_v61  ;;  %4264 = vmatmul.mubr.bf16.vlgmr.msra.gmra.mrb[16].mxu1 %v6204_v16  ;;  %v5249_v53 = vcombine.high %v123_v40, %v139_v41  ;;  %v171_v59 = vld [vmem:[%s8032_s1 + $0x4d0] sm:$0xff]  ;;  %v172_v61 = vld [vmem:[%s8032_s1 + $0x4d8] sm:$0xff]  ;;  %vm5001_vm5 = vcmp.ge.f32.partialorder %v7159_v43, 0.0 }
 0x176   :  { %v4842_v9 = vsub.f32 0.0, %v4810_v62  ;;  %4191 = vmatpush1.bf16.msra.mxu0 %v5660_v52  ;;  %v4844_v12 = vsub.f32 0.0, %v4812_v4  ;;  %4273 = vmatpush1.bf16.msra.mxu1 %v5662_v57  ;;  %v5218_v52 = vcombine.low %v92_v27, %v108_v29  ;;  %v155_v57 = vld [vmem:[%s8032_s1 + $0x450] sm:$0xff]  ;;  %v5248_v62 = vcombine.low %v123_v40, %v139_v41  ;;  %v268_v29 = vld [vmem:[%s8032_s1 + $0x7d8] sm:$0xff] }
 0x177   :  { %v4877_v11 = vmul.f32 1.442695, %v4841_v2  ;;  %4192 = vmatprep.subr.bf16.mxu0 %v5693_v60  ;;  %v4881_v15 = vmul.f32 1.442695, %v4843_v8  ;;  %4274 = vmatprep.subr.bf16.mxu1 %v5695_v63  ;;  %v156_v60 = vld [vmem:[%s8032_s1 + $0x458] sm:$0xff]  ;;  %v5250_v63 = vcombine.low %v124_v44, %v140_v45  ;;  %v5281_v0 = vcombine.high %v155_v57, %v171_v59  ;;  %v187_v2 = vld [vmem:[%s8032_s1 + $0x550] sm:$0xff] }
 0x178   :  { %v4879_v34 = vmul.f32 1.442695, %v4842_v9  ;;  %4222 = vmatprep.mubr.bf16.mxu0 %v5956_v3  ;;  %v4883_v35 = vmul.f32 1.442695, %v4844_v12  ;;  %4304 = vmatprep.mubr.bf16.mxu1 %v5956_v3  ;;  %v5283_v1 = vcombine.high %v156_v60, %v172_v61  ;;  %v203_v4 = vld [vmem:[%s8032_s1 + $0x5d0] sm:$0xff]  ;;  %v5280_v7 = vcombine.low %v155_v57, %v171_v59  ;;  %v300_v40 = vld [vmem:[%s8032_s1 + $0x8d8] sm:$0xff] }
 0x179   :  { %5841 = vpow2.f32 %v4877_v11  ;;  %v5282_v8 = vcombine.low %v156_v60, %v172_v61  ;;  %v5313_v9 = vcombine.high %v187_v2, %v203_v4  ;;  %v5315_v11 = vcombine.high %v188_v5, %v204_v6  ;;  %v219_v12 = vld [vmem:[%s8032_s1 + $0x650] sm:$0xff]  ;;  %v348_v60 = vld [vmem:[%s8032_s1 + $0xa58] sm:$0xff] }
 0x17a   :  { %5843 = vpow2.f32 %v4881_v15  ;;  %4193 = vmatpush1.bf16.msra.mxu0 %v5692_v10  ;;  %4275 = vmatpush1.bf16.msra.mxu1 %v5694_v28  ;;  %v235_v28 = vld [vmem:[%s8032_s1 + $0x6d0] sm:$0xff]  ;;  %v5312_v19 = vcombine.low %v187_v2, %v203_v4  ;;  %v5314_v20 = vcombine.low %v188_v5, %v204_v6  ;;  %vm5003_vm6 = vcmp.ge.f32.partialorder %v7168_v48, 0.0  ;;  %v364_v61 = vld [vmem:[%s8032_s1 + $0xad8] sm:$0xff] }
 0x17b   :  { %5845 = vpow2.f32 %v4879_v34  ;;  %4313 = vmatprep.subr.bf16.mxu0 %v5153_v13  ;;  %4395 = vmatprep.subr.bf16.mxu1 %v5155_v17  ;;  %v220_v34 = vld [vmem:[%s8032_s1 + $0x658] sm:$0xff]  ;;  %vm5002_vm7 = vcmp.ge.f32.partialorder %v7171_v49, 0.0  ;;  %v251_v26 = vld [vmem:[%s8032_s1 + $0x750] sm:$0xff]  ;;  %vm5004_vm8 = vcmp.ge.f32.partialorder %v7175_v55, 0.0 }
 0x17c   :  { %5847 = vpow2.f32 %v4883_v35  ;;  %v236_v17 = vld [vmem:[%s8032_s1 + $0x6d8] sm:$0xff]  ;;  %v267_v48 = vld [vmem:[%s8032_s1 + $0x7d0] sm:$0xff] }
 0x17d   :  { %v5347_v25 = vcombine.high %v220_v34, %v236_v17  ;;  %v252_v49 = vld [vmem:[%s8032_s1 + $0x758] sm:$0xff]  ;;  %v5346_v55 = vcombine.low %v220_v34, %v236_v17  ;;  %v5376_v41 = vcombine.low %v251_v26, %v267_v48  ;;  %v315_v45 = vld [vmem:[%s8032_s1 + $0x950] sm:$0xff] }
 0x17e   :  { %v347_v57 = vld [vmem:[%s8032_s1 + $0xa50] sm:$0xff]  ;;  %v380_v5 = vld [vmem:[%s8032_s1 + $0xb58] sm:$0xff] }
 0x17f   :  { %v363_v59 = vld [vmem:[%s8032_s1 + $0xad0] sm:$0xff]  ;;  %v396_v6 = vld [vmem:[%s8032_s1 + $0xbd8] sm:$0xff] }
 0x180   :  { %v379_v2 = vld [vmem:[%s8032_s1 + $0xb50] sm:$0xff]  ;;  %v5506_v34 = vcombine.low %v380_v5, %v396_v6 }
 0x181   :  { %5716 = vmatmul.mubr.msk.bf16.vlgmr.msra.gmra.mrb[16].mxu0 %vm3489_vm0, %v6950_v14  ;;  %5717 = vmatmul.mubr.msk.bf16.vlgmr.msra.gmra.mrb[16].mxu1 %vm3489_vm0, %v6950_v14  ;;  %v395_v4 = vld [vmem:[%s8032_s1 + $0xbd0] sm:$0xff] }
 0x182   :  { %4314 = vmatpush1.bf16.msra.mxu0 %v5152_v21  ;;  %4396 = vmatpush1.bf16.msra.mxu1 %v5154_v54 }
 0x183   :  { %v5842_v31 = vpop.eup %5841  ;;  %4315 = vmatprep.subr.bf16.mxu0 %v5185_v23  ;;  %4397 = vmatprep.subr.bf16.mxu1 %v5187_v24  ;;  %v5345_v23 = vcombine.high %v219_v12, %v235_v28 }
 0x184   :  { %v5844_v32 = vpop.eup %5843  ;;  %v4937_v37 = vadd.f32 1.0, %v5842_v31  ;;  %4345 = vmatprep.mubr.bf16.mxu0 %v6075_v58  ;;  %4427 = vmatprep.mubr.bf16.mxu1 %v6075_v58 }
 0x185   :  { %v5846_v14 = vpop.eup %5845  ;;  %v4939_v42 = vadd.f32 1.0, %v5844_v32 }
 0x186   :  { %v5848_v46 = vpop.eup %5847  ;;  %5849 = vrcp.f32 %v4937_v37  ;;  %v4938_v47 = vadd.f32 1.0, %v5846_v14  ;;  %4316 = vmatpush1.bf16.msra.mxu0 %v5184_v30  ;;  %4398 = vmatpush1.bf16.msra.mxu1 %v5186_v33  ;;  %v5377_v33 = vcombine.high %v251_v26, %v267_v48  ;;  %v299_v37 = vld [vmem:[%s8032_s1 + $0x8d0] sm:$0xff]  ;;  %v476_v26 = vld [vmem:[%s8032_s1 + $0xe58] sm:$0xff] }
 0x187   :  { %5851 = vrcp.f32 %v4939_v42  ;;  %v4940_v51 = vadd.f32 1.0, %v5848_v46  ;;  %4317 = vmatprep.subr.bf16.mxu0 %v5217_v36  ;;  %4399 = vmatprep.subr.bf16.mxu1 %v5219_v38  ;;  %v5379_v36 = vcombine.high %v252_v49, %v268_v29  ;;  %v284_v38 = vld [vmem:[%s8032_s1 + $0x858] sm:$0xff] }
 0x188   :  { %5853 = vrcp.f32 %v4938_v47  ;;  %v5411_v44 = vcombine.high %v284_v38, %v300_v40  ;;  %v316_v47 = vld [vmem:[%s8032_s1 + $0x958] sm:$0xff] }
 0x189   :  { %5855 = vrcp.f32 %v4940_v51  ;;  %v492_v48 = vld [vmem:[%s8032_s1 + $0xed8] sm:$0xff] }
 0x18a   :  { %4318 = vmatpush1.bf16.msra.mxu0 %v5216_v50  ;;  %4400 = vmatpush1.bf16.msra.mxu1 %v5218_v52  ;;  %v332_v50 = vld [vmem:[%s8032_s1 + $0x9d8] sm:$0xff]  ;;  %v5410_v52 = vcombine.low %v284_v38, %v300_v40 }
 0x18b   :  { %4319 = vmatprep.subr.bf16.mxu0 %v5249_v53  ;;  %4401 = vmatprep.subr.bf16.mxu1 %v5251_v56  ;;  %v5443_v56 = vcombine.high %v316_v47, %v332_v50 }
 0x18e   :  { %4320 = vmatpush1.bf16.msra.mxu0 %v5248_v62  ;;  %4402 = vmatpush1.bf16.msra.mxu1 %v5250_v63  ;;  %v5442_v63 = vcombine.low %v316_v47, %v332_v50 }
 0x18f   :  { %4321 = vmatprep.subr.bf16.mxu0 %v5281_v0  ;;  %4403 = vmatprep.subr.bf16.mxu1 %v5283_v1  ;;  %v5473_v0 = vcombine.high %v347_v57, %v363_v59  ;;  %v5475_v1 = vcombine.high %v348_v60, %v364_v61 }
 0x190   :  { %v5850_v10 = vpop.eup %5849 }
 0x191   :  { %v5852_v13 = vpop.eup %5851  ;;  %v5033_v15 = vmul.f32 %v5850_v10, %v5842_v31  ;;  %v5344_v31 = vcombine.low %v219_v12, %v235_v28  ;;  %v427_v12 = vld [vmem:[%s8032_s1 + $0xcd0] sm:$0xff]  ;;  %v412_v28 = vld [vmem:[%s8032_s1 + $0xc58] sm:$0xff] }
 0x192   :  { %v5854_v35 = vpop.eup %5853  ;;  %v5035_v18 = vmul.f32 %v5852_v13, %v5844_v32  ;;  %4322 = vmatpush1.bf16.msra.mxu0 %v5280_v7  ;;  %4404 = vmatpush1.bf16.msra.mxu1 %v5282_v8  ;;  %v283_v32 = vld [vmem:[%s8032_s1 + $0x850] sm:$0xff]  ;;  %v5472_v7 = vcombine.low %v347_v57, %v363_v59  ;;  %v5474_v8 = vcombine.low %v348_v60, %v364_v61  ;;  %v572_v60 = vld [vmem:[%s8032_s1 + $0x1158] sm:$0xff] }
 0x193   :  { %v5856_v39 = vpop.eup %5855  ;;  %v5065_v21 = vsel %vm5001_vm5, %v5850_v10, %v5033_v15  ;;  %v5034_v54 = vmul.f32 %v5854_v35, %v5846_v14  ;;  %4323 = vmatprep.subr.bf16.mxu0 %v5313_v9  ;;  %4405 = vmatprep.subr.bf16.mxu1 %v5315_v11  ;;  %v5378_v14 = vcombine.low %v252_v49, %v268_v29  ;;  %v411_v11 = vld [vmem:[%s8032_s1 + $0xc50] sm:$0xff]  ;;  %v588_v61 = vld [vmem:[%s8032_s1 + $0x11d8] sm:$0xff] }
 0x194   :  { %5097 = vst [vmem:[%s8035_s3 + $0x20] sm:$0xff] %v5065_v21  ;;  %v5067_v24 = vsel %vm5003_vm6, %v5852_v13, %v5035_v18  ;;  %v5036_v43 = vmul.f32 %v5856_v39, %v5848_v46  ;;  %v5409_v42 = vcombine.high %v283_v32, %v299_v37  ;;  %v331_v46 = vld [vmem:[%s8032_s1 + $0x9d0] sm:$0xff]  ;;  %v5408_v51 = vcombine.low %v283_v32, %v299_v37  ;;  %v428_v13 = vld [vmem:[%s8032_s1 + $0xcd8] sm:$0xff] }
 0x195   :  { %5099 = vst [vmem:[%s8035_s3 + $0x30] sm:$0xff] %v5067_v24  ;;  %v5066_v27 = vsel %vm5002_vm7, %v5854_v35, %v5034_v54  ;;  %v5441_v53 = vcombine.high %v315_v45, %v331_v46  ;;  %v5440_v62 = vcombine.low %v315_v45, %v331_v46  ;;  %v5505_v9 = vcombine.high %v379_v2, %v395_v4  ;;  %v443_v18 = vld [vmem:[%s8032_s1 + $0xd50] sm:$0xff] }
 0x196   :  { %5098 = vst [vmem:[%s8035_s3 + $0x28] sm:$0xff] %v5066_v27  ;;  %v5068_v30 = vsel %vm5004_vm8, %v5856_v39, %v5036_v43  ;;  %4324 = vmatpush1.bf16.msra.mxu0 %v5312_v19  ;;  %4406 = vmatpush1.bf16.msra.mxu1 %v5314_v20  ;;  %v5507_v10 = vcombine.high %v380_v5, %v396_v6  ;;  %v459_v19 = vld [vmem:[%s8032_s1 + $0xdd0] sm:$0xff]  ;;  %v444_v20 = vld [vmem:[%s8032_s1 + $0xd58] sm:$0xff] }
 0x197   :  { %5100 = vst [vmem:[%s8035_s3 + $0x38] sm:$0xff] %v5068_v30  ;;  %4325 = vmatprep.subr.bf16.mxu0 %v5345_v23  ;;  %4407 = vmatprep.subr.bf16.mxu1 %v5347_v25  ;;  %v5504_v15 = vcombine.low %v379_v2, %v395_v4  ;;  %v5537_v17 = vcombine.high %v411_v11, %v427_v12  ;;  %v460_v39 = vld [vmem:[%s8032_s1 + $0xdd8] sm:$0xff]  ;;  %v475_v43 = vld [vmem:[%s8032_s1 + $0xe50] sm:$0xff] }
 0x198   :  { %v5539_v35 = vcombine.high %v412_v28, %v428_v13  ;;  %v5536_v21 = vcombine.low %v411_v11, %v427_v12  ;;  %v5538_v54 = vcombine.low %v412_v28, %v428_v13  ;;  %v5569_v23 = vcombine.high %v443_v18, %v459_v19  ;;  %v491_v25 = vld [vmem:[%s8032_s1 + $0xed0] sm:$0xff]  ;;  %v29_v28 = vld [vmem:[%s8032_s1 + $0x60] sm:$0xff] }
 0x199   :  { %v5571_v24 = vcombine.high %v444_v20, %v460_v39  ;;  %v5568_v27 = vcombine.low %v443_v18, %v459_v19  ;;  %v5570_v49 = vcombine.low %v444_v20, %v460_v39  ;;  %v5601_v29 = vcombine.high %v475_v43, %v491_v25  ;;  %v45_v13 = vld [vmem:[%s8032_s1 + $0xe0] sm:$0xff]  ;;  %v46_v18 = vld [vmem:[%s8032_s1 + $0xe8] sm:$0xff] }
 0x19a   :  { %4326 = vmatpush1.bf16.msra.mxu0 %v5344_v31  ;;  %4408 = vmatpush1.bf16.msra.mxu1 %v5346_v55  ;;  %v5603_v30 = vcombine.high %v476_v26, %v492_v48  ;;  %v507_v31 = vld [vmem:[%s8032_s1 + $0xf50] sm:$0xff]  ;;  %v5600_v32 = vcombine.low %v475_v43, %v491_v25  ;;  %v5602_v37 = vcombine.low %v476_v26, %v492_v48 }
 0x19b   :  { %4327 = vmatprep.subr.bf16.mxu0 %v5377_v33  ;;  %4409 = vmatprep.subr.bf16.mxu1 %v5379_v36  ;;  %v523_v55 = vld [vmem:[%s8032_s1 + $0xfd0] sm:$0xff]  ;;  %v508_v33 = vld [vmem:[%s8032_s1 + $0xf58] sm:$0xff]  ;;  %v5699_v12 = vcombine.high %v572_v60, %v588_v61 }
 0x19c   :  { %v524_v36 = vld [vmem:[%s8032_s1 + $0xfd8] sm:$0xff]  ;;  %v5633_v38 = vcombine.high %v507_v31, %v523_v55  ;;  %v5632_v45 = vcombine.low %v507_v31, %v523_v55  ;;  %v5156_v31 = vcombine.low %v29_v28, %v45_v13 }
 0x19d   :  { %v5635_v40 = vcombine.high %v508_v33, %v524_v36  ;;  %v5634_v46 = vcombine.low %v508_v33, %v524_v36 }
 0x19e   :  { %4328 = vmatpush1.bf16.msra.mxu0 %v5376_v41  ;;  %4410 = vmatpush1.bf16.msra.mxu1 %v5378_v14  ;;  %v539_v41 = vld [vmem:[%s8032_s1 + $0x1050] sm:$0xff] }
 0x19f   :  { %4329 = vmatprep.subr.bf16.mxu0 %v5409_v42  ;;  %4411 = vmatprep.subr.bf16.mxu1 %v5411_v44  ;;  %v555_v14 = vld [vmem:[%s8032_s1 + $0x10d0] sm:$0xff]  ;;  %v540_v42 = vld [vmem:[%s8032_s1 + $0x1058] sm:$0xff] }
 0x1a0   :  { %v556_v44 = vld [vmem:[%s8032_s1 + $0x10d8] sm:$0xff]  ;;  %v5665_v47 = vcombine.high %v539_v41, %v555_v14  ;;  %v5664_v2 = vcombine.low %v539_v41, %v555_v14  ;;  %v110_v41 = vld [vmem:[%s8032_s1 + $0x2e8] sm:$0xff] }
 0x1a2   :  { %4330 = vmatpush1.bf16.msra.mxu0 %v5408_v51  ;;  %4412 = vmatpush1.bf16.msra.mxu1 %v5410_v52  ;;  %v5667_v51 = vcombine.high %v540_v42, %v556_v44  ;;  %v571_v52 = vld [vmem:[%s8032_s1 + $0x1150] sm:$0xff] }
 0x1a3   :  { %4331 = vmatprep.subr.bf16.mxu0 %v5441_v53  ;;  %4413 = vmatprep.subr.bf16.mxu1 %v5443_v56  ;;  %v587_v53 = vld [vmem:[%s8032_s1 + $0x11d0] sm:$0xff] }
 0x1a4   :  { %v5696_v39 = vcombine.low %v571_v52, %v587_v53 }
 0x1a6   :  { %4332 = vmatpush1.bf16.msra.mxu0 %v5440_v62  ;;  %4414 = vmatpush1.bf16.msra.mxu1 %v5442_v63 }
 0x1a7   :  { %4333 = vmatprep.subr.bf16.mxu0 %v5473_v0  ;;  %4415 = vmatprep.subr.bf16.mxu1 %v5475_v1 }
 0x1aa   :  { %4334 = vmatpush1.bf16.msra.mxu0 %v5472_v7  ;;  %4416 = vmatpush1.bf16.msra.mxu1 %v5474_v8  ;;  %v5666_v7 = vcombine.low %v540_v42, %v556_v44 }
 0x1ab   :  { %4335 = vmatprep.subr.bf16.mxu0 %v5505_v9  ;;  %4417 = vmatprep.subr.bf16.mxu1 %v5507_v10  ;;  %v5697_v9 = vcombine.high %v571_v52, %v587_v53  ;;  %v141_v52 = vld [vmem:[%s8032_s1 + $0x3e0] sm:$0xff] }
 0x1ae   :  { %4336 = vmatpush1.bf16.msra.mxu0 %v5504_v15  ;;  %4418 = vmatpush1.bf16.msra.mxu1 %v5506_v34 }
 0x1af   :  { %4337 = vmatprep.subr.bf16.mxu0 %v5537_v17  ;;  %4419 = vmatprep.subr.bf16.mxu1 %v5539_v35  ;;  %v30_v35 = vld [vmem:[%s8032_s1 + $0x68] sm:$0xff] }
 0x1b0   :  { %v5159_v26 = vcombine.high %v30_v35, %v46_v18  ;;  %v5158_v55 = vcombine.low %v30_v35, %v46_v18  ;;  %v190_v35 = vld [vmem:[%s8032_s1 + $0x568] sm:$0xff] }
 0x1b1   :  { %v206_v18 = vld [vmem:[%s8032_s1 + $0x5e8] sm:$0xff] }
 0x1b2   :  { %4338 = vmatpush1.bf16.msra.mxu0 %v5536_v21  ;;  %4420 = vmatpush1.bf16.msra.mxu1 %v5538_v54 }
 0x1b3   :  { %4339 = vmatprep.subr.bf16.mxu0 %v5569_v23  ;;  %4421 = vmatprep.subr.bf16.mxu1 %v5571_v24  ;;  %v5698_v23 = vcombine.low %v572_v60, %v588_v61  ;;  %v5157_v24 = vcombine.high %v29_v28, %v45_v13  ;;  %v142_v60 = vld [vmem:[%s8032_s1 + $0x3e8] sm:$0xff] }
 0x1b6   :  { %4340 = vmatpush1.bf16.msra.mxu0 %v5568_v27  ;;  %4422 = vmatpush1.bf16.msra.mxu1 %v5570_v49  ;;  %v61_v27 = vld [vmem:[%s8032_s1 + $0x160] sm:$0xff] }
 0x1b7   :  { %4341 = vmatprep.subr.bf16.mxu0 %v5601_v29  ;;  %4423 = vmatprep.subr.bf16.mxu1 %v5603_v30  ;;  %v77_v49 = vld [vmem:[%s8032_s1 + $0x1e0] sm:$0xff]  ;;  %v62_v29 = vld [vmem:[%s8032_s1 + $0x168] sm:$0xff] }
 0x1b8   :  { %v78_v30 = vld [vmem:[%s8032_s1 + $0x1e8] sm:$0xff]  ;;  %v5189_v33 = vcombine.high %v61_v27, %v77_v49  ;;  %v5188_v14 = vcombine.low %v61_v27, %v77_v49 }
 0x1b9   :  { %v5191_v36 = vcombine.high %v62_v29, %v78_v30  ;;  %v5190_v44 = vcombine.low %v62_v29, %v78_v30  ;;  %v5318_v30 = vcombine.low %v190_v35, %v206_v18 }
 0x1ba   :  { %4342 = vmatpush1.bf16.msra.mxu0 %v5600_v32  ;;  %4424 = vmatpush1.bf16.msra.mxu1 %v5602_v37  ;;  %v93_v32 = vld [vmem:[%s8032_s1 + $0x260] sm:$0xff] }
 0x1bb   :  { %4343 = vmatprep.subr.bf16.mxu0 %v5633_v38  ;;  %4425 = vmatprep.subr.bf16.mxu1 %v5635_v40  ;;  %v109_v37 = vld [vmem:[%s8032_s1 + $0x2e0] sm:$0xff]  ;;  %v7475_v38 = vld [vmem:[%s8033_s0 + $0x8] ss:$0 sps:$4 sm:$0xff]  }
 0x1bc   :  { %v3896_v50 = vpop.f32.mrb[8].mxu0  ;;  %v3978_v57 = vpop.f32.mrb[8].mxu1  ;;  %v94_v40 = vld [vmem:[%s8032_s1 + $0x268] sm:$0xff] }
 0x1bd   :  { %v7417_v56 = vadd.f32 %v3896_v50, %v6883_v22  ;;  %v3898_v59 = vpop.f32.mrb[9].mxu0  ;;  %v7426_v62 = vadd.f32 %v3978_v57, %v6883_v22  ;;  %v3980_v0 = vpop.f32.mrb[9].mxu1  ;;  %v5223_v50 = vcombine.high %v94_v40, %v110_v41 }
 0x1be   :  { %4344 = vmatpush1.bf16.msra.mxu0 %v5632_v45  ;;  %v7429_v63 = vadd.f32 %v3898_v59, %v6883_v22  ;;  %v3900_v1 = vpop.f32.mrb[10].mxu0  ;;  %4426 = vmatpush1.bf16.msra.mxu1 %v5634_v46  ;;  %v7433_v5 = vadd.f32 %v3980_v0, %v6883_v22  ;;  %v3982_v6 = vpop.f32.mrb[10].mxu1  ;;  %v5221_v45 = vcombine.high %v93_v32, %v109_v37  ;;  %v126_v59 = vld [vmem:[%s8032_s1 + $0x368] sm:$0xff] }
 0x1bf   :  { %v4813_v4 = vand.u32 2147483647, %v7417_v56  ;;  %4354 = vmatprep.subr.bf16.mxu0 %v5665_v47  ;;  %v3901_v8 = vpop.f32.mrb[11].mxu0  ;;  %v4815_v10 = vand.u32 2147483647, %v7426_v62  ;;  %4436 = vmatprep.subr.bf16.mxu1 %v5667_v51  ;;  %v3983_v17 = vpop.f32.mrb[11].mxu1  ;;  %v5220_v1 = vcombine.low %v93_v32, %v109_v37  ;;  %v5254_v28 = vcombine.low %v126_v59, %v142_v60 }
 0x1c0   :  { %v4814_v11 = vand.u32 2147483647, %v7429_v63  ;;  %v4816_v34 = vand.u32 2147483647, %v7433_v5  ;;  %v125_v51 = vld [vmem:[%s8032_s1 + $0x360] sm:$0xff]  ;;  %vm5005_vm9 = vcmp.ge.f32.partialorder %v7417_v56, 0.0 }
 0x1c1   :  { %v4845_v15 = vsub.f32 0.0, %v4813_v4  ;;  %4346 = vmatmul.mubr.bf16.vlgmr.msra.gmra.mrb[20].mxu0 %v6204_v16  ;;  %v4847_v19 = vsub.f32 0.0, %v4815_v10  ;;  %4428 = vmatmul.mubr.bf16.vlgmr.msra.gmra.mrb[20].mxu1 %v6204_v16  ;;  %v5222_v4 = vcombine.low %v94_v40, %v110_v41  ;;  %v5253_v6 = vcombine.high %v125_v51, %v141_v52  ;;  %v157_v8 = vld [vmem:[%s8032_s1 + $0x460] sm:$0xff]  ;;  %v158_v10 = vld [vmem:[%s8032_s1 + $0x468] sm:$0xff] }
 0x1c2   :  { %v4846_v20 = vsub.f32 0.0, %v4814_v11  ;;  %4355 = vmatpush1.bf16.msra.mxu0 %v5664_v2  ;;  %v4848_v54 = vsub.f32 0.0, %v4816_v34  ;;  %4437 = vmatpush1.bf16.msra.mxu1 %v5666_v7  ;;  %v5255_v7 = vcombine.high %v126_v59, %v142_v60  ;;  %v174_v11 = vld [vmem:[%s8032_s1 + $0x4e8] sm:$0xff]  ;;  %v189_v34 = vld [vmem:[%s8032_s1 + $0x560] sm:$0xff]  ;;  %vm5007_vm10 = vcmp.ge.f32.partialorder %v7426_v62, 0.0 }
 0x1c3   :  { %v4885_v21 = vmul.f32 1.442695, %v4845_v15  ;;  %4356 = vmatprep.subr.bf16.mxu0 %v5697_v9  ;;  %v4889_v43 = vmul.f32 1.442695, %v4847_v19  ;;  %4438 = vmatprep.subr.bf16.mxu1 %v5699_v12  ;;  %v173_v9 = vld [vmem:[%s8032_s1 + $0x4e0] sm:$0xff]  ;;  %v5252_v12 = vcombine.low %v125_v51, %v141_v52  ;;  %v5287_v15 = vcombine.high %v158_v10, %v174_v11  ;;  %v286_v51 = vld [vmem:[%s8032_s1 + $0x868] sm:$0xff] }
 0x1c4   :  { %v4887_v25 = vmul.f32 1.442695, %v4846_v20  ;;  %4386 = vmatprep.mubr.bf16.mxu0 %v5956_v3  ;;  %v4891_v48 = vmul.f32 1.442695, %v4848_v54  ;;  %4468 = vmatprep.mubr.bf16.mxu1 %v5956_v3  ;;  %v5285_v13 = vcombine.high %v157_v8, %v173_v9  ;;  %v205_v17 = vld [vmem:[%s8032_s1 + $0x5e0] sm:$0xff]  ;;  %v5284_v19 = vcombine.low %v157_v8, %v173_v9  ;;  %v302_v52 = vld [vmem:[%s8032_s1 + $0x8e8] sm:$0xff] }
 0x1c5   :  { %5857 = vpow2.f32 %v4885_v21  ;;  %v5286_v20 = vcombine.low %v158_v10, %v174_v11  ;;  %v5319_v54 = vcombine.high %v190_v35, %v206_v18  ;;  %v5316_v29 = vcombine.low %v189_v34, %v205_v17  ;;  %v253_v40 = vld [vmem:[%s8032_s1 + $0x760] sm:$0xff]  ;;  %v350_v11 = vld [vmem:[%s8032_s1 + $0xa68] sm:$0xff] }
 0x1c6   :  { %5859 = vpow2.f32 %v4889_v43  ;;  %4357 = vmatpush1.bf16.msra.mxu0 %v5696_v39  ;;  %4439 = vmatpush1.bf16.msra.mxu1 %v5698_v23  ;;  %v5317_v39 = vcombine.high %v189_v34, %v205_v17  ;;  %v221_v23 = vld [vmem:[%s8032_s1 + $0x660] sm:$0xff]  ;;  %vm5006_vm11 = vcmp.ge.f32.partialorder %v7429_v63, 0.0  ;;  %vm5008_vm12 = vcmp.ge.f32.partialorder %v7433_v5, 0.0  ;;  %v254_v63 = vld [vmem:[%s8032_s1 + $0x768] sm:$0xff] }
 0x1c7   :  { %5861 = vpow2.f32 %v4887_v25  ;;  %4477 = vmatprep.subr.bf16.mxu0 %v5157_v24  ;;  %4559 = vmatprep.subr.bf16.mxu1 %v5159_v26  ;;  %v237_v24 = vld [vmem:[%s8032_s1 + $0x6e0] sm:$0xff]  ;;  %v222_v26 = vld [vmem:[%s8032_s1 + $0x668] sm:$0xff]  ;;  %v5415_v60 = vcombine.high %v286_v51, %v302_v52 }
 0x1c8   :  { %5863 = vpow2.f32 %v4891_v48  ;;  %v238_v48 = vld [vmem:[%s8032_s1 + $0x6e8] sm:$0xff]  ;;  %v269_v62 = vld [vmem:[%s8032_s1 + $0x7e0] sm:$0xff] }
 0x1c9   :  { %v5351_v37 = vcombine.high %v222_v26, %v238_v48  ;;  %v5350_v5 = vcombine.low %v222_v26, %v238_v48  ;;  %v349_v9 = vld [vmem:[%s8032_s1 + $0xa60] sm:$0xff]  ;;  %v382_v18 = vld [vmem:[%s8032_s1 + $0xb68] sm:$0xff] }
 0x1ca   :  { %v365_v10 = vld [vmem:[%s8032_s1 + $0xae0] sm:$0xff] }
 0x1cb   :  { %v381_v17 = vld [vmem:[%s8032_s1 + $0xb60] sm:$0xff] }
 0x1cc   :  { %v397_v35 = vld [vmem:[%s8032_s1 + $0xbe0] sm:$0xff] }
 0x1cd   :  { %5718 = vmatmul.mubr.msk.bf16.vlgmr.msra.gmra.mrb[20].mxu0 %vm3489_vm0, %v7475_v38  ;;  %5719 = vmatmul.mubr.msk.bf16.vlgmr.msra.gmra.mrb[20].mxu1 %vm3489_vm0, %v7475_v38  ;;  %v5508_v26 = vcombine.low %v381_v17, %v397_v35 }
 0x1ce   :  { %4478 = vmatpush1.bf16.msra.mxu0 %v5156_v31  ;;  %4560 = vmatpush1.bf16.msra.mxu1 %v5158_v55 }
 0x1cf   :  { %v5858_v42 = vpop.eup %5857  ;;  %4479 = vmatprep.subr.bf16.mxu0 %v5189_v33  ;;  %4561 = vmatprep.subr.bf16.mxu1 %v5191_v36  ;;  %v5349_v36 = vcombine.high %v221_v23, %v237_v24 }
 0x1d0   :  { %v5860_v46 = vpop.eup %5859  ;;  %v4941_v47 = vadd.f32 1.0, %v5858_v42  ;;  %4509 = vmatprep.mubr.bf16.mxu0 %v6075_v58  ;;  %4591 = vmatprep.mubr.bf16.mxu1 %v6075_v58 }
 0x1d1   :  { %v5862_v53 = vpop.eup %5861  ;;  %v4943_v57 = vadd.f32 1.0, %v5860_v46 }
 0x1d2   :  { %v5864_v61 = vpop.eup %5863  ;;  %5865 = vrcp.f32 %v4941_v47  ;;  %v4942_v0 = vadd.f32 1.0, %v5862_v53  ;;  %4480 = vmatpush1.bf16.msra.mxu0 %v5188_v14  ;;  %4562 = vmatpush1.bf16.msra.mxu1 %v5190_v44  ;;  %v270_v14 = vld [vmem:[%s8032_s1 + $0x7e8] sm:$0xff]  ;;  %v5348_v44 = vcombine.low %v221_v23, %v237_v24  ;;  %v285_v47 = vld [vmem:[%s8032_s1 + $0x860] sm:$0xff] }
 0x1d3   :  { %5867 = vrcp.f32 %v4943_v57  ;;  %v4944_v2 = vadd.f32 1.0, %v5864_v61  ;;  %4481 = vmatprep.subr.bf16.mxu0 %v5221_v45  ;;  %4563 = vmatprep.subr.bf16.mxu1 %v5223_v50  ;;  %v5381_v45 = vcombine.high %v253_v40, %v269_v62  ;;  %v301_v50 = vld [vmem:[%s8032_s1 + $0x8e0] sm:$0xff]  ;;  %v5382_v57 = vcombine.low %v254_v63, %v270_v14 }
 0x1d4   :  { %5869 = vrcp.f32 %v4942_v0  ;;  %v5413_v59 = vcombine.high %v285_v47, %v301_v50  ;;  %v333_v0 = vld [vmem:[%s8032_s1 + $0x9e0] sm:$0xff] }
 0x1d5   :  { %5871 = vrcp.f32 %v4944_v2  ;;  %v334_v2 = vld [vmem:[%s8032_s1 + $0x9e8] sm:$0xff]  ;;  %v413_v23 = vld [vmem:[%s8032_s1 + $0xc60] sm:$0xff] }
 0x1d6   :  { %4482 = vmatpush1.bf16.msra.mxu0 %v5220_v1  ;;  %4564 = vmatpush1.bf16.msra.mxu1 %v5222_v4  ;;  %v318_v1 = vld [vmem:[%s8032_s1 + $0x968] sm:$0xff]  ;;  %v5412_v4 = vcombine.low %v285_v47, %v301_v50  ;;  %v429_v24 = vld [vmem:[%s8032_s1 + $0xce0] sm:$0xff] }
 0x1d7   :  { %4483 = vmatprep.subr.bf16.mxu0 %v5253_v6  ;;  %4565 = vmatprep.subr.bf16.mxu1 %v5255_v7  ;;  %v5414_v6 = vcombine.low %v286_v51, %v302_v52  ;;  %v5447_v8 = vcombine.high %v318_v1, %v334_v2  ;;  %v526_v47 = vld [vmem:[%s8032_s1 + $0xfe8] sm:$0xff] }
 0x1da   :  { %4484 = vmatpush1.bf16.msra.mxu0 %v5252_v12  ;;  %4566 = vmatpush1.bf16.msra.mxu1 %v5254_v28  ;;  %v366_v12 = vld [vmem:[%s8032_s1 + $0xae8] sm:$0xff] }
 0x1db   :  { %4485 = vmatprep.subr.bf16.mxu0 %v5285_v13  ;;  %4567 = vmatprep.subr.bf16.mxu1 %v5287_v15  ;;  %v5446_v13 = vcombine.low %v318_v1, %v334_v2  ;;  %v5477_v15 = vcombine.high %v349_v9, %v365_v10  ;;  %v5479_v34 = vcombine.high %v350_v11, %v366_v12 }
 0x1dc   :  { %v5866_v21 = vpop.eup %5865 }
 0x1dd   :  { %v5868_v43 = vpop.eup %5867  ;;  %v5037_v25 = vmul.f32 %v5866_v21, %v5858_v42 }
 0x1de   :  { %v5870_v27 = vpop.eup %5869  ;;  %v5039_v49 = vmul.f32 %v5868_v43, %v5860_v46  ;;  %4486 = vmatpush1.bf16.msra.mxu0 %v5284_v19  ;;  %4568 = vmatpush1.bf16.msra.mxu1 %v5286_v20  ;;  %v5383_v46 = vcombine.high %v254_v63, %v270_v14  ;;  %v398_v19 = vld [vmem:[%s8032_s1 + $0xbe8] sm:$0xff]  ;;  %v5476_v20 = vcombine.low %v349_v9, %v365_v10 }
 0x1df   :  { %v5872_v31 = vpop.eup %5871  ;;  %v5069_v55 = vsel %vm5005_vm9, %v5866_v21, %v5037_v25  ;;  %v5038_v33 = vmul.f32 %v5870_v27, %v5862_v53  ;;  %4487 = vmatprep.subr.bf16.mxu0 %v5317_v39  ;;  %4569 = vmatprep.subr.bf16.mxu1 %v5319_v54  ;;  %v5380_v53 = vcombine.low %v253_v40, %v269_v62  ;;  %v430_v25 = vld [vmem:[%s8032_s1 + $0xce8] sm:$0xff]  ;;  %v493_v40 = vld [vmem:[%s8032_s1 + $0xee0] sm:$0xff] }
 0x1e0   :  { %5101 = vst [vmem:[%s8035_s3 + $0x40] sm:$0xff] %v5069_v55  ;;  %v5071_v32 = vsel %vm5007_vm10, %v5868_v43, %v5039_v49  ;;  %v5040_v56 = vmul.f32 %v5872_v31, %v5864_v61  ;;  %v317_v61 = vld [vmem:[%s8032_s1 + $0x960] sm:$0xff]  ;;  %v5478_v39 = vcombine.low %v350_v11, %v366_v12  ;;  %v5509_v21 = vcombine.high %v381_v17, %v397_v35  ;;  %v414_v43 = vld [vmem:[%s8032_s1 + $0xc68] sm:$0xff] }
 0x1e1   :  { %5103 = vst [vmem:[%s8035_s3 + $0x50] sm:$0xff] %v5071_v32  ;;  %v5070_v41 = vsel %vm5006_vm11, %v5870_v27, %v5038_v33  ;;  %v5445_v7 = vcombine.high %v317_v61, %v333_v0  ;;  %v5444_v28 = vcombine.low %v317_v61, %v333_v0  ;;  %v5511_v54 = vcombine.high %v382_v18, %v398_v19  ;;  %v462_v55 = vld [vmem:[%s8032_s1 + $0xde8] sm:$0xff] }
 0x1e2   :  { %5102 = vst [vmem:[%s8035_s3 + $0x48] sm:$0xff] %v5070_v41  ;;  %v5072_v42 = vsel %vm5008_vm12, %v5872_v31, %v5040_v56  ;;  %4488 = vmatpush1.bf16.msra.mxu0 %v5316_v29  ;;  %4570 = vmatpush1.bf16.msra.mxu1 %v5318_v30  ;;  %v5510_v48 = vcombine.low %v382_v18, %v398_v19  ;;  %v445_v29 = vld [vmem:[%s8032_s1 + $0xd60] sm:$0xff]  ;;  %v446_v31 = vld [vmem:[%s8032_s1 + $0xd68] sm:$0xff] }
 0x1e3   :  { %5104 = vst [vmem:[%s8035_s3 + $0x58] sm:$0xff] %v5072_v42  ;;  %4489 = vmatprep.subr.bf16.mxu0 %v5349_v36  ;;  %4571 = vmatprep.subr.bf16.mxu1 %v5351_v37  ;;  %v5541_v27 = vcombine.high %v413_v23, %v429_v24  ;;  %v5543_v49 = vcombine.high %v414_v43, %v430_v25  ;;  %v461_v30 = vld [vmem:[%s8032_s1 + $0xde0] sm:$0xff]  ;;  %v478_v62 = vld [vmem:[%s8032_s1 + $0xe68] sm:$0xff] }
 0x1e4   :  { %v5540_v33 = vcombine.low %v413_v23, %v429_v24  ;;  %v5542_v36 = vcombine.low %v414_v43, %v430_v25  ;;  %v5573_v32 = vcombine.high %v445_v29, %v461_v30  ;;  %v5575_v56 = vcombine.high %v446_v31, %v462_v55  ;;  %v477_v37 = vld [vmem:[%s8032_s1 + $0xe60] sm:$0xff]  ;;  %v494_v41 = vld [vmem:[%s8032_s1 + $0xee8] sm:$0xff]  ;;  %v31_v25 = vld [vmem:[%s8032_s1 + $0x70] sm:$0xff] }
 0x1e5   :  { %v5572_v63 = vcombine.low %v445_v29, %v461_v30  ;;  %v5574_v14 = vcombine.low %v446_v31, %v462_v55  ;;  %v5605_v42 = vcombine.high %v477_v37, %v493_v40  ;;  %v5604_v50 = vcombine.low %v477_v37, %v493_v40  ;;  %v558_v61 = vld [vmem:[%s8032_s1 + $0x10e8] sm:$0xff]  ;;  %v32_v29 = vld [vmem:[%s8032_s1 + $0x78] sm:$0xff] }
 0x1e6   :  { %4490 = vmatpush1.bf16.msra.mxu0 %v5348_v44  ;;  %4572 = vmatpush1.bf16.msra.mxu1 %v5350_v5  ;;  %v5607_v44 = vcombine.high %v478_v62, %v494_v41  ;;  %v509_v5 = vld [vmem:[%s8032_s1 + $0xf60] sm:$0xff]  ;;  %v5606_v51 = vcombine.low %v478_v62, %v494_v41  ;;  %v574_v12 = vld [vmem:[%s8032_s1 + $0x1168] sm:$0xff]  ;;  %v48_v30 = vld [vmem:[%s8032_s1 + $0xf8] sm:$0xff] }
 0x1e7   :  { %4491 = vmatprep.subr.bf16.mxu0 %v5381_v45  ;;  %4573 = vmatprep.subr.bf16.mxu1 %v5383_v46  ;;  %v525_v45 = vld [vmem:[%s8032_s1 + $0xfe0] sm:$0xff]  ;;  %v510_v46 = vld [vmem:[%s8032_s1 + $0xf68] sm:$0xff]  ;;  %v5163_v41 = vcombine.high %v32_v29, %v48_v30 }
 0x1e8   :  { %v5637_v52 = vcombine.high %v509_v5, %v525_v45  ;;  %v5636_v0 = vcombine.low %v509_v5, %v525_v45  ;;  %v5638_v1 = vcombine.low %v510_v46, %v526_v47  ;;  %v80_v5 = vld [vmem:[%s8032_s1 + $0x1f8] sm:$0xff] }
 0x1ea   :  { %4492 = vmatpush1.bf16.msra.mxu0 %v5380_v53  ;;  %4574 = vmatpush1.bf16.msra.mxu1 %v5382_v57  ;;  %v5639_v53 = vcombine.high %v510_v46, %v526_v47  ;;  %v541_v57 = vld [vmem:[%s8032_s1 + $0x1060] sm:$0xff]  ;;  %v5162_v46 = vcombine.low %v32_v29, %v48_v30 }
 0x1eb   :  { %4493 = vmatprep.subr.bf16.mxu0 %v5413_v59  ;;  %4575 = vmatprep.subr.bf16.mxu1 %v5415_v60  ;;  %v557_v59 = vld [vmem:[%s8032_s1 + $0x10e0] sm:$0xff]  ;;  %v542_v60 = vld [vmem:[%s8032_s1 + $0x1068] sm:$0xff] }
 0x1ec   :  { %v5669_v2 = vcombine.high %v541_v57, %v557_v59  ;;  %v5668_v35 = vcombine.low %v541_v57, %v557_v59  ;;  %v112_v57 = vld [vmem:[%s8032_s1 + $0x2f8] sm:$0xff] }
 0x1ee   :  { %4494 = vmatpush1.bf16.msra.mxu0 %v5412_v4  ;;  %4576 = vmatpush1.bf16.msra.mxu1 %v5414_v6  ;;  %v5671_v6 = vcombine.high %v542_v60, %v558_v61 }
 0x1ef   :  { %4495 = vmatprep.subr.bf16.mxu0 %v5445_v7  ;;  %4577 = vmatprep.subr.bf16.mxu1 %v5447_v8  ;;  %v573_v7 = vld [vmem:[%s8032_s1 + $0x1160] sm:$0xff] }
 0x1f0   :  { %v589_v8 = vld [vmem:[%s8032_s1 + $0x11e0] sm:$0xff] }
 0x1f2   :  { %4496 = vmatpush1.bf16.msra.mxu0 %v5444_v28  ;;  %4578 = vmatpush1.bf16.msra.mxu1 %v5446_v13  ;;  %v590_v28 = vld [vmem:[%s8032_s1 + $0x11e8] sm:$0xff] }
 0x1f3   :  { %4497 = vmatprep.subr.bf16.mxu0 %v5477_v15  ;;  %4579 = vmatprep.subr.bf16.mxu1 %v5479_v34  ;;  %v5703_v43 = vcombine.high %v574_v12, %v590_v28 }
 0x1f6   :  { %4498 = vmatpush1.bf16.msra.mxu0 %v5476_v20  ;;  %4580 = vmatpush1.bf16.msra.mxu1 %v5478_v39  ;;  %v5670_v39 = vcombine.low %v542_v60, %v558_v61 }
 0x1f7   :  { %4499 = vmatprep.subr.bf16.mxu0 %v5509_v21  ;;  %4581 = vmatprep.subr.bf16.mxu1 %v5511_v54  ;;  %v5701_v54 = vcombine.high %v573_v7, %v589_v8 }
 0x1fa   :  { %4500 = vmatpush1.bf16.msra.mxu0 %v5508_v26  ;;  %4582 = vmatpush1.bf16.msra.mxu1 %v5510_v48  ;;  %v47_v26 = vld [vmem:[%s8032_s1 + $0xf0] sm:$0xff] }
 0x1fb   :  { %4501 = vmatprep.subr.bf16.mxu0 %v5541_v27  ;;  %4583 = vmatprep.subr.bf16.mxu1 %v5543_v49  ;;  %v5161_v37 = vcombine.high %v31_v25, %v47_v26  ;;  %v5160_v45 = vcombine.low %v31_v25, %v47_v26  ;;  %v191_v26 = vld [vmem:[%s8032_s1 + $0x570] sm:$0xff] }
 0x1fe   :  { %4502 = vmatpush1.bf16.msra.mxu0 %v5540_v33  ;;  %4584 = vmatpush1.bf16.msra.mxu1 %v5542_v36  ;;  %v5700_v33 = vcombine.low %v573_v7, %v589_v8  ;;  %v143_v7 = vld [vmem:[%s8032_s1 + $0x3f0] sm:$0xff] }
 0x1ff   :  { %4503 = vmatprep.subr.bf16.mxu0 %v5573_v32  ;;  %4585 = vmatprep.subr.bf16.mxu1 %v5575_v56  ;;  %v5702_v56 = vcombine.low %v574_v12, %v590_v28 }
 0x202   :  { %4504 = vmatpush1.bf16.msra.mxu0 %v5572_v63  ;;  %4586 = vmatpush1.bf16.msra.mxu1 %v5574_v14  ;;  %v63_v14 = vld [vmem:[%s8032_s1 + $0x170] sm:$0xff] }
 0x203   :  { %4505 = vmatprep.subr.bf16.mxu0 %v5605_v42  ;;  %4587 = vmatprep.subr.bf16.mxu1 %v5607_v44  ;;  %v79_v42 = vld [vmem:[%s8032_s1 + $0x1f0] sm:$0xff]  ;;  %v64_v44 = vld [vmem:[%s8032_s1 + $0x178] sm:$0xff] }
 0x204   :  { %v5193_v47 = vcombine.high %v63_v14, %v79_v42  ;;  %v5192_v59 = vcombine.low %v63_v14, %v79_v42  ;;  %v5194_v61 = vcombine.low %v64_v44, %v80_v5 }
 0x206   :  { %4506 = vmatpush1.bf16.msra.mxu0 %v5604_v50  ;;  %4588 = vmatpush1.bf16.msra.mxu1 %v5606_v51  ;;  %v5195_v50 = vcombine.high %v64_v44, %v80_v5  ;;  %v95_v51 = vld [vmem:[%s8032_s1 + $0x270] sm:$0xff] }
 0x207   :  { %4507 = vmatprep.subr.bf16.mxu0 %v5637_v52  ;;  %4589 = vmatprep.subr.bf16.mxu1 %v5639_v53  ;;  %v111_v52 = vld [vmem:[%s8032_s1 + $0x2f0] sm:$0xff]  ;;  %v96_v53 = vld [vmem:[%s8032_s1 + $0x278] sm:$0xff] }
 0x208   :  { %v4060_v4 = vpop.f32.mrb[12].mxu0  ;;  %v4142_v10 = vpop.f32.mrb[12].mxu1 }
 0x209   :  { %v7680_v9 = vadd.f32 %v4060_v4, %v6883_v22  ;;  %v4062_v11 = vpop.f32.mrb[13].mxu0  ;;  %v7689_v13 = vadd.f32 %v4142_v10, %v6883_v22  ;;  %v4144_v34 = vpop.f32.mrb[13].mxu1  ;;  %v5227_v4 = vcombine.high %v96_v53, %v112_v57  ;;  %v128_v10 = vld [vmem:[%s8032_s1 + $0x378] sm:$0xff] }
 0x20a   :  { %4508 = vmatpush1.bf16.msra.mxu0 %v5636_v0  ;;  %v7692_v15 = vadd.f32 %v4062_v11, %v6883_v22  ;;  %v4064_v17 = vpop.f32.mrb[14].mxu0  ;;  %4590 = vmatpush1.bf16.msra.mxu1 %v5638_v1  ;;  %v7696_v19 = vadd.f32 %v4144_v34, %v6883_v22  ;;  %v4146_v20 = vpop.f32.mrb[14].mxu1  ;;  %v5225_v0 = vcombine.high %v95_v51, %v111_v52  ;;  %v144_v11 = vld [vmem:[%s8032_s1 + $0x3f8] sm:$0xff] }
 0x20b   :  { %v4817_v18 = vand.u32 2147483647, %v7680_v9  ;;  %4518 = vmatprep.subr.bf16.mxu0 %v5669_v2  ;;  %v4065_v21 = vpop.f32.mrb[15].mxu0  ;;  %v4819_v23 = vand.u32 2147483647, %v7689_v13  ;;  %4600 = vmatprep.subr.bf16.mxu1 %v5671_v6  ;;  %v4147_v49 = vpop.f32.mrb[15].mxu1  ;;  %v5224_v34 = vcombine.low %v95_v51, %v111_v52  ;;  %v5259_v20 = vcombine.high %v128_v10, %v144_v11 }
 0x20c   :  { %v4818_v24 = vand.u32 2147483647, %v7692_v15  ;;  %v4820_v27 = vand.u32 2147483647, %v7696_v19  ;;  %v127_v6 = vld [vmem:[%s8032_s1 + $0x370] sm:$0xff]  ;;  %v160_v21 = vld [vmem:[%s8032_s1 + $0x478] sm:$0xff] }
 0x20d   :  { %v4849_v48 = vsub.f32 0.0, %v4817_v18  ;;  %4510 = vmatmul.mubr.bf16.vlgmr.msra.gmra.mrb[24].mxu0 %v6204_v16  ;;  %v4851_v31 = vsub.f32 0.0, %v4819_v23  ;;  %4592 = vmatmul.mubr.bf16.vlgmr.msra.gmra.mrb[24].mxu1 %v6204_v16  ;;  %v5257_v18 = vcombine.high %v127_v6, %v143_v7  ;;  %v5256_v23 = vcombine.low %v127_v6, %v143_v7  ;;  %v208_v49 = vld [vmem:[%s8032_s1 + $0x5f8] sm:$0xff]  ;;  %v255_v51 = vld [vmem:[%s8032_s1 + $0x770] sm:$0xff] }
 0x20e   :  { %v4850_v55 = vsub.f32 0.0, %v4818_v24  ;;  %4519 = vmatpush1.bf16.msra.mxu0 %v5668_v35  ;;  %v4852_v32 = vsub.f32 0.0, %v4820_v27  ;;  %4601 = vmatpush1.bf16.msra.mxu1 %v5670_v39  ;;  %v5226_v35 = vcombine.low %v96_v53, %v112_v57  ;;  %v159_v39 = vld [vmem:[%s8032_s1 + $0x470] sm:$0xff]  ;;  %v5258_v24 = vcombine.low %v128_v10, %v144_v11  ;;  %v192_v27 = vld [vmem:[%s8032_s1 + $0x578] sm:$0xff] }
 0x20f   :  { %v4893_v36 = vmul.f32 1.442695, %v4849_v48  ;;  %4520 = vmatprep.subr.bf16.mxu0 %v5701_v54  ;;  %v4897_v40 = vmul.f32 1.442695, %v4851_v31  ;;  %4602 = vmatprep.subr.bf16.mxu1 %v5703_v43  ;;  %v176_v54 = vld [vmem:[%s8032_s1 + $0x4f8] sm:$0xff]  ;;  %v207_v48 = vld [vmem:[%s8032_s1 + $0x5f0] sm:$0xff]  ;;  %v5322_v42 = vcombine.low %v192_v27, %v208_v49 }
 0x210   :  { %v4895_v62 = vmul.f32 1.442695, %v4850_v55  ;;  %4550 = vmatprep.mubr.bf16.mxu0 %v5956_v3  ;;  %v4899_v63 = vmul.f32 1.442695, %v4852_v32  ;;  %4632 = vmatprep.mubr.bf16.mxu1 %v5956_v3  ;;  %v5291_v25 = vcombine.high %v160_v21, %v176_v54  ;;  %v5290_v30 = vcombine.low %v160_v21, %v176_v54  ;;  %v239_v32 = vld [vmem:[%s8032_s1 + $0x6f0] sm:$0xff]  ;;  %v272_v53 = vld [vmem:[%s8032_s1 + $0x7f8] sm:$0xff] }
 0x211   :  { %5873 = vpow2.f32 %v4893_v36  ;;  %v5321_v31 = vcombine.high %v191_v26, %v207_v48  ;;  %v223_v36 = vld [vmem:[%s8032_s1 + $0x670] sm:$0xff]  ;;  %vm5009_vm13 = vcmp.ge.f32.partialorder %v7680_v9, 0.0  ;;  %v5320_v14 = vcombine.low %v191_v26, %v207_v48  ;;  %v368_v21 = vld [vmem:[%s8032_s1 + $0xaf8] sm:$0xff] }
 0x212   :  { %5875 = vpow2.f32 %v4897_v40  ;;  %4521 = vmatpush1.bf16.msra.mxu0 %v5700_v33  ;;  %4603 = vmatpush1.bf16.msra.mxu1 %v5702_v56  ;;  %v5323_v33 = vcombine.high %v192_v27, %v208_v49  ;;  %v224_v40 = vld [vmem:[%s8032_s1 + $0x678] sm:$0xff]  ;;  %vm5011_vm14 = vcmp.ge.f32.partialorder %v7689_v13, 0.0  ;;  %vm5010_vm15 = vcmp.ge.f32.partialorder %v7692_v15, 0.0  ;;  %v271_v13 = vld [vmem:[%s8032_s1 + $0x7f0] sm:$0xff] }
 0x213   :  { %5877 = vpow2.f32 %v4895_v62  ;;  %4641 = vmatprep.subr.bf16.mxu0 %v5161_v37  ;;  %4723 = vmatprep.subr.bf16.mxu1 %v5163_v41  ;;  %v240_v62 = vld [vmem:[%s8032_s1 + $0x6f8] sm:$0xff]  ;;  %vm5012_vm1 = vcmp.ge.f32.partialorder %v7696_v19, 0.0  ;;  %v5384_v6 = vcombine.low %v255_v51, %v271_v13  ;;  %v319_v10 = vld [vmem:[%s8032_s1 + $0x970] sm:$0xff] }
 0x214   :  { %5879 = vpow2.f32 %v4899_v63  ;;  %v256_v15 = vld [vmem:[%s8032_s1 + $0x778] sm:$0xff]  ;;  %v5354_v19 = vcombine.low %v224_v40, %v240_v62  ;;  %v335_v11 = vld [vmem:[%s8032_s1 + $0x9f0] sm:$0xff] }
 0x215   :  { %v5386_v7 = vcombine.low %v256_v15, %v272_v53  ;;  %v5448_v54 = vcombine.low %v319_v10, %v335_v11  ;;  %v399_v26 = vld [vmem:[%s8032_s1 + $0xbf0] sm:$0xff]  ;;  %v384_v48 = vld [vmem:[%s8032_s1 + $0xb78] sm:$0xff] }
 0x216   :  { %v400_v27 = vld [vmem:[%s8032_s1 + $0xbf8] sm:$0xff] }
 0x219   :  { %5720 = vmatmul.mubr.msk.bf16.vlgmr.msra.gmra.mrb[24].mxu0 %vm3489_vm0, %v7475_v38  ;;  %5721 = vmatmul.mubr.msk.bf16.vlgmr.msra.gmra.mrb[24].mxu1 %vm3489_vm0, %v7475_v38 }
 0x21a   :  { %4642 = vmatpush1.bf16.msra.mxu0 %v5160_v45  ;;  %4724 = vmatpush1.bf16.msra.mxu1 %v5162_v46  ;;  %v5353_v46 = vcombine.high %v223_v36, %v239_v32 }
 0x21b   :  { %v5874_v60 = vpop.eup %5873  ;;  %4643 = vmatprep.subr.bf16.mxu0 %v5193_v47  ;;  %4725 = vmatprep.subr.bf16.mxu1 %v5195_v50  ;;  %v5355_v50 = vcombine.high %v224_v40, %v240_v62 }
 0x21c   :  { %v5876_v1 = vpop.eup %5875  ;;  %v4945_v2 = vadd.f32 1.0, %v5874_v60  ;;  %4673 = vmatprep.mubr.bf16.mxu0 %v6075_v58  ;;  %4755 = vmatprep.mubr.bf16.mxu1 %v6075_v58  ;;  %v175_v58 = vld [vmem:[%s8032_s1 + $0x4f0] sm:$0xff] }
 0x21d   :  { %v5878_v38 = vpop.eup %5877  ;;  %v4947_v8 = vadd.f32 1.0, %v5876_v1  ;;  %v5289_v43 = vcombine.high %v159_v39, %v175_v58  ;;  %v5288_v29 = vcombine.low %v159_v39, %v175_v58  ;;  %v367_v39 = vld [vmem:[%s8032_s1 + $0xaf0] sm:$0xff]  ;;  %v352_v58 = vld [vmem:[%s8032_s1 + $0xa78] sm:$0xff] }
 0x21e   :  { %v5880_v12 = vpop.eup %5879  ;;  %5881 = vrcp.f32 %v4945_v2  ;;  %v4946_v28 = vadd.f32 1.0, %v5878_v38  ;;  %4644 = vmatpush1.bf16.msra.mxu0 %v5192_v59  ;;  %4726 = vmatpush1.bf16.msra.mxu1 %v5194_v61  ;;  %v5352_v59 = vcombine.low %v223_v36, %v239_v32  ;;  %v5387_v61 = vcombine.high %v256_v15, %v272_v53  ;;  %v288_v2 = vld [vmem:[%s8032_s1 + $0x878] sm:$0xff] }
 0x21f   :  { %5883 = vrcp.f32 %v4947_v8  ;;  %v4948_v17 = vadd.f32 1.0, %v5880_v12  ;;  %4645 = vmatprep.subr.bf16.mxu0 %v5225_v0  ;;  %4727 = vmatprep.subr.bf16.mxu1 %v5227_v4  ;;  %v287_v0 = vld [vmem:[%s8032_s1 + $0x870] sm:$0xff]  ;;  %v304_v4 = vld [vmem:[%s8032_s1 + $0x8f8] sm:$0xff] }
 0x220   :  { %5885 = vrcp.f32 %v4946_v28  ;;  %v5419_v8 = vcombine.high %v288_v2, %v304_v4  ;;  %v336_v28 = vld [vmem:[%s8032_s1 + $0x9f8] sm:$0xff] }
 0x221   :  { %5887 = vrcp.f32 %v4948_v17  ;;  %v5418_v17 = vcombine.low %v288_v2, %v304_v4  ;;  %v416_v36 = vld [vmem:[%s8032_s1 + $0xc78] sm:$0xff]  ;;  %v543_v4 = vld [vmem:[%s8032_s1 + $0x1070] sm:$0xff] }
 0x222   :  { %4646 = vmatpush1.bf16.msra.mxu0 %v5224_v34  ;;  %4728 = vmatpush1.bf16.msra.mxu1 %v5226_v35  ;;  %v5449_v35 = vcombine.high %v319_v10, %v335_v11  ;;  %v432_v32 = vld [vmem:[%s8032_s1 + $0xcf8] sm:$0xff] }
 0x223   :  { %4647 = vmatprep.subr.bf16.mxu0 %v5257_v18  ;;  %4729 = vmatprep.subr.bf16.mxu1 %v5259_v20  ;;  %v351_v20 = vld [vmem:[%s8032_s1 + $0xa70] sm:$0xff]  ;;  %v5547_v62 = vcombine.high %v416_v36, %v432_v32 }
 0x224   :  { %v5480_v49 = vcombine.low %v351_v20, %v367_v39 }
 0x226   :  { %4648 = vmatpush1.bf16.msra.mxu0 %v5256_v23  ;;  %4730 = vmatpush1.bf16.msra.mxu1 %v5258_v24  ;;  %v5481_v24 = vcombine.high %v351_v20, %v367_v39  ;;  %v576_v39 = vld [vmem:[%s8032_s1 + $0x1178] sm:$0xff] }
 0x227   :  { %4649 = vmatprep.subr.bf16.mxu0 %v5289_v43  ;;  %4731 = vmatprep.subr.bf16.mxu1 %v5291_v25  ;;  %v5483_v43 = vcombine.high %v352_v58, %v368_v21  ;;  %v383_v25 = vld [vmem:[%s8032_s1 + $0xb70] sm:$0xff] }
 0x228   :  { %v5882_v55 = vpop.eup %5881 }
 0x229   :  { %v5884_v56 = vpop.eup %5883  ;;  %v5041_v37 = vmul.f32 %v5882_v55, %v5874_v60  ;;  %v5385_v60 = vcombine.high %v255_v51, %v271_v13  ;;  %v496_v51 = vld [vmem:[%s8032_s1 + $0xef8] sm:$0xff] }
 0x22a   :  { %v5886_v41 = vpop.eup %5885  ;;  %v5043_v63 = vmul.f32 %v5884_v56, %v5876_v1  ;;  %4650 = vmatpush1.bf16.msra.mxu0 %v5288_v29  ;;  %4732 = vmatpush1.bf16.msra.mxu1 %v5290_v30  ;;  %v303_v1 = vld [vmem:[%s8032_s1 + $0x8f0] sm:$0xff]  ;;  %v5482_v29 = vcombine.low %v352_v58, %v368_v21  ;;  %v5513_v30 = vcombine.high %v383_v25, %v399_v26  ;;  %v592_v58 = vld [vmem:[%s8032_s1 + $0x11f8] sm:$0xff] }
 0x22b   :  { %v5888_v44 = vpop.eup %5887  ;;  %v5073_v5 = vsel %vm5009_vm13, %v5882_v55, %v5041_v37  ;;  %v5042_v45 = vmul.f32 %v5886_v41, %v5878_v38  ;;  %4651 = vmatprep.subr.bf16.mxu0 %v5321_v31  ;;  %4733 = vmatprep.subr.bf16.mxu1 %v5323_v33  ;;  %v5417_v38 = vcombine.high %v287_v0, %v303_v1  ;;  %v415_v55 = vld [vmem:[%s8032_s1 + $0xc70] sm:$0xff] }
 0x22c   :  { %5105 = vst [vmem:[%s8035_s3 + $0x60] sm:$0xff] %v5073_v5  ;;  %v5075_v47 = vsel %vm5011_vm14, %v5884_v56, %v5043_v63  ;;  %v5044_v9 = vmul.f32 %v5888_v44, %v5880_v12  ;;  %v320_v12 = vld [vmem:[%s8032_s1 + $0x978] sm:$0xff]  ;;  %v5416_v34 = vcombine.low %v287_v0, %v303_v1  ;;  %v5515_v31 = vcombine.high %v384_v48, %v400_v27  ;;  %v431_v33 = vld [vmem:[%s8032_s1 + $0xcf0] sm:$0xff] }
 0x22d   :  { %5107 = vst [vmem:[%s8035_s3 + $0x70] sm:$0xff] %v5075_v47  ;;  %v5074_v52 = vsel %vm5010_vm15, %v5886_v41, %v5042_v45  ;;  %v5451_v18 = vcombine.high %v320_v12, %v336_v28  ;;  %v5450_v23 = vcombine.low %v320_v12, %v336_v28  ;;  %v5512_v56 = vcombine.low %v383_v25, %v399_v26  ;;  %v447_v41 = vld [vmem:[%s8032_s1 + $0xd70] sm:$0xff] }
 0x22e   :  { %5106 = vst [vmem:[%s8035_s3 + $0x68] sm:$0xff] %v5074_v52  ;;  %v5076_v57 = vsel %vm5012_vm1, %v5888_v44, %v5044_v9  ;;  %4652 = vmatpush1.bf16.msra.mxu0 %v5320_v14  ;;  %4734 = vmatpush1.bf16.msra.mxu1 %v5322_v42  ;;  %v5514_v37 = vcombine.low %v384_v48, %v400_v27  ;;  %v463_v63 = vld [vmem:[%s8032_s1 + $0xdf0] sm:$0xff]  ;;  %v448_v14 = vld [vmem:[%s8032_s1 + $0xd78] sm:$0xff] }
 0x22f   :  { %5108 = vst [vmem:[%s8035_s3 + $0x78] sm:$0xff] %v5076_v57  ;;  %4653 = vmatprep.subr.bf16.mxu0 %v5353_v46  ;;  %4735 = vmatprep.subr.bf16.mxu1 %v5355_v50  ;;  %v5545_v40 = vcombine.high %v415_v55, %v431_v33  ;;  %v464_v42 = vld [vmem:[%s8032_s1 + $0xdf8] sm:$0xff]  ;;  %v5544_v44 = vcombine.low %v415_v55, %v431_v33  ;;  %v479_v47 = vld [vmem:[%s8032_s1 + $0xe70] sm:$0xff] }
 0x230   :  { %v5546_v5 = vcombine.low %v416_v36, %v432_v32  ;;  %v5577_v45 = vcombine.high %v447_v41, %v463_v63  ;;  %v5579_v46 = vcombine.high %v448_v14, %v464_v42  ;;  %v495_v9 = vld [vmem:[%s8032_s1 + $0xef0] sm:$0xff]  ;;  %v480_v50 = vld [vmem:[%s8032_s1 + $0xe78] sm:$0xff]  ;;  %v5576_v13 = vcombine.low %v447_v41, %v463_v63 }
 0x231   :  { %v5578_v52 = vcombine.low %v448_v14, %v464_v42  ;;  %v5609_v15 = vcombine.high %v479_v47, %v495_v9  ;;  %v5611_v53 = vcombine.high %v480_v50, %v496_v51  ;;  %v511_v57 = vld [vmem:[%s8032_s1 + $0xf70] sm:$0xff]  ;;  %v5610_v0 = vcombine.low %v480_v50, %v496_v51 }
 0x232   :  { %4654 = vmatpush1.bf16.msra.mxu0 %v5352_v59  ;;  %4736 = vmatpush1.bf16.msra.mxu1 %v5354_v19  ;;  %v527_v59 = vld [vmem:[%s8032_s1 + $0xff0] sm:$0xff]  ;;  %v512_v19 = vld [vmem:[%s8032_s1 + $0xf78] sm:$0xff]  ;;  %v5707_v55 = vcombine.high %v576_v39, %v592_v58  ;;  %v5706_v63 = vcombine.low %v576_v39, %v592_v58 }
 0x233   :  { %4655 = vmatprep.subr.bf16.mxu0 %v5385_v60  ;;  %4737 = vmatprep.subr.bf16.mxu1 %v5387_v61  ;;  %v528_v60 = vld [vmem:[%s8032_s1 + $0xff8] sm:$0xff]  ;;  %v5608_v61 = vcombine.low %v479_v47, %v495_v9  ;;  %v5641_v1 = vcombine.high %v511_v57, %v527_v59 }
 0x234   :  { %v5643_v2 = vcombine.high %v512_v19, %v528_v60  ;;  %v5642_v10 = vcombine.low %v512_v19, %v528_v60 }
 0x236   :  { %4656 = vmatpush1.bf16.msra.mxu0 %v5384_v6  ;;  %4738 = vmatpush1.bf16.msra.mxu1 %v5386_v7  ;;  %v559_v6 = vld [vmem:[%s8032_s1 + $0x10f0] sm:$0xff]  ;;  %v544_v7 = vld [vmem:[%s8032_s1 + $0x1078] sm:$0xff] }
 0x237   :  { %4657 = vmatprep.subr.bf16.mxu0 %v5417_v38  ;;  %4739 = vmatprep.subr.bf16.mxu1 %v5419_v8  ;;  %v560_v38 = vld [vmem:[%s8032_s1 + $0x10f8] sm:$0xff]  ;;  %v5640_v8 = vcombine.low %v511_v57, %v527_v59  ;;  %v5673_v11 = vcombine.high %v543_v4, %v559_v6 }
 0x238   :  { %v5675_v28 = vcombine.high %v544_v7, %v560_v38  ;;  %v5674_v27 = vcombine.low %v544_v7, %v560_v38 }
 0x23a   :  { %4658 = vmatpush1.bf16.msra.mxu0 %v5416_v34  ;;  %4740 = vmatpush1.bf16.msra.mxu1 %v5418_v17  ;;  %v575_v34 = vld [vmem:[%s8032_s1 + $0x1170] sm:$0xff] }
 0x23b   :  { %4659 = vmatprep.subr.bf16.mxu0 %v5449_v35  ;;  %4741 = vmatprep.subr.bf16.mxu1 %v5451_v18  ;;  %v591_v17 = vld [vmem:[%s8032_s1 + $0x11f0] sm:$0xff] }
 0x23e   :  { %4660 = vmatpush1.bf16.msra.mxu0 %v5448_v54  ;;  %4742 = vmatpush1.bf16.msra.mxu1 %v5450_v23 }
 0x23f   :  { %4661 = vmatprep.subr.bf16.mxu0 %v5481_v24  ;;  %4743 = vmatprep.subr.bf16.mxu1 %v5483_v43  ;;  %v5672_v43 = vcombine.low %v543_v4, %v559_v6 }
 0x242   :  { %4662 = vmatpush1.bf16.msra.mxu0 %v5480_v49  ;;  %4744 = vmatpush1.bf16.msra.mxu1 %v5482_v29  ;;  %v5705_v29 = vcombine.high %v575_v34, %v591_v17 }
 0x243   :  { %4663 = vmatprep.subr.bf16.mxu0 %v5513_v30  ;;  %4745 = vmatprep.subr.bf16.mxu1 %v5515_v31 }
 0x246   :  { %4664 = vmatpush1.bf16.msra.mxu0 %v5512_v56  ;;  %4746 = vmatpush1.bf16.msra.mxu1 %v5514_v37 }
 0x247   :  { %4665 = vmatprep.subr.bf16.mxu0 %v5545_v40  ;;  %4747 = vmatprep.subr.bf16.mxu1 %v5547_v62  ;;  %v5704_v40 = vcombine.low %v575_v34, %v591_v17 }
 0x24a   :  { %4666 = vmatpush1.bf16.msra.mxu0 %v5544_v44  ;;  %4748 = vmatpush1.bf16.msra.mxu1 %v5546_v5 }
 0x24b   :  { %4667 = vmatprep.subr.bf16.mxu0 %v5577_v45  ;;  %4749 = vmatprep.subr.bf16.mxu1 %v5579_v46 }
 0x24e   :  { %4668 = vmatpush1.bf16.msra.mxu0 %v5576_v13  ;;  %4750 = vmatpush1.bf16.msra.mxu1 %v5578_v52 }
 0x24f   :  { %4669 = vmatprep.subr.bf16.mxu0 %v5609_v15  ;;  %4751 = vmatprep.subr.bf16.mxu1 %v5611_v53 }
 0x252   :  { %4670 = vmatpush1.bf16.msra.mxu0 %v5608_v61  ;;  %4752 = vmatpush1.bf16.msra.mxu1 %v5610_v0 }
 0x253   :  { %4671 = vmatprep.subr.bf16.mxu0 %v5641_v1  ;;  %4753 = vmatprep.subr.bf16.mxu1 %v5643_v2 }
 0x254   :  { %v4224_v12 = vpop.f32.mrb[16].mxu0  ;;  %v4306_v18 = vpop.f32.mrb[16].mxu1 }
 0x255   :  { %v7938_v35 = vadd.f32 %v4224_v12, %v6883_v22  ;;  %v4226_v20 = vpop.f32.mrb[17].mxu0  ;;  %v7947_v21 = vadd.f32 %v4306_v18, %v6883_v22  ;;  %v4308_v23 = vpop.f32.mrb[17].mxu1 }
 0x256   :  { %4672 = vmatpush1.bf16.msra.mxu0 %v5640_v8  ;;  %v7950_v54 = vadd.f32 %v4226_v20, %v6883_v22  ;;  %v4228_v24 = vpop.f32.mrb[18].mxu0  ;;  %4754 = vmatpush1.bf16.msra.mxu1 %v5642_v10  ;;  %v7954_v26 = vadd.f32 %v4308_v23, %v6883_v22  ;;  %v4310_v48 = vpop.f32.mrb[18].mxu1 }
 0x257   :  { %v4821_v25 = vand.u32 2147483647, %v7938_v35  ;;  %4682 = vmatprep.subr.bf16.mxu0 %v5673_v11  ;;  %v4229_v49 = vpop.f32.mrb[19].mxu0  ;;  %v4823_v30 = vand.u32 2147483647, %v7947_v21  ;;  %4764 = vmatprep.subr.bf16.mxu1 %v5675_v28  ;;  %v4311_v32 = vpop.f32.mrb[19].mxu1 }
 0x258   :  { %v4822_v31 = vand.u32 2147483647, %v7950_v54  ;;  %v4824_v36 = vand.u32 2147483647, %v7954_v26  ;;  %vm5013_vm2 = vcmp.ge.f32.partialorder %v7938_v35, 0.0  ;;  %vm5014_vm3 = vcmp.ge.f32.partialorder %v7950_v54, 0.0 }
 0x259   :  { %v4853_v33 = vsub.f32 0.0, %v4821_v25  ;;  %4674 = vmatmul.mubr.bf16.vlgmr.msra.gmra.mrb[28].mxu0 %v6204_v16  ;;  %v4855_v56 = vsub.f32 0.0, %v4823_v30  ;;  %4756 = vmatmul.mubr.bf16.vlgmr.msra.gmra.mrb[28].mxu1 %v6204_v16  ;;  %v5955_v16 = vld [vmem:[%s8033_s0 + $0x8] ss:$0 sps:$4 sm:$0xff]   ;;  %vm5016_vm4 = vcmp.ge.f32.partialorder %v7954_v26, 0.0 }
 0x25a   :  { %v4854_v37 = vsub.f32 0.0, %v4822_v31  ;;  %4683 = vmatpush1.bf16.msra.mxu0 %v5672_v43  ;;  %v4856_v41 = vsub.f32 0.0, %v4824_v36  ;;  %4765 = vmatpush1.bf16.msra.mxu1 %v5674_v27 }
 0x25b   :  { %v4901_v62 = vmul.f32 1.442695, %v4853_v33  ;;  %4684 = vmatprep.subr.bf16.mxu0 %v5705_v29  ;;  %v4905_v14 = vmul.f32 1.442695, %v4855_v56  ;;  %4766 = vmatprep.subr.bf16.mxu1 %v5707_v55 }
 0x25c   :  { %v4903_v42 = vmul.f32 1.442695, %v4854_v37  ;;  %4714 = vmatprep.mubr.bf16.mxu0 %v5956_v3  ;;  %v4907_v44 = vmul.f32 1.442695, %v4856_v41  ;;  %4796 = vmatprep.mubr.bf16.mxu1 %v5956_v3 }
 0x25d   :  { %5889 = vpow2.f32 %v4901_v62 }
 0x25e   :  { %5891 = vpow2.f32 %v4905_v14  ;;  %4685 = vmatpush1.bf16.msra.mxu0 %v5704_v40  ;;  %4767 = vmatpush1.bf16.msra.mxu1 %v5706_v63 }
 0x25f   :  { %5893 = vpow2.f32 %v4903_v42 }
 0x260   :  { %5895 = vpow2.f32 %v4907_v44 }
 0x265   :  { %5722 = vmatmul.mubr.msk.bf16.vlgmr.msra.gmra.mrb[28].mxu0 %vm3489_vm0, %v5955_v16  ;;  %5723 = vmatmul.mubr.msk.bf16.vlgmr.msra.gmra.mrb[28].mxu1 %vm3489_vm0, %v5955_v16  ;;  %vm5015_vm0 = vcmp.ge.f32.partialorder %v7947_v21, 0.0 }
 0x267   :  { %v5890_v5 = vpop.eup %5889 }
 0x268   :  { %v5892_v45 = vpop.eup %5891  ;;  %v4949_v46 = vadd.f32 1.0, %v5890_v5 }
 0x269   :  { %v5894_v47 = vpop.eup %5893  ;;  %v4951_v9 = vadd.f32 1.0, %v5892_v45 }
 0x26a   :  { %v5896_v50 = vpop.eup %5895  ;;  %5897 = vrcp.f32 %v4949_v46  ;;  %v4950_v3 = vadd.f32 1.0, %v5894_v47 }
 0x26b   :  { %5899 = vrcp.f32 %v4951_v9  ;;  %v4952_v51 = vadd.f32 1.0, %v5896_v50 }
 0x26c   :  { %5901 = vrcp.f32 %v4950_v3 }
 0x26d   :  { %5903 = vrcp.f32 %v4952_v51 }
 0x274   :  { %v5898_v13 = vpop.eup %5897 }
 0x275   :  { %v5900_v52 = vpop.eup %5899  ;;  %v5045_v15 = vmul.f32 %v5898_v13, %v5890_v5 }
 0x276   :  { %v5902_v53 = vpop.eup %5901  ;;  %v5047_v57 = vmul.f32 %v5900_v52, %v5892_v45 }
 0x277   :  { %v5904_v59 = vpop.eup %5903  ;;  %v5077_v19 = vsel %vm5013_vm2, %v5898_v13, %v5045_v15  ;;  %v5046_v60 = vmul.f32 %v5902_v53, %v5894_v47 }
 0x278   :  { %5109 = vst [vmem:[%s8035_s3 + $0x80] sm:$0xff] %v5077_v19  ;;  %v5079_v61 = vsel %vm5015_vm0, %v5900_v52, %v5047_v57  ;;  %v5048_v0 = vmul.f32 %v5904_v59, %v5896_v50 }
 0x279   :  { %5111 = vst [vmem:[%s8035_s3 + $0x90] sm:$0xff] %v5079_v61  ;;  %v5078_v1 = vsel %vm5014_vm3, %v5902_v53, %v5046_v60 }
 0x27a   :  { %5110 = vst [vmem:[%s8035_s3 + $0x88] sm:$0xff] %v5078_v1  ;;  %v5080_v2 = vsel %vm5016_vm4, %v5904_v59, %v5048_v0 }
 0x27b   :  { %5112 = vst [vmem:[%s8035_s3 + $0x98] sm:$0xff] %v5080_v2 }
 0x2a0   :  { %v4388_v4 = vpop.f32.mrb[20].mxu0  ;;  %v4470_v7 = vpop.f32.mrb[20].mxu1 }
 0x2a1   :  { %v5744_v6 = vadd.f32 %v4388_v4, %v6883_v22  ;;  %v4390_v38 = vpop.f32.mrb[21].mxu0  ;;  %v5746_v8 = vadd.f32 %v4470_v7, %v6883_v22  ;;  %v4472_v11 = vpop.f32.mrb[21].mxu1 }
 0x2a2   :  { %v5745_v10 = vadd.f32 %v4390_v38, %v6883_v22  ;;  %v4392_v12 = vpop.f32.mrb[22].mxu0  ;;  %v5747_v34 = vadd.f32 %v4472_v11, %v6883_v22  ;;  %v4474_v17 = vpop.f32.mrb[22].mxu1 }
 0x2a3   :  { %v4825_v28 = vand.u32 2147483647, %v5744_v6  ;;  %v4393_v35 = vpop.f32.mrb[23].mxu0  ;;  %v4827_v18 = vand.u32 2147483647, %v5746_v8  ;;  %v4475_v21 = vpop.f32.mrb[23].mxu1 }
 0x2a4   :  { %v4826_v20 = vand.u32 2147483647, %v5745_v10  ;;  %v4828_v58 = vand.u32 2147483647, %v5747_v34  ;;  %vm5017_vm5 = vcmp.ge.f32.partialorder %v5744_v6, 0.0  ;;  %vm5019_vm6 = vcmp.ge.f32.partialorder %v5746_v8, 0.0 }
 0x2a5   :  { %v4857_v39 = vsub.f32 0.0, %v4825_v28  ;;  %v4859_v54 = vsub.f32 0.0, %v4827_v18  ;;  %vm5018_vm7 = vcmp.ge.f32.partialorder %v5745_v10, 0.0  ;;  %vm5020_vm8 = vcmp.ge.f32.partialorder %v5747_v34, 0.0 }
 0x2a6   :  { %v4858_v23 = vsub.f32 0.0, %v4826_v20  ;;  %v4860_v43 = vsub.f32 0.0, %v4828_v58 }
 0x2a7   :  { %v4909_v24 = vmul.f32 1.442695, %v4857_v39  ;;  %v4913_v25 = vmul.f32 1.442695, %v4859_v54 }
 0x2a8   :  { %v4911_v26 = vmul.f32 1.442695, %v4858_v23  ;;  %v4915_v48 = vmul.f32 1.442695, %v4860_v43 }
 0x2a9   :  { %5905 = vpow2.f32 %v4909_v24 }
 0x2aa   :  { %5907 = vpow2.f32 %v4913_v25 }
 0x2ab   :  { %5909 = vpow2.f32 %v4911_v26 }
 0x2ac   :  { %5911 = vpow2.f32 %v4915_v48 }
 0x2b3   :  { %v5906_v27 = vpop.eup %5905 }
 0x2b4   :  { %v5908_v49 = vpop.eup %5907  ;;  %v4953_v29 = vadd.f32 1.0, %v5906_v27 }
 0x2b5   :  { %v5910_v30 = vpop.eup %5909  ;;  %v4955_v31 = vadd.f32 1.0, %v5908_v49 }
 0x2b6   :  { %v5912_v55 = vpop.eup %5911  ;;  %5913 = vrcp.f32 %v4953_v29  ;;  %v4954_v33 = vadd.f32 1.0, %v5910_v30 }
 0x2b7   :  { %5915 = vrcp.f32 %v4955_v31  ;;  %v4956_v36 = vadd.f32 1.0, %v5912_v55 }
 0x2b8   :  { %5917 = vrcp.f32 %v4954_v33 }
 0x2b9   :  { %5919 = vrcp.f32 %v4956_v36 }
 0x2c0   :  { %v5914_v32 = vpop.eup %5913 }
 0x2c1   :  { %v5916_v56 = vpop.eup %5915  ;;  %v5049_v37 = vmul.f32 %v5914_v32, %v5906_v27 }
 0x2c2   :  { %v5918_v40 = vpop.eup %5917  ;;  %v5051_v62 = vmul.f32 %v5916_v56, %v5908_v49 }
 0x2c3   :  { %v5920_v41 = vpop.eup %5919  ;;  %v5081_v63 = vsel %vm5017_vm5, %v5914_v32, %v5049_v37  ;;  %v5050_v14 = vmul.f32 %v5918_v40, %v5910_v30 }
 0x2c4   :  { %5113 = vst [vmem:[%s8035_s3 + $0xa0] sm:$0xff] %v5081_v63  ;;  %v5083_v42 = vsel %vm5019_vm6, %v5916_v56, %v5051_v62  ;;  %v5052_v44 = vmul.f32 %v5920_v41, %v5912_v55 }
 0x2c5   :  { %5115 = vst [vmem:[%s8035_s3 + $0xb0] sm:$0xff] %v5083_v42  ;;  %v5082_v16 = vsel %vm5018_vm7, %v5918_v40, %v5050_v14 }
 0x2c6   :  { %5114 = vst [vmem:[%s8035_s3 + $0xa8] sm:$0xff] %v5082_v16  ;;  %v5084_v5 = vsel %vm5020_vm8, %v5920_v41, %v5052_v44 }
 0x2c7   :  { %5116 = vst [vmem:[%s8035_s3 + $0xb8] sm:$0xff] %v5084_v5 }
 0x2ec   :  { %v4552_v45 = vpop.f32.mrb[24].mxu0  ;;  %v4634_v47 = vpop.f32.mrb[24].mxu1 }
 0x2ed   :  { %v5748_v46 = vadd.f32 %v4552_v45, %v6883_v22  ;;  %v4554_v9 = vpop.f32.mrb[25].mxu0  ;;  %v5750_v50 = vadd.f32 %v4634_v47, %v6883_v22  ;;  %v4636_v51 = vpop.f32.mrb[25].mxu1 }
 0x2ee   :  { %v5749_v3 = vadd.f32 %v4554_v9, %v6883_v22  ;;  %v4556_v13 = vpop.f32.mrb[26].mxu0  ;;  %v5751_v15 = vadd.f32 %v4636_v51, %v6883_v22  ;;  %v4638_v53 = vpop.f32.mrb[26].mxu1 }
 0x2ef   :  { %v4829_v52 = vand.u32 2147483647, %v5748_v46  ;;  %v4557_v57 = vpop.f32.mrb[27].mxu0  ;;  %v4831_v59 = vand.u32 2147483647, %v5750_v50  ;;  %v4639_v0 = vpop.f32.mrb[27].mxu1 }
 0x2f0   :  { %v4830_v19 = vand.u32 2147483647, %v5749_v3  ;;  %v4832_v61 = vand.u32 2147483647, %v5751_v15  ;;  %vm5021_vm9 = vcmp.ge.f32.partialorder %v5748_v46, 0.0  ;;  %vm5023_vm10 = vcmp.ge.f32.partialorder %v5750_v50, 0.0 }
 0x2f1   :  { %v4861_v60 = vsub.f32 0.0, %v4829_v52  ;;  %v4863_v1 = vsub.f32 0.0, %v4831_v59  ;;  %vm5022_vm11 = vcmp.ge.f32.partialorder %v5749_v3, 0.0  ;;  %vm5024_vm12 = vcmp.ge.f32.partialorder %v5751_v15, 0.0 }
 0x2f2   :  { %v4862_v2 = vsub.f32 0.0, %v4830_v19  ;;  %v4864_v6 = vsub.f32 0.0, %v4832_v61 }
 0x2f3   :  { %v4917_v4 = vmul.f32 1.442695, %v4861_v60  ;;  %v4921_v7 = vmul.f32 1.442695, %v4863_v1 }
 0x2f4   :  { %v4919_v38 = vmul.f32 1.442695, %v4862_v2  ;;  %v4923_v8 = vmul.f32 1.442695, %v4864_v6 }
 0x2f5   :  { %5921 = vpow2.f32 %v4917_v4 }
 0x2f6   :  { %5923 = vpow2.f32 %v4921_v7 }
 0x2f7   :  { %5925 = vpow2.f32 %v4919_v38 }
 0x2f8   :  { %5927 = vpow2.f32 %v4923_v8 }
 0x2ff   :  { %v5922_v10 = vpop.eup %5921 }
 0x300   :  { %v5924_v11 = vpop.eup %5923  ;;  %v4957_v12 = vadd.f32 1.0, %v5922_v10 }
 0x301   :  { %v5926_v28 = vpop.eup %5925  ;;  %v4959_v34 = vadd.f32 1.0, %v5924_v11 }
 0x302   :  { %v5928_v17 = vpop.eup %5927  ;;  %5929 = vrcp.f32 %v4957_v12  ;;  %v4958_v35 = vadd.f32 1.0, %v5926_v28 }
 0x303   :  { %5931 = vrcp.f32 %v4959_v34  ;;  %v4960_v18 = vadd.f32 1.0, %v5928_v17 }
 0x304   :  { %5933 = vrcp.f32 %v4958_v35 }
 0x305   :  { %5935 = vrcp.f32 %v4960_v18 }
 0x30c   :  { %v5930_v20 = vpop.eup %5929 }
 0x30d   :  { %v5932_v39 = vpop.eup %5931  ;;  %v5053_v58 = vmul.f32 %v5930_v20, %v5922_v10 }
 0x30e   :  { %v5934_v21 = vpop.eup %5933  ;;  %v5055_v54 = vmul.f32 %v5932_v39, %v5924_v11 }
 0x30f   :  { %v5936_v23 = vpop.eup %5935  ;;  %v5085_v24 = vsel %vm5021_vm9, %v5930_v20, %v5053_v58  ;;  %v5054_v43 = vmul.f32 %v5934_v21, %v5926_v28 }
 0x310   :  { %5117 = vst [vmem:[%s8035_s3 + $0xc0] sm:$0xff] %v5085_v24  ;;  %v5087_v25 = vsel %vm5023_vm10, %v5932_v39, %v5055_v54  ;;  %v5056_v26 = vmul.f32 %v5936_v23, %v5928_v17 }
 0x311   :  { %5119 = vst [vmem:[%s8035_s3 + $0xd0] sm:$0xff] %v5087_v25  ;;  %v5086_v48 = vsel %vm5022_vm11, %v5934_v21, %v5054_v43 }
 0x312   :  { %5118 = vst [vmem:[%s8035_s3 + $0xc8] sm:$0xff] %v5086_v48  ;;  %v5088_v27 = vsel %vm5024_vm12, %v5936_v23, %v5056_v26 }
 0x313   :  { %5120 = vst [vmem:[%s8035_s3 + $0xd8] sm:$0xff] %v5088_v27 }
 0x338   :  { %v4716_v49 = vpop.f32.mrb[28].mxu0  ;;  %v4798_v30 = vpop.f32.mrb[28].mxu1 }
 0x339   :  { %v5752_v29 = vadd.f32 %v4716_v49, %v6883_v22  ;;  %v4718_v31 = vpop.f32.mrb[29].mxu0  ;;  %v5754_v55 = vadd.f32 %v4798_v30, %v6883_v22  ;;  %v4800_v36 = vpop.f32.mrb[29].mxu1 }
 0x33a   :  { %v5753_v33 = vadd.f32 %v4718_v31, %v6883_v22  ;;  %v4720_v32 = vpop.f32.mrb[30].mxu0  ;;  %v5755_v37 = vadd.f32 %v4800_v36, %v6883_v22  ;;  %v4802_v40 = vpop.f32.mrb[30].mxu1 }
 0x33b   :  { %v4833_v56 = vand.u32 2147483647, %v5752_v29  ;;  %v4721_v62 = vpop.f32.mrb[31].mxu0  ;;  %v4835_v41 = vand.u32 2147483647, %v5754_v55  ;;  %v4803_v44 = vpop.f32.mrb[31].mxu1 }
 0x33c   :  { %v4834_v63 = vand.u32 2147483647, %v5753_v33  ;;  %v4836_v42 = vand.u32 2147483647, %v5755_v37  ;;  %vm5025_vm13 = vcmp.ge.f32.partialorder %v5752_v29, 0.0  ;;  %vm5027_vm14 = vcmp.ge.f32.partialorder %v5754_v55, 0.0 }
 0x33d   :  { %v4865_v14 = vsub.f32 0.0, %v4833_v56  ;;  %v4867_v16 = vsub.f32 0.0, %v4835_v41  ;;  %vm5026_vm15 = vcmp.ge.f32.partialorder %v5753_v33, 0.0  ;;  %vm5028_vm1 = vcmp.ge.f32.partialorder %v5755_v37, 0.0 }
 0x33e   :  { %v4866_v5 = vsub.f32 0.0, %v4834_v63  ;;  %v4868_v46 = vsub.f32 0.0, %v4836_v42 }
 0x33f   :  { %v4925_v45 = vmul.f32 1.442695, %v4865_v14  ;;  %v4929_v47 = vmul.f32 1.442695, %v4867_v16 }
 0x340   :  { %v4927_v9 = vmul.f32 1.442695, %v4866_v5  ;;  %v4931_v50 = vmul.f32 1.442695, %v4868_v46 }
 0x341   :  { %5937 = vpow2.f32 %v4925_v45 }
 0x342   :  { %5939 = vpow2.f32 %v4929_v47 }
 0x343   :  { %5941 = vpow2.f32 %v4927_v9 }
 0x344   :  { %5943 = vpow2.f32 %v4931_v50 }
 0x34b   :  { %v5938_v3 = vpop.eup %5937 }
 0x34c   :  { %v5940_v22 = vpop.eup %5939  ;;  %v4961_v51 = vadd.f32 1.0, %v5938_v3 }
 0x34d   :  { %v5942_v13 = vpop.eup %5941  ;;  %v4963_v52 = vadd.f32 1.0, %v5940_v22 }
 0x34e   :  { %v5944_v15 = vpop.eup %5943  ;;  %5945 = vrcp.f32 %v4961_v51  ;;  %v4962_v53 = vadd.f32 1.0, %v5942_v13 }
 0x34f   :  { %5947 = vrcp.f32 %v4963_v52  ;;  %v4964_v57 = vadd.f32 1.0, %v5944_v15 }
 0x350   :  { %5949 = vrcp.f32 %v4962_v53 }
 0x351   :  { %5951 = vrcp.f32 %v4964_v57 }
 0x358   :  { %v5946_v59 = vpop.eup %5945 }
 0x359   :  { %v5948_v19 = vpop.eup %5947  ;;  %v5057_v60 = vmul.f32 %v5946_v59, %v5938_v3 }
 0x35a   :  { %v5950_v61 = vpop.eup %5949  ;;  %v5059_v0 = vmul.f32 %v5948_v19, %v5940_v22 }
 0x35b   :  { %v5952_v1 = vpop.eup %5951  ;;  %v5089_v2 = vsel %vm5025_vm13, %v5946_v59, %v5057_v60  ;;  %v5058_v4 = vmul.f32 %v5950_v61, %v5942_v13 }
 0x35c   :  { %5121 = vst [vmem:[%s8035_s3 + $0xe0] sm:$0xff] %v5089_v2  ;;  %v5091_v6 = vsel %vm5027_vm14, %v5948_v19, %v5059_v0  ;;  %v5060_v7 = vmul.f32 %v5952_v1, %v5944_v15 }
 0x35d   :  { %5123 = vst [vmem:[%s8035_s3 + $0xf0] sm:$0xff] %v5091_v6  ;;  %v5090_v38 = vsel %vm5026_vm15, %v5950_v61, %v5058_v4 }
 0x35e   :  { %5122 = vst [vmem:[%s8035_s3 + $0xe8] sm:$0xff] %v5090_v38  ;;  %v5092_v8 = vsel %vm5028_vm1, %v5952_v1, %v5060_v7 }
 0x35f   :  { %5124 = vst [vmem:[%s8035_s3 + $0xf8] sm:$0xff] %v5092_v8 }

</bundles_post_ra>
